<compile_context>
chip_gen: v7x
topology: tpu7x:2x2x1
jax: 0.10.0
libtpu: 0.0.40
codegen_flags: <defaults>
</compile_context>

<pallas_src>
import functools
import math

import jax
import jax.numpy as jnp
from jax.experimental import pallas as pl
from jax.experimental.pallas import tpu as pltpu

NEG_SLOPE = 0.2     # leaky_relu slope (GATv2 attention and the encoder nonlinearity)
BN_EPS = 1e-5
NEG_INF = -1e30     # f32-safe mask value for the attention softmax


def _round_up(x, m):
    return ((x + m - 1) // m) * m


# ----------------------------- Pallas kernels ------------------------------ #

def _proj_kernel(x_ref, w_ref, b_ref, o_ref):
    """Fused GATv2 projections for one row tile: x @ [Wl | Wr | Wres] + [bl | br | 0]."""
    o_ref[...] = (jnp.dot(x_ref[...], w_ref[...], preferred_element_type=jnp.float32)
                  + b_ref[...])


def _gat_attn_kernel(*refs, heads, head_dim, with_proj):
    """GATv2 attention + residual + folded BatchNorm(eval) + LeakyReLU for one target-row tile.

    If with_proj, the final Linear is fused in before the store (last layer only).
    """
    if with_proj:
        (att_ref, xrres_ref, adj_ref, xlt_ref, xlb_ref,
         scale_ref, shift_ref, wp_ref, bp_ref, out_ref) = refs
    else:
        (att_ref, xrres_ref, adj_ref, xlt_ref, xlb_ref,
         scale_ref, shift_ref, out_ref) = refs
        wp_ref = bp_ref = None

    hdt = heads * head_dim
    xrres = xrres_ref[...]                       # [TQ, 2*H*D] f32 : [ lin_r(x) | residual ]
    xr = xrres[:, :hdt]
    res = xrres[:, hdt:]
    mask = adj_ref[...] != 0                     # [TQ, N] bool (int8 adjacency, row=target)
    xlt = xlt_ref[...]                           # [H*D, N] f32 : lin_l(x) transposed (lane = source j)
    tq = xr.shape[0]

    agg = jnp.zeros((tq, hdt), jnp.float32)
    for h in range(heads):                       # static unroll (heads is small)
        # e[i, j] = sum_d att[h, d] * leaky_relu(xl[j, hD+d] + xr[i, hD+d])
        # accumulated one d at a time on lane-dense [TQ, N] tiles (no rank-3 temporary).
        e = None
        for d in range(head_dim):                # static unroll (head_dim is small)
            c = h * head_dim + d
            s = xlt[c:c + 1, :] + xr[:, c:c + 1]             # [TQ, N] via broadcast
            s = jnp.where(s > 0, s, NEG_SLOPE * s)
            contrib = att_ref[h, d] * s                      # SMEM scalar * vector tile
            e = contrib if e is None else e + contrib

        # masked softmax over incoming edges j (f32 throughout; self-loops keep rows valid)
        e = jnp.where(mask, e, NEG_INF)
        m = jnp.max(e, axis=1, keepdims=True)
        p = jnp.exp(e - m)
        denom = jnp.sum(p, axis=1, keepdims=True)
        alpha = p * pl.reciprocal(denom, approx=True)        # EUP, not a VALU divide

        # xlb[h] is [N, H*D] with only head-h columns nonzero -> the MXU writes the
        # lane-dense [TQ, H*D] accumulator directly (no lane concat of D-wide pieces).
        agg = agg + jnp.dot(alpha.astype(jnp.bfloat16), xlb_ref[h],
                            preferred_element_type=jnp.float32)

    # GATv2 output (+ residual + bias), BatchNorm1d(eval) folded to scale/shift, LeakyReLU(0.2)
    y = (agg + res) * scale_ref[...] + shift_ref[...]
    y = jnp.where(y > 0, y, NEG_SLOPE * y)
    if with_proj:                                # fused final nn.Linear (last layer only)
        y = (jnp.dot(y.astype(jnp.bfloat16), wp_ref[...],
                     preferred_element_type=jnp.float32) + bp_ref[...])
    out_ref[...] = y.astype(out_ref.dtype)


# ------------------------------ pallas_call wrappers ------------------------ #

def _fused_projection(x, w3, b3, tq, n_pad):
    fin = x.shape[1]
    width = w3.shape[1]
    return pl.pallas_call(
        _proj_kernel,
        out_shape=jax.ShapeDtypeStruct((n_pad, width), jnp.float32),
        grid=(n_pad // tq,),
        in_specs=[pl.BlockSpec((tq, fin), lambda i: (i, 0)),      # x row tile (bf16)
                  pl.BlockSpec((fin, width), lambda i: (0, 0)),   # fused weights (bf16, resident)
                  pl.BlockSpec((1, width), lambda i: (0, 0))],    # fused biases (f32)
        out_specs=pl.BlockSpec((tq, width), lambda i: (i, 0)),
        compiler_params=pltpu.CompilerParams(dimension_semantics=("parallel",)),
    )(x, w3, b3)


def _gat_attention(att, xrres, adj, xlt, xlb, scale, shift, wp, bp,
                   *, heads, head_dim, tq, out_dim, out_dtype):
    n_pad = adj.shape[0]
    hdt = heads * head_dim
    with_proj = wp is not None
    kernel = functools.partial(_gat_attn_kernel, heads=heads, head_dim=head_dim,
                               with_proj=with_proj)
    in_specs = [
        pl.BlockSpec(memory_space=pltpu.MemorySpace.SMEM),         # att [H, D] scalars
        pl.BlockSpec((tq, 2 * hdt), lambda i: (i, 0)),             # [xr | res] row tile (f32)
        pl.BlockSpec((tq, n_pad), lambda i: (i, 0)),               # adjacency row tile (int8)
        pl.BlockSpec((hdt, n_pad), lambda i: (0, 0)),              # xl^T, full resident (f32)
        pl.BlockSpec((heads, n_pad, hdt), lambda i: (0, 0, 0)),    # per-head block xl (bf16)
        pl.BlockSpec((1, hdt), lambda i: (0, 0)),                  # folded BN scale
        pl.BlockSpec((1, hdt), lambda i: (0, 0)),                  # folded BN shift (+GAT bias)
    ]
    args = [att, xrres, adj, xlt, xlb, scale, shift]
    if with_proj:
        in_specs += [pl.BlockSpec((hdt, out_dim), lambda i: (0, 0)),   # final proj W (bf16)
                     pl.BlockSpec((1, out_dim), lambda i: (0, 0))]     # final proj b (f32)
        args += [wp, bp]
    width = out_dim if with_proj else hdt
    return pl.pallas_call(
        kernel,
        out_shape=jax.ShapeDtypeStruct((n_pad, width), out_dtype),
        grid=(n_pad // tq,),
        in_specs=in_specs,
        out_specs=pl.BlockSpec((tq, width), lambda i: (i, 0)),
        compiler_params=pltpu.CompilerParams(dimension_semantics=("parallel",)),
    )(*args)


# ------------------------------- encoder forward ---------------------------- #

def simple_gat_encoder(x, edge_index, params, *, heads):
    layers = params["layers"]
    hdt = layers[0]["wl"].shape[1]               # heads * head_dim == hidden_dim
    head_dim = hdt // heads
    out_dim = params["proj_w"].shape[1]
    n = x.shape[0]

    # Row tiling: multiples of 32 keep int8/bf16 sublane tiling happy; TQ=256 keeps the
    # adj tile + per-head score tile comfortably inside v7x's smaller (64 MiB) VMEM.
    if n <= 256:
        n_pad = _round_up(n, 32)
        tq = n_pad
    else:
        tq = 256
        n_pad = _round_up(n, tq)

    # glue: sparse edge_index -> dense int8 adjacency (row = target i, col = source j) + self loops
    src, dst = edge_index[0], edge_index[1]
    adj = jnp.zeros((n_pad, n_pad), jnp.int8).at[dst, src].set(1)
    diag = jnp.arange(n_pad)
    adj = adj.at[diag, diag].set(1)

    # pad node features; bf16 activations for the MXU (accumulation stays f32 in-kernel)
    h = jnp.zeros((n_pad, x.shape[1]), jnp.bfloat16).at[:n].set(x.astype(jnp.bfloat16))

    head_sel = (jnp.arange(heads)[:, None] == jnp.arange(heads)[None, :]).astype(jnp.float32)

    num_layers = len(layers)
    for li, lp in enumerate(layers):
        last = li == num_layers - 1

        # fused [Wl | Wr | Wres] projection (single MXU pass per row tile)
        w3 = jnp.concatenate([lp["wl"], lp["wr"], lp["wres"]], axis=1).astype(jnp.bfloat16)
        b3 = jnp.concatenate([lp["bl"], lp["br"], jnp.zeros_like(lp["bl"])], axis=1)
        proj = _fused_projection(h, w3, b3, tq, n_pad)          # [n_pad, 3*hdt] f32
        xl = proj[:, :hdt]                                      # lin_l(x): source-side messages
        xrres = proj[:, hdt:]                                   # [ lin_r(x) | residual ]

        # wrapper-side layout plumbing: lane-major source messages + per-head block expansion
        xlt = xl.T                                              # [hdt, n_pad]
        xlb = (xl.reshape(1, n_pad, heads, head_dim)
               * head_sel[:, None, :, None]).reshape(heads, n_pad, hdt).astype(jnp.bfloat16)

        # fold BatchNorm1d(eval) + GATv2 output bias into per-channel scale / shift
        scale = lp["gamma"] / jnp.sqrt(lp["running_var"] + BN_EPS)       # [1, hdt]
        shift = lp["beta"] + (lp["bias"] - lp["running_mean"]) * scale   # [1, hdt]

        if last:
            h = _gat_attention(lp["att"], xrres, adj, xlt, xlb, scale, shift,
                               params["proj_w"].astype(jnp.bfloat16), params["proj_b"],
                               heads=heads, head_dim=head_dim, tq=tq,
                               out_dim=out_dim, out_dtype=jnp.float32)
        else:
            h = _gat_attention(lp["att"], xrres, adj, xlt, xlb, scale, shift, None, None,
                               heads=heads, head_dim=head_dim, tq=tq,
                               out_dim=hdt, out_dtype=jnp.bfloat16)

    return h[:n]


# ----------------------------- parameter init ------------------------------ #

def _glorot(key, shape):
    fan_in, fan_out = shape[0], shape[-1]
    limit = math.sqrt(6.0 / (fan_in + fan_out))
    return jax.random.uniform(key, shape, jnp.float32, -limit, limit)


def init_encoder_params(key, in_dim, hidden_dim, out_dim, heads, num_layers):
    head_dim = hidden_dim // heads
    layers = []
    for i in range(num_layers):
        fin = in_dim if i == 0 else hidden_dim
        key, k1, k2, k3, k4 = jax.random.split(key, 5)
        layers.append(dict(
            wl=_glorot(k1, (fin, hidden_dim)),                  # lin_l weight (glorot), bias zeros
            bl=jnp.zeros((1, hidden_dim), jnp.float32),
            wr=_glorot(k2, (fin, hidden_dim)),                  # lin_r
            br=jnp.zeros((1, hidden_dim), jnp.float32),
            att=_glorot(k3, (heads, head_dim)),                 # attention vector per head
            wres=_glorot(k4, (fin, hidden_dim)),                # residual projection (bias=False)
            bias=jnp.zeros((1, hidden_dim), jnp.float32),       # GATv2Conv output bias
            gamma=jnp.ones((1, hidden_dim), jnp.float32),       # BatchNorm1d affine
            beta=jnp.zeros((1, hidden_dim), jnp.float32),
            running_mean=jnp.zeros((1, hidden_dim), jnp.float32),  # BN running stats (eval)
            running_var=jnp.ones((1, hidden_dim), jnp.float32),
        ))
    key, kp = jax.random.split(key)
    return dict(
        layers=layers,
        proj_w=_glorot(kp, (hidden_dim, out_dim)),              # final_proj: xavier_uniform
        proj_b=jnp.zeros((1, out_dim), jnp.float32),            # final_proj bias zeros
    )


# ---------------------------------- main ----------------------------------- #

if __name__ == "__main__":
    N, IN_DIM, HIDDEN, OUT_DIM, HEADS, NUM_LAYERS, E = 16, 8, 32, 16, 4, 3, 48

    key = jax.random.PRNGKey(0)
    kx, ke, kp = jax.random.split(key, 3)

    x = jax.random.normal(kx, (N, IN_DIM), jnp.float32)
    edge_index = jax.random.randint(ke, (2, E), 0, N, dtype=jnp.int32)
    params = init_encoder_params(kp, IN_DIM, HIDDEN, OUT_DIM, HEADS, NUM_LAYERS)

    encoder = jax.jit(functools.partial(simple_gat_encoder, heads=HEADS))
    out = jax.block_until_ready(encoder(x, edge_index, params))

    assert out.shape == (N, OUT_DIM) and out.dtype == jnp.float32
    assert bool(jnp.all(jnp.isfinite(out)))
    print("KERNEL_OK")
</pallas_src>

<mosaic_0001>
module attributes {stable_mosaic.version = 11 : i64} {
  func.func @_proj_kernel(%arg0: i32, %arg1: memref<32x8xbf16, #tpu.memory_space<vmem>>, %arg2: memref<8x96xbf16, #tpu.memory_space<vmem>>, %arg3: memref<1x96xf32, #tpu.memory_space<vmem>>, %arg4: memref<32x96xf32, #tpu.memory_space<vmem>>) attributes {dimension_semantics = [#tpu.dimension_semantics<parallel>], iteration_bounds = array<i64: 1>, scalar_prefetch = 0 : i64, scratch_operands = 0 : i64, tpu.core_type = #tpu.core_type<tc>, window_params = [{transform_indices = @transform_0, window_bounds = array<i64: 32, 8>}, {pipeline_mode = #tpu.pipeline_mode<synchronous>, transform_indices = @transform_1, window_bounds = array<i64: 8, 96>}, {pipeline_mode = #tpu.pipeline_mode<synchronous>, transform_indices = @transform_2, window_bounds = array<i64: 1, 96>}, {transform_indices = @transform_3, window_bounds = array<i64: 32, 96>}]} {
    %c0 = arith.constant 0 : index
    %c0_0 = arith.constant 0 : index
    %0 = vector.load %arg1[%c0, %c0_0] : memref<32x8xbf16, #tpu.memory_space<vmem>>, vector<32x8xbf16>
    %c0_1 = arith.constant 0 : index
    %c0_2 = arith.constant 0 : index
    %1 = vector.load %arg2[%c0_1, %c0_2] : memref<8x96xbf16, #tpu.memory_space<vmem>>, vector<8x96xbf16>
    %cst = arith.constant dense<0.000000e+00> : vector<32x96xf32>
    %2 = tpu.matmul %0, %1, %cst {dimension_numbers = #tpu.dot_dimension_numbers<[1], [0], [0], [1], [0, 0, 1, 1], [], []>} : vector<32x8xbf16>, vector<8x96xbf16>, vector<32x96xf32> -> vector<32x96xf32>
    %c0_3 = arith.constant 0 : index
    %c0_4 = arith.constant 0 : index
    %3 = vector.load %arg3[%c0_3, %c0_4] : memref<1x96xf32, #tpu.memory_space<vmem>>, vector<1x96xf32>
    %4 = vector.broadcast %3 : vector<1x96xf32> to vector<32x96xf32>
    %5 = arith.addf %2, %4 : vector<32x96xf32>
    %c0_5 = arith.constant 0 : index
    %c0_6 = arith.constant 0 : index
    %6 = vector.load %arg4[%c0_5, %c0_6] : memref<32x96xf32, #tpu.memory_space<vmem>>, vector<32x96xf32>
    tpu.vector_store %arg4[%c0_5, %c0_6], %5 {strides = array<i32>} : memref<32x96xf32, #tpu.memory_space<vmem>>, vector<32x96xf32>,
    return
  }
  func.func @transform_0(%arg0: i32) -> (i32, i32) {
    %c0_i32 = arith.constant 0 : i32
    %c0_i32_0 = arith.constant 0 : i32
    return %arg0, %c0_i32 : i32, i32
  }
  func.func @transform_1(%arg0: i32) -> (i32, i32) {
    %c0_i32 = arith.constant 0 : i32
    %c0_i32_0 = arith.constant 0 : i32
    %c0_i32_1 = arith.constant 0 : i32
    return %c0_i32, %c0_i32_0 : i32, i32
  }
  func.func @transform_2(%arg0: i32) -> (i32, i32) {
    %c0_i32 = arith.constant 0 : i32
    %c0_i32_0 = arith.constant 0 : i32
    %c0_i32_1 = arith.constant 0 : i32
    return %c0_i32, %c0_i32_0 : i32, i32
  }
  func.func @transform_3(%arg0: i32) -> (i32, i32) {
    %c0_i32 = arith.constant 0 : i32
    %c0_i32_0 = arith.constant 0 : i32
    return %arg0, %c0_i32 : i32, i32
  }
}

module attributes {stable_mosaic.version = 11 : i64} {
  func.func @_gat_attn_kernel(%arg0: i32, %arg1: memref<4x8xf32, #tpu.memory_space<smem>>, %arg2: memref<32x64xf32, #tpu.memory_space<vmem>>, %arg3: memref<32x32xi8, #tpu.memory_space<vmem>>, %arg4: memref<32x32xf32, #tpu.memory_space<vmem>>, %arg5: memref<4x32x32xbf16, #tpu.memory_space<vmem>>, %arg6: memref<1x32xf32, #tpu.memory_space<vmem>>, %arg7: memref<1x32xf32, #tpu.memory_space<vmem>>, %arg8: memref<32x32xbf16, #tpu.memory_space<vmem>>) attributes {dimension_semantics = [#tpu.dimension_semantics<parallel>], iteration_bounds = array<i64: 1>, scalar_prefetch = 0 : i64, scratch_operands = 0 : i64, tpu.core_type = #tpu.core_type<tc>, window_params = [{transform_indices = @transform_0, window_bounds = array<i64: 4, 8>}, {transform_indices = @transform_1, window_bounds = array<i64: 32, 64>}, {transform_indices = @transform_2, window_bounds = array<i64: 32, 32>}, {pipeline_mode = #tpu.pipeline_mode<synchronous>, transform_indices = @transform_3, window_bounds = array<i64: 32, 32>}, {pipeline_mode = #tpu.pipeline_mode<synchronous>, transform_indices = @transform_4, window_bounds = array<i64: 4, 32, 32>}, {pipeline_mode = #tpu.pipeline_mode<synchronous>, transform_indices = @transform_5, window_bounds = array<i64: 1, 32>}, {pipeline_mode = #tpu.pipeline_mode<synchronous>, transform_indices = @transform_6, window_bounds = array<i64: 1, 32>}, {transform_indices = @transform_7, window_bounds = array<i64: 32, 32>}]} {
    %c0 = arith.constant 0 : index
    %c0_0 = arith.constant 0 : index
    %0 = vector.load %arg2[%c0, %c0_0] : memref<32x64xf32, #tpu.memory_space<vmem>>, vector<32x64xf32>
    %1 = vector.extract_strided_slice %0 {offsets = [0, 0], sizes = [32, 32], strides = [1, 1]} : vector<32x64xf32> to vector<32x32xf32>
    %2 = vector.extract_strided_slice %0 {offsets = [0, 32], sizes = [32, 32], strides = [1, 1]} : vector<32x64xf32> to vector<32x32xf32>
    %c0_1 = arith.constant 0 : index
    %c0_2 = arith.constant 0 : index
    %3 = vector.load %arg3[%c0_1, %c0_2] : memref<32x32xi8, #tpu.memory_space<vmem>>, vector<32x32xi8>
    %c0_i8 = arith.constant 0 : i8
    %4 = vector.broadcast %c0_i8 : i8 to vector<32x32xi8>
    %5 = arith.cmpi ne, %3, %4 : vector<32x32xi8>
    %c0_3 = arith.constant 0 : index
    %c0_4 = arith.constant 0 : index
    %6 = vector.load %arg4[%c0_3, %c0_4] : memref<32x32xf32, #tpu.memory_space<vmem>>, vector<32x32xf32>
    %cst = arith.constant 0.000000e+00 : f32
    %7 = vector.broadcast %cst : f32 to vector<32x32xf32>
    %8 = vector.extract_strided_slice %6 {offsets = [0, 0], sizes = [1, 32], strides = [1, 1]} : vector<32x32xf32> to vector<1x32xf32>
    %9 = vector.extract_strided_slice %1 {offsets = [0, 0], sizes = [32, 1], strides = [1, 1]} : vector<32x32xf32> to vector<32x1xf32>
    %10 = vector.broadcast %8 : vector<1x32xf32> to vector<32x32xf32>
    %11 = vector.broadcast %9 : vector<32x1xf32> to vector<32x32xf32>
    %12 = arith.addf %10, %11 : vector<32x32xf32>
    %cst_5 = arith.constant 0.000000e+00 : f32
    %13 = vector.broadcast %cst_5 : f32 to vector<32x32xf32>
    %14 = arith.cmpf ogt, %12, %13 : vector<32x32xf32>
    %cst_6 = arith.constant 2.000000e-01 : f32
    %15 = vector.broadcast %cst_6 : f32 to vector<32x32xf32>
    %16 = arith.mulf %15, %12 : vector<32x32xf32>
    %17 = arith.select %14, %12, %16 : vector<32x32xi1>, vector<32x32xf32>
    %c0_7 = arith.constant 0 : index
    %c0_8 = arith.constant 0 : index
    %18 = memref.load %arg1[%c0_7, %c0_8] : memref<4x8xf32, #tpu.memory_space<smem>>
    %19 = vector.broadcast %18 : f32 to vector<32x32xf32>
    %20 = arith.mulf %19, %17 : vector<32x32xf32>
    %21 = vector.extract_strided_slice %6 {offsets = [1, 0], sizes = [1, 32], strides = [1, 1]} : vector<32x32xf32> to vector<1x32xf32>
    %22 = vector.extract_strided_slice %1 {offsets = [0, 1], sizes = [32, 1], strides = [1, 1]} : vector<32x32xf32> to vector<32x1xf32>
    %23 = vector.broadcast %21 : vector<1x32xf32> to vector<32x32xf32>
    %24 = vector.broadcast %22 : vector<32x1xf32> to vector<32x32xf32>
    %25 = arith.addf %23, %24 : vector<32x32xf32>
    %cst_9 = arith.constant 0.000000e+00 : f32
    %26 = vector.broadcast %cst_9 : f32 to vector<32x32xf32>
    %27 = arith.cmpf ogt, %25, %26 : vector<32x32xf32>
    %cst_10 = arith.constant 2.000000e-01 : f32
    %28 = vector.broadcast %cst_10 : f32 to vector<32x32xf32>
    %29 = arith.mulf %28, %25 : vector<32x32xf32>
    %30 = arith.select %27, %25, %29 : vector<32x32xi1>, vector<32x32xf32>
    %c0_11 = arith.constant 0 : index
    %c1 = arith.constant 1 : index
    %31 = memref.load %arg1[%c0_11, %c1] : memref<4x8xf32, #tpu.memory_space<smem>>
    %32 = vector.broadcast %31 : f32 to vector<32x32xf32>
    %33 = arith.mulf %32, %30 : vector<32x32xf32>
    %34 = arith.addf %20, %33 : vector<32x32xf32>
    %35 = vector.extract_strided_slice %6 {offsets = [2, 0], sizes = [1, 32], strides = [1, 1]} : vector<32x32xf32> to vector<1x32xf32>
    %36 = vector.extract_strided_slice %1 {offsets = [0, 2], sizes = [32, 1], strides = [1, 1]} : vector<32x32xf32> to vector<32x1xf32>
    %37 = vector.broadcast %35 : vector<1x32xf32> to vector<32x32xf32>
    %38 = vector.broadcast %36 : vector<32x1xf32> to vector<32x32xf32>
    %39 = arith.addf %37, %38 : vector<32x32xf32>
    %cst_12 = arith.constant 0.000000e+00 : f32
    %40 = vector.broadcast %cst_12 : f32 to vector<32x32xf32>
    %41 = arith.cmpf ogt, %39, %40 : vector<32x32xf32>
    %cst_13 = arith.constant 2.000000e-01 : f32
    %42 = vector.broadcast %cst_13 : f32 to vector<32x32xf32>
    %43 = arith.mulf %42, %39 : vector<32x32xf32>
    %44 = arith.select %41, %39, %43 : vector<32x32xi1>, vector<32x32xf32>
    %c0_14 = arith.constant 0 : index
    %c2 = arith.constant 2 : index
    %45 = memref.load %arg1[%c0_14, %c2] : memref<4x8xf32, #tpu.memory_space<smem>>
    %46 = vector.broadcast %45 : f32 to vector<32x32xf32>
    %47 = arith.mulf %46, %44 : vector<32x32xf32>
    %48 = arith.addf %34, %47 : vector<32x32xf32>
    %49 = vector.extract_strided_slice %6 {offsets = [3, 0], sizes = [1, 32], strides = [1, 1]} : vector<32x32xf32> to vector<1x32xf32>
    %50 = vector.extract_strided_slice %1 {offsets = [0, 3], sizes = [32, 1], strides = [1, 1]} : vector<32x32xf32> to vector<32x1xf32>
    %51 = vector.broadcast %49 : vector<1x32xf32> to vector<32x32xf32>
    %52 = vector.broadcast %50 : vector<32x1xf32> to vector<32x32xf32>
    %53 = arith.addf %51, %52 : vector<32x32xf32>
    %cst_15 = arith.constant 0.000000e+00 : f32
    %54 = vector.broadcast %cst_15 : f32 to vector<32x32xf32>
    %55 = arith.cmpf ogt, %53, %54 : vector<32x32xf32>
    %cst_16 = arith.constant 2.000000e-01 : f32
    %56 = vector.broadcast %cst_16 : f32 to vector<32x32xf32>
    %57 = arith.mulf %56, %53 : vector<32x32xf32>
    %58 = arith.select %55, %53, %57 : vector<32x32xi1>, vector<32x32xf32>
    %c0_17 = arith.constant 0 : index
    %c3 = arith.constant 3 : index
    %59 = memref.load %arg1[%c0_17, %c3] : memref<4x8xf32, #tpu.memory_space<smem>>
    %60 = vector.broadcast %59 : f32 to vector<32x32xf32>
    %61 = arith.mulf %60, %58 : vector<32x32xf32>
    %62 = arith.addf %48, %61 : vector<32x32xf32>
    %63 = vector.extract_strided_slice %6 {offsets = [4, 0], sizes = [1, 32], strides = [1, 1]} : vector<32x32xf32> to vector<1x32xf32>
    %64 = vector.extract_strided_slice %1 {offsets = [0, 4], sizes = [32, 1], strides = [1, 1]} : vector<32x32xf32> to vector<32x1xf32>
    %65 = vector.broadcast %63 : vector<1x32xf32> to vector<32x32xf32>
    %66 = vector.broadcast %64 : vector<32x1xf32> to vector<32x32xf32>
    %67 = arith.addf %65, %66 : vector<32x32xf32>
    %cst_18 = arith.constant 0.000000e+00 : f32
    %68 = vector.broadcast %cst_18 : f32 to vector<32x32xf32>
    %69 = arith.cmpf ogt, %67, %68 : vector<32x32xf32>
    %cst_19 = arith.constant 2.000000e-01 : f32
    %70 = vector.broadcast %cst_19 : f32 to vector<32x32xf32>
    %71 = arith.mulf %70, %67 : vector<32x32xf32>
    %72 = arith.select %69, %67, %71 : vector<32x32xi1>, vector<32x32xf32>
    %c0_20 = arith.constant 0 : index
    %c4 = arith.constant 4 : index
    %73 = memref.load %arg1[%c0_20, %c4] : memref<4x8xf32, #tpu.memory_space<smem>>
    %74 = vector.broadcast %73 : f32 to vector<32x32xf32>
    %75 = arith.mulf %74, %72 : vector<32x32xf32>
    %76 = arith.addf %62, %75 : vector<32x32xf32>
    %77 = vector.extract_strided_slice %6 {offsets = [5, 0], sizes = [1, 32], strides = [1, 1]} : vector<32x32xf32> to vector<1x32xf32>
    %78 = vector.extract_strided_slice %1 {offsets = [0, 5], sizes = [32, 1], strides = [1, 1]} : vector<32x32xf32> to vector<32x1xf32>
    %79 = vector.broadcast %77 : vector<1x32xf32> to vector<32x32xf32>
    %80 = vector.broadcast %78 : vector<32x1xf32> to vector<32x32xf32>
    %81 = arith.addf %79, %80 : vector<32x32xf32>
    %cst_21 = arith.constant 0.000000e+00 : f32
    %82 = vector.broadcast %cst_21 : f32 to vector<32x32xf32>
    %83 = arith.cmpf ogt, %81, %82 : vector<32x32xf32>
    %cst_22 = arith.constant 2.000000e-01 : f32
    %84 = vector.broadcast %cst_22 : f32 to vector<32x32xf32>
    %85 = arith.mulf %84, %81 : vector<32x32xf32>
    %86 = arith.select %83, %81, %85 : vector<32x32xi1>, vector<32x32xf32>
    %c0_23 = arith.constant 0 : index
    %c5 = arith.constant 5 : index
    %87 = memref.load %arg1[%c0_23, %c5] : memref<4x8xf32, #tpu.memory_space<smem>>
    %88 = vector.broadcast %87 : f32 to vector<32x32xf32>
    %89 = arith.mulf %88, %86 : vector<32x32xf32>
    %90 = arith.addf %76, %89 : vector<32x32xf32>
    %91 = vector.extract_strided_slice %6 {offsets = [6, 0], sizes = [1, 32], strides = [1, 1]} : vector<32x32xf32> to vector<1x32xf32>
    %92 = vector.extract_strided_slice %1 {offsets = [0, 6], sizes = [32, 1], strides = [1, 1]} : vector<32x32xf32> to vector<32x1xf32>
    %93 = vector.broadcast %91 : vector<1x32xf32> to vector<32x32xf32>
    %94 = vector.broadcast %92 : vector<32x1xf32> to vector<32x32xf32>
    %95 = arith.addf %93, %94 : vector<32x32xf32>
    %cst_24 = arith.constant 0.000000e+00 : f32
    %96 = vector.broadcast %cst_24 : f32 to vector<32x32xf32>
    %97 = arith.cmpf ogt, %95, %96 : vector<32x32xf32>
    %cst_25 = arith.constant 2.000000e-01 : f32
    %98 = vector.broadcast %cst_25 : f32 to vector<32x32xf32>
    %99 = arith.mulf %98, %95 : vector<32x32xf32>
    %100 = arith.select %97, %95, %99 : vector<32x32xi1>, vector<32x32xf32>
    %c0_26 = arith.constant 0 : index
    %c6 = arith.constant 6 : index
    %101 = memref.load %arg1[%c0_26, %c6] : memref<4x8xf32, #tpu.memory_space<smem>>
    %102 = vector.broadcast %101 : f32 to vector<32x32xf32>
    %103 = arith.mulf %102, %100 : vector<32x32xf32>
    %104 = arith.addf %90, %103 : vector<32x32xf32>
    %105 = vector.extract_strided_slice %6 {offsets = [7, 0], sizes = [1, 32], strides = [1, 1]} : vector<32x32xf32> to vector<1x32xf32>
    %106 = vector.extract_strided_slice %1 {offsets = [0, 7], sizes = [32, 1], strides = [1, 1]} : vector<32x32xf32> to vector<32x1xf32>
    %107 = vector.broadcast %105 : vector<1x32xf32> to vector<32x32xf32>
    %108 = vector.broadcast %106 : vector<32x1xf32> to vector<32x32xf32>
    %109 = arith.addf %107, %108 : vector<32x32xf32>
    %cst_27 = arith.constant 0.000000e+00 : f32
    %110 = vector.broadcast %cst_27 : f32 to vector<32x32xf32>
    %111 = arith.cmpf ogt, %109, %110 : vector<32x32xf32>
    %cst_28 = arith.constant 2.000000e-01 : f32
    %112 = vector.broadcast %cst_28 : f32 to vector<32x32xf32>
    %113 = arith.mulf %112, %109 : vector<32x32xf32>
    %114 = arith.select %111, %109, %113 : vector<32x32xi1>, vector<32x32xf32>
    %c0_29 = arith.constant 0 : index
    %c7 = arith.constant 7 : index
    %115 = memref.load %arg1[%c0_29, %c7] : memref<4x8xf32, #tpu.memory_space<smem>>
    %116 = vector.broadcast %115 : f32 to vector<32x32xf32>
    %117 = arith.mulf %116, %114 : vector<32x32xf32>
    %118 = arith.addf %104, %117 : vector<32x32xf32>
    %cst_30 = arith.constant -1.000000e+30 : f32
    %119 = vector.broadcast %cst_30 : f32 to vector<32x32xf32>
    %120 = arith.select %5, %118, %119 : vector<32x32xi1>, vector<32x32xf32>
    %cst_31 = arith.constant dense<0xFF800000> : vector<32xf32>
    %121 = vector.multi_reduction <maximumf>, %120, %cst_31 [1] : vector<32x32xf32> to vector<32xf32>
    %122 = vector.shape_cast %121 : vector<32xf32> to vector<32x1xf32>
    %123 = vector.broadcast %122 : vector<32x1xf32> to vector<32x32xf32>
    %124 = arith.subf %120, %123 : vector<32x32xf32>
    %125 = math.exp %124 : vector<32x32xf32>
    %cst_32 = arith.constant dense<0.000000e+00> : vector<32xf32>
    %126 = vector.multi_reduction <add>, %125, %cst_32 [1] : vector<32x32xf32> to vector<32xf32>
    %127 = vector.shape_cast %126 : vector<32xf32> to vector<32x1xf32>
    %128 = tpu.reciprocal %127 {approx = true} : vector<32x1xf32> -> vector<32x1xf32>
    %129 = vector.broadcast %128 : vector<32x1xf32> to vector<32x32xf32>
    %130 = arith.mulf %125, %129 : vector<32x32xf32>
    %131 = arith.truncf %130 : vector<32x32xf32> to vector<32x32xbf16>
    %c0_33 = arith.constant 0 : index
    %c0_34 = arith.constant 0 : index
    %c0_35 = arith.constant 0 : index
    %132 = vector.load %arg5[%c0_33, %c0_34, %c0_35] : memref<4x32x32xbf16, #tpu.memory_space<vmem>>, vector<1x32x32xbf16>
    %133 = vector.shape_cast %132 : vector<1x32x32xbf16> to vector<32x32xbf16>
    %cst_36 = arith.constant dense<0.000000e+00> : vector<32x32xf32>
    %134 = tpu.matmul %131, %133, %cst_36 {dimension_numbers = #tpu.dot_dimension_numbers<[1], [0], [0], [1], [0, 0, 1, 1], [], []>} : vector<32x32xbf16>, vector<32x32xbf16>, vector<32x32xf32> -> vector<32x32xf32>
    %135 = arith.addf %7, %134 : vector<32x32xf32>
    %136 = vector.extract_strided_slice %6 {offsets = [8, 0], sizes = [1, 32], strides = [1, 1]} : vector<32x32xf32> to vector<1x32xf32>
    %137 = vector.extract_strided_slice %1 {offsets = [0, 8], sizes = [32, 1], strides = [1, 1]} : vector<32x32xf32> to vector<32x1xf32>
    %138 = vector.broadcast %136 : vector<1x32xf32> to vector<32x32xf32>
    %139 = vector.broadcast %137 : vector<32x1xf32> to vector<32x32xf32>
    %140 = arith.addf %138, %139 : vector<32x32xf32>
    %cst_37 = arith.constant 0.000000e+00 : f32
    %141 = vector.broadcast %cst_37 : f32 to vector<32x32xf32>
    %142 = arith.cmpf ogt, %140, %141 : vector<32x32xf32>
    %cst_38 = arith.constant 2.000000e-01 : f32
    %143 = vector.broadcast %cst_38 : f32 to vector<32x32xf32>
    %144 = arith.mulf %143, %140 : vector<32x32xf32>
    %145 = arith.select %142, %140, %144 : vector<32x32xi1>, vector<32x32xf32>
    %c1_39 = arith.constant 1 : index
    %c0_40 = arith.constant 0 : index
    %146 = memref.load %arg1[%c1_39, %c0_40] : memref<4x8xf32, #tpu.memory_space<smem>>
    %147 = vector.broadcast %146 : f32 to vector<32x32xf32>
    %148 = arith.mulf %147, %145 : vector<32x32xf32>
    %149 = vector.extract_strided_slice %6 {offsets = [9, 0], sizes = [1, 32], strides = [1, 1]} : vector<32x32xf32> to vector<1x32xf32>
    %150 = vector.extract_strided_slice %1 {offsets = [0, 9], sizes = [32, 1], strides = [1, 1]} : vector<32x32xf32> to vector<32x1xf32>
    %151 = vector.broadcast %149 : vector<1x32xf32> to vector<32x32xf32>
    %152 = vector.broadcast %150 : vector<32x1xf32> to vector<32x32xf32>
    %153 = arith.addf %151, %152 : vector<32x32xf32>
    %cst_41 = arith.constant 0.000000e+00 : f32
    %154 = vector.broadcast %cst_41 : f32 to vector<32x32xf32>
    %155 = arith.cmpf ogt, %153, %154 : vector<32x32xf32>
    %cst_42 = arith.constant 2.000000e-01 : f32
    %156 = vector.broadcast %cst_42 : f32 to vector<32x32xf32>
    %157 = arith.mulf %156, %153 : vector<32x32xf32>
    %158 = arith.select %155, %153, %157 : vector<32x32xi1>, vector<32x32xf32>
    %c1_43 = arith.constant 1 : index
    %c1_44 = arith.constant 1 : index
    %159 = memref.load %arg1[%c1_43, %c1_44] : memref<4x8xf32, #tpu.memory_space<smem>>
    %160 = vector.broadcast %159 : f32 to vector<32x32xf32>
    %161 = arith.mulf %160, %158 : vector<32x32xf32>
    %162 = arith.addf %148, %161 : vector<32x32xf32>
    %163 = vector.extract_strided_slice %6 {offsets = [10, 0], sizes = [1, 32], strides = [1, 1]} : vector<32x32xf32> to vector<1x32xf32>
    %164 = vector.extract_strided_slice %1 {offsets = [0, 10], sizes = [32, 1], strides = [1, 1]} : vector<32x32xf32> to vector<32x1xf32>
    %165 = vector.broadcast %163 : vector<1x32xf32> to vector<32x32xf32>
    %166 = vector.broadcast %164 : vector<32x1xf32> to vector<32x32xf32>
    %167 = arith.addf %165, %166 : vector<32x32xf32>
    %cst_45 = arith.constant 0.000000e+00 : f32
    %168 = vector.broadcast %cst_45 : f32 to vector<32x32xf32>
    %169 = arith.cmpf ogt, %167, %168 : vector<32x32xf32>
    %cst_46 = arith.constant 2.000000e-01 : f32
    %170 = vector.broadcast %cst_46 : f32 to vector<32x32xf32>
    %171 = arith.mulf %170, %167 : vector<32x32xf32>
    %172 = arith.select %169, %167, %171 : vector<32x32xi1>, vector<32x32xf32>
    %c1_47 = arith.constant 1 : index
    %c2_48 = arith.constant 2 : index
    %173 = memref.load %arg1[%c1_47, %c2_48] : memref<4x8xf32, #tpu.memory_space<smem>>
    %174 = vector.broadcast %173 : f32 to vector<32x32xf32>
    %175 = arith.mulf %174, %172 : vector<32x32xf32>
    %176 = arith.addf %162, %175 : vector<32x32xf32>
    %177 = vector.extract_strided_slice %6 {offsets = [11, 0], sizes = [1, 32], strides = [1, 1]} : vector<32x32xf32> to vector<1x32xf32>
    %178 = vector.extract_strided_slice %1 {offsets = [0, 11], sizes = [32, 1], strides = [1, 1]} : vector<32x32xf32> to vector<32x1xf32>
    %179 = vector.broadcast %177 : vector<1x32xf32> to vector<32x32xf32>
    %180 = vector.broadcast %178 : vector<32x1xf32> to vector<32x32xf32>
    %181 = arith.addf %179, %180 : vector<32x32xf32>
    %cst_49 = arith.constant 0.000000e+00 : f32
    %182 = vector.broadcast %cst_49 : f32 to vector<32x32xf32>
    %183 = arith.cmpf ogt, %181, %182 : vector<32x32xf32>
    %cst_50 = arith.constant 2.000000e-01 : f32
    %184 = vector.broadcast %cst_50 : f32 to vector<32x32xf32>
    %185 = arith.mulf %184, %181 : vector<32x32xf32>
    %186 = arith.select %183, %181, %185 : vector<32x32xi1>, vector<32x32xf32>
    %c1_51 = arith.constant 1 : index
    %c3_52 = arith.constant 3 : index
    %187 = memref.load %arg1[%c1_51, %c3_52] : memref<4x8xf32, #tpu.memory_space<smem>>
    %188 = vector.broadcast %187 : f32 to vector<32x32xf32>
    %189 = arith.mulf %188, %186 : vector<32x32xf32>
    %190 = arith.addf %176, %189 : vector<32x32xf32>
    %191 = vector.extract_strided_slice %6 {offsets = [12, 0], sizes = [1, 32], strides = [1, 1]} : vector<32x32xf32> to vector<1x32xf32>
    %192 = vector.extract_strided_slice %1 {offsets = [0, 12], sizes = [32, 1], strides = [1, 1]} : vector<32x32xf32> to vector<32x1xf32>
    %193 = vector.broadcast %191 : vector<1x32xf32> to vector<32x32xf32>
    %194 = vector.broadcast %192 : vector<32x1xf32> to vector<32x32xf32>
    %195 = arith.addf %193, %194 : vector<32x32xf32>
    %cst_53 = arith.constant 0.000000e+00 : f32
    %196 = vector.broadcast %cst_53 : f32 to vector<32x32xf32>
    %197 = arith.cmpf ogt, %195, %196 : vector<32x32xf32>
    %cst_54 = arith.constant 2.000000e-01 : f32
    %198 = vector.broadcast %cst_54 : f32 to vector<32x32xf32>
    %199 = arith.mulf %198, %195 : vector<32x32xf32>
    %200 = arith.select %197, %195, %199 : vector<32x32xi1>, vector<32x32xf32>
    %c1_55 = arith.constant 1 : index
    %c4_56 = arith.constant 4 : index
    %201 = memref.load %arg1[%c1_55, %c4_56] : memref<4x8xf32, #tpu.memory_space<smem>>
    %202 = vector.broadcast %201 : f32 to vector<32x32xf32>
    %203 = arith.mulf %202, %200 : vector<32x32xf32>
    %204 = arith.addf %190, %203 : vector<32x32xf32>
    %205 = vector.extract_strided_slice %6 {offsets = [13, 0], sizes = [1, 32], strides = [1, 1]} : vector<32x32xf32> to vector<1x32xf32>
    %206 = vector.extract_strided_slice %1 {offsets = [0, 13], sizes = [32, 1], strides = [1, 1]} : vector<32x32xf32> to vector<32x1xf32>
    %207 = vector.broadcast %205 : vector<1x32xf32> to vector<32x32xf32>
    %208 = vector.broadcast %206 : vector<32x1xf32> to vector<32x32xf32>
    %209 = arith.addf %207, %208 : vector<32x32xf32>
    %cst_57 = arith.constant 0.000000e+00 : f32
    %210 = vector.broadcast %cst_57 : f32 to vector<32x32xf32>
    %211 = arith.cmpf ogt, %209, %210 : vector<32x32xf32>
    %cst_58 = arith.constant 2.000000e-01 : f32
    %212 = vector.broadcast %cst_58 : f32 to vector<32x32xf32>
    %213 = arith.mulf %212, %209 : vector<32x32xf32>
    %214 = arith.select %211, %209, %213 : vector<32x32xi1>, vector<32x32xf32>
    %c1_59 = arith.constant 1 : index
    %c5_60 = arith.constant 5 : index
    %215 = memref.load %arg1[%c1_59, %c5_60] : memref<4x8xf32, #tpu.memory_space<smem>>
    %216 = vector.broadcast %215 : f32 to vector<32x32xf32>
    %217 = arith.mulf %216, %214 : vector<32x32xf32>
    %218 = arith.addf %204, %217 : vector<32x32xf32>
    %219 = vector.extract_strided_slice %6 {offsets = [14, 0], sizes = [1, 32], strides = [1, 1]} : vector<32x32xf32> to vector<1x32xf32>
    %220 = vector.extract_strided_slice %1 {offsets = [0, 14], sizes = [32, 1], strides = [1, 1]} : vector<32x32xf32> to vector<32x1xf32>
    %221 = vector.broadcast %219 : vector<1x32xf32> to vector<32x32xf32>
    %222 = vector.broadcast %220 : vector<32x1xf32> to vector<32x32xf32>
    %223 = arith.addf %221, %222 : vector<32x32xf32>
    %cst_61 = arith.constant 0.000000e+00 : f32
    %224 = vector.broadcast %cst_61 : f32 to vector<32x32xf32>
    %225 = arith.cmpf ogt, %223, %224 : vector<32x32xf32>
    %cst_62 = arith.constant 2.000000e-01 : f32
    %226 = vector.broadcast %cst_62 : f32 to vector<32x32xf32>
    %227 = arith.mulf %226, %223 : vector<32x32xf32>
    %228 = arith.select %225, %223, %227 : vector<32x32xi1>, vector<32x32xf32>
    %c1_63 = arith.constant 1 : index
    %c6_64 = arith.constant 6 : index
    %229 = memref.load %arg1[%c1_63, %c6_64] : memref<4x8xf32, #tpu.memory_space<smem>>
    %230 = vector.broadcast %229 : f32 to vector<32x32xf32>
    %231 = arith.mulf %230, %228 : vector<32x32xf32>
    %232 = arith.addf %218, %231 : vector<32x32xf32>
    %233 = vector.extract_strided_slice %6 {offsets = [15, 0], sizes = [1, 32], strides = [1, 1]} : vector<32x32xf32> to vector<1x32xf32>
    %234 = vector.extract_strided_slice %1 {offsets = [0, 15], sizes = [32, 1], strides = [1, 1]} : vector<32x32xf32> to vector<32x1xf32>
    %235 = vector.broadcast %233 : vector<1x32xf32> to vector<32x32xf32>
    %236 = vector.broadcast %234 : vector<32x1xf32> to vector<32x32xf32>
    %237 = arith.addf %235, %236 : vector<32x32xf32>
    %cst_65 = arith.constant 0.000000e+00 : f32
    %238 = vector.broadcast %cst_65 : f32 to vector<32x32xf32>
    %239 = arith.cmpf ogt, %237, %238 : vector<32x32xf32>
    %cst_66 = arith.constant 2.000000e-01 : f32
    %240 = vector.broadcast %cst_66 : f32 to vector<32x32xf32>
    %241 = arith.mulf %240, %237 : vector<32x32xf32>
    %242 = arith.select %239, %237, %241 : vector<32x32xi1>, vector<32x32xf32>
    %c1_67 = arith.constant 1 : index
    %c7_68 = arith.constant 7 : index
    %243 = memref.load %arg1[%c1_67, %c7_68] : memref<4x8xf32, #tpu.memory_space<smem>>
    %244 = vector.broadcast %243 : f32 to vector<32x32xf32>
    %245 = arith.mulf %244, %242 : vector<32x32xf32>
    %246 = arith.addf %232, %245 : vector<32x32xf32>
    %cst_69 = arith.constant -1.000000e+30 : f32
    %247 = vector.broadcast %cst_69 : f32 to vector<32x32xf32>
    %248 = arith.select %5, %246, %247 : vector<32x32xi1>, vector<32x32xf32>
    %cst_70 = arith.constant dense<0xFF800000> : vector<32xf32>
    %249 = vector.multi_reduction <maximumf>, %248, %cst_70 [1] : vector<32x32xf32> to vector<32xf32>
    %250 = vector.shape_cast %249 : vector<32xf32> to vector<32x1xf32>
    %251 = vector.broadcast %250 : vector<32x1xf32> to vector<32x32xf32>
    %252 = arith.subf %248, %251 : vector<32x32xf32>
    %253 = math.exp %252 : vector<32x32xf32>
    %cst_71 = arith.constant dense<0.000000e+00> : vector<32xf32>
    %254 = vector.multi_reduction <add>, %253, %cst_71 [1] : vector<32x32xf32> to vector<32xf32>
    %255 = vector.shape_cast %254 : vector<32xf32> to vector<32x1xf32>
    %256 = tpu.reciprocal %255 {approx = true} : vector<32x1xf32> -> vector<32x1xf32>
    %257 = vector.broadcast %256 : vector<32x1xf32> to vector<32x32xf32>
    %258 = arith.mulf %253, %257 : vector<32x32xf32>
    %259 = arith.truncf %258 : vector<32x32xf32> to vector<32x32xbf16>
    %c1_72 = arith.constant 1 : index
    %c0_73 = arith.constant 0 : index
    %c0_74 = arith.constant 0 : index
    %260 = vector.load %arg5[%c1_72, %c0_73, %c0_74] : memref<4x32x32xbf16, #tpu.memory_space<vmem>>, vector<1x32x32xbf16>
    %261 = vector.shape_cast %260 : vector<1x32x32xbf16> to vector<32x32xbf16>
    %cst_75 = arith.constant dense<0.000000e+00> : vector<32x32xf32>
    %262 = tpu.matmul %259, %261, %cst_75 {dimension_numbers = #tpu.dot_dimension_numbers<[1], [0], [0], [1], [0, 0, 1, 1], [], []>} : vector<32x32xbf16>, vector<32x32xbf16>, vector<32x32xf32> -> vector<32x32xf32>
    %263 = arith.addf %135, %262 : vector<32x32xf32>
    %264 = vector.extract_strided_slice %6 {offsets = [16, 0], sizes = [1, 32], strides = [1, 1]} : vector<32x32xf32> to vector<1x32xf32>
    %265 = vector.extract_strided_slice %1 {offsets = [0, 16], sizes = [32, 1], strides = [1, 1]} : vector<32x32xf32> to vector<32x1xf32>
    %266 = vector.broadcast %264 : vector<1x32xf32> to vector<32x32xf32>
    %267 = vector.broadcast %265 : vector<32x1xf32> to vector<32x32xf32>
    %268 = arith.addf %266, %267 : vector<32x32xf32>
    %cst_76 = arith.constant 0.000000e+00 : f32
    %269 = vector.broadcast %cst_76 : f32 to vector<32x32xf32>
    %270 = arith.cmpf ogt, %268, %269 : vector<32x32xf32>
    %cst_77 = arith.constant 2.000000e-01 : f32
    %271 = vector.broadcast %cst_77 : f32 to vector<32x32xf32>
    %272 = arith.mulf %271, %268 : vector<32x32xf32>
    %273 = arith.select %270, %268, %272 : vector<32x32xi1>, vector<32x32xf32>
    %c2_78 = arith.constant 2 : index
    %c0_79 = arith.constant 0 : index
    %274 = memref.load %arg1[%c2_78, %c0_79] : memref<4x8xf32, #tpu.memory_space<smem>>
    %275 = vector.broadcast %274 : f32 to vector<32x32xf32>
    %276 = arith.mulf %275, %273 : vector<32x32xf32>
    %277 = vector.extract_strided_slice %6 {offsets = [17, 0], sizes = [1, 32], strides = [1, 1]} : vector<32x32xf32> to vector<1x32xf32>
    %278 = vector.extract_strided_slice %1 {offsets = [0, 17], sizes = [32, 1], strides = [1, 1]} : vector<32x32xf32> to vector<32x1xf32>
    %279 = vector.broadcast %277 : vector<1x32xf32> to vector<32x32xf32>
    %280 = vector.broadcast %278 : vector<32x1xf32> to vector<32x32xf32>
    %281 = arith.addf %279, %280 : vector<32x32xf32>
    %cst_80 = arith.constant 0.000000e+00 : f32
    %282 = vector.broadcast %cst_80 : f32 to vector<32x32xf32>
    %283 = arith.cmpf ogt, %281, %282 : vector<32x32xf32>
    %cst_81 = arith.constant 2.000000e-01 : f32
    %284 = vector.broadcast %cst_81 : f32 to vector<32x32xf32>
    %285 = arith.mulf %284, %281 : vector<32x32xf32>
    %286 = arith.select %283, %281, %285 : vector<32x32xi1>, vector<32x32xf32>
    %c2_82 = arith.constant 2 : index
    %c1_83 = arith.constant 1 : index
    %287 = memref.load %arg1[%c2_82, %c1_83] : memref<4x8xf32, #tpu.memory_space<smem>>
    %288 = vector.broadcast %287 : f32 to vector<32x32xf32>
    %289 = arith.mulf %288, %286 : vector<32x32xf32>
    %290 = arith.addf %276, %289 : vector<32x32xf32>
    %291 = vector.extract_strided_slice %6 {offsets = [18, 0], sizes = [1, 32], strides = [1, 1]} : vector<32x32xf32> to vector<1x32xf32>
    %292 = vector.extract_strided_slice %1 {offsets = [0, 18], sizes = [32, 1], strides = [1, 1]} : vector<32x32xf32> to vector<32x1xf32>
    %293 = vector.broadcast %291 : vector<1x32xf32> to vector<32x32xf32>
    %294 = vector.broadcast %292 : vector<32x1xf32> to vector<32x32xf32>
    %295 = arith.addf %293, %294 : vector<32x32xf32>
    %cst_84 = arith.constant 0.000000e+00 : f32
    %296 = vector.broadcast %cst_84 : f32 to vector<32x32xf32>
    %297 = arith.cmpf ogt, %295, %296 : vector<32x32xf32>
    %cst_85 = arith.constant 2.000000e-01 : f32
    %298 = vector.broadcast %cst_85 : f32 to vector<32x32xf32>
    %299 = arith.mulf %298, %295 : vector<32x32xf32>
    %300 = arith.select %297, %295, %299 : vector<32x32xi1>, vector<32x32xf32>
    %c2_86 = arith.constant 2 : index
    %c2_87 = arith.constant 2 : index
    %301 = memref.load %arg1[%c2_86, %c2_87] : memref<4x8xf32, #tpu.memory_space<smem>>
    %302 = vector.broadcast %301 : f32 to vector<32x32xf32>
    %303 = arith.mulf %302, %300 : vector<32x32xf32>
    %304 = arith.addf %290, %303 : vector<32x32xf32>
    %305 = vector.extract_strided_slice %6 {offsets = [19, 0], sizes = [1, 32], strides = [1, 1]} : vector<32x32xf32> to vector<1x32xf32>
    %306 = vector.extract_strided_slice %1 {offsets = [0, 19], sizes = [32, 1], strides = [1, 1]} : vector<32x32xf32> to vector<32x1xf32>
    %307 = vector.broadcast %305 : vector<1x32xf32> to vector<32x32xf32>
    %308 = vector.broadcast %306 : vector<32x1xf32> to vector<32x32xf32>
    %309 = arith.addf %307, %308 : vector<32x32xf32>
    %cst_88 = arith.constant 0.000000e+00 : f32
    %310 = vector.broadcast %cst_88 : f32 to vector<32x32xf32>
    %311 = arith.cmpf ogt, %309, %310 : vector<32x32xf32>
    %cst_89 = arith.constant 2.000000e-01 : f32
    %312 = vector.broadcast %cst_89 : f32 to vector<32x32xf32>
    %313 = arith.mulf %312, %309 : vector<32x32xf32>
    %314 = arith.select %311, %309, %313 : vector<32x32xi1>, vector<32x32xf32>
    %c2_90 = arith.constant 2 : index
    %c3_91 = arith.constant 3 : index
    %315 = memref.load %arg1[%c2_90, %c3_91] : memref<4x8xf32, #tpu.memory_space<smem>>
    %316 = vector.broadcast %315 : f32 to vector<32x32xf32>
    %317 = arith.mulf %316, %314 : vector<32x32xf32>
    %318 = arith.addf %304, %317 : vector<32x32xf32>
    %319 = vector.extract_strided_slice %6 {offsets = [20, 0], sizes = [1, 32], strides = [1, 1]} : vector<32x32xf32> to vector<1x32xf32>
    %320 = vector.extract_strided_slice %1 {offsets = [0, 20], sizes = [32, 1], strides = [1, 1]} : vector<32x32xf32> to vector<32x1xf32>
    %321 = vector.broadcast %319 : vector<1x32xf32> to vector<32x32xf32>
    %322 = vector.broadcast %320 : vector<32x1xf32> to vector<32x32xf32>
    %323 = arith.addf %321, %322 : vector<32x32xf32>
    %cst_92 = arith.constant 0.000000e+00 : f32
    %324 = vector.broadcast %cst_92 : f32 to vector<32x32xf32>
    %325 = arith.cmpf ogt, %323, %324 : vector<32x32xf32>
    %cst_93 = arith.constant 2.000000e-01 : f32
    %326 = vector.broadcast %cst_93 : f32 to vector<32x32xf32>
    %327 = arith.mulf %326, %323 : vector<32x32xf32>
    %328 = arith.select %325, %323, %327 : vector<32x32xi1>, vector<32x32xf32>
    %c2_94 = arith.constant 2 : index
    %c4_95 = arith.constant 4 : index
    %329 = memref.load %arg1[%c2_94, %c4_95] : memref<4x8xf32, #tpu.memory_space<smem>>
    %330 = vector.broadcast %329 : f32 to vector<32x32xf32>
    %331 = arith.mulf %330, %328 : vector<32x32xf32>
    %332 = arith.addf %318, %331 : vector<32x32xf32>
    %333 = vector.extract_strided_slice %6 {offsets = [21, 0], sizes = [1, 32], strides = [1, 1]} : vector<32x32xf32> to vector<1x32xf32>
    %334 = vector.extract_strided_slice %1 {offsets = [0, 21], sizes = [32, 1], strides = [1, 1]} : vector<32x32xf32> to vector<32x1xf32>
    %335 = vector.broadcast %333 : vector<1x32xf32> to vector<32x32xf32>
    %336 = vector.broadcast %334 : vector<32x1xf32> to vector<32x32xf32>
    %337 = arith.addf %335, %336 : vector<32x32xf32>
    %cst_96 = arith.constant 0.000000e+00 : f32
    %338 = vector.broadcast %cst_96 : f32 to vector<32x32xf32>
    %339 = arith.cmpf ogt, %337, %338 : vector<32x32xf32>
    %cst_97 = arith.constant 2.000000e-01 : f32
    %340 = vector.broadcast %cst_97 : f32 to vector<32x32xf32>
    %341 = arith.mulf %340, %337 : vector<32x32xf32>
    %342 = arith.select %339, %337, %341 : vector<32x32xi1>, vector<32x32xf32>
    %c2_98 = arith.constant 2 : index
    %c5_99 = arith.constant 5 : index
    %343 = memref.load %arg1[%c2_98, %c5_99] : memref<4x8xf32, #tpu.memory_space<smem>>
    %344 = vector.broadcast %343 : f32 to vector<32x32xf32>
    %345 = arith.mulf %344, %342 : vector<32x32xf32>
    %346 = arith.addf %332, %345 : vector<32x32xf32>
    %347 = vector.extract_strided_slice %6 {offsets = [22, 0], sizes = [1, 32], strides = [1, 1]} : vector<32x32xf32> to vector<1x32xf32>
    %348 = vector.extract_strided_slice %1 {offsets = [0, 22], sizes = [32, 1], strides = [1, 1]} : vector<32x32xf32> to vector<32x1xf32>
    %349 = vector.broadcast %347 : vector<1x32xf32> to vector<32x32xf32>
    %350 = vector.broadcast %348 : vector<32x1xf32> to vector<32x32xf32>
    %351 = arith.addf %349, %350 : vector<32x32xf32>
    %cst_100 = arith.constant 0.000000e+00 : f32
    %352 = vector.broadcast %cst_100 : f32 to vector<32x32xf32>
    %353 = arith.cmpf ogt, %351, %352 : vector<32x32xf32>
    %cst_101 = arith.constant 2.000000e-01 : f32
    %354 = vector.broadcast %cst_101 : f32 to vector<32x32xf32>
    %355 = arith.mulf %354, %351 : vector<32x32xf32>
    %356 = arith.select %353, %351, %355 : vector<32x32xi1>, vector<32x32xf32>
    %c2_102 = arith.constant 2 : index
    %c6_103 = arith.constant 6 : index
    %357 = memref.load %arg1[%c2_102, %c6_103] : memref<4x8xf32, #tpu.memory_space<smem>>
    %358 = vector.broadcast %357 : f32 to vector<32x32xf32>
    %359 = arith.mulf %358, %356 : vector<32x32xf32>
    %360 = arith.addf %346, %359 : vector<32x32xf32>
    %361 = vector.extract_strided_slice %6 {offsets = [23, 0], sizes = [1, 32], strides = [1, 1]} : vector<32x32xf32> to vector<1x32xf32>
    %362 = vector.extract_strided_slice %1 {offsets = [0, 23], sizes = [32, 1], strides = [1, 1]} : vector<32x32xf32> to vector<32x1xf32>
    %363 = vector.broadcast %361 : vector<1x32xf32> to vector<32x32xf32>
    %364 = vector.broadcast %362 : vector<32x1xf32> to vector<32x32xf32>
    %365 = arith.addf %363, %364 : vector<32x32xf32>
    %cst_104 = arith.constant 0.000000e+00 : f32
    %366 = vector.broadcast %cst_104 : f32 to vector<32x32xf32>
    %367 = arith.cmpf ogt, %365, %366 : vector<32x32xf32>
    %cst_105 = arith.constant 2.000000e-01 : f32
    %368 = vector.broadcast %cst_105 : f32 to vector<32x32xf32>
    %369 = arith.mulf %368, %365 : vector<32x32xf32>
    %370 = arith.select %367, %365, %369 : vector<32x32xi1>, vector<32x32xf32>
    %c2_106 = arith.constant 2 : index
    %c7_107 = arith.constant 7 : index
    %371 = memref.load %arg1[%c2_106, %c7_107] : memref<4x8xf32, #tpu.memory_space<smem>>
    %372 = vector.broadcast %371 : f32 to vector<32x32xf32>
    %373 = arith.mulf %372, %370 : vector<32x32xf32>
    %374 = arith.addf %360, %373 : vector<32x32xf32>
    %cst_108 = arith.constant -1.000000e+30 : f32
    %375 = vector.broadcast %cst_108 : f32 to vector<32x32xf32>
    %376 = arith.select %5, %374, %375 : vector<32x32xi1>, vector<32x32xf32>
    %cst_109 = arith.constant dense<0xFF800000> : vector<32xf32>
    %377 = vector.multi_reduction <maximumf>, %376, %cst_109 [1] : vector<32x32xf32> to vector<32xf32>
    %378 = vector.shape_cast %377 : vector<32xf32> to vector<32x1xf32>
    %379 = vector.broadcast %378 : vector<32x1xf32> to vector<32x32xf32>
    %380 = arith.subf %376, %379 : vector<32x32xf32>
    %381 = math.exp %380 : vector<32x32xf32>
    %cst_110 = arith.constant dense<0.000000e+00> : vector<32xf32>
    %382 = vector.multi_reduction <add>, %381, %cst_110 [1] : vector<32x32xf32> to vector<32xf32>
    %383 = vector.shape_cast %382 : vector<32xf32> to vector<32x1xf32>
    %384 = tpu.reciprocal %383 {approx = true} : vector<32x1xf32> -> vector<32x1xf32>
    %385 = vector.broadcast %384 : vector<32x1xf32> to vector<32x32xf32>
    %386 = arith.mulf %381, %385 : vector<32x32xf32>
    %387 = arith.truncf %386 : vector<32x32xf32> to vector<32x32xbf16>
    %c2_111 = arith.constant 2 : index
    %c0_112 = arith.constant 0 : index
    %c0_113 = arith.constant 0 : index
    %388 = vector.load %arg5[%c2_111, %c0_112, %c0_113] : memref<4x32x32xbf16, #tpu.memory_space<vmem>>, vector<1x32x32xbf16>
    %389 = vector.shape_cast %388 : vector<1x32x32xbf16> to vector<32x32xbf16>
    %cst_114 = arith.constant dense<0.000000e+00> : vector<32x32xf32>
    %390 = tpu.matmul %387, %389, %cst_114 {dimension_numbers = #tpu.dot_dimension_numbers<[1], [0], [0], [1], [0, 0, 1, 1], [], []>} : vector<32x32xbf16>, vector<32x32xbf16>, vector<32x32xf32> -> vector<32x32xf32>
    %391 = arith.addf %263, %390 : vector<32x32xf32>
    %392 = vector.extract_strided_slice %6 {offsets = [24, 0], sizes = [1, 32], strides = [1, 1]} : vector<32x32xf32> to vector<1x32xf32>
    %393 = vector.extract_strided_slice %1 {offsets = [0, 24], sizes = [32, 1], strides = [1, 1]} : vector<32x32xf32> to vector<32x1xf32>
    %394 = vector.broadcast %392 : vector<1x32xf32> to vector<32x32xf32>
    %395 = vector.broadcast %393 : vector<32x1xf32> to vector<32x32xf32>
    %396 = arith.addf %394, %395 : vector<32x32xf32>
    %cst_115 = arith.constant 0.000000e+00 : f32
    %397 = vector.broadcast %cst_115 : f32 to vector<32x32xf32>
    %398 = arith.cmpf ogt, %396, %397 : vector<32x32xf32>
    %cst_116 = arith.constant 2.000000e-01 : f32
    %399 = vector.broadcast %cst_116 : f32 to vector<32x32xf32>
    %400 = arith.mulf %399, %396 : vector<32x32xf32>
    %401 = arith.select %398, %396, %400 : vector<32x32xi1>, vector<32x32xf32>
    %c3_117 = arith.constant 3 : index
    %c0_118 = arith.constant 0 : index
    %402 = memref.load %arg1[%c3_117, %c0_118] : memref<4x8xf32, #tpu.memory_space<smem>>
    %403 = vector.broadcast %402 : f32 to vector<32x32xf32>
    %404 = arith.mulf %403, %401 : vector<32x32xf32>
    %405 = vector.extract_strided_slice %6 {offsets = [25, 0], sizes = [1, 32], strides = [1, 1]} : vector<32x32xf32> to vector<1x32xf32>
    %406 = vector.extract_strided_slice %1 {offsets = [0, 25], sizes = [32, 1], strides = [1, 1]} : vector<32x32xf32> to vector<32x1xf32>
    %407 = vector.broadcast %405 : vector<1x32xf32> to vector<32x32xf32>
    %408 = vector.broadcast %406 : vector<32x1xf32> to vector<32x32xf32>
    %409 = arith.addf %407, %408 : vector<32x32xf32>
    %cst_119 = arith.constant 0.000000e+00 : f32
    %410 = vector.broadcast %cst_119 : f32 to vector<32x32xf32>
    %411 = arith.cmpf ogt, %409, %410 : vector<32x32xf32>
    %cst_120 = arith.constant 2.000000e-01 : f32
    %412 = vector.broadcast %cst_120 : f32 to vector<32x32xf32>
    %413 = arith.mulf %412, %409 : vector<32x32xf32>
    %414 = arith.select %411, %409, %413 : vector<32x32xi1>, vector<32x32xf32>
    %c3_121 = arith.constant 3 : index
    %c1_122 = arith.constant 1 : index
    %415 = memref.load %arg1[%c3_121, %c1_122] : memref<4x8xf32, #tpu.memory_space<smem>>
    %416 = vector.broadcast %415 : f32 to vector<32x32xf32>
    %417 = arith.mulf %416, %414 : vector<32x32xf32>
    %418 = arith.addf %404, %417 : vector<32x32xf32>
    %419 = vector.extract_strided_slice %6 {offsets = [26, 0], sizes = [1, 32], strides = [1, 1]} : vector<32x32xf32> to vector<1x32xf32>
    %420 = vector.extract_strided_slice %1 {offsets = [0, 26], sizes = [32, 1], strides = [1, 1]} : vector<32x32xf32> to vector<32x1xf32>
    %421 = vector.broadcast %419 : vector<1x32xf32> to vector<32x32xf32>
    %422 = vector.broadcast %420 : vector<32x1xf32> to vector<32x32xf32>
    %423 = arith.addf %421, %422 : vector<32x32xf32>
    %cst_123 = arith.constant 0.000000e+00 : f32
    %424 = vector.broadcast %cst_123 : f32 to vector<32x32xf32>
    %425 = arith.cmpf ogt, %423, %424 : vector<32x32xf32>
    %cst_124 = arith.constant 2.000000e-01 : f32
    %426 = vector.broadcast %cst_124 : f32 to vector<32x32xf32>
    %427 = arith.mulf %426, %423 : vector<32x32xf32>
    %428 = arith.select %425, %423, %427 : vector<32x32xi1>, vector<32x32xf32>
    %c3_125 = arith.constant 3 : index
    %c2_126 = arith.constant 2 : index
    %429 = memref.load %arg1[%c3_125, %c2_126] : memref<4x8xf32, #tpu.memory_space<smem>>
    %430 = vector.broadcast %429 : f32 to vector<32x32xf32>
    %431 = arith.mulf %430, %428 : vector<32x32xf32>
    %432 = arith.addf %418, %431 : vector<32x32xf32>
    %433 = vector.extract_strided_slice %6 {offsets = [27, 0], sizes = [1, 32], strides = [1, 1]} : vector<32x32xf32> to vector<1x32xf32>
    %434 = vector.extract_strided_slice %1 {offsets = [0, 27], sizes = [32, 1], strides = [1, 1]} : vector<32x32xf32> to vector<32x1xf32>
    %435 = vector.broadcast %433 : vector<1x32xf32> to vector<32x32xf32>
    %436 = vector.broadcast %434 : vector<32x1xf32> to vector<32x32xf32>
    %437 = arith.addf %435, %436 : vector<32x32xf32>
    %cst_127 = arith.constant 0.000000e+00 : f32
    %438 = vector.broadcast %cst_127 : f32 to vector<32x32xf32>
    %439 = arith.cmpf ogt, %437, %438 : vector<32x32xf32>
    %cst_128 = arith.constant 2.000000e-01 : f32
    %440 = vector.broadcast %cst_128 : f32 to vector<32x32xf32>
    %441 = arith.mulf %440, %437 : vector<32x32xf32>
    %442 = arith.select %439, %437, %441 : vector<32x32xi1>, vector<32x32xf32>
    %c3_129 = arith.constant 3 : index
    %c3_130 = arith.constant 3 : index
    %443 = memref.load %arg1[%c3_129, %c3_130] : memref<4x8xf32, #tpu.memory_space<smem>>
    %444 = vector.broadcast %443 : f32 to vector<32x32xf32>
    %445 = arith.mulf %444, %442 : vector<32x32xf32>
    %446 = arith.addf %432, %445 : vector<32x32xf32>
    %447 = vector.extract_strided_slice %6 {offsets = [28, 0], sizes = [1, 32], strides = [1, 1]} : vector<32x32xf32> to vector<1x32xf32>
    %448 = vector.extract_strided_slice %1 {offsets = [0, 28], sizes = [32, 1], strides = [1, 1]} : vector<32x32xf32> to vector<32x1xf32>
    %449 = vector.broadcast %447 : vector<1x32xf32> to vector<32x32xf32>
    %450 = vector.broadcast %448 : vector<32x1xf32> to vector<32x32xf32>
    %451 = arith.addf %449, %450 : vector<32x32xf32>
    %cst_131 = arith.constant 0.000000e+00 : f32
    %452 = vector.broadcast %cst_131 : f32 to vector<32x32xf32>
    %453 = arith.cmpf ogt, %451, %452 : vector<32x32xf32>
    %cst_132 = arith.constant 2.000000e-01 : f32
    %454 = vector.broadcast %cst_132 : f32 to vector<32x32xf32>
    %455 = arith.mulf %454, %451 : vector<32x32xf32>
    %456 = arith.select %453, %451, %455 : vector<32x32xi1>, vector<32x32xf32>
    %c3_133 = arith.constant 3 : index
    %c4_134 = arith.constant 4 : index
    %457 = memref.load %arg1[%c3_133, %c4_134] : memref<4x8xf32, #tpu.memory_space<smem>>
    %458 = vector.broadcast %457 : f32 to vector<32x32xf32>
    %459 = arith.mulf %458, %456 : vector<32x32xf32>
    %460 = arith.addf %446, %459 : vector<32x32xf32>
    %461 = vector.extract_strided_slice %6 {offsets = [29, 0], sizes = [1, 32], strides = [1, 1]} : vector<32x32xf32> to vector<1x32xf32>
    %462 = vector.extract_strided_slice %1 {offsets = [0, 29], sizes = [32, 1], strides = [1, 1]} : vector<32x32xf32> to vector<32x1xf32>
    %463 = vector.broadcast %461 : vector<1x32xf32> to vector<32x32xf32>
    %464 = vector.broadcast %462 : vector<32x1xf32> to vector<32x32xf32>
    %465 = arith.addf %463, %464 : vector<32x32xf32>
    %cst_135 = arith.constant 0.000000e+00 : f32
    %466 = vector.broadcast %cst_135 : f32 to vector<32x32xf32>
    %467 = arith.cmpf ogt, %465, %466 : vector<32x32xf32>
    %cst_136 = arith.constant 2.000000e-01 : f32
    %468 = vector.broadcast %cst_136 : f32 to vector<32x32xf32>
    %469 = arith.mulf %468, %465 : vector<32x32xf32>
    %470 = arith.select %467, %465, %469 : vector<32x32xi1>, vector<32x32xf32>
    %c3_137 = arith.constant 3 : index
    %c5_138 = arith.constant 5 : index
    %471 = memref.load %arg1[%c3_137, %c5_138] : memref<4x8xf32, #tpu.memory_space<smem>>
    %472 = vector.broadcast %471 : f32 to vector<32x32xf32>
    %473 = arith.mulf %472, %470 : vector<32x32xf32>
    %474 = arith.addf %460, %473 : vector<32x32xf32>
    %475 = vector.extract_strided_slice %6 {offsets = [30, 0], sizes = [1, 32], strides = [1, 1]} : vector<32x32xf32> to vector<1x32xf32>
    %476 = vector.extract_strided_slice %1 {offsets = [0, 30], sizes = [32, 1], strides = [1, 1]} : vector<32x32xf32> to vector<32x1xf32>
    %477 = vector.broadcast %475 : vector<1x32xf32> to vector<32x32xf32>
    %478 = vector.broadcast %476 : vector<32x1xf32> to vector<32x32xf32>
    %479 = arith.addf %477, %478 : vector<32x32xf32>
    %cst_139 = arith.constant 0.000000e+00 : f32
    %480 = vector.broadcast %cst_139 : f32 to vector<32x32xf32>
    %481 = arith.cmpf ogt, %479, %480 : vector<32x32xf32>
    %cst_140 = arith.constant 2.000000e-01 : f32
    %482 = vector.broadcast %cst_140 : f32 to vector<32x32xf32>
    %483 = arith.mulf %482, %479 : vector<32x32xf32>
    %484 = arith.select %481, %479, %483 : vector<32x32xi1>, vector<32x32xf32>
    %c3_141 = arith.constant 3 : index
    %c6_142 = arith.constant 6 : index
    %485 = memref.load %arg1[%c3_141, %c6_142] : memref<4x8xf32, #tpu.memory_space<smem>>
    %486 = vector.broadcast %485 : f32 to vector<32x32xf32>
    %487 = arith.mulf %486, %484 : vector<32x32xf32>
    %488 = arith.addf %474, %487 : vector<32x32xf32>
    %489 = vector.extract_strided_slice %6 {offsets = [31, 0], sizes = [1, 32], strides = [1, 1]} : vector<32x32xf32> to vector<1x32xf32>
    %490 = vector.extract_strided_slice %1 {offsets = [0, 31], sizes = [32, 1], strides = [1, 1]} : vector<32x32xf32> to vector<32x1xf32>
    %491 = vector.broadcast %489 : vector<1x32xf32> to vector<32x32xf32>
    %492 = vector.broadcast %490 : vector<32x1xf32> to vector<32x32xf32>
    %493 = arith.addf %491, %492 : vector<32x32xf32>
    %cst_143 = arith.constant 0.000000e+00 : f32
    %494 = vector.broadcast %cst_143 : f32 to vector<32x32xf32>
    %495 = arith.cmpf ogt, %493, %494 : vector<32x32xf32>
    %cst_144 = arith.constant 2.000000e-01 : f32
    %496 = vector.broadcast %cst_144 : f32 to vector<32x32xf32>
    %497 = arith.mulf %496, %493 : vector<32x32xf32>
    %498 = arith.select %495, %493, %497 : vector<32x32xi1>, vector<32x32xf32>
    %c3_145 = arith.constant 3 : index
    %c7_146 = arith.constant 7 : index
    %499 = memref.load %arg1[%c3_145, %c7_146] : memref<4x8xf32, #tpu.memory_space<smem>>
    %500 = vector.broadcast %499 : f32 to vector<32x32xf32>
    %501 = arith.mulf %500, %498 : vector<32x32xf32>
    %502 = arith.addf %488, %501 : vector<32x32xf32>
    %cst_147 = arith.constant -1.000000e+30 : f32
    %503 = vector.broadcast %cst_147 : f32 to vector<32x32xf32>
    %504 = arith.select %5, %502, %503 : vector<32x32xi1>, vector<32x32xf32>
    %cst_148 = arith.constant dense<0xFF800000> : vector<32xf32>
    %505 = vector.multi_reduction <maximumf>, %504, %cst_148 [1] : vector<32x32xf32> to vector<32xf32>
    %506 = vector.shape_cast %505 : vector<32xf32> to vector<32x1xf32>
    %507 = vector.broadcast %506 : vector<32x1xf32> to vector<32x32xf32>
    %508 = arith.subf %504, %507 : vector<32x32xf32>
    %509 = math.exp %508 : vector<32x32xf32>
    %cst_149 = arith.constant dense<0.000000e+00> : vector<32xf32>
    %510 = vector.multi_reduction <add>, %509, %cst_149 [1] : vector<32x32xf32> to vector<32xf32>
    %511 = vector.shape_cast %510 : vector<32xf32> to vector<32x1xf32>
    %512 = tpu.reciprocal %511 {approx = true} : vector<32x1xf32> -> vector<32x1xf32>
    %513 = vector.broadcast %512 : vector<32x1xf32> to vector<32x32xf32>
    %514 = arith.mulf %509, %513 : vector<32x32xf32>
    %515 = arith.truncf %514 : vector<32x32xf32> to vector<32x32xbf16>
    %c3_150 = arith.constant 3 : index
    %c0_151 = arith.constant 0 : index
    %c0_152 = arith.constant 0 : index
    %516 = vector.load %arg5[%c3_150, %c0_151, %c0_152] : memref<4x32x32xbf16, #tpu.memory_space<vmem>>, vector<1x32x32xbf16>
    %517 = vector.shape_cast %516 : vector<1x32x32xbf16> to vector<32x32xbf16>
    %cst_153 = arith.constant dense<0.000000e+00> : vector<32x32xf32>
    %518 = tpu.matmul %515, %517, %cst_153 {dimension_numbers = #tpu.dot_dimension_numbers<[1], [0], [0], [1], [0, 0, 1, 1], [], []>} : vector<32x32xbf16>, vector<32x32xbf16>, vector<32x32xf32> -> vector<32x32xf32>
    %519 = arith.addf %391, %518 : vector<32x32xf32>
    %520 = arith.addf %519, %2 : vector<32x32xf32>
    %c0_154 = arith.constant 0 : index
    %c0_155 = arith.constant 0 : index
    %521 = vector.load %arg6[%c0_154, %c0_155] : memref<1x32xf32, #tpu.memory_space<vmem>>, vector<1x32xf32>
    %522 = vector.broadcast %521 : vector<1x32xf32> to vector<32x32xf32>
    %523 = arith.mulf %520, %522 : vector<32x32xf32>
    %c0_156 = arith.constant 0 : index
    %c0_157 = arith.constant 0 : index
    %524 = vector.load %arg7[%c0_156, %c0_157] : memref<1x32xf32, #tpu.memory_space<vmem>>, vector<1x32xf32>
    %525 = vector.broadcast %524 : vector<1x32xf32> to vector<32x32xf32>
    %526 = arith.addf %523, %525 : vector<32x32xf32>
    %cst_158 = arith.constant 0.000000e+00 : f32
    %527 = vector.broadcast %cst_158 : f32 to vector<32x32xf32>
    %528 = arith.cmpf ogt, %526, %527 : vector<32x32xf32>
    %cst_159 = arith.constant 2.000000e-01 : f32
    %529 = vector.broadcast %cst_159 : f32 to vector<32x32xf32>
    %530 = arith.mulf %529, %526 : vector<32x32xf32>
    %531 = arith.select %528, %526, %530 : vector<32x32xi1>, vector<32x32xf32>
    %532 = arith.truncf %531 : vector<32x32xf32> to vector<32x32xbf16>
    %c0_160 = arith.constant 0 : index
    %c0_161 = arith.constant 0 : index
    %533 = vector.load %arg8[%c0_160, %c0_161] : memref<32x32xbf16, #tpu.memory_space<vmem>>, vector<32x32xbf16>
    tpu.vector_store %arg8[%c0_160, %c0_161], %532 {strides = array<i32>} : memref<32x32xbf16, #tpu.memory_space<vmem>>, vector<32x32xbf16>,
    return
  }
  func.func @transform_0(%arg0: i32) -> (i32, i32) {
    %c0_i32 = arith.constant 0 : i32
    %c0_i32_0 = arith.constant 0 : i32
    %c0_i32_1 = arith.constant 0 : i32
    return %c0_i32, %c0_i32_0 : i32, i32
  }
  func.func @transform_1(%arg0: i32) -> (i32, i32) {
    %c0_i32 = arith.constant 0 : i32
    %c0_i32_0 = arith.constant 0 : i32
    return %arg0, %c0_i32 : i32, i32
  }
  func.func @transform_2(%arg0: i32) -> (i32, i32) {
    %c0_i32 = arith.constant 0 : i32
    %c0_i32_0 = arith.constant 0 : i32
    return %arg0, %c0_i32 : i32, i32
  }
  func.func @transform_3(%arg0: i32) -> (i32, i32) {
    %c0_i32 = arith.constant 0 : i32
    %c0_i32_0 = arith.constant 0 : i32
    %c0_i32_1 = arith.constant 0 : i32
    return %c0_i32, %c0_i32_0 : i32, i32
  }
  func.func @transform_4(%arg0: i32) -> (i32, i32, i32) {
    %c0_i32 = arith.constant 0 : i32
    %c0_i32_0 = arith.constant 0 : i32
    %c0_i32_1 = arith.constant 0 : i32
    %c0_i32_2 = arith.constant 0 : i32
    return %c0_i32, %c0_i32_0, %c0_i32_1 : i32, i32, i32
  }
  func.func @transform_5(%arg0: i32) -> (i32, i32) {
    %c0_i32 = arith.constant 0 : i32
    %c0_i32_0 = arith.constant 0 : i32
    %c0_i32_1 = arith.constant 0 : i32
    return %c0_i32, %c0_i32_0 : i32, i32
  }
  func.func @transform_6(%arg0: i32) -> (i32, i32) {
    %c0_i32 = arith.constant 0 : i32
    %c0_i32_0 = arith.constant 0 : i32
    %c0_i32_1 = arith.constant 0 : i32
    return %c0_i32, %c0_i32_0 : i32, i32
  }
  func.func @transform_7(%arg0: i32) -> (i32, i32) {
    %c0_i32 = arith.constant 0 : i32
    %c0_i32_0 = arith.constant 0 : i32
    return %arg0, %c0_i32 : i32, i32
  }
}

module attributes {stable_mosaic.version = 11 : i64} {
  func.func @_proj_kernel(%arg0: i32, %arg1: memref<32x32xbf16, #tpu.memory_space<vmem>>, %arg2: memref<32x96xbf16, #tpu.memory_space<vmem>>, %arg3: memref<1x96xf32, #tpu.memory_space<vmem>>, %arg4: memref<32x96xf32, #tpu.memory_space<vmem>>) attributes {dimension_semantics = [#tpu.dimension_semantics<parallel>], iteration_bounds = array<i64: 1>, scalar_prefetch = 0 : i64, scratch_operands = 0 : i64, tpu.core_type = #tpu.core_type<tc>, window_params = [{transform_indices = @transform_0, window_bounds = array<i64: 32, 32>}, {pipeline_mode = #tpu.pipeline_mode<synchronous>, transform_indices = @transform_1, window_bounds = array<i64: 32, 96>}, {pipeline_mode = #tpu.pipeline_mode<synchronous>, transform_indices = @transform_2, window_bounds = array<i64: 1, 96>}, {transform_indices = @transform_3, window_bounds = array<i64: 32, 96>}]} {
    %c0 = arith.constant 0 : index
    %c0_0 = arith.constant 0 : index
    %0 = vector.load %arg1[%c0, %c0_0] : memref<32x32xbf16, #tpu.memory_space<vmem>>, vector<32x32xbf16>
    %c0_1 = arith.constant 0 : index
    %c0_2 = arith.constant 0 : index
    %1 = vector.load %arg2[%c0_1, %c0_2] : memref<32x96xbf16, #tpu.memory_space<vmem>>, vector<32x96xbf16>
    %cst = arith.constant dense<0.000000e+00> : vector<32x96xf32>
    %2 = tpu.matmul %0, %1, %cst {dimension_numbers = #tpu.dot_dimension_numbers<[1], [0], [0], [1], [0, 0, 1, 1], [], []>} : vector<32x32xbf16>, vector<32x96xbf16>, vector<32x96xf32> -> vector<32x96xf32>
    %c0_3 = arith.constant 0 : index
    %c0_4 = arith.constant 0 : index
    %3 = vector.load %arg3[%c0_3, %c0_4] : memref<1x96xf32, #tpu.memory_space<vmem>>, vector<1x96xf32>
    %4 = vector.broadcast %3 : vector<1x96xf32> to vector<32x96xf32>
    %5 = arith.addf %2, %4 : vector<32x96xf32>
    %c0_5 = arith.constant 0 : index
    %c0_6 = arith.constant 0 : index
    %6 = vector.load %arg4[%c0_5, %c0_6] : memref<32x96xf32, #tpu.memory_space<vmem>>, vector<32x96xf32>
    tpu.vector_store %arg4[%c0_5, %c0_6], %5 {strides = array<i32>} : memref<32x96xf32, #tpu.memory_space<vmem>>, vector<32x96xf32>,
    return
  }
  func.func @transform_0(%arg0: i32) -> (i32, i32) {
    %c0_i32 = arith.constant 0 : i32
    %c0_i32_0 = arith.constant 0 : i32
    return %arg0, %c0_i32 : i32, i32
  }
  func.func @transform_1(%arg0: i32) -> (i32, i32) {
    %c0_i32 = arith.constant 0 : i32
    %c0_i32_0 = arith.constant 0 : i32
    %c0_i32_1 = arith.constant 0 : i32
    return %c0_i32, %c0_i32_0 : i32, i32
  }
  func.func @transform_2(%arg0: i32) -> (i32, i32) {
    %c0_i32 = arith.constant 0 : i32
    %c0_i32_0 = arith.constant 0 : i32
    %c0_i32_1 = arith.constant 0 : i32
    return %c0_i32, %c0_i32_0 : i32, i32
  }
  func.func @transform_3(%arg0: i32) -> (i32, i32) {
    %c0_i32 = arith.constant 0 : i32
    %c0_i32_0 = arith.constant 0 : i32
    return %arg0, %c0_i32 : i32, i32
  }
}

module attributes {stable_mosaic.version = 11 : i64} {
  func.func @_gat_attn_kernel(%arg0: i32, %arg1: memref<4x8xf32, #tpu.memory_space<smem>>, %arg2: memref<32x64xf32, #tpu.memory_space<vmem>>, %arg3: memref<32x32xi8, #tpu.memory_space<vmem>>, %arg4: memref<32x32xf32, #tpu.memory_space<vmem>>, %arg5: memref<4x32x32xbf16, #tpu.memory_space<vmem>>, %arg6: memref<1x32xf32, #tpu.memory_space<vmem>>, %arg7: memref<1x32xf32, #tpu.memory_space<vmem>>, %arg8: memref<32x16xbf16, #tpu.memory_space<vmem>>, %arg9: memref<1x16xf32, #tpu.memory_space<vmem>>, %arg10: memref<32x16xf32, #tpu.memory_space<vmem>>) attributes {dimension_semantics = [#tpu.dimension_semantics<parallel>], iteration_bounds = array<i64: 1>, scalar_prefetch = 0 : i64, scratch_operands = 0 : i64, tpu.core_type = #tpu.core_type<tc>, window_params = [{transform_indices = @transform_0, window_bounds = array<i64: 4, 8>}, {transform_indices = @transform_1, window_bounds = array<i64: 32, 64>}, {transform_indices = @transform_2, window_bounds = array<i64: 32, 32>}, {pipeline_mode = #tpu.pipeline_mode<synchronous>, transform_indices = @transform_3, window_bounds = array<i64: 32, 32>}, {pipeline_mode = #tpu.pipeline_mode<synchronous>, transform_indices = @transform_4, window_bounds = array<i64: 4, 32, 32>}, {pipeline_mode = #tpu.pipeline_mode<synchronous>, transform_indices = @transform_5, window_bounds = array<i64: 1, 32>}, {pipeline_mode = #tpu.pipeline_mode<synchronous>, transform_indices = @transform_6, window_bounds = array<i64: 1, 32>}, {pipeline_mode = #tpu.pipeline_mode<synchronous>, transform_indices = @transform_7, window_bounds = array<i64: 32, 16>}, {pipeline_mode = #tpu.pipeline_mode<synchronous>, transform_indices = @transform_8, window_bounds = array<i64: 1, 16>}, {transform_indices = @transform_9, window_bounds = array<i64: 32, 16>}]} {
    %c0 = arith.constant 0 : index
    %c0_0 = arith.constant 0 : index
    %0 = vector.load %arg2[%c0, %c0_0] : memref<32x64xf32, #tpu.memory_space<vmem>>, vector<32x64xf32>
    %1 = vector.extract_strided_slice %0 {offsets = [0, 0], sizes = [32, 32], strides = [1, 1]} : vector<32x64xf32> to vector<32x32xf32>
    %2 = vector.extract_strided_slice %0 {offsets = [0, 32], sizes = [32, 32], strides = [1, 1]} : vector<32x64xf32> to vector<32x32xf32>
    %c0_1 = arith.constant 0 : index
    %c0_2 = arith.constant 0 : index
    %3 = vector.load %arg3[%c0_1, %c0_2] : memref<32x32xi8, #tpu.memory_space<vmem>>, vector<32x32xi8>
    %c0_i8 = arith.constant 0 : i8
    %4 = vector.broadcast %c0_i8 : i8 to vector<32x32xi8>
    %5 = arith.cmpi ne, %3, %4 : vector<32x32xi8>
    %c0_3 = arith.constant 0 : index
    %c0_4 = arith.constant 0 : index
    %6 = vector.load %arg4[%c0_3, %c0_4] : memref<32x32xf32, #tpu.memory_space<vmem>>, vector<32x32xf32>
    %cst = arith.constant 0.000000e+00 : f32
    %7 = vector.broadcast %cst : f32 to vector<32x32xf32>
    %8 = vector.extract_strided_slice %6 {offsets = [0, 0], sizes = [1, 32], strides = [1, 1]} : vector<32x32xf32> to vector<1x32xf32>
    %9 = vector.extract_strided_slice %1 {offsets = [0, 0], sizes = [32, 1], strides = [1, 1]} : vector<32x32xf32> to vector<32x1xf32>
    %10 = vector.broadcast %8 : vector<1x32xf32> to vector<32x32xf32>
    %11 = vector.broadcast %9 : vector<32x1xf32> to vector<32x32xf32>
    %12 = arith.addf %10, %11 : vector<32x32xf32>
    %cst_5 = arith.constant 0.000000e+00 : f32
    %13 = vector.broadcast %cst_5 : f32 to vector<32x32xf32>
    %14 = arith.cmpf ogt, %12, %13 : vector<32x32xf32>
    %cst_6 = arith.constant 2.000000e-01 : f32
    %15 = vector.broadcast %cst_6 : f32 to vector<32x32xf32>
    %16 = arith.mulf %15, %12 : vector<32x32xf32>
    %17 = arith.select %14, %12, %16 : vector<32x32xi1>, vector<32x32xf32>
    %c0_7 = arith.constant 0 : index
    %c0_8 = arith.constant 0 : index
    %18 = memref.load %arg1[%c0_7, %c0_8] : memref<4x8xf32, #tpu.memory_space<smem>>
    %19 = vector.broadcast %18 : f32 to vector<32x32xf32>
    %20 = arith.mulf %19, %17 : vector<32x32xf32>
    %21 = vector.extract_strided_slice %6 {offsets = [1, 0], sizes = [1, 32], strides = [1, 1]} : vector<32x32xf32> to vector<1x32xf32>
    %22 = vector.extract_strided_slice %1 {offsets = [0, 1], sizes = [32, 1], strides = [1, 1]} : vector<32x32xf32> to vector<32x1xf32>
    %23 = vector.broadcast %21 : vector<1x32xf32> to vector<32x32xf32>
    %24 = vector.broadcast %22 : vector<32x1xf32> to vector<32x32xf32>
    %25 = arith.addf %23, %24 : vector<32x32xf32>
    %cst_9 = arith.constant 0.000000e+00 : f32
    %26 = vector.broadcast %cst_9 : f32 to vector<32x32xf32>
    %27 = arith.cmpf ogt, %25, %26 : vector<32x32xf32>
    %cst_10 = arith.constant 2.000000e-01 : f32
    %28 = vector.broadcast %cst_10 : f32 to vector<32x32xf32>
    %29 = arith.mulf %28, %25 : vector<32x32xf32>
    %30 = arith.select %27, %25, %29 : vector<32x32xi1>, vector<32x32xf32>
    %c0_11 = arith.constant 0 : index
    %c1 = arith.constant 1 : index
    %31 = memref.load %arg1[%c0_11, %c1] : memref<4x8xf32, #tpu.memory_space<smem>>
    %32 = vector.broadcast %31 : f32 to vector<32x32xf32>
    %33 = arith.mulf %32, %30 : vector<32x32xf32>
    %34 = arith.addf %20, %33 : vector<32x32xf32>
    %35 = vector.extract_strided_slice %6 {offsets = [2, 0], sizes = [1, 32], strides = [1, 1]} : vector<32x32xf32> to vector<1x32xf32>
    %36 = vector.extract_strided_slice %1 {offsets = [0, 2], sizes = [32, 1], strides = [1, 1]} : vector<32x32xf32> to vector<32x1xf32>
    %37 = vector.broadcast %35 : vector<1x32xf32> to vector<32x32xf32>
    %38 = vector.broadcast %36 : vector<32x1xf32> to vector<32x32xf32>
    %39 = arith.addf %37, %38 : vector<32x32xf32>
    %cst_12 = arith.constant 0.000000e+00 : f32
    %40 = vector.broadcast %cst_12 : f32 to vector<32x32xf32>
    %41 = arith.cmpf ogt, %39, %40 : vector<32x32xf32>
    %cst_13 = arith.constant 2.000000e-01 : f32
    %42 = vector.broadcast %cst_13 : f32 to vector<32x32xf32>
    %43 = arith.mulf %42, %39 : vector<32x32xf32>
    %44 = arith.select %41, %39, %43 : vector<32x32xi1>, vector<32x32xf32>
    %c0_14 = arith.constant 0 : index
    %c2 = arith.constant 2 : index
    %45 = memref.load %arg1[%c0_14, %c2] : memref<4x8xf32, #tpu.memory_space<smem>>
    %46 = vector.broadcast %45 : f32 to vector<32x32xf32>
    %47 = arith.mulf %46, %44 : vector<32x32xf32>
    %48 = arith.addf %34, %47 : vector<32x32xf32>
    %49 = vector.extract_strided_slice %6 {offsets = [3, 0], sizes = [1, 32], strides = [1, 1]} : vector<32x32xf32> to vector<1x32xf32>
    %50 = vector.extract_strided_slice %1 {offsets = [0, 3], sizes = [32, 1], strides = [1, 1]} : vector<32x32xf32> to vector<32x1xf32>
    %51 = vector.broadcast %49 : vector<1x32xf32> to vector<32x32xf32>
    %52 = vector.broadcast %50 : vector<32x1xf32> to vector<32x32xf32>
    %53 = arith.addf %51, %52 : vector<32x32xf32>
    %cst_15 = arith.constant 0.000000e+00 : f32
    %54 = vector.broadcast %cst_15 : f32 to vector<32x32xf32>
    %55 = arith.cmpf ogt, %53, %54 : vector<32x32xf32>
    %cst_16 = arith.constant 2.000000e-01 : f32
    %56 = vector.broadcast %cst_16 : f32 to vector<32x32xf32>
    %57 = arith.mulf %56, %53 : vector<32x32xf32>
    %58 = arith.select %55, %53, %57 : vector<32x32xi1>, vector<32x32xf32>
    %c0_17 = arith.constant 0 : index
    %c3 = arith.constant 3 : index
    %59 = memref.load %arg1[%c0_17, %c3] : memref<4x8xf32, #tpu.memory_space<smem>>
    %60 = vector.broadcast %59 : f32 to vector<32x32xf32>
    %61 = arith.mulf %60, %58 : vector<32x32xf32>
    %62 = arith.addf %48, %61 : vector<32x32xf32>
    %63 = vector.extract_strided_slice %6 {offsets = [4, 0], sizes = [1, 32], strides = [1, 1]} : vector<32x32xf32> to vector<1x32xf32>
    %64 = vector.extract_strided_slice %1 {offsets = [0, 4], sizes = [32, 1], strides = [1, 1]} : vector<32x32xf32> to vector<32x1xf32>
    %65 = vector.broadcast %63 : vector<1x32xf32> to vector<32x32xf32>
    %66 = vector.broadcast %64 : vector<32x1xf32> to vector<32x32xf32>
    %67 = arith.addf %65, %66 : vector<32x32xf32>
    %cst_18 = arith.constant 0.000000e+00 : f32
    %68 = vector.broadcast %cst_18 : f32 to vector<32x32xf32>
    %69 = arith.cmpf ogt, %67, %68 : vector<32x32xf32>
    %cst_19 = arith.constant 2.000000e-01 : f32
    %70 = vector.broadcast %cst_19 : f32 to vector<32x32xf32>
    %71 = arith.mulf %70, %67 : vector<32x32xf32>
    %72 = arith.select %69, %67, %71 : vector<32x32xi1>, vector<32x32xf32>
    %c0_20 = arith.constant 0 : index
    %c4 = arith.constant 4 : index
    %73 = memref.load %arg1[%c0_20, %c4] : memref<4x8xf32, #tpu.memory_space<smem>>
    %74 = vector.broadcast %73 : f32 to vector<32x32xf32>
    %75 = arith.mulf %74, %72 : vector<32x32xf32>
    %76 = arith.addf %62, %75 : vector<32x32xf32>
    %77 = vector.extract_strided_slice %6 {offsets = [5, 0], sizes = [1, 32], strides = [1, 1]} : vector<32x32xf32> to vector<1x32xf32>
    %78 = vector.extract_strided_slice %1 {offsets = [0, 5], sizes = [32, 1], strides = [1, 1]} : vector<32x32xf32> to vector<32x1xf32>
    %79 = vector.broadcast %77 : vector<1x32xf32> to vector<32x32xf32>
    %80 = vector.broadcast %78 : vector<32x1xf32> to vector<32x32xf32>
    %81 = arith.addf %79, %80 : vector<32x32xf32>
    %cst_21 = arith.constant 0.000000e+00 : f32
    %82 = vector.broadcast %cst_21 : f32 to vector<32x32xf32>
    %83 = arith.cmpf ogt, %81, %82 : vector<32x32xf32>
    %cst_22 = arith.constant 2.000000e-01 : f32
    %84 = vector.broadcast %cst_22 : f32 to vector<32x32xf32>
    %85 = arith.mulf %84, %81 : vector<32x32xf32>
    %86 = arith.select %83, %81, %85 : vector<32x32xi1>, vector<32x32xf32>
    %c0_23 = arith.constant 0 : index
    %c5 = arith.constant 5 : index
    %87 = memref.load %arg1[%c0_23, %c5] : memref<4x8xf32, #tpu.memory_space<smem>>
    %88 = vector.broadcast %87 : f32 to vector<32x32xf32>
    %89 = arith.mulf %88, %86 : vector<32x32xf32>
    %90 = arith.addf %76, %89 : vector<32x32xf32>
    %91 = vector.extract_strided_slice %6 {offsets = [6, 0], sizes = [1, 32], strides = [1, 1]} : vector<32x32xf32> to vector<1x32xf32>
    %92 = vector.extract_strided_slice %1 {offsets = [0, 6], sizes = [32, 1], strides = [1, 1]} : vector<32x32xf32> to vector<32x1xf32>
    %93 = vector.broadcast %91 : vector<1x32xf32> to vector<32x32xf32>
    %94 = vector.broadcast %92 : vector<32x1xf32> to vector<32x32xf32>
    %95 = arith.addf %93, %94 : vector<32x32xf32>
    %cst_24 = arith.constant 0.000000e+00 : f32
    %96 = vector.broadcast %cst_24 : f32 to vector<32x32xf32>
    %97 = arith.cmpf ogt, %95, %96 : vector<32x32xf32>
    %cst_25 = arith.constant 2.000000e-01 : f32
    %98 = vector.broadcast %cst_25 : f32 to vector<32x32xf32>
    %99 = arith.mulf %98, %95 : vector<32x32xf32>
    %100 = arith.select %97, %95, %99 : vector<32x32xi1>, vector<32x32xf32>
    %c0_26 = arith.constant 0 : index
    %c6 = arith.constant 6 : index
    %101 = memref.load %arg1[%c0_26, %c6] : memref<4x8xf32, #tpu.memory_space<smem>>
    %102 = vector.broadcast %101 : f32 to vector<32x32xf32>
    %103 = arith.mulf %102, %100 : vector<32x32xf32>
    %104 = arith.addf %90, %103 : vector<32x32xf32>
    %105 = vector.extract_strided_slice %6 {offsets = [7, 0], sizes = [1, 32], strides = [1, 1]} : vector<32x32xf32> to vector<1x32xf32>
    %106 = vector.extract_strided_slice %1 {offsets = [0, 7], sizes = [32, 1], strides = [1, 1]} : vector<32x32xf32> to vector<32x1xf32>
    %107 = vector.broadcast %105 : vector<1x32xf32> to vector<32x32xf32>
    %108 = vector.broadcast %106 : vector<32x1xf32> to vector<32x32xf32>
    %109 = arith.addf %107, %108 : vector<32x32xf32>
    %cst_27 = arith.constant 0.000000e+00 : f32
    %110 = vector.broadcast %cst_27 : f32 to vector<32x32xf32>
    %111 = arith.cmpf ogt, %109, %110 : vector<32x32xf32>
    %cst_28 = arith.constant 2.000000e-01 : f32
    %112 = vector.broadcast %cst_28 : f32 to vector<32x32xf32>
    %113 = arith.mulf %112, %109 : vector<32x32xf32>
    %114 = arith.select %111, %109, %113 : vector<32x32xi1>, vector<32x32xf32>
    %c0_29 = arith.constant 0 : index
    %c7 = arith.constant 7 : index
    %115 = memref.load %arg1[%c0_29, %c7] : memref<4x8xf32, #tpu.memory_space<smem>>
    %116 = vector.broadcast %115 : f32 to vector<32x32xf32>
    %117 = arith.mulf %116, %114 : vector<32x32xf32>
    %118 = arith.addf %104, %117 : vector<32x32xf32>
    %cst_30 = arith.constant -1.000000e+30 : f32
    %119 = vector.broadcast %cst_30 : f32 to vector<32x32xf32>
    %120 = arith.select %5, %118, %119 : vector<32x32xi1>, vector<32x32xf32>
    %cst_31 = arith.constant dense<0xFF800000> : vector<32xf32>
    %121 = vector.multi_reduction <maximumf>, %120, %cst_31 [1] : vector<32x32xf32> to vector<32xf32>
    %122 = vector.shape_cast %121 : vector<32xf32> to vector<32x1xf32>
    %123 = vector.broadcast %122 : vector<32x1xf32> to vector<32x32xf32>
    %124 = arith.subf %120, %123 : vector<32x32xf32>
    %125 = math.exp %124 : vector<32x32xf32>
    %cst_32 = arith.constant dense<0.000000e+00> : vector<32xf32>
    %126 = vector.multi_reduction <add>, %125, %cst_32 [1] : vector<32x32xf32> to vector<32xf32>
    %127 = vector.shape_cast %126 : vector<32xf32> to vector<32x1xf32>
    %128 = tpu.reciprocal %127 {approx = true} : vector<32x1xf32> -> vector<32x1xf32>
    %129 = vector.broadcast %128 : vector<32x1xf32> to vector<32x32xf32>
    %130 = arith.mulf %125, %129 : vector<32x32xf32>
    %131 = arith.truncf %130 : vector<32x32xf32> to vector<32x32xbf16>
    %c0_33 = arith.constant 0 : index
    %c0_34 = arith.constant 0 : index
    %c0_35 = arith.constant 0 : index
    %132 = vector.load %arg5[%c0_33, %c0_34, %c0_35] : memref<4x32x32xbf16, #tpu.memory_space<vmem>>, vector<1x32x32xbf16>
    %133 = vector.shape_cast %132 : vector<1x32x32xbf16> to vector<32x32xbf16>
    %cst_36 = arith.constant dense<0.000000e+00> : vector<32x32xf32>
    %134 = tpu.matmul %131, %133, %cst_36 {dimension_numbers = #tpu.dot_dimension_numbers<[1], [0], [0], [1], [0, 0, 1, 1], [], []>} : vector<32x32xbf16>, vector<32x32xbf16>, vector<32x32xf32> -> vector<32x32xf32>
    %135 = arith.addf %7, %134 : vector<32x32xf32>
    %136 = vector.extract_strided_slice %6 {offsets = [8, 0], sizes = [1, 32], strides = [1, 1]} : vector<32x32xf32> to vector<1x32xf32>
    %137 = vector.extract_strided_slice %1 {offsets = [0, 8], sizes = [32, 1], strides = [1, 1]} : vector<32x32xf32> to vector<32x1xf32>
    %138 = vector.broadcast %136 : vector<1x32xf32> to vector<32x32xf32>
    %139 = vector.broadcast %137 : vector<32x1xf32> to vector<32x32xf32>
    %140 = arith.addf %138, %139 : vector<32x32xf32>
    %cst_37 = arith.constant 0.000000e+00 : f32
    %141 = vector.broadcast %cst_37 : f32 to vector<32x32xf32>
    %142 = arith.cmpf ogt, %140, %141 : vector<32x32xf32>
    %cst_38 = arith.constant 2.000000e-01 : f32
    %143 = vector.broadcast %cst_38 : f32 to vector<32x32xf32>
    %144 = arith.mulf %143, %140 : vector<32x32xf32>
    %145 = arith.select %142, %140, %144 : vector<32x32xi1>, vector<32x32xf32>
    %c1_39 = arith.constant 1 : index
    %c0_40 = arith.constant 0 : index
    %146 = memref.load %arg1[%c1_39, %c0_40] : memref<4x8xf32, #tpu.memory_space<smem>>
    %147 = vector.broadcast %146 : f32 to vector<32x32xf32>
    %148 = arith.mulf %147, %145 : vector<32x32xf32>
    %149 = vector.extract_strided_slice %6 {offsets = [9, 0], sizes = [1, 32], strides = [1, 1]} : vector<32x32xf32> to vector<1x32xf32>
    %150 = vector.extract_strided_slice %1 {offsets = [0, 9], sizes = [32, 1], strides = [1, 1]} : vector<32x32xf32> to vector<32x1xf32>
    %151 = vector.broadcast %149 : vector<1x32xf32> to vector<32x32xf32>
    %152 = vector.broadcast %150 : vector<32x1xf32> to vector<32x32xf32>
    %153 = arith.addf %151, %152 : vector<32x32xf32>
    %cst_41 = arith.constant 0.000000e+00 : f32
    %154 = vector.broadcast %cst_41 : f32 to vector<32x32xf32>
    %155 = arith.cmpf ogt, %153, %154 : vector<32x32xf32>
    %cst_42 = arith.constant 2.000000e-01 : f32
    %156 = vector.broadcast %cst_42 : f32 to vector<32x32xf32>
    %157 = arith.mulf %156, %153 : vector<32x32xf32>
    %158 = arith.select %155, %153, %157 : vector<32x32xi1>, vector<32x32xf32>
    %c1_43 = arith.constant 1 : index
    %c1_44 = arith.constant 1 : index
    %159 = memref.load %arg1[%c1_43, %c1_44] : memref<4x8xf32, #tpu.memory_space<smem>>
    %160 = vector.broadcast %159 : f32 to vector<32x32xf32>
    %161 = arith.mulf %160, %158 : vector<32x32xf32>
    %162 = arith.addf %148, %161 : vector<32x32xf32>
    %163 = vector.extract_strided_slice %6 {offsets = [10, 0], sizes = [1, 32], strides = [1, 1]} : vector<32x32xf32> to vector<1x32xf32>
    %164 = vector.extract_strided_slice %1 {offsets = [0, 10], sizes = [32, 1], strides = [1, 1]} : vector<32x32xf32> to vector<32x1xf32>
    %165 = vector.broadcast %163 : vector<1x32xf32> to vector<32x32xf32>
    %166 = vector.broadcast %164 : vector<32x1xf32> to vector<32x32xf32>
    %167 = arith.addf %165, %166 : vector<32x32xf32>
    %cst_45 = arith.constant 0.000000e+00 : f32
    %168 = vector.broadcast %cst_45 : f32 to vector<32x32xf32>
    %169 = arith.cmpf ogt, %167, %168 : vector<32x32xf32>
    %cst_46 = arith.constant 2.000000e-01 : f32
    %170 = vector.broadcast %cst_46 : f32 to vector<32x32xf32>
    %171 = arith.mulf %170, %167 : vector<32x32xf32>
    %172 = arith.select %169, %167, %171 : vector<32x32xi1>, vector<32x32xf32>
    %c1_47 = arith.constant 1 : index
    %c2_48 = arith.constant 2 : index
    %173 = memref.load %arg1[%c1_47, %c2_48] : memref<4x8xf32, #tpu.memory_space<smem>>
    %174 = vector.broadcast %173 : f32 to vector<32x32xf32>
    %175 = arith.mulf %174, %172 : vector<32x32xf32>
    %176 = arith.addf %162, %175 : vector<32x32xf32>
    %177 = vector.extract_strided_slice %6 {offsets = [11, 0], sizes = [1, 32], strides = [1, 1]} : vector<32x32xf32> to vector<1x32xf32>
    %178 = vector.extract_strided_slice %1 {offsets = [0, 11], sizes = [32, 1], strides = [1, 1]} : vector<32x32xf32> to vector<32x1xf32>
    %179 = vector.broadcast %177 : vector<1x32xf32> to vector<32x32xf32>
    %180 = vector.broadcast %178 : vector<32x1xf32> to vector<32x32xf32>
    %181 = arith.addf %179, %180 : vector<32x32xf32>
    %cst_49 = arith.constant 0.000000e+00 : f32
    %182 = vector.broadcast %cst_49 : f32 to vector<32x32xf32>
    %183 = arith.cmpf ogt, %181, %182 : vector<32x32xf32>
    %cst_50 = arith.constant 2.000000e-01 : f32
    %184 = vector.broadcast %cst_50 : f32 to vector<32x32xf32>
    %185 = arith.mulf %184, %181 : vector<32x32xf32>
    %186 = arith.select %183, %181, %185 : vector<32x32xi1>, vector<32x32xf32>
    %c1_51 = arith.constant 1 : index
    %c3_52 = arith.constant 3 : index
    %187 = memref.load %arg1[%c1_51, %c3_52] : memref<4x8xf32, #tpu.memory_space<smem>>
    %188 = vector.broadcast %187 : f32 to vector<32x32xf32>
    %189 = arith.mulf %188, %186 : vector<32x32xf32>
    %190 = arith.addf %176, %189 : vector<32x32xf32>
    %191 = vector.extract_strided_slice %6 {offsets = [12, 0], sizes = [1, 32], strides = [1, 1]} : vector<32x32xf32> to vector<1x32xf32>
    %192 = vector.extract_strided_slice %1 {offsets = [0, 12], sizes = [32, 1], strides = [1, 1]} : vector<32x32xf32> to vector<32x1xf32>
    %193 = vector.broadcast %191 : vector<1x32xf32> to vector<32x32xf32>
    %194 = vector.broadcast %192 : vector<32x1xf32> to vector<32x32xf32>
    %195 = arith.addf %193, %194 : vector<32x32xf32>
    %cst_53 = arith.constant 0.000000e+00 : f32
    %196 = vector.broadcast %cst_53 : f32 to vector<32x32xf32>
    %197 = arith.cmpf ogt, %195, %196 : vector<32x32xf32>
    %cst_54 = arith.constant 2.000000e-01 : f32
    %198 = vector.broadcast %cst_54 : f32 to vector<32x32xf32>
    %199 = arith.mulf %198, %195 : vector<32x32xf32>
    %200 = arith.select %197, %195, %199 : vector<32x32xi1>, vector<32x32xf32>
    %c1_55 = arith.constant 1 : index
    %c4_56 = arith.constant 4 : index
    %201 = memref.load %arg1[%c1_55, %c4_56] : memref<4x8xf32, #tpu.memory_space<smem>>
    %202 = vector.broadcast %201 : f32 to vector<32x32xf32>
    %203 = arith.mulf %202, %200 : vector<32x32xf32>
    %204 = arith.addf %190, %203 : vector<32x32xf32>
    %205 = vector.extract_strided_slice %6 {offsets = [13, 0], sizes = [1, 32], strides = [1, 1]} : vector<32x32xf32> to vector<1x32xf32>
    %206 = vector.extract_strided_slice %1 {offsets = [0, 13], sizes = [32, 1], strides = [1, 1]} : vector<32x32xf32> to vector<32x1xf32>
    %207 = vector.broadcast %205 : vector<1x32xf32> to vector<32x32xf32>
    %208 = vector.broadcast %206 : vector<32x1xf32> to vector<32x32xf32>
    %209 = arith.addf %207, %208 : vector<32x32xf32>
    %cst_57 = arith.constant 0.000000e+00 : f32
    %210 = vector.broadcast %cst_57 : f32 to vector<32x32xf32>
    %211 = arith.cmpf ogt, %209, %210 : vector<32x32xf32>
    %cst_58 = arith.constant 2.000000e-01 : f32
    %212 = vector.broadcast %cst_58 : f32 to vector<32x32xf32>
    %213 = arith.mulf %212, %209 : vector<32x32xf32>
    %214 = arith.select %211, %209, %213 : vector<32x32xi1>, vector<32x32xf32>
    %c1_59 = arith.constant 1 : index
    %c5_60 = arith.constant 5 : index
    %215 = memref.load %arg1[%c1_59, %c5_60] : memref<4x8xf32, #tpu.memory_space<smem>>
    %216 = vector.broadcast %215 : f32 to vector<32x32xf32>
    %217 = arith.mulf %216, %214 : vector<32x32xf32>
    %218 = arith.addf %204, %217 : vector<32x32xf32>
    %219 = vector.extract_strided_slice %6 {offsets = [14, 0], sizes = [1, 32], strides = [1, 1]} : vector<32x32xf32> to vector<1x32xf32>
    %220 = vector.extract_strided_slice %1 {offsets = [0, 14], sizes = [32, 1], strides = [1, 1]} : vector<32x32xf32> to vector<32x1xf32>
    %221 = vector.broadcast %219 : vector<1x32xf32> to vector<32x32xf32>
    %222 = vector.broadcast %220 : vector<32x1xf32> to vector<32x32xf32>
    %223 = arith.addf %221, %222 : vector<32x32xf32>
    %cst_61 = arith.constant 0.000000e+00 : f32
    %224 = vector.broadcast %cst_61 : f32 to vector<32x32xf32>
    %225 = arith.cmpf ogt, %223, %224 : vector<32x32xf32>
    %cst_62 = arith.constant 2.000000e-01 : f32
    %226 = vector.broadcast %cst_62 : f32 to vector<32x32xf32>
    %227 = arith.mulf %226, %223 : vector<32x32xf32>
    %228 = arith.select %225, %223, %227 : vector<32x32xi1>, vector<32x32xf32>
    %c1_63 = arith.constant 1 : index
    %c6_64 = arith.constant 6 : index
    %229 = memref.load %arg1[%c1_63, %c6_64] : memref<4x8xf32, #tpu.memory_space<smem>>
    %230 = vector.broadcast %229 : f32 to vector<32x32xf32>
    %231 = arith.mulf %230, %228 : vector<32x32xf32>
    %232 = arith.addf %218, %231 : vector<32x32xf32>
    %233 = vector.extract_strided_slice %6 {offsets = [15, 0], sizes = [1, 32], strides = [1, 1]} : vector<32x32xf32> to vector<1x32xf32>
    %234 = vector.extract_strided_slice %1 {offsets = [0, 15], sizes = [32, 1], strides = [1, 1]} : vector<32x32xf32> to vector<32x1xf32>
    %235 = vector.broadcast %233 : vector<1x32xf32> to vector<32x32xf32>
    %236 = vector.broadcast %234 : vector<32x1xf32> to vector<32x32xf32>
    %237 = arith.addf %235, %236 : vector<32x32xf32>
    %cst_65 = arith.constant 0.000000e+00 : f32
    %238 = vector.broadcast %cst_65 : f32 to vector<32x32xf32>
    %239 = arith.cmpf ogt, %237, %238 : vector<32x32xf32>
    %cst_66 = arith.constant 2.000000e-01 : f32
    %240 = vector.broadcast %cst_66 : f32 to vector<32x32xf32>
    %241 = arith.mulf %240, %237 : vector<32x32xf32>
    %242 = arith.select %239, %237, %241 : vector<32x32xi1>, vector<32x32xf32>
    %c1_67 = arith.constant 1 : index
    %c7_68 = arith.constant 7 : index
    %243 = memref.load %arg1[%c1_67, %c7_68] : memref<4x8xf32, #tpu.memory_space<smem>>
    %244 = vector.broadcast %243 : f32 to vector<32x32xf32>
    %245 = arith.mulf %244, %242 : vector<32x32xf32>
    %246 = arith.addf %232, %245 : vector<32x32xf32>
    %cst_69 = arith.constant -1.000000e+30 : f32
    %247 = vector.broadcast %cst_69 : f32 to vector<32x32xf32>
    %248 = arith.select %5, %246, %247 : vector<32x32xi1>, vector<32x32xf32>
    %cst_70 = arith.constant dense<0xFF800000> : vector<32xf32>
    %249 = vector.multi_reduction <maximumf>, %248, %cst_70 [1] : vector<32x32xf32> to vector<32xf32>
    %250 = vector.shape_cast %249 : vector<32xf32> to vector<32x1xf32>
    %251 = vector.broadcast %250 : vector<32x1xf32> to vector<32x32xf32>
    %252 = arith.subf %248, %251 : vector<32x32xf32>
    %253 = math.exp %252 : vector<32x32xf32>
    %cst_71 = arith.constant dense<0.000000e+00> : vector<32xf32>
    %254 = vector.multi_reduction <add>, %253, %cst_71 [1] : vector<32x32xf32> to vector<32xf32>
    %255 = vector.shape_cast %254 : vector<32xf32> to vector<32x1xf32>
    %256 = tpu.reciprocal %255 {approx = true} : vector<32x1xf32> -> vector<32x1xf32>
    %257 = vector.broadcast %256 : vector<32x1xf32> to vector<32x32xf32>
    %258 = arith.mulf %253, %257 : vector<32x32xf32>
    %259 = arith.truncf %258 : vector<32x32xf32> to vector<32x32xbf16>
    %c1_72 = arith.constant 1 : index
    %c0_73 = arith.constant 0 : index
    %c0_74 = arith.constant 0 : index
    %260 = vector.load %arg5[%c1_72, %c0_73, %c0_74] : memref<4x32x32xbf16, #tpu.memory_space<vmem>>, vector<1x32x32xbf16>
    %261 = vector.shape_cast %260 : vector<1x32x32xbf16> to vector<32x32xbf16>
    %cst_75 = arith.constant dense<0.000000e+00> : vector<32x32xf32>
    %262 = tpu.matmul %259, %261, %cst_75 {dimension_numbers = #tpu.dot_dimension_numbers<[1], [0], [0], [1], [0, 0, 1, 1], [], []>} : vector<32x32xbf16>, vector<32x32xbf16>, vector<32x32xf32> -> vector<32x32xf32>
    %263 = arith.addf %135, %262 : vector<32x32xf32>
    %264 = vector.extract_strided_slice %6 {offsets = [16, 0], sizes = [1, 32], strides = [1, 1]} : vector<32x32xf32> to vector<1x32xf32>
    %265 = vector.extract_strided_slice %1 {offsets = [0, 16], sizes = [32, 1], strides = [1, 1]} : vector<32x32xf32> to vector<32x1xf32>
    %266 = vector.broadcast %264 : vector<1x32xf32> to vector<32x32xf32>
    %267 = vector.broadcast %265 : vector<32x1xf32> to vector<32x32xf32>
    %268 = arith.addf %266, %267 : vector<32x32xf32>
    %cst_76 = arith.constant 0.000000e+00 : f32
    %269 = vector.broadcast %cst_76 : f32 to vector<32x32xf32>
    %270 = arith.cmpf ogt, %268, %269 : vector<32x32xf32>
    %cst_77 = arith.constant 2.000000e-01 : f32
    %271 = vector.broadcast %cst_77 : f32 to vector<32x32xf32>
    %272 = arith.mulf %271, %268 : vector<32x32xf32>
    %273 = arith.select %270, %268, %272 : vector<32x32xi1>, vector<32x32xf32>
    %c2_78 = arith.constant 2 : index
    %c0_79 = arith.constant 0 : index
    %274 = memref.load %arg1[%c2_78, %c0_79] : memref<4x8xf32, #tpu.memory_space<smem>>
    %275 = vector.broadcast %274 : f32 to vector<32x32xf32>
    %276 = arith.mulf %275, %273 : vector<32x32xf32>
    %277 = vector.extract_strided_slice %6 {offsets = [17, 0], sizes = [1, 32], strides = [1, 1]} : vector<32x32xf32> to vector<1x32xf32>
    %278 = vector.extract_strided_slice %1 {offsets = [0, 17], sizes = [32, 1], strides = [1, 1]} : vector<32x32xf32> to vector<32x1xf32>
    %279 = vector.broadcast %277 : vector<1x32xf32> to vector<32x32xf32>
    %280 = vector.broadcast %278 : vector<32x1xf32> to vector<32x32xf32>
    %281 = arith.addf %279, %280 : vector<32x32xf32>
    %cst_80 = arith.constant 0.000000e+00 : f32
    %282 = vector.broadcast %cst_80 : f32 to vector<32x32xf32>
    %283 = arith.cmpf ogt, %281, %282 : vector<32x32xf32>
    %cst_81 = arith.constant 2.000000e-01 : f32
    %284 = vector.broadcast %cst_81 : f32 to vector<32x32xf32>
    %285 = arith.mulf %284, %281 : vector<32x32xf32>
    %286 = arith.select %283, %281, %285 : vector<32x32xi1>, vector<32x32xf32>
    %c2_82 = arith.constant 2 : index
    %c1_83 = arith.constant 1 : index
    %287 = memref.load %arg1[%c2_82, %c1_83] : memref<4x8xf32, #tpu.memory_space<smem>>
    %288 = vector.broadcast %287 : f32 to vector<32x32xf32>
    %289 = arith.mulf %288, %286 : vector<32x32xf32>
    %290 = arith.addf %276, %289 : vector<32x32xf32>
    %291 = vector.extract_strided_slice %6 {offsets = [18, 0], sizes = [1, 32], strides = [1, 1]} : vector<32x32xf32> to vector<1x32xf32>
    %292 = vector.extract_strided_slice %1 {offsets = [0, 18], sizes = [32, 1], strides = [1, 1]} : vector<32x32xf32> to vector<32x1xf32>
    %293 = vector.broadcast %291 : vector<1x32xf32> to vector<32x32xf32>
    %294 = vector.broadcast %292 : vector<32x1xf32> to vector<32x32xf32>
    %295 = arith.addf %293, %294 : vector<32x32xf32>
    %cst_84 = arith.constant 0.000000e+00 : f32
    %296 = vector.broadcast %cst_84 : f32 to vector<32x32xf32>
    %297 = arith.cmpf ogt, %295, %296 : vector<32x32xf32>
    %cst_85 = arith.constant 2.000000e-01 : f32
    %298 = vector.broadcast %cst_85 : f32 to vector<32x32xf32>
    %299 = arith.mulf %298, %295 : vector<32x32xf32>
    %300 = arith.select %297, %295, %299 : vector<32x32xi1>, vector<32x32xf32>
    %c2_86 = arith.constant 2 : index
    %c2_87 = arith.constant 2 : index
    %301 = memref.load %arg1[%c2_86, %c2_87] : memref<4x8xf32, #tpu.memory_space<smem>>
    %302 = vector.broadcast %301 : f32 to vector<32x32xf32>
    %303 = arith.mulf %302, %300 : vector<32x32xf32>
    %304 = arith.addf %290, %303 : vector<32x32xf32>
    %305 = vector.extract_strided_slice %6 {offsets = [19, 0], sizes = [1, 32], strides = [1, 1]} : vector<32x32xf32> to vector<1x32xf32>
    %306 = vector.extract_strided_slice %1 {offsets = [0, 19], sizes = [32, 1], strides = [1, 1]} : vector<32x32xf32> to vector<32x1xf32>
    %307 = vector.broadcast %305 : vector<1x32xf32> to vector<32x32xf32>
    %308 = vector.broadcast %306 : vector<32x1xf32> to vector<32x32xf32>
    %309 = arith.addf %307, %308 : vector<32x32xf32>
    %cst_88 = arith.constant 0.000000e+00 : f32
    %310 = vector.broadcast %cst_88 : f32 to vector<32x32xf32>
    %311 = arith.cmpf ogt, %309, %310 : vector<32x32xf32>
    %cst_89 = arith.constant 2.000000e-01 : f32
    %312 = vector.broadcast %cst_89 : f32 to vector<32x32xf32>
    %313 = arith.mulf %312, %309 : vector<32x32xf32>
    %314 = arith.select %311, %309, %313 : vector<32x32xi1>, vector<32x32xf32>
    %c2_90 = arith.constant 2 : index
    %c3_91 = arith.constant 3 : index
    %315 = memref.load %arg1[%c2_90, %c3_91] : memref<4x8xf32, #tpu.memory_space<smem>>
    %316 = vector.broadcast %315 : f32 to vector<32x32xf32>
    %317 = arith.mulf %316, %314 : vector<32x32xf32>
    %318 = arith.addf %304, %317 : vector<32x32xf32>
    %319 = vector.extract_strided_slice %6 {offsets = [20, 0], sizes = [1, 32], strides = [1, 1]} : vector<32x32xf32> to vector<1x32xf32>
    %320 = vector.extract_strided_slice %1 {offsets = [0, 20], sizes = [32, 1], strides = [1, 1]} : vector<32x32xf32> to vector<32x1xf32>
    %321 = vector.broadcast %319 : vector<1x32xf32> to vector<32x32xf32>
    %322 = vector.broadcast %320 : vector<32x1xf32> to vector<32x32xf32>
    %323 = arith.addf %321, %322 : vector<32x32xf32>
    %cst_92 = arith.constant 0.000000e+00 : f32
    %324 = vector.broadcast %cst_92 : f32 to vector<32x32xf32>
    %325 = arith.cmpf ogt, %323, %324 : vector<32x32xf32>
    %cst_93 = arith.constant 2.000000e-01 : f32
    %326 = vector.broadcast %cst_93 : f32 to vector<32x32xf32>
    %327 = arith.mulf %326, %323 : vector<32x32xf32>
    %328 = arith.select %325, %323, %327 : vector<32x32xi1>, vector<32x32xf32>
    %c2_94 = arith.constant 2 : index
    %c4_95 = arith.constant 4 : index
    %329 = memref.load %arg1[%c2_94, %c4_95] : memref<4x8xf32, #tpu.memory_space<smem>>
    %330 = vector.broadcast %329 : f32 to vector<32x32xf32>
    %331 = arith.mulf %330, %328 : vector<32x32xf32>
    %332 = arith.addf %318, %331 : vector<32x32xf32>
    %333 = vector.extract_strided_slice %6 {offsets = [21, 0], sizes = [1, 32], strides = [1, 1]} : vector<32x32xf32> to vector<1x32xf32>
    %334 = vector.extract_strided_slice %1 {offsets = [0, 21], sizes = [32, 1], strides = [1, 1]} : vector<32x32xf32> to vector<32x1xf32>
    %335 = vector.broadcast %333 : vector<1x32xf32> to vector<32x32xf32>
    %336 = vector.broadcast %334 : vector<32x1xf32> to vector<32x32xf32>
    %337 = arith.addf %335, %336 : vector<32x32xf32>
    %cst_96 = arith.constant 0.000000e+00 : f32
    %338 = vector.broadcast %cst_96 : f32 to vector<32x32xf32>
    %339 = arith.cmpf ogt, %337, %338 : vector<32x32xf32>
    %cst_97 = arith.constant 2.000000e-01 : f32
    %340 = vector.broadcast %cst_97 : f32 to vector<32x32xf32>
    %341 = arith.mulf %340, %337 : vector<32x32xf32>
    %342 = arith.select %339, %337, %341 : vector<32x32xi1>, vector<32x32xf32>
    %c2_98 = arith.constant 2 : index
    %c5_99 = arith.constant 5 : index
    %343 = memref.load %arg1[%c2_98, %c5_99] : memref<4x8xf32, #tpu.memory_space<smem>>
    %344 = vector.broadcast %343 : f32 to vector<32x32xf32>
    %345 = arith.mulf %344, %342 : vector<32x32xf32>
    %346 = arith.addf %332, %345 : vector<32x32xf32>
    %347 = vector.extract_strided_slice %6 {offsets = [22, 0], sizes = [1, 32], strides = [1, 1]} : vector<32x32xf32> to vector<1x32xf32>
    %348 = vector.extract_strided_slice %1 {offsets = [0, 22], sizes = [32, 1], strides = [1, 1]} : vector<32x32xf32> to vector<32x1xf32>
    %349 = vector.broadcast %347 : vector<1x32xf32> to vector<32x32xf32>
    %350 = vector.broadcast %348 : vector<32x1xf32> to vector<32x32xf32>
    %351 = arith.addf %349, %350 : vector<32x32xf32>
    %cst_100 = arith.constant 0.000000e+00 : f32
    %352 = vector.broadcast %cst_100 : f32 to vector<32x32xf32>
    %353 = arith.cmpf ogt, %351, %352 : vector<32x32xf32>
    %cst_101 = arith.constant 2.000000e-01 : f32
    %354 = vector.broadcast %cst_101 : f32 to vector<32x32xf32>
    %355 = arith.mulf %354, %351 : vector<32x32xf32>
    %356 = arith.select %353, %351, %355 : vector<32x32xi1>, vector<32x32xf32>
    %c2_102 = arith.constant 2 : index
    %c6_103 = arith.constant 6 : index
    %357 = memref.load %arg1[%c2_102, %c6_103] : memref<4x8xf32, #tpu.memory_space<smem>>
    %358 = vector.broadcast %357 : f32 to vector<32x32xf32>
    %359 = arith.mulf %358, %356 : vector<32x32xf32>
    %360 = arith.addf %346, %359 : vector<32x32xf32>
    %361 = vector.extract_strided_slice %6 {offsets = [23, 0], sizes = [1, 32], strides = [1, 1]} : vector<32x32xf32> to vector<1x32xf32>
    %362 = vector.extract_strided_slice %1 {offsets = [0, 23], sizes = [32, 1], strides = [1, 1]} : vector<32x32xf32> to vector<32x1xf32>
    %363 = vector.broadcast %361 : vector<1x32xf32> to vector<32x32xf32>
    %364 = vector.broadcast %362 : vector<32x1xf32> to vector<32x32xf32>
    %365 = arith.addf %363, %364 : vector<32x32xf32>
    %cst_104 = arith.constant 0.000000e+00 : f32
    %366 = vector.broadcast %cst_104 : f32 to vector<32x32xf32>
    %367 = arith.cmpf ogt, %365, %366 : vector<32x32xf32>
    %cst_105 = arith.constant 2.000000e-01 : f32
    %368 = vector.broadcast %cst_105 : f32 to vector<32x32xf32>
    %369 = arith.mulf %368, %365 : vector<32x32xf32>
    %370 = arith.select %367, %365, %369 : vector<32x32xi1>, vector<32x32xf32>
    %c2_106 = arith.constant 2 : index
    %c7_107 = arith.constant 7 : index
    %371 = memref.load %arg1[%c2_106, %c7_107] : memref<4x8xf32, #tpu.memory_space<smem>>
    %372 = vector.broadcast %371 : f32 to vector<32x32xf32>
    %373 = arith.mulf %372, %370 : vector<32x32xf32>
    %374 = arith.addf %360, %373 : vector<32x32xf32>
    %cst_108 = arith.constant -1.000000e+30 : f32
    %375 = vector.broadcast %cst_108 : f32 to vector<32x32xf32>
    %376 = arith.select %5, %374, %375 : vector<32x32xi1>, vector<32x32xf32>
    %cst_109 = arith.constant dense<0xFF800000> : vector<32xf32>
    %377 = vector.multi_reduction <maximumf>, %376, %cst_109 [1] : vector<32x32xf32> to vector<32xf32>
    %378 = vector.shape_cast %377 : vector<32xf32> to vector<32x1xf32>
    %379 = vector.broadcast %378 : vector<32x1xf32> to vector<32x32xf32>
    %380 = arith.subf %376, %379 : vector<32x32xf32>
    %381 = math.exp %380 : vector<32x32xf32>
    %cst_110 = arith.constant dense<0.000000e+00> : vector<32xf32>
    %382 = vector.multi_reduction <add>, %381, %cst_110 [1] : vector<32x32xf32> to vector<32xf32>
    %383 = vector.shape_cast %382 : vector<32xf32> to vector<32x1xf32>
    %384 = tpu.reciprocal %383 {approx = true} : vector<32x1xf32> -> vector<32x1xf32>
    %385 = vector.broadcast %384 : vector<32x1xf32> to vector<32x32xf32>
    %386 = arith.mulf %381, %385 : vector<32x32xf32>
    %387 = arith.truncf %386 : vector<32x32xf32> to vector<32x32xbf16>
    %c2_111 = arith.constant 2 : index
    %c0_112 = arith.constant 0 : index
    %c0_113 = arith.constant 0 : index
    %388 = vector.load %arg5[%c2_111, %c0_112, %c0_113] : memref<4x32x32xbf16, #tpu.memory_space<vmem>>, vector<1x32x32xbf16>
    %389 = vector.shape_cast %388 : vector<1x32x32xbf16> to vector<32x32xbf16>
    %cst_114 = arith.constant dense<0.000000e+00> : vector<32x32xf32>
    %390 = tpu.matmul %387, %389, %cst_114 {dimension_numbers = #tpu.dot_dimension_numbers<[1], [0], [0], [1], [0, 0, 1, 1], [], []>} : vector<32x32xbf16>, vector<32x32xbf16>, vector<32x32xf32> -> vector<32x32xf32>
    %391 = arith.addf %263, %390 : vector<32x32xf32>
    %392 = vector.extract_strided_slice %6 {offsets = [24, 0], sizes = [1, 32], strides = [1, 1]} : vector<32x32xf32> to vector<1x32xf32>
    %393 = vector.extract_strided_slice %1 {offsets = [0, 24], sizes = [32, 1], strides = [1, 1]} : vector<32x32xf32> to vector<32x1xf32>
    %394 = vector.broadcast %392 : vector<1x32xf32> to vector<32x32xf32>
    %395 = vector.broadcast %393 : vector<32x1xf32> to vector<32x32xf32>
    %396 = arith.addf %394, %395 : vector<32x32xf32>
    %cst_115 = arith.constant 0.000000e+00 : f32
    %397 = vector.broadcast %cst_115 : f32 to vector<32x32xf32>
    %398 = arith.cmpf ogt, %396, %397 : vector<32x32xf32>
    %cst_116 = arith.constant 2.000000e-01 : f32
    %399 = vector.broadcast %cst_116 : f32 to vector<32x32xf32>
    %400 = arith.mulf %399, %396 : vector<32x32xf32>
    %401 = arith.select %398, %396, %400 : vector<32x32xi1>, vector<32x32xf32>
    %c3_117 = arith.constant 3 : index
    %c0_118 = arith.constant 0 : index
    %402 = memref.load %arg1[%c3_117, %c0_118] : memref<4x8xf32, #tpu.memory_space<smem>>
    %403 = vector.broadcast %402 : f32 to vector<32x32xf32>
    %404 = arith.mulf %403, %401 : vector<32x32xf32>
    %405 = vector.extract_strided_slice %6 {offsets = [25, 0], sizes = [1, 32], strides = [1, 1]} : vector<32x32xf32> to vector<1x32xf32>
    %406 = vector.extract_strided_slice %1 {offsets = [0, 25], sizes = [32, 1], strides = [1, 1]} : vector<32x32xf32> to vector<32x1xf32>
    %407 = vector.broadcast %405 : vector<1x32xf32> to vector<32x32xf32>
    %408 = vector.broadcast %406 : vector<32x1xf32> to vector<32x32xf32>
    %409 = arith.addf %407, %408 : vector<32x32xf32>
    %cst_119 = arith.constant 0.000000e+00 : f32
    %410 = vector.broadcast %cst_119 : f32 to vector<32x32xf32>
    %411 = arith.cmpf ogt, %409, %410 : vector<32x32xf32>
    %cst_120 = arith.constant 2.000000e-01 : f32
    %412 = vector.broadcast %cst_120 : f32 to vector<32x32xf32>
    %413 = arith.mulf %412, %409 : vector<32x32xf32>
    %414 = arith.select %411, %409, %413 : vector<32x32xi1>, vector<32x32xf32>
    %c3_121 = arith.constant 3 : index
    %c1_122 = arith.constant 1 : index
    %415 = memref.load %arg1[%c3_121, %c1_122] : memref<4x8xf32, #tpu.memory_space<smem>>
    %416 = vector.broadcast %415 : f32 to vector<32x32xf32>
    %417 = arith.mulf %416, %414 : vector<32x32xf32>
    %418 = arith.addf %404, %417 : vector<32x32xf32>
    %419 = vector.extract_strided_slice %6 {offsets = [26, 0], sizes = [1, 32], strides = [1, 1]} : vector<32x32xf32> to vector<1x32xf32>
    %420 = vector.extract_strided_slice %1 {offsets = [0, 26], sizes = [32, 1], strides = [1, 1]} : vector<32x32xf32> to vector<32x1xf32>
    %421 = vector.broadcast %419 : vector<1x32xf32> to vector<32x32xf32>
    %422 = vector.broadcast %420 : vector<32x1xf32> to vector<32x32xf32>
    %423 = arith.addf %421, %422 : vector<32x32xf32>
    %cst_123 = arith.constant 0.000000e+00 : f32
    %424 = vector.broadcast %cst_123 : f32 to vector<32x32xf32>
    %425 = arith.cmpf ogt, %423, %424 : vector<32x32xf32>
    %cst_124 = arith.constant 2.000000e-01 : f32
    %426 = vector.broadcast %cst_124 : f32 to vector<32x32xf32>
    %427 = arith.mulf %426, %423 : vector<32x32xf32>
    %428 = arith.select %425, %423, %427 : vector<32x32xi1>, vector<32x32xf32>
    %c3_125 = arith.constant 3 : index
    %c2_126 = arith.constant 2 : index
    %429 = memref.load %arg1[%c3_125, %c2_126] : memref<4x8xf32, #tpu.memory_space<smem>>
    %430 = vector.broadcast %429 : f32 to vector<32x32xf32>
    %431 = arith.mulf %430, %428 : vector<32x32xf32>
    %432 = arith.addf %418, %431 : vector<32x32xf32>
    %433 = vector.extract_strided_slice %6 {offsets = [27, 0], sizes = [1, 32], strides = [1, 1]} : vector<32x32xf32> to vector<1x32xf32>
    %434 = vector.extract_strided_slice %1 {offsets = [0, 27], sizes = [32, 1], strides = [1, 1]} : vector<32x32xf32> to vector<32x1xf32>
    %435 = vector.broadcast %433 : vector<1x32xf32> to vector<32x32xf32>
    %436 = vector.broadcast %434 : vector<32x1xf32> to vector<32x32xf32>
    %437 = arith.addf %435, %436 : vector<32x32xf32>
    %cst_127 = arith.constant 0.000000e+00 : f32
    %438 = vector.broadcast %cst_127 : f32 to vector<32x32xf32>
    %439 = arith.cmpf ogt, %437, %438 : vector<32x32xf32>
    %cst_128 = arith.constant 2.000000e-01 : f32
    %440 = vector.broadcast %cst_128 : f32 to vector<32x32xf32>
    %441 = arith.mulf %440, %437 : vector<32x32xf32>
    %442 = arith.select %439, %437, %441 : vector<32x32xi1>, vector<32x32xf32>
    %c3_129 = arith.constant 3 : index
    %c3_130 = arith.constant 3 : index
    %443 = memref.load %arg1[%c3_129, %c3_130] : memref<4x8xf32, #tpu.memory_space<smem>>
    %444 = vector.broadcast %443 : f32 to vector<32x32xf32>
    %445 = arith.mulf %444, %442 : vector<32x32xf32>
    %446 = arith.addf %432, %445 : vector<32x32xf32>
    %447 = vector.extract_strided_slice %6 {offsets = [28, 0], sizes = [1, 32], strides = [1, 1]} : vector<32x32xf32> to vector<1x32xf32>
    %448 = vector.extract_strided_slice %1 {offsets = [0, 28], sizes = [32, 1], strides = [1, 1]} : vector<32x32xf32> to vector<32x1xf32>
    %449 = vector.broadcast %447 : vector<1x32xf32> to vector<32x32xf32>
    %450 = vector.broadcast %448 : vector<32x1xf32> to vector<32x32xf32>
    %451 = arith.addf %449, %450 : vector<32x32xf32>
    %cst_131 = arith.constant 0.000000e+00 : f32
    %452 = vector.broadcast %cst_131 : f32 to vector<32x32xf32>
    %453 = arith.cmpf ogt, %451, %452 : vector<32x32xf32>
    %cst_132 = arith.constant 2.000000e-01 : f32
    %454 = vector.broadcast %cst_132 : f32 to vector<32x32xf32>
    %455 = arith.mulf %454, %451 : vector<32x32xf32>
    %456 = arith.select %453, %451, %455 : vector<32x32xi1>, vector<32x32xf32>
    %c3_133 = arith.constant 3 : index
    %c4_134 = arith.constant 4 : index
    %457 = memref.load %arg1[%c3_133, %c4_134] : memref<4x8xf32, #tpu.memory_space<smem>>
    %458 = vector.broadcast %457 : f32 to vector<32x32xf32>
    %459 = arith.mulf %458, %456 : vector<32x32xf32>
    %460 = arith.addf %446, %459 : vector<32x32xf32>
    %461 = vector.extract_strided_slice %6 {offsets = [29, 0], sizes = [1, 32], strides = [1, 1]} : vector<32x32xf32> to vector<1x32xf32>
    %462 = vector.extract_strided_slice %1 {offsets = [0, 29], sizes = [32, 1], strides = [1, 1]} : vector<32x32xf32> to vector<32x1xf32>
    %463 = vector.broadcast %461 : vector<1x32xf32> to vector<32x32xf32>
    %464 = vector.broadcast %462 : vector<32x1xf32> to vector<32x32xf32>
    %465 = arith.addf %463, %464 : vector<32x32xf32>
    %cst_135 = arith.constant 0.000000e+00 : f32
    %466 = vector.broadcast %cst_135 : f32 to vector<32x32xf32>
    %467 = arith.cmpf ogt, %465, %466 : vector<32x32xf32>
    %cst_136 = arith.constant 2.000000e-01 : f32
    %468 = vector.broadcast %cst_136 : f32 to vector<32x32xf32>
    %469 = arith.mulf %468, %465 : vector<32x32xf32>
    %470 = arith.select %467, %465, %469 : vector<32x32xi1>, vector<32x32xf32>
    %c3_137 = arith.constant 3 : index
    %c5_138 = arith.constant 5 : index
    %471 = memref.load %arg1[%c3_137, %c5_138] : memref<4x8xf32, #tpu.memory_space<smem>>
    %472 = vector.broadcast %471 : f32 to vector<32x32xf32>
    %473 = arith.mulf %472, %470 : vector<32x32xf32>
    %474 = arith.addf %460, %473 : vector<32x32xf32>
    %475 = vector.extract_strided_slice %6 {offsets = [30, 0], sizes = [1, 32], strides = [1, 1]} : vector<32x32xf32> to vector<1x32xf32>
    %476 = vector.extract_strided_slice %1 {offsets = [0, 30], sizes = [32, 1], strides = [1, 1]} : vector<32x32xf32> to vector<32x1xf32>
    %477 = vector.broadcast %475 : vector<1x32xf32> to vector<32x32xf32>
    %478 = vector.broadcast %476 : vector<32x1xf32> to vector<32x32xf32>
    %479 = arith.addf %477, %478 : vector<32x32xf32>
    %cst_139 = arith.constant 0.000000e+00 : f32
    %480 = vector.broadcast %cst_139 : f32 to vector<32x32xf32>
    %481 = arith.cmpf ogt, %479, %480 : vector<32x32xf32>
    %cst_140 = arith.constant 2.000000e-01 : f32
    %482 = vector.broadcast %cst_140 : f32 to vector<32x32xf32>
    %483 = arith.mulf %482, %479 : vector<32x32xf32>
    %484 = arith.select %481, %479, %483 : vector<32x32xi1>, vector<32x32xf32>
    %c3_141 = arith.constant 3 : index
    %c6_142 = arith.constant 6 : index
    %485 = memref.load %arg1[%c3_141, %c6_142] : memref<4x8xf32, #tpu.memory_space<smem>>
    %486 = vector.broadcast %485 : f32 to vector<32x32xf32>
    %487 = arith.mulf %486, %484 : vector<32x32xf32>
    %488 = arith.addf %474, %487 : vector<32x32xf32>
    %489 = vector.extract_strided_slice %6 {offsets = [31, 0], sizes = [1, 32], strides = [1, 1]} : vector<32x32xf32> to vector<1x32xf32>
    %490 = vector.extract_strided_slice %1 {offsets = [0, 31], sizes = [32, 1], strides = [1, 1]} : vector<32x32xf32> to vector<32x1xf32>
    %491 = vector.broadcast %489 : vector<1x32xf32> to vector<32x32xf32>
    %492 = vector.broadcast %490 : vector<32x1xf32> to vector<32x32xf32>
    %493 = arith.addf %491, %492 : vector<32x32xf32>
    %cst_143 = arith.constant 0.000000e+00 : f32
    %494 = vector.broadcast %cst_143 : f32 to vector<32x32xf32>
    %495 = arith.cmpf ogt, %493, %494 : vector<32x32xf32>
    %cst_144 = arith.constant 2.000000e-01 : f32
    %496 = vector.broadcast %cst_144 : f32 to vector<32x32xf32>
    %497 = arith.mulf %496, %493 : vector<32x32xf32>
    %498 = arith.select %495, %493, %497 : vector<32x32xi1>, vector<32x32xf32>
    %c3_145 = arith.constant 3 : index
    %c7_146 = arith.constant 7 : index
    %499 = memref.load %arg1[%c3_145, %c7_146] : memref<4x8xf32, #tpu.memory_space<smem>>
    %500 = vector.broadcast %499 : f32 to vector<32x32xf32>
    %501 = arith.mulf %500, %498 : vector<32x32xf32>
    %502 = arith.addf %488, %501 : vector<32x32xf32>
    %cst_147 = arith.constant -1.000000e+30 : f32
    %503 = vector.broadcast %cst_147 : f32 to vector<32x32xf32>
    %504 = arith.select %5, %502, %503 : vector<32x32xi1>, vector<32x32xf32>
    %cst_148 = arith.constant dense<0xFF800000> : vector<32xf32>
    %505 = vector.multi_reduction <maximumf>, %504, %cst_148 [1] : vector<32x32xf32> to vector<32xf32>
    %506 = vector.shape_cast %505 : vector<32xf32> to vector<32x1xf32>
    %507 = vector.broadcast %506 : vector<32x1xf32> to vector<32x32xf32>
    %508 = arith.subf %504, %507 : vector<32x32xf32>
    %509 = math.exp %508 : vector<32x32xf32>
    %cst_149 = arith.constant dense<0.000000e+00> : vector<32xf32>
    %510 = vector.multi_reduction <add>, %509, %cst_149 [1] : vector<32x32xf32> to vector<32xf32>
    %511 = vector.shape_cast %510 : vector<32xf32> to vector<32x1xf32>
    %512 = tpu.reciprocal %511 {approx = true} : vector<32x1xf32> -> vector<32x1xf32>
    %513 = vector.broadcast %512 : vector<32x1xf32> to vector<32x32xf32>
    %514 = arith.mulf %509, %513 : vector<32x32xf32>
    %515 = arith.truncf %514 : vector<32x32xf32> to vector<32x32xbf16>
    %c3_150 = arith.constant 3 : index
    %c0_151 = arith.constant 0 : index
    %c0_152 = arith.constant 0 : index
    %516 = vector.load %arg5[%c3_150, %c0_151, %c0_152] : memref<4x32x32xbf16, #tpu.memory_space<vmem>>, vector<1x32x32xbf16>
    %517 = vector.shape_cast %516 : vector<1x32x32xbf16> to vector<32x32xbf16>
    %cst_153 = arith.constant dense<0.000000e+00> : vector<32x32xf32>
    %518 = tpu.matmul %515, %517, %cst_153 {dimension_numbers = #tpu.dot_dimension_numbers<[1], [0], [0], [1], [0, 0, 1, 1], [], []>} : vector<32x32xbf16>, vector<32x32xbf16>, vector<32x32xf32> -> vector<32x32xf32>
    %519 = arith.addf %391, %518 : vector<32x32xf32>
    %520 = arith.addf %519, %2 : vector<32x32xf32>
    %c0_154 = arith.constant 0 : index
    %c0_155 = arith.constant 0 : index
    %521 = vector.load %arg6[%c0_154, %c0_155] : memref<1x32xf32, #tpu.memory_space<vmem>>, vector<1x32xf32>
    %522 = vector.broadcast %521 : vector<1x32xf32> to vector<32x32xf32>
    %523 = arith.mulf %520, %522 : vector<32x32xf32>
    %c0_156 = arith.constant 0 : index
    %c0_157 = arith.constant 0 : index
    %524 = vector.load %arg7[%c0_156, %c0_157] : memref<1x32xf32, #tpu.memory_space<vmem>>, vector<1x32xf32>
    %525 = vector.broadcast %524 : vector<1x32xf32> to vector<32x32xf32>
    %526 = arith.addf %523, %525 : vector<32x32xf32>
    %cst_158 = arith.constant 0.000000e+00 : f32
    %527 = vector.broadcast %cst_158 : f32 to vector<32x32xf32>
    %528 = arith.cmpf ogt, %526, %527 : vector<32x32xf32>
    %cst_159 = arith.constant 2.000000e-01 : f32
    %529 = vector.broadcast %cst_159 : f32 to vector<32x32xf32>
    %530 = arith.mulf %529, %526 : vector<32x32xf32>
    %531 = arith.select %528, %526, %530 : vector<32x32xi1>, vector<32x32xf32>
    %532 = arith.truncf %531 : vector<32x32xf32> to vector<32x32xbf16>
    %c0_160 = arith.constant 0 : index
    %c0_161 = arith.constant 0 : index
    %533 = vector.load %arg8[%c0_160, %c0_161] : memref<32x16xbf16, #tpu.memory_space<vmem>>, vector<32x16xbf16>
    %cst_162 = arith.constant dense<0.000000e+00> : vector<32x16xf32>
    %534 = tpu.matmul %532, %533, %cst_162 {dimension_numbers = #tpu.dot_dimension_numbers<[1], [0], [0], [1], [0, 0, 1, 1], [], []>} : vector<32x32xbf16>, vector<32x16xbf16>, vector<32x16xf32> -> vector<32x16xf32>
    %c0_163 = arith.constant 0 : index
    %c0_164 = arith.constant 0 : index
    %535 = vector.load %arg9[%c0_163, %c0_164] : memref<1x16xf32, #tpu.memory_space<vmem>>, vector<1x16xf32>
    %536 = vector.broadcast %535 : vector<1x16xf32> to vector<32x16xf32>
    %537 = arith.addf %534, %536 : vector<32x16xf32>
    %c0_165 = arith.constant 0 : index
    %c0_166 = arith.constant 0 : index
    %538 = vector.load %arg10[%c0_165, %c0_166] : memref<32x16xf32, #tpu.memory_space<vmem>>, vector<32x16xf32>
    tpu.vector_store %arg10[%c0_165, %c0_166], %537 {strides = array<i32>} : memref<32x16xf32, #tpu.memory_space<vmem>>, vector<32x16xf32>,
    return
  }
  func.func @transform_0(%arg0: i32) -> (i32, i32) {
    %c0_i32 = arith.constant 0 : i32
    %c0_i32_0 = arith.constant 0 : i32
    %c0_i32_1 = arith.constant 0 : i32
    return %c0_i32, %c0_i32_0 : i32, i32
  }
  func.func @transform_1(%arg0: i32) -> (i32, i32) {
    %c0_i32 = arith.constant 0 : i32
    %c0_i32_0 = arith.constant 0 : i32
    return %arg0, %c0_i32 : i32, i32
  }
  func.func @transform_2(%arg0: i32) -> (i32, i32) {
    %c0_i32 = arith.constant 0 : i32
    %c0_i32_0 = arith.constant 0 : i32
    return %arg0, %c0_i32 : i32, i32
  }
  func.func @transform_3(%arg0: i32) -> (i32, i32) {
    %c0_i32 = arith.constant 0 : i32
    %c0_i32_0 = arith.constant 0 : i32
    %c0_i32_1 = arith.constant 0 : i32
    return %c0_i32, %c0_i32_0 : i32, i32
  }
  func.func @transform_4(%arg0: i32) -> (i32, i32, i32) {
    %c0_i32 = arith.constant 0 : i32
    %c0_i32_0 = arith.constant 0 : i32
    %c0_i32_1 = arith.constant 0 : i32
    %c0_i32_2 = arith.constant 0 : i32
    return %c0_i32, %c0_i32_0, %c0_i32_1 : i32, i32, i32
  }
  func.func @transform_5(%arg0: i32) -> (i32, i32) {
    %c0_i32 = arith.constant 0 : i32
    %c0_i32_0 = arith.constant 0 : i32
    %c0_i32_1 = arith.constant 0 : i32
    return %c0_i32, %c0_i32_0 : i32, i32
  }
  func.func @transform_6(%arg0: i32) -> (i32, i32) {
    %c0_i32 = arith.constant 0 : i32
    %c0_i32_0 = arith.constant 0 : i32
    %c0_i32_1 = arith.constant 0 : i32
    return %c0_i32, %c0_i32_0 : i32, i32
  }
  func.func @transform_7(%arg0: i32) -> (i32, i32) {
    %c0_i32 = arith.constant 0 : i32
    %c0_i32_0 = arith.constant 0 : i32
    %c0_i32_1 = arith.constant 0 : i32
    return %c0_i32, %c0_i32_0 : i32, i32
  }
  func.func @transform_8(%arg0: i32) -> (i32, i32) {
    %c0_i32 = arith.constant 0 : i32
    %c0_i32_0 = arith.constant 0 : i32
    %c0_i32_1 = arith.constant 0 : i32
    return %c0_i32, %c0_i32_0 : i32, i32
  }
  func.func @transform_9(%arg0: i32) -> (i32, i32) {
    %c0_i32 = arith.constant 0 : i32
    %c0_i32_0 = arith.constant 0 : i32
    return %arg0, %c0_i32 : i32, i32
  }
}

</mosaic_0001>

<bundles_post_ra>
// kernel: simple_gat_encoder.6
= control target key start
LH: loop header
LB: loop body
LE: loop exit
PB: predicated region body
PF: predicated region fallthrough
CT: control target
= control target key end

     0   :  { %vm44_vm0 = vcmask 1043456   ;;  %vm37_vm1 = vcmask 64512   ;;  %vm97_vm2 = vcmask 785408   ;;  %s167_s1 = inlined_call_operand.vmem [shape: bf16[8,96], index: 1, kind: input, shape index: {}]   ;;  %s168_s0 = inlined_call_operand.vmem [shape: bf16[32,8], index: 0, kind: input, shape index: {}]   ;;  %s169_s2 = inlined_call_operand.vmem [shape: f32[1,96], index: 2, kind: input, shape index: {}]   ;;  %s170_s3 = inlined_call_operand.vmem [shape: f32[32,96], index: 3, kind: output, shape index: {}]  }
   0x1   :  { %v19_v0 = vld [vmem:[%s167_s1] sm:$0xf]  ;;  %v122_v3 = vld [vmem:[%s168_s0 + $0x8] sm:$0xff]  }
   0x2   :  { %120 = vmatprep.subr.msk.bf16.mxu0 %vm44_vm0, %v19_v0  ;;  %v46_v1 = vsel %vm44_vm0, %v19_v0, 0  ;;  %v121_v2 = vld [vmem:[%s168_s0] sm:$0xff]  }
   0x3   :  { %115 = vmatpush3.bf16.msra.mxu0 %v46_v1  ;;  %116 = vmatprep.mubr.msk.bf16.mxu0 %vm37_vm1, %v121_v2  ;;  %v106_v4 = vld [vmem:[%s169_s2] ss:$0 sm:$0xff] }
   0x6   :  { %117 = vmatmul.mubr.msk.bf16.vlgmr.msra.gmra.mrb[0].mxu0 %vm37_vm1, %v122_v3 }
  0xd9   :  { %v118_v5 = vpop.f32.mrb[0].mxu0 }
  0xda   :  { %v91_v6 = vadd.f32 %v118_v5, %v106_v4  ;;  %v82_v7 = vpop.f32.mrb[1].mxu0 }
  0xdb   :  { %v83_v8 = vadd.f32 %v106_v4, %v82_v7  ;;  %v119_v9 = vpop.f32.mrb[2].mxu0 }
  0xdc   :  { %100 = vst.msk [vmem:[%s170_s3 + $0x10] sm:$0xff] %vm97_vm2, %v91_v6  ;;  %v94_v10 = vadd.f32 %v119_v9, %v106_v4  ;;  %v85_v11 = vpop.f32.mrb[3].mxu0 }
  0xdd   :  { %98 = vst.msk [vmem:[%s170_s3] sm:$0xff] %vm97_vm2, %v83_v8  ;;  %v86_v12 = vadd.f32 %v106_v4, %v85_v11 }
  0xde   :  { %101 = vst.msk [vmem:[%s170_s3 + $0x18] sm:$0xff] %vm97_vm2, %v94_v10 }
  0xdf   :  { %99 = vst.msk [vmem:[%s170_s3 + $0x8] sm:$0xff] %vm97_vm2, %v86_v12 }

// kernel: simple_gat_encoder.8
= control target key start
LH: loop header
LB: loop body
LE: loop exit
PB: predicated region body
PF: predicated region fallthrough
CT: control target
= control target key end

     0   :  { %vm52_vm0 = vcmask 261120   ;;  %vm108_vm1 = vcmask 785408   ;;  %s187_s1 = inlined_call_operand.vmem [shape: bf16[32,96], index: 1, kind: input, shape index: {}]   ;;  %s188_s0 = inlined_call_operand.vmem [shape: bf16[32,32], index: 0, kind: input, shape index: {}]   ;;  %s189_s2 = inlined_call_operand.vmem [shape: f32[1,96], index: 2, kind: input, shape index: {}]   ;;  %s190_s3 = inlined_call_operand.vmem [shape: f32[32,96], index: 3, kind: output, shape index: {}]  }
   0x1   :  { %v136_v0 = vld [vmem:[%s187_s1] sm:$0xff]   ;;  %v137_v1 = vld [vmem:[%s187_s1 + $0x8] sm:$0xff]  }
   0x2   :  { %128 = vmatprep.subr.bf16.mxu0 %v136_v0  ;;  %v138_v2 = vld [vmem:[%s188_s0] sm:$0xff]   ;;  %v139_v3 = vld [vmem:[%s188_s0 + $0x8] sm:$0xff]  }
   0x3   :  { %129 = vmatpush3.bf16.msra.mxu0 %v136_v0  ;;  %132 = vmatprep.mubr.msk.bf16.mxu0 %vm52_vm0, %v138_v2  ;;  %v117_v4 = vld [vmem:[%s189_s2] ss:$0 sm:$0xff] }
   0x4   :  { %130 = vmatprep.subr.bf16.mxu0 %v137_v1 }
   0x7   :  { %131 = vmatpush3.bf16.msra.mxu0 %v137_v1 }
   0xa   :  { %133 = vmatmul.mubr.msk.bf16.vlgmr.msra.gmra.mrb[0].mxu0 %vm52_vm0, %v139_v3 }
  0xdd   :  { %v134_v5 = vpop.f32.mrb[0].mxu0 }
  0xde   :  { %v102_v6 = vadd.f32 %v134_v5, %v117_v4  ;;  %v93_v7 = vpop.f32.mrb[1].mxu0 }
  0xdf   :  { %v94_v8 = vadd.f32 %v117_v4, %v93_v7  ;;  %v135_v9 = vpop.f32.mrb[2].mxu0 }
  0xe0   :  { %111 = vst.msk [vmem:[%s190_s3 + $0x10] sm:$0xff] %vm108_vm1, %v102_v6  ;;  %v105_v10 = vadd.f32 %v135_v9, %v117_v4  ;;  %v96_v11 = vpop.f32.mrb[3].mxu0 }
  0xe1   :  { %109 = vst.msk [vmem:[%s190_s3] sm:$0xff] %vm108_vm1, %v94_v8  ;;  %v97_v12 = vadd.f32 %v117_v4, %v96_v11 }
  0xe2   :  { %112 = vst.msk [vmem:[%s190_s3 + $0x18] sm:$0xff] %vm108_vm1, %v105_v10 }
  0xe3   :  { %110 = vst.msk [vmem:[%s190_s3 + $0x8] sm:$0xff] %vm108_vm1, %v97_v12 }

// kernel: simple_gat_encoder.7
= control target key start
LH: loop header
LB: loop body
LE: loop exit
PB: predicated region body
PF: predicated region fallthrough
CT: control target
= control target key end

     0   :  { %12 = vsyncpa [#allocation3], 0  ;;  %s3882_s0 = inlined_call_operand.vmem [shape: f32[4,8], index: 0, kind: input, shape index: {}]   ;;  %s3883_s1 = inlined_call_operand.vmem [shape: f32[32,64], index: 1, kind: input, shape index: {}]   ;;  %s3884_s2 = inlined_call_operand.vmem [shape: s8[32,32], index: 2, kind: input, shape index: {}]   ;;  %s3885_s3 = inlined_call_operand.vmem [shape: f32[32,32], index: 3, kind: input, shape index: {}]   ;;  %s3886_s4 = inlined_call_operand.vmem [shape: bf16[4,32,32], index: 4, kind: input, shape index: {}]   ;;  %s3887_s5 = inlined_call_operand.vmem [shape: f32[1,32], index: 5, kind: input, shape index: {}]   ;;  %s3888_s6 = inlined_call_operand.vmem [shape: f32[1,32], index: 6, kind: input, shape index: {}]   ;;  %s3889_s7 = inlined_call_operand.vmem [shape: bf16[32,32], index: 7, kind: output, shape index: {}]  }
   0x1   :  { %s19_s26 = sshll.u32 %s3882_s0, 4  ;;  %s20_s26 = int_to_ptr.vmem [resolvable:$true] %s19_s26 }
   0x2   :  { %s2425_s27 = scalar_lea.vmem %s20_s26, 64  ;;  %p2430_p1 = scmp.lt.s32.totalorder %s20_s26, %s20_s26 }
   0x3   :  { %p2426_p0 = scmp.ne.s32.totalorder %s20_s26, %s2425_s27  ;;  %p2431_p2 = scmp.lt.s32.totalorder %s2425_s27, %s2425_s27 }
   0x5   :  { %p2432_p3 = por %p2431_p2, %p2430_p1 }
   0x7   :  { %p2433_p4 = pnand %p2432_p3, %p2426_p0 }
   0x9   :  { %2436 = shalt.err (!%p2433_p4)
}
   0xa   :  { %s2439_s28 = smov [#allocation2]  }
   0xb   :  { %22 = dma.vmem_to_smem %s20_s26, 64, %s2439_s28, [#allocation3]  }
   0xc   :  { %2437 = dma.done.wait [#allocation3], 64  }
   0xd   :  { %2438 = vsyncadd [#allocation3], 4294967232 }
   0xe   :  { %38 = sfence }
   0xf   :  { %v2519_v0 = vld [vmem:[%s3883_s1 + $0x10] sm:$0xff]  ;;  %v2524_v1 = vld [vmem:[%s3883_s1] sm:$0xff]  ;;  %v3890_v2 = vmov 0   ;;  %v2533_v3 = vld [vmem:[%s3883_s1 + $0x18] sm:$0xff]  ;;  %v2441_v5 = vmov 1   ;;  %v2442_v6 = vmov 2   ;;  %v58_v13 = vlaneseq }
  0x10   :  { %2266 = vset.pattern.permute.xlu1 %v3890_v2  ;;  %2265 = vset.pattern.permute.xlu0 %v3890_v2  ;;  %v2538_v4 = vld [vmem:[%s3883_s1 + $0x8] sm:$0xff]  ;;  %v2443_v7 = vmov 3   ;;  %v2444_v8 = vmov 4   ;;  %v2445_v9 = vmov 5   ;;  %v2446_v10 = vmov 6   ;;  %v2578_v16 = vld [vmem:[%s3885_s3] sm:$0xff] }
  0x11   :  { %74 = vperm.xlu1 %2266, %v2519_v0   ;;  %64 = vperm.xlu0 %2265, %v2524_v1   ;;  %v2447_v11 = vmov 7   ;;  %v2448_v12 = vmov 8   ;;  %v2570_v14 = vshrl.u32 %v58_v13, 7  ;;  %s98_s15 = sld [smem:[#allocation2]]  ;;  %s2102_s16 = sld [smem:[#allocation2 + $0x1]] }
  0x12   :  { %s2103_s17 = sld [smem:[#allocation2 + $0x2]]  ;;  %s2104_s18 = sld [smem:[#allocation2 + $0x3]] }
  0x13   :  { %v2573_v15 = vsub.s32 0, %v2570_v14  ;;  %v2590_v24 = vsub.s32 1, %v2570_v14  ;;  %v2610_v41 = vsub.s32 2, %v2570_v14  ;;  %v2615_v43 = vsub.s32 3, %v2570_v14  ;;  %s2105_s19 = sld [smem:[#allocation2 + $0x4]]  ;;  %s2106_s20 = sld [smem:[#allocation2 + $0x5]] }
  0x14   :  { %s2107_s21 = sld [smem:[#allocation2 + $0x6]]  ;;  %s2108_s22 = sld [smem:[#allocation2 + $0x7]]  ;;  %v2640_v62 = vsub.s32 4, %v2570_v14 }
  0x15   :  { %79 = vperm.xlu1 %2266, %v2533_v3   ;;  %69 = vperm.xlu0 %2265, %v2538_v4   ;;  %3970 = vst [vmem:[#allocation5_spill] sm:$0xff] %v2573_v15  ;;  %v2586_v19 = vrot.slane %v2578_v16, %v2573_v15  ;;  %3971 = vst [vmem:[#allocation6_spill] sm:$0xff] %v2590_v24  ;;  %v2597_v30 = vrot.slane %v2578_v16, %v2590_v24  ;;  %s2109_s0 = sld [smem:[#allocation2 + $0x80]]  ;;  %s3032_s23 = sld [smem:[#allocation2 + $0x103]] }
  0x16   :  { %3972 = vst [vmem:[#allocation7_spill] sm:$0xff] %v2610_v41  ;;  %3973 = vst [vmem:[#allocation8_spill] sm:$0xff] %v2615_v43  ;;  %v2621_v45 = vrot.slane %v2578_v16, %v2610_v41  ;;  %v2625_v46 = vrot.slane %v2578_v16, %v2615_v43  ;;  %s3034_s24 = sld [smem:[#allocation2 + $0x84]]  ;;  %s3067_s28 = sld [smem:[#allocation2 + $0x85]] }
  0x17   :  { %v2592_v25 = vstv %s98_s15  ;;  %v2602_v35 = vstv %s2102_s16  ;;  %3974 = vst [vmem:[#allocation9_spill] sm:$0xff] %v2640_v62  ;;  %s3044_s27 = sld [smem:[#allocation2 + $0x104]]  ;;  %s3079_s29 = sld [smem:[#allocation2 + $0x105]] }
  0x18   :  { %v2629_v53 = vstv %s2103_s17  ;;  %v2633_v56 = vstv %s2104_s18  ;;  %s2110_s17 = sld [smem:[#allocation2 + $0x81]]  ;;  %s2129_s18 = sld [smem:[#allocation2 + $0x100]] }
  0x19   :  { %2268 = vset.pattern.permute.xlu1 %v2441_v5  ;;  %2267 = vset.pattern.permute.xlu0 %v2441_v5  ;;  %v2645_v5 = vsub.s32 5, %v2570_v14  ;;  %s3081_s30 = sld [smem:[#allocation2 + $0x86]]  ;;  %s3129_s8 = sld [smem:[#allocation2 + $0x87]] }
  0x1a   :  { %113 = vperm.xlu1 %2268, %v2538_v4   ;;  %109 = vperm.xlu0 %2267, %v2524_v1   ;;  %s2146_s11 = sld [smem:[#allocation2 + $0x181]] }
  0x1b   :  { %3975 = vst [vmem:[#allocation10_spill] sm:$0xff] %v2645_v5 }
  0x1e   :  { %117 = vperm.xlu1 %2268, %v2519_v0   ;;  %121 = vperm.xlu0 %2267, %v2533_v3  }
  0x22   :  { %2269 = vset.pattern.permute.xlu1 %v2442_v6  ;;  %2270 = vset.pattern.permute.xlu0 %v2442_v6  ;;  %v46_v6 = vld [vmem:[%s3884_s2] sm:$0x3] }
  0x23   :  { %155 = vperm.xlu1 %2269, %v2524_v1   ;;  %159 = vperm.xlu0 %2270, %v2538_v4   ;;  %vm50_vm4 = vnez %v46_v6 }
  0x27   :  { %163 = vperm.xlu1 %2269, %v2519_v0   ;;  %2271 = vset.pattern.permute.xlu0 %v2443_v7 }
  0x28   :  { %201 = vperm.xlu0 %2271, %v2524_v1  }
  0x2b   :  { %167 = vperm.xlu1 %2269, %v2533_v3  }
  0x2c   :  { %213 = vperm.xlu0 %2271, %v2533_v3  }
  0x2f   :  { %2272 = vset.pattern.permute.xlu1 %v2443_v7 }
  0x30   :  { %205 = vperm.xlu1 %2272, %v2538_v4   ;;  %2274 = vset.pattern.permute.xlu0 %v2444_v8 }
  0x31   :  { %251 = vperm.xlu0 %2274, %v2538_v4  }
  0x34   :  { %209 = vperm.xlu1 %2272, %v2519_v0  }
  0x35   :  { %2275 = vset.pattern.permute.xlu0 %v2445_v9 }
  0x36   :  { %293 = vperm.xlu0 %2275, %v2524_v1  }
  0x38   :  { %2273 = vset.pattern.permute.xlu1 %v2444_v8  ;;  %v2653_v8 = vsub.s32 6, %v2570_v14 }
  0x39   :  { %247 = vperm.xlu1 %2273, %v2524_v1  }
  0x3a   :  { %305 = vperm.xlu0 %2275, %v2533_v3   ;;  %3976 = vst [vmem:[#allocation11_spill] sm:$0xff] %v2653_v8 }
  0x3d   :  { %255 = vperm.xlu1 %2273, %v2519_v0  }
  0x3e   :  { %2278 = vset.pattern.permute.xlu0 %v2446_v10 }
  0x3f   :  { %343 = vperm.xlu0 %2278, %v2538_v4  }
  0x41   :  { %259 = vperm.xlu1 %2273, %v2533_v3  }
  0x43   :  { %2279 = vset.pattern.permute.xlu0 %v2447_v11 }
  0x44   :  { %385 = vperm.xlu0 %2279, %v2524_v1  }
  0x45   :  { %2276 = vset.pattern.permute.xlu1 %v2445_v9  ;;  %v2656_v9 = vsub.s32 7, %v2570_v14 }
  0x46   :  { %297 = vperm.xlu1 %2276, %v2538_v4  }
  0x47   :  { %3977 = vst [vmem:[#allocation12_spill] sm:$0xff] %v2656_v9 }
  0x48   :  { %397 = vperm.xlu0 %2279, %v2533_v3  }
  0x4a   :  { %301 = vperm.xlu1 %2276, %v2519_v0  }
  0x4c   :  { %2281 = vset.pattern.permute.xlu0 %v2448_v12 }
  0x4e   :  { %2277 = vset.pattern.permute.xlu1 %v2446_v10 }
  0x4f   :  { %339 = vperm.xlu1 %2277, %v2524_v1  }
  0x53   :  { %347 = vperm.xlu1 %2277, %v2519_v0  }
  0x57   :  { %351 = vperm.xlu1 %2277, %v2533_v3  }
  0x5b   :  { %2280 = vset.pattern.permute.xlu1 %v2447_v11 }
  0x5c   :  { %389 = vperm.xlu1 %2280, %v2538_v4  }
  0x60   :  { %393 = vperm.xlu1 %2280, %v2519_v0  }
  0x64   :  { %2282 = vset.pattern.permute.xlu1 %v2448_v12 }
  0x90   :  { %v2580_v17 = vpop.permute.xlu1 %74  ;;  %v2582_v18 = vpop.permute.xlu0 %64 }
  0x91   :  { %v82_v10 = vadd.f32 %v2582_v18, %v2586_v19  ;;  %v2676_v18 = vrot.slane %v2578_v16, %v2645_v5 }
  0x93   :  { %vm86_vm5 = vcmp.gt.f32.partialorder %v82_v10, 0.0 }
  0x94   :  { %v80_v20 = vpop.permute.xlu1 %79  ;;  %v70_v21 = vpop.permute.xlu0 %69 }
  0x95   :  { %v85_v22 = vadd.f32 %v80_v20, %v2586_v19  ;;  %v83_v12 = vadd.f32 %v70_v21, %v2586_v19  ;;  %v2666_v20 = vrot.slane %v2578_v16, %v2640_v62  ;;  %v2678_v21 = vstv %s2106_s20  ;;  %s2131_s20 = sld [smem:[#allocation2 + $0x102]] }
  0x97   :  { %vm89_vm0 = vcmp.gt.f32.partialorder %v85_v22, 0.0  ;;  %v93_v23 = vmul.f32 0.2, %v85_v22  ;;  %vm87_vm7 = vcmp.gt.f32.partialorder %v83_v12, 0.0 }
  0x99   :  { %v97_v26 = vsel %vm89_vm0, %v85_v22, %v93_v23  ;;  %v114_v27 = vpop.permute.xlu1 %113  ;;  %v110_v28 = vpop.permute.xlu0 %109  ;;  %v47_v22 = vld [vmem:[%s3884_s2 + $0x2] sm:$0x3]  ;;  %v2672_v23 = vstv %s2105_s19  ;;  %s2130_s19 = sld [smem:[#allocation2 + $0x101]] }
  0x9a   :  { %v103_v29 = vmul.f32 %v2592_v25, %v97_v26  ;;  %v125_v13 = vadd.f32 %v114_v27, %v2597_v30  ;;  %v124_v14 = vadd.f32 %v110_v28, %v2597_v30  ;;  %v2682_v27 = vrot.slane %v2578_v16, %v2653_v8 }
  0x9b   :  { %v2690_v28 = vstv %s2108_s22  ;;  %vm51_vm6 = vnez %v47_v22  ;;  %s3030_s22 = sld [smem:[#allocation2 + $0x83]] }
  0x9c   :  { %vm129_vm8 = vcmp.gt.f32.partialorder %v125_v13, 0.0  ;;  %vm128_vm9 = vcmp.gt.f32.partialorder %v124_v14, 0.0 }
  0x9d   :  { %v2599_v31 = vpop.permute.xlu1 %117  ;;  %v122_v32 = vpop.permute.xlu0 %121 }
  0x9e   :  { %v127_v33 = vadd.f32 %v122_v32, %v2597_v30  ;;  %v2688_v32 = vrot.slane %v2578_v16, %v2656_v9  ;;  %v132_v16 = vmul.f32 0.2, %v124_v14 }
  0xa0   :  { %vm131_vm1 = vcmp.gt.f32.partialorder %v127_v33, 0.0  ;;  %v135_v34 = vmul.f32 0.2, %v127_v33 }
  0xa2   :  { %v139_v36 = vsel %vm131_vm1, %v127_v33, %v135_v34  ;;  %v2604_v37 = vpop.permute.xlu1 %155  ;;  %v2606_v38 = vpop.permute.xlu0 %159  ;;  %v84_v33 = vadd.f32 %v2580_v17, %v2586_v19 }
  0xa3   :  { %v145_v39 = vmul.f32 %v2602_v35, %v139_v36  ;;  %v2695_v36 = vsel %vm50_vm4, 16843009, %v3890_v2  ;;  %v170_v17 = vadd.f32 %v2604_v37, %v2621_v45  ;;  %v136_v37 = vsel %vm128_vm9, %v124_v14, %v132_v16 }
  0xa4   :  { %vm88_vm11 = vcmp.gt.f32.partialorder %v84_v33, 0.0  ;;  %v171_v22 = vadd.f32 %v2606_v38, %v2621_v45  ;;  %vm442_vm9 = vcmask 261120  }
  0xa5   :  { %v149_v40 = vadd.f32 %v145_v39, %v103_v29  ;;  %v2684_v29 = vstv %s2107_s21  ;;  %v90_v39 = vmul.f32 0.2, %v82_v10  ;;  %vm174_vm13 = vcmp.gt.f32.partialorder %v170_v17, 0.0  ;;  %s3025_s21 = sld [smem:[#allocation2 + $0x82]] }
  0xa6   :  { %v2612_v42 = vpop.permute.xlu1 %163  ;;  %vm175_vm15 = vcmp.gt.f32.partialorder %v171_v22, 0.0 }
  0xa7   :  { %v2617_v44 = vpop.permute.xlu0 %201 }
  0xa8   :  { %v216_v6 = vadd.f32 %v2617_v44, %v2625_v46 }
  0xaa   :  { %v168_v47 = vpop.permute.xlu1 %167  ;;  %v224_v38 = vmul.f32 0.2, %v216_v6  ;;  %vm220_vm0 = vcmp.gt.f32.partialorder %v216_v6, 0.0 }
  0xab   :  { %v173_v48 = vadd.f32 %v168_v47, %v2621_v45  ;;  %v214_v49 = vpop.permute.xlu0 %213  ;;  %v133_v47 = vmul.f32 0.2, %v125_v13 }
  0xac   :  { %v219_v50 = vadd.f32 %v214_v49, %v2625_v46  ;;  %v126_v49 = vadd.f32 %v2599_v31, %v2597_v30 }
  0xad   :  { %vm177_vm2 = vcmp.gt.f32.partialorder %v173_v48, 0.0  ;;  %v181_v51 = vmul.f32 0.2, %v173_v48  ;;  %v137_v30 = vsel %vm129_vm8, %v125_v13, %v133_v47  ;;  %v142_v47 = vmul.f32 %v2602_v35, %v136_v37 }
  0xae   :  { %vm223_vm3 = vcmp.gt.f32.partialorder %v219_v50, 0.0  ;;  %v227_v52 = vmul.f32 0.2, %v219_v50  ;;  %vm130_vm12 = vcmp.gt.f32.partialorder %v126_v49, 0.0 }
  0xaf   :  { %v185_v54 = vsel %vm177_vm2, %v173_v48, %v181_v51  ;;  %v2631_v55 = vpop.permute.xlu1 %205  ;;  %v92_v51 = vmul.f32 0.2, %v84_v33 }
  0xb0   :  { %v191_v57 = vmul.f32 %v2629_v53, %v185_v54  ;;  %v231_v58 = vsel %vm223_vm3, %v219_v50, %v227_v52  ;;  %v2637_v60 = vpop.permute.xlu0 %251  ;;  %v2707_v54 = vsel %vm51_vm6, 16843009, %v3890_v2  ;;  %v178_v52 = vmul.f32 0.2, %v170_v17 }
  0xb1   :  { %v237_v59 = vmul.f32 %v2633_v56, %v231_v58 }
  0xb2   :  { %v195_v61 = vadd.f32 %v191_v57, %v149_v40  ;;  %v91_v40 = vmul.f32 0.2, %v83_v12  ;;  %v94_v57 = vsel %vm86_vm5, %v82_v10, %v90_v39 }
  0xb3   :  { %v2642_v63 = vpop.permute.xlu1 %209  ;;  %v100_v39 = vmul.f32 %v2592_v25, %v94_v57 }
  0xb4   :  { %v2650_v7 = vadd.f32 %v237_v59, %v195_v61  ;;  %v95_v58 = vsel %vm87_vm7, %v83_v12, %v91_v40  ;;  %v134_v61 = vmul.f32 0.2, %v126_v49  ;;  %v96_v12 = vsel %vm88_vm11, %v84_v33, %v92_v51 }
  0xb5   :  { %v2660_v11 = vpop.permute.xlu0 %293  ;;  %v101_v44 = vmul.f32 %v2592_v25, %v95_v58  ;;  %v143_v40 = vmul.f32 %v2602_v35, %v137_v30  ;;  %v179_v33 = vmul.f32 0.2, %v171_v22  ;;  %v2730_v30 = vmul.f32 %v2592_v25, %v96_v12 }
  0xb6   :  { %v308_v51 = vadd.f32 %v2660_v11, %v2676_v18  ;;  %v172_v25 = vadd.f32 %v2612_v42, %v2621_v45 }
  0xb7   :  { %v183_v11 = vsel %vm175_vm15, %v171_v22, %v179_v33 }
  0xb8   :  { %v248_v26 = vpop.permute.xlu1 %247  ;;  %vm312_vm3 = vcmp.gt.f32.partialorder %v308_v51, 0.0  ;;  %v189_v45 = vmul.f32 %v2629_v53, %v183_v11  ;;  %vm176_vm6 = vcmp.gt.f32.partialorder %v172_v25, 0.0 }
  0xb9   :  { %v306_v34 = vpop.permute.xlu0 %305  ;;  %v262_v13 = vadd.f32 %v248_v26, %v2666_v20 }
  0xba   :  { %v311_v48 = vadd.f32 %v306_v34, %v2676_v18 }
  0xbb   :  { %v270_v26 = vmul.f32 0.2, %v262_v13  ;;  %vm266_vm1 = vcmp.gt.f32.partialorder %v262_v13, 0.0 }
  0xbc   :  { %v2702_v19 = vpop.permute.xlu1 %255  ;;  %vm315_vm10 = vcmp.gt.f32.partialorder %v311_v48, 0.0  ;;  %v319_v50 = vmul.f32 0.2, %v311_v48 }
  0xbe   :  { %v323_v31 = vsel %vm315_vm10, %v311_v48, %v319_v50  ;;  %v2710_v59 = vpop.permute.xlu0 %343  ;;  %v138_v48 = vsel %vm130_vm12, %v126_v49, %v134_v61  ;;  %v147_v49 = vadd.f32 %v143_v40, %v101_v44  ;;  %v228_v61 = vsel %vm220_vm0, %v216_v6, %v224_v38 }
  0xbf   :  { %v329_v34 = vmul.f32 %v2678_v21, %v323_v31  ;;  %v182_v31 = vsel %vm174_vm13, %v170_v17, %v178_v52  ;;  %v146_v17 = vadd.f32 %v142_v47, %v100_v39  ;;  %v144_v52 = vmul.f32 %v2602_v35, %v138_v48 }
  0xc0   :  { %v260_v2 = vpop.permute.xlu1 %259  ;;  %v188_v9 = vmul.f32 %v2629_v53, %v182_v31  ;;  %v274_v44 = vsel %vm266_vm1, %v262_v13, %v270_v26  ;;  %v316_v40 = vmul.f32 0.2, %v308_v51  ;;  %v234_v6 = vmul.f32 %v2633_v56, %v228_v61 }
  0xc1   :  { %v265_v14 = vadd.f32 %v260_v2, %v2666_v20  ;;  %v217_v2 = vadd.f32 %v2631_v55, %v2625_v46  ;;  %v263_v55 = vadd.f32 %v2637_v60, %v2666_v20 }
  0xc2   :  { %v192_v42 = vadd.f32 %v188_v9, %v146_v17  ;;  %v218_v9 = vadd.f32 %v2642_v63, %v2625_v46  ;;  %v3978_v17 = vunpack.c.0.s8 %v2695_v36  ;;  %v355_v46 = vadd.f32 %v2710_v59, %v2682_v27 }
  0xc3   :  { %vm269_vm14 = vcmp.gt.f32.partialorder %v265_v14, 0.0  ;;  %v273_v16 = vmul.f32 0.2, %v265_v14  ;;  %v386_v50 = vpop.permute.xlu0 %385  ;;  %vm221_vm2 = vcmp.gt.f32.partialorder %v217_v2, 0.0  ;;  %v271_v47 = vmul.f32 0.2, %v263_v55 }
  0xc4   :  { %v400_v22 = vadd.f32 %v386_v50, %v2688_v32  ;;  %vm267_vm5 = vcmp.gt.f32.partialorder %v263_v55, 0.0  ;;  %v238_v31 = vadd.f32 %v234_v6, %v192_v42  ;;  %vm2757_vm7 = vcmp.ne.s32.totalorder %v3978_v17, 0 }
  0xc5   :  { %v277_v57 = vsel %vm269_vm14, %v265_v14, %v273_v16  ;;  %v298_v58 = vpop.permute.xlu1 %297  ;;  %v225_v14 = vmul.f32 0.2, %v217_v2  ;;  %v180_v16 = vmul.f32 0.2, %v172_v25  ;;  %v275_v50 = vsel %vm267_vm5, %v263_v55, %v271_v47 }
  0xc6   :  { %v283_v37 = vmul.f32 %v2672_v23, %v277_v57  ;;  %v408_v57 = vmul.f32 0.2, %v400_v22  ;;  %vm404_vm8 = vcmp.gt.f32.partialorder %v400_v22, 0.0  ;;  %v264_v55 = vadd.f32 %v2702_v19, %v2666_v20 }
  0xc7   :  { %v398_v10 = vpop.permute.xlu0 %397  ;;  %v229_v13 = vsel %vm221_vm2, %v217_v2, %v225_v14  ;;  %v3979_v2 = vmov 0  ;;  %v193_v36 = vadd.f32 %v189_v45, %v147_v49  ;;  %v184_v11 = vsel %vm176_vm6, %v172_v25, %v180_v16 }
  0xc8   :  { %v287_v12 = vadd.f32 %v283_v37, %v2650_v7  ;;  %v403_v35 = vadd.f32 %v398_v10, %v2688_v32  ;;  %v280_v7 = vmul.f32 %v2672_v23, %v274_v44  ;;  %v320_v10 = vsel %vm312_vm3, %v308_v51, %v316_v40 }
  0xc9   :  { %v302_v39 = vpop.permute.xlu1 %301  ;;  %v3980_v2 = vsel %vm2757_vm7, 4294967295, %v3979_v2  ;;  %v235_v51 = vmul.f32 %v2633_v56, %v229_v13  ;;  %v326_v61 = vmul.f32 %v2678_v21, %v320_v10  ;;  %v226_v40 = vmul.f32 0.2, %v218_v9 }
  0xca   :  { %v2743_v60 = vadd.f32 %v329_v34, %v287_v12  ;;  %vm407_vm4 = vcmp.gt.f32.partialorder %v403_v35, 0.0  ;;  %v411_v48 = vmul.f32 0.2, %v403_v35  ;;  %v309_v34 = vadd.f32 %v298_v58, %v2676_v18  ;;  %3981 = vst [vmem:[#allocation13_spill] sm:$0xff] %v3980_v2 }
  0xcb   :  { %v284_v58 = vadd.f32 %v280_v7, %v238_v31  ;;  %v281_v12 = vmul.f32 %v2672_v23, %v275_v50  ;;  %v239_v47 = vadd.f32 %v235_v51, %v193_v36  ;;  %v148_v59 = vadd.f32 %v144_v52, %v2730_v30 }
  0xcc   :  { %v415_v38 = vsel %vm407_vm4, %v403_v35, %v411_v48  ;;  %v317_v14 = vmul.f32 0.2, %v309_v34  ;;  %vm313_vm11 = vcmp.gt.f32.partialorder %v309_v34, 0.0  ;;  %v412_v35 = vsel %vm404_vm8, %v400_v22, %v408_v57 }
  0xcd   :  { %v2750_v26 = vmul.f32 %v2690_v28, %v415_v38  ;;  %v310_v48 = vadd.f32 %v302_v39, %v2676_v18  ;;  %v330_v19 = vadd.f32 %v326_v61, %v284_v58  ;;  %vm222_vm12 = vcmp.gt.f32.partialorder %v218_v9, 0.0 }
  0xce   :  { %v340_v33 = vpop.permute.xlu1 %339  ;;  %v272_v49 = vmul.f32 0.2, %v264_v55  ;;  %v363_v42 = vmul.f32 0.2, %v355_v46  ;;  %v321_v25 = vsel %vm313_vm11, %v309_v34, %v317_v14  ;;  %v418_v10 = vmul.f32 %v2690_v28, %v412_v35  ;;  %v48_v34 = vld [vmem:[%s3884_s2 + $0x4] sm:$0x3] }
  0xcf   :  { %v354_v37 = vadd.f32 %v340_v33, %v2682_v27  ;;  %v190_v22 = vmul.f32 %v2629_v53, %v184_v11  ;;  %vm268_vm13 = vcmp.gt.f32.partialorder %v264_v55, 0.0  ;;  %vm359_vm14 = vcmp.gt.f32.partialorder %v355_v46, 0.0 }
  0xd0   :  { %v285_v39 = vadd.f32 %v281_v12, %v239_v47  ;;  %v230_v38 = vsel %vm222_vm12, %v218_v9, %v226_v40  ;;  %v318_v16 = vmul.f32 0.2, %v310_v48  ;;  %v327_v52 = vmul.f32 %v2678_v21, %v321_v25 }
  0xd1   :  { %vm358_vm10 = vcmp.gt.f32.partialorder %v354_v37, 0.0  ;;  %v362_v63 = vmul.f32 0.2, %v354_v37  ;;  %vm314_vm15 = vcmp.gt.f32.partialorder %v310_v48, 0.0  ;;  %v276_v33 = vsel %vm268_vm13, %v264_v55, %v272_v49 }
  0xd2   :  { %v348_v44 = vpop.permute.xlu1 %347  ;;  %v367_v50 = vsel %vm359_vm14, %v355_v46, %v363_v42  ;;  %v322_v51 = vsel %vm314_vm15, %v310_v48, %v318_v16  ;;  %vm52_vm2 = vnez %v48_v34  ;;  %v194_v55 = vadd.f32 %v190_v22, %v148_v59 }
  0xd3   :  { %v366_v6 = vsel %vm358_vm10, %v354_v37, %v362_v63  ;;  %v356_v45 = vadd.f32 %v348_v44, %v2682_v27  ;;  %v282_v46 = vmul.f32 %v2672_v23, %v276_v33  ;;  %v373_v63 = vmul.f32 %v2684_v29, %v367_v50 }
  0xd4   :  { %v372_v20 = vmul.f32 %v2684_v29, %v366_v6  ;;  %v331_v36 = vadd.f32 %v327_v52, %v285_v39  ;;  %v328_v44 = vmul.f32 %v2678_v21, %v322_v51  ;;  %v3982_v35 = vmov 0   ;;  %v49_v52 = vld [vmem:[%s3884_s2 + $0x6] sm:$0x3]  ;;  %s3114_s2 = sld [smem:[#allocation2 + $0x106]] }
  0xd5   :  { %v364_v53 = vmul.f32 0.2, %v356_v45  ;;  %vm360_vm1 = vcmp.gt.f32.partialorder %v356_v45, 0.0  ;;  %v428_v6 = vsel %vm52_vm2, 16843009, %v3982_v35  ;;  %v3984_v21 = vmov 0 }
  0xd6   :  { %v352_v7 = vpop.permute.xlu1 %351  ;;  %v376_v13 = vadd.f32 %v372_v20, %v330_v19  ;;  %v377_v59 = vadd.f32 %v373_v63, %v331_v36  ;;  %v432_v25 = vunpack.c.0.s8 %v428_v6  ;;  %v2451_v16 = vmov 17  }
  0xd7   :  { %v357_v18 = vadd.f32 %v352_v7, %v2682_v27  ;;  %v236_v27 = vmul.f32 %v2633_v56, %v230_v38  ;;  %v368_v56 = vsel %vm360_vm1, %v356_v45, %v364_v53  ;;  %v2450_v38 = vmov 16  }
  0xd8   :  { %v422_v30 = vadd.f32 %v418_v10, %v376_v13  ;;  %v374_v19 = vmul.f32 %v2684_v29, %v368_v56  ;;  %vm2811_vm6 = vcmp.ne.s32.totalorder %v432_v25, 0  ;;  %vm53_vm8 = vnez %v49_v52 }
  0xd9   :  { %vm361_vm0 = vcmp.gt.f32.partialorder %v357_v18, 0.0  ;;  %v365_v31 = vmul.f32 0.2, %v357_v18  ;;  %v240_v14 = vadd.f32 %v236_v27, %v194_v55  ;;  %v2454_v34 = vmov 11  }
  0xda   :  { %v2782_v57 = vsel %vm2757_vm7, %v422_v30, -1e+30  ;;  %v2452_v30 = vmov 18   ;;  %v429_v33 = vsel %vm53_vm8, 16843009, %v3982_v35  ;;  %v2455_v53 = vmov 19  }
  0xdb   :  { %v369_v9 = vsel %vm361_vm0, %v357_v18, %v365_v31  ;;  %v390_v37 = vpop.permute.xlu1 %389  ;;  %v443_v17 = vsel %vm442_vm9, %v2782_v57, -inf  ;;  %v286_v23 = vadd.f32 %v282_v46, %v240_v14  ;;  %v2453_v31 = vmov 10  }
  0xdc   :  { %v375_v58 = vmul.f32 %v2684_v29, %v369_v9  ;;  %v401_v61 = vadd.f32 %v390_v37, %v2688_v32  ;;  %444 = vmax.xlane.f32.xlu1 %v443_v17  ;;  %v433_v50 = vunpack.c.0.s8 %v429_v33  ;;  %v3991_v27 = vmov 0 }
  0xdd   :  { %v332_v7 = vadd.f32 %v328_v44, %v286_v23  ;;  %v2456_v17 = vmov 12   ;;  %v2457_v51 = vmov 20   ;;  %v2460_v55 = vmov 14  }
  0xde   :  { %vm405_vm3 = vcmp.gt.f32.partialorder %v401_v61, 0.0  ;;  %v409_v11 = vmul.f32 0.2, %v401_v61  ;;  %v379_v12 = vadd.f32 %v375_v58, %v2743_v60  ;;  %v3983_v60 = vunpack.c.0.s8 %v2707_v54 }
  0xdf   :  { %v394_v40 = vpop.permute.xlu1 %393  ;;  %v378_v29 = vadd.f32 %v374_v19, %v332_v7  ;;  %v3988_v54 = vmov 0  ;;  %vm2843_vm10 = vcmp.ne.s32.totalorder %v433_v50, 0  ;;  %v2458_v58 = vmov 13  }
  0xe0   :  { %v413_v47 = vsel %vm405_vm3, %v401_v61, %v409_v11  ;;  %v402_v48 = vadd.f32 %v394_v40, %v2688_v32  ;;  %v425_v20 = vadd.f32 %v2750_v26, %v379_v12  ;;  %vm2800_vm5 = vcmp.ne.s32.totalorder %v3983_v60, 0  ;;  %v2890_v11 = vld [vmem:[%s3885_s3 + $0x8] sm:$0xff] }
  0xe1   :  { %v419_v49 = vmul.f32 %v2690_v28, %v413_v47  ;;  %v3985_v21 = vsel %vm2800_vm5, 4294967295, %v3984_v21  ;;  %v3989_v54 = vsel %vm2811_vm6, 4294967295, %v3988_v54  ;;  %v3992_v27 = vsel %vm2843_vm10, 4294967295, %v3991_v27 }
  0xe2   :  { %vm406_vm4 = vcmp.gt.f32.partialorder %v402_v48, 0.0  ;;  %v410_v42 = vmul.f32 0.2, %v402_v48  ;;  %3986 = vst [vmem:[#allocation14_spill] sm:$0xff] %v3985_v21  ;;  %3990 = vst [vmem:[#allocation16_spill] sm:$0xff] %v3989_v54  ;;  %v2459_v61 = vmov 21   ;;  %v2895_v44 = vrot.slane %v2890_v11, %v2573_v15 }
  0xe3   :  { %v423_v45 = vadd.f32 %v419_v49, %v377_v59  ;;  %3993 = vst [vmem:[#allocation17_spill] sm:$0xff] %v3992_v27  ;;  %v2850_v9 = vsel %vm2843_vm10, %v425_v20, -1e+30  ;;  %v3906_v46 = vmov 22   ;;  %v3902_v63 = vmov 23  }
  0xe4   :  { %v414_v32 = vsel %vm406_vm4, %v402_v48, %v410_v42  ;;  %3994 = vst [vmem:[#allocation18_spill] sm:$0xff] %v2850_v9  ;;  %v452_v37 = vsel %vm442_vm9, %v2850_v9, -inf  ;;  %v3904_v36 = vmov 15   ;;  %v3900_v56 = vmov 24  }
  0xe5   :  { %v2806_v26 = vsel %vm2800_vm5, %v423_v45, -1e+30  ;;  %v420_v13 = vmul.f32 %v2690_v28, %v414_v32  ;;  %v2449_v28 = vmov 9   ;;  %v2900_v47 = vstv %s2109_s0  ;;  %s3228_s0 = sld [smem:[#allocation2 + $0x107]] }
  0xe6   :  { %3987 = vst [vmem:[#allocation15_spill] sm:$0xff] %v2806_v26  ;;  %v446_v10 = vsel %vm442_vm9, %v2806_v26, -inf  ;;  %v3102_v54 = vstv %s3030_s22  ;;  %v3105_v27 = vstv %s3032_s23  ;;  %s2150_s22 = sld [smem:[#allocation2 + $0x185]]  ;;  %s3581_s23 = sld [smem:[#allocation2 + $0x186]] }
  0xe7   :  { %447 = vmax.xlane.f32.xlu0 %v446_v10  ;;  %v424_v22 = vadd.f32 %v420_v13, %v378_v29 }
  0xe9   :  { %v2817_v18 = vsel %vm2811_vm6, %v424_v22, -1e+30 }
  0xea   :  { %v449_v39 = vsel %vm442_vm9, %v2817_v18, -inf }
  0xeb   :  { %450 = vmax.xlane.f32.xlu0 %v449_v39 }
  0xed   :  { %502 = vperm.xlu1 %2282, %v2538_v4  }
  0xf1   :  { %506 = vperm.xlu1 %2282, %v2519_v0  }
  0xf5   :  { %510 = vperm.xlu1 %2282, %v2533_v3  }
  0xf9   :  { %2283 = vset.pattern.permute.xlu1 %v2449_v28 }
  0xfa   :  { %540 = vperm.xlu1 %2283, %v2524_v1  }
  0xfe   :  { %544 = vperm.xlu1 %2283, %v2538_v4  }
 0x101   :  { %498 = vperm.xlu0 %2281, %v2524_v1  }
 0x102   :  { %2284 = vset.pattern.permute.xlu1 %v2450_v38 }
 0x103   :  { %1051 = vperm.xlu1 %2284, %v2524_v1  }
 0x105   :  { %2287 = vset.pattern.permute.xlu0 %v2450_v38 }
 0x106   :  { %1059 = vperm.xlu0 %2287, %v2519_v0  }
 0x107   :  { %1055 = vperm.xlu1 %2284, %v2538_v4  }
 0x10a   :  { %2288 = vset.pattern.permute.xlu0 %v2451_v16 }
 0x10b   :  { %1097 = vperm.xlu0 %2288, %v2538_v4   ;;  %2285 = vset.pattern.permute.xlu1 %v2451_v16 }
 0x10f   :  { %1105 = vperm.xlu0 %2288, %v2533_v3  }
 0x113   :  { %2292 = vset.pattern.permute.xlu0 %v2452_v30 }
 0x114   :  { %1139 = vperm.xlu0 %2292, %v2524_v1  }
 0x118   :  { %2295 = vset.pattern.permute.xlu0 %v2453_v31 }
 0x119   :  { %598 = vperm.xlu0 %2295, %v2533_v3  }
 0x11d   :  { %2297 = vset.pattern.permute.xlu0 %v2454_v34 }
 0x11e   :  { %632 = vperm.xlu0 %2297, %v2524_v1  }
 0x122   :  { %2300 = vset.pattern.permute.xlu0 %v2455_v53 }
 0x123   :  { %1189 = vperm.xlu0 %2300, %v2538_v4  }
 0x127   :  { %1193 = vperm.xlu0 %2300, %v2519_v0  }
 0x12b   :  { %2303 = vset.pattern.permute.xlu0 %v2456_v17  ;;  %453 = vmax.xlane.f32.xlu1 %v452_v37  ;;  %v3898_v37 = vmov 25  }
 0x12c   :  { %678 = vperm.xlu0 %2303, %v2524_v1  }
 0x130   :  { %2306 = vset.pattern.permute.xlu0 %v2457_v51 }
 0x131   :  { %1235 = vperm.xlu0 %2306, %v2538_v4  }
 0x135   :  { %1239 = vperm.xlu0 %2306, %v2519_v0  }
 0x139   :  { %2309 = vset.pattern.permute.xlu0 %v2458_v58 }
 0x13a   :  { %724 = vperm.xlu0 %2309, %v2524_v1  }
 0x13c   :  { %1093 = vperm.xlu1 %2285, %v2524_v1  }
 0x13e   :  { %2312 = vset.pattern.permute.xlu0 %v2459_v61 }
 0x13f   :  { %1281 = vperm.xlu0 %2312, %v2538_v4  }
 0x140   :  { %2286 = vset.pattern.permute.xlu1 %v2449_v28 }
 0x141   :  { %548 = vperm.xlu1 %2286, %v2519_v0  }
 0x143   :  { %1285 = vperm.xlu0 %2312, %v2519_v0  }
 0x145   :  { %552 = vperm.xlu1 %2286, %v2533_v3  }
 0x147   :  { %2315 = vset.pattern.permute.xlu0 %v2460_v55 }
 0x148   :  { %770 = vperm.xlu0 %2315, %v2524_v1  }
 0x149   :  { %2289 = vset.pattern.permute.xlu1 %v2450_v38 }
 0x14a   :  { %1063 = vperm.xlu1 %2289, %v2533_v3  }
 0x14c   :  { %2318 = vset.pattern.permute.xlu0 %v3906_v46 }
 0x14d   :  { %1327 = vperm.xlu0 %2318, %v2538_v4  }
 0x14e   :  { %2290 = vset.pattern.permute.xlu1 %v2451_v16 }
 0x14f   :  { %1101 = vperm.xlu1 %2290, %v2519_v0  }
 0x151   :  { %1331 = vperm.xlu0 %2318, %v2519_v0  }
 0x153   :  { %2291 = vset.pattern.permute.xlu1 %v2453_v31 }
 0x154   :  { %586 = vperm.xlu1 %2291, %v2524_v1  }
 0x155   :  { %2323 = vset.pattern.permute.xlu0 %v3902_v63  ;;  %v3908_v63 = vmov 30  }
 0x156   :  { %1373 = vperm.xlu0 %2323, %v2538_v4  }
 0x158   :  { %590 = vperm.xlu1 %2291, %v2538_v4  }
 0x15a   :  { %2324 = vset.pattern.permute.xlu0 %v3904_v36 }
 0x15b   :  { %816 = vperm.xlu0 %2324, %v2524_v1  }
 0x15c   :  { %2293 = vset.pattern.permute.xlu1 %v2452_v30 }
 0x15d   :  { %1143 = vperm.xlu1 %2293, %v2538_v4  }
 0x15f   :  { %828 = vperm.xlu0 %2324, %v2533_v3  }
 0x161   :  { %2294 = vset.pattern.permute.xlu1 %v2453_v31 }
 0x162   :  { %594 = vperm.xlu1 %2294, %v2519_v0  }
 0x163   :  { %2329 = vset.pattern.permute.xlu0 %v3900_v56 }
 0x166   :  { %2296 = vset.pattern.permute.xlu1 %v2452_v30 }
 0x167   :  { %1147 = vperm.xlu1 %2296, %v2519_v0  }
 0x169   :  { %v445_v12 = vpop.xlane.xlu1 %444 }
 0x16a   :  { %v455_v14 = vsub.f32 %v2782_v57, %v445_v12 }
 0x16b   :  { %1151 = vperm.xlu1 %2296, %v2533_v3  }
 0x16c   :  { %v459_v40 = vmul.f32 1.442695, %v455_v14  ;;  %v3897_v14 = vmov 26  }
 0x16d   :  { %v503_v35 = vpop.permute.xlu1 %502 }
 0x16e   :  { %v514_v6 = vadd.f32 %v503_v35, %v2895_v44  ;;  %2353 = vpow2.f32 %v459_v40 }
 0x16f   :  { %2298 = vset.pattern.permute.xlu1 %v2454_v34 }
 0x170   :  { %vm518_vm11 = vcmp.gt.f32.partialorder %v514_v6, 0.0  ;;  %v522_v48 = vmul.f32 0.2, %v514_v6  ;;  %636 = vperm.xlu1 %2298, %v2538_v4  }
 0x171   :  { %v507_v57 = vpop.permute.xlu1 %506 }
 0x172   :  { %v526_v20 = vsel %vm518_vm11, %v514_v6, %v522_v48  ;;  %v515_v23 = vadd.f32 %v507_v57, %v2895_v44  ;;  %v3000_v6 = vld [vmem:[%s3883_s1 + $0x8] sm:$0xff] }
 0x173   :  { %v2905_v19 = vmul.f32 %v2900_v47, %v526_v20  ;;  %v3895_v20 = vmov 28  }
 0x174   :  { %vm519_vm12 = vcmp.gt.f32.partialorder %v515_v23, 0.0  ;;  %v523_v59 = vmul.f32 0.2, %v515_v23  ;;  %2299 = vset.pattern.permute.xlu1 %v2455_v53  ;;  %v2908_v49 = vpop.xlane.xlu0 %447 }
 0x175   :  { %3995 = vst [vmem:[#allocation19_spill] sm:$0xff] %v2905_v19  ;;  %v511_v42 = vpop.permute.xlu1 %510  ;;  %1185 = vperm.xlu1 %2299, %v2524_v1   ;;  %v3151_v19 = vstv %s3079_s29 }
 0x176   :  { %v527_v60 = vsel %vm519_vm12, %v515_v23, %v523_v59  ;;  %v516_v25 = vadd.f32 %v511_v42, %v2895_v44  ;;  %v3018_v59 = vrot.slane %v2890_v11, %v2610_v41 }
 0x177   :  { %v2913_v45 = vmul.f32 %v2900_v47, %v527_v60 }
 0x178   :  { %vm520_vm13 = vcmp.gt.f32.partialorder %v516_v25, 0.0  ;;  %v524_v7 = vmul.f32 0.2, %v516_v25  ;;  %v451_v32 = vpop.xlane.xlu0 %450  ;;  %v2917_v13 = vpop.eup %2353  ;;  %4005 = vst [vmem:[#allocation29_spill] sm:$0xff] %v3018_v59 }
 0x179   :  { %3996 = vst [vmem:[#allocation20_spill] sm:$0xff] %v2913_v45  ;;  %v457_v29 = vsub.f32 %v2817_v18, %v451_v32  ;;  %2301 = vset.pattern.permute.xlu1 %v2454_v34  ;;  %3997 = vst [vmem:[#allocation21_spill] sm:$0xff] %v2917_v13  ;;  %v467_v28 = vsel %vm442_vm9, %v2917_v13, 0.0 }
 0x17a   :  { %v528_v10 = vsel %vm520_vm13, %v516_v25, %v524_v7  ;;  %640 = vperm.xlu1 %2301, %v2519_v0   ;;  %v3894_v7 = vmov 29  }
 0x17b   :  { %v2921_v22 = vmul.f32 %v2900_v47, %v528_v10  ;;  %v463_v39 = vmul.f32 1.442695, %v457_v29  ;;  %v3042_v29 = vld [vmem:[%s3885_s3 + $0x10] sm:$0xff]  ;;  %v3050_v10 = vrot.slane %v2890_v11, %v2590_v24 }
 0x17d   :  { %2355 = vpow2.f32 %v463_v39  ;;  %4008 = vst [vmem:[#allocation32_spill] sm:$0xff] %v3050_v10 }
 0x17e   :  { %468 = vadd.xlane.f32.xlu0 %v467_v28  ;;  %644 = vperm.xlu1 %2301, %v2533_v3   ;;  %v3055_v28 = vstv %s2110_s17 }
 0x17f   :  { %4009 = vst [vmem:[#allocation33_spill] sm:$0xff] %v3055_v28 }
 0x180   :  { %v2926_v38 = vpop.permute.xlu0 %498 }
 0x182   :  { %2302 = vset.pattern.permute.xlu1 %v2455_v53 }
 0x183   :  { %1197 = vperm.xlu1 %2302, %v2533_v3  }
 0x185   :  { %v2930_v18 = vpop.permute.xlu0 %1059 }
 0x187   :  { %v2932_v16 = vpop.eup %2355  ;;  %2304 = vset.pattern.permute.xlu1 %v2456_v17 }
 0x188   :  { %3998 = vst [vmem:[#allocation22_spill] sm:$0xff] %v2932_v16  ;;  %682 = vperm.xlu1 %2304, %v2538_v4   ;;  %v473_v30 = vsel %vm442_vm9, %v2932_v16, 0.0 }
 0x189   :  { %474 = vadd.xlane.f32.xlu0 %v473_v30 }
 0x18a   :  { %v2938_v52 = vpop.permute.xlu0 %1097 }
 0x18c   :  { %2305 = vset.pattern.permute.xlu1 %v2457_v51 }
 0x18d   :  { %1231 = vperm.xlu1 %2305, %v2524_v1   ;;  %v2956_v1 = vpop.permute.xlu1 %540 }
 0x18e   :  { %v2942_v31 = vpop.permute.xlu0 %1105  ;;  %v555_v36 = vadd.f32 %v2956_v1, %v3050_v10 }
 0x18f   :  { %3999 = vst [vmem:[#allocation23_spill] sm:$0xff] %v2942_v31 }
 0x190   :  { %vm559_vm0 = vcmp.gt.f32.partialorder %v555_v36, 0.0 }
 0x191   :  { %2307 = vset.pattern.permute.xlu1 %v2456_v17  ;;  %v2976_v17 = vld [vmem:[%s3883_s1 + $0x18] sm:$0xff] }
 0x192   :  { %686 = vperm.xlu1 %2307, %v2519_v0   ;;  %4002 = vst [vmem:[#allocation26_spill] sm:$0xff] %v2976_v17 }
 0x193   :  { %v2946_v34 = vpop.permute.xlu0 %1139 }
 0x194   :  { %4000 = vst [vmem:[#allocation24_spill] sm:$0xff] %v2946_v34 }
 0x196   :  { %690 = vperm.xlu1 %2307, %v2533_v3  }
 0x198   :  { %v599_v33 = vpop.permute.xlu0 %598 }
 0x199   :  { %v604_v25 = vadd.f32 %v599_v33, %v3018_v59  ;;  %v3059_v33 = vrot.slane %v3042_v29, %v2573_v15  ;;  %v563_v15 = vmul.f32 0.2, %v555_v36 }
 0x19a   :  { %2308 = vset.pattern.permute.xlu1 %v2457_v51  ;;  %v2983_v51 = vld [vmem:[%s3883_s1 + $0x10] sm:$0xff] }
 0x19b   :  { %1243 = vperm.xlu1 %2308, %v2533_v3   ;;  %v2965_v3 = vld [vmem:[%s3883_s1] sm:$0xff]  ;;  %v612_v30 = vmul.f32 0.2, %v604_v25  ;;  %4010 = vst [vmem:[#allocation34_spill] sm:$0xff] %v3059_v33  ;;  %vm608_vm14 = vcmp.gt.f32.partialorder %v604_v25, 0.0 }
 0x19d   :  { %v2951_v50 = vpop.permute.xlu0 %632  ;;  %v616_v1 = vsel %vm608_vm14, %v604_v25, %v612_v30  ;;  %v3125_v25 = vrot.slane %v2890_v11, %v2645_v5 }
 0x19f   :  { %2310 = vset.pattern.permute.xlu1 %v2458_v58  ;;  %1549 = vperm.xlu0 %2329, %v2519_v0   ;;  %4013 = vst [vmem:[#allocation37_spill] sm:$0xff] %v3125_v25 }
 0x1a0   :  { %728 = vperm.xlu1 %2310, %v2538_v4   ;;  %v2971_v4 = vpop.permute.xlu1 %544 }
 0x1a1   :  { %4001 = vst [vmem:[#allocation25_spill] sm:$0xff] %v2971_v4 }
 0x1a2   :  { %v2958_v53 = vpop.permute.xlu0 %1189 }
 0x1a3   :  { %2330 = vset.pattern.permute.xlu0 %v3898_v37  ;;  %v3075_v37 = vstv %s2131_s20  ;;  %s2148_s20 = sld [smem:[#allocation2 + $0x183]] }
 0x1a4   :  { %2311 = vset.pattern.permute.xlu1 %v2459_v61  ;;  %1583 = vperm.xlu0 %2330, %v2965_v3   ;;  %v2989_v40 = vpop.permute.xlu1 %1051 }
 0x1a5   :  { %1277 = vperm.xlu1 %2311, %v2965_v3   ;;  %4003 = vst [vmem:[#allocation27_spill] sm:$0xff] %v2989_v40  ;;  %v4015_v40 = vmov 22  }
 0x1a6   :  { %v2969_v0 = vpop.permute.xlu0 %1193 }
 0x1a8   :  { %1595 = vperm.xlu0 %2330, %v2976_v17   ;;  %v3004_v48 = vpop.permute.xlu1 %1055 }
 0x1a9   :  { %2313 = vset.pattern.permute.xlu1 %v2458_v58  ;;  %v3896_v58 = vmov 27  }
 0x1aa   :  { %732 = vperm.xlu1 %2313, %v2983_v51  }
 0x1ab   :  { %v2986_v12 = vpop.permute.xlu0 %678 }
 0x1ac   :  { %2334 = vset.pattern.permute.xlu0 %v3897_v14  ;;  %v3073_v14 = vrot.slane %v3042_v29, %v2610_v41  ;;  %v3090_v41 = vrot.slane %v2890_v11, %v2615_v43 }
 0x1ad   :  { %1637 = vperm.xlu0 %2334, %v2983_v51  }
 0x1ae   :  { %736 = vperm.xlu1 %2313, %v2976_v17   ;;  %4011 = vst [vmem:[#allocation35_spill] sm:$0xff] %v3090_v41 }
 0x1b0   :  { %v2993_v35 = vpop.permute.xlu0 %1235 }
 0x1b1   :  { %2336 = vset.pattern.permute.xlu0 %v3896_v58  ;;  %v3069_v58 = vstv %s2130_s19 }
 0x1b2   :  { %2314 = vset.pattern.permute.xlu1 %v2459_v61  ;;  %1679 = vperm.xlu0 %2336, %v3000_v6  }
 0x1b3   :  { %1289 = vperm.xlu1 %2314, %v2976_v17  }
 0x1b4   :  { %v3006_v57 = vpop.permute.xlu0 %1239 }
 0x1b6   :  { %2337 = vset.pattern.permute.xlu0 %v3895_v20 }
 0x1b7   :  { %2316 = vset.pattern.permute.xlu1 %v2460_v55  ;;  %1721 = vperm.xlu0 %2337, %v2965_v3  }
 0x1b8   :  { %774 = vperm.xlu1 %2316, %v3000_v6   ;;  %v3012_v61 = vpop.xlane.xlu1 %453 }
 0x1b9   :  { %4004 = vst [vmem:[#allocation28_spill] sm:$0xff] %v3012_v61  ;;  %v3014_v23 = vpop.permute.xlu0 %724 }
 0x1bb   :  { %1733 = vperm.xlu0 %2337, %v2976_v17  }
 0x1bc   :  { %2317 = vset.pattern.permute.xlu1 %v3906_v46  ;;  %v3022_v42 = vpop.permute.xlu1 %1093  ;;  %v3086_v46 = vstv %s3025_s21  ;;  %s2149_s21 = sld [smem:[#allocation2 + $0x184]] }
 0x1bd   :  { %4006 = vst [vmem:[#allocation30_spill] sm:$0xff] %v3022_v42  ;;  %1323 = vperm.xlu1 %2317, %v2965_v3   ;;  %v3145_v42 = vstv %s3067_s28 }
 0x1be   :  { %v3027_v60 = vpop.permute.xlu0 %1281 }
 0x1bf   :  { %2340 = vset.pattern.permute.xlu0 %v3894_v7  ;;  %v3061_v7 = vstv %s2129_s18 }
 0x1c0   :  { %v3037_v32 = vpop.permute.xlu1 %548  ;;  %1771 = vperm.xlu0 %2340, %v3000_v6  }
 0x1c1   :  { %4007 = vst [vmem:[#allocation31_spill] sm:$0xff] %v3037_v32  ;;  %2319 = vset.pattern.permute.xlu1 %v2460_v55  ;;  %v3065_v55 = vrot.slane %v3042_v29, %v2590_v24  ;;  %v3112_v24 = vstv %s3034_s24  ;;  %v3162_v32 = vrot.slane %v3042_v29, %v2653_v8  ;;  %s3583_s24 = sld [smem:[#allocation2 + $0x187]] }
 0x1c2   :  { %778 = vperm.xlu1 %2319, %v2983_v51   ;;  %v3053_v39 = vpop.permute.xlu0 %1285 }
 0x1c3   :  { %v1109_v45 = vadd.f32 %v2938_v52, %v3065_v55  ;;  %v1067_v52 = vadd.f32 %v3004_v48, %v3059_v33 }
 0x1c4   :  { %v553_v20 = vpop.permute.xlu1 %552  ;;  %2341 = vset.pattern.permute.xlu0 %v3908_v63  ;;  %v513_v63 = vadd.f32 %v2926_v38, %v2895_v44  ;;  %v3118_v44 = vrot.slane %v3042_v29, %v2640_v62  ;;  %v3121_v38 = vstv %s3044_s27 }
 0x1c5   :  { %v558_v56 = vadd.f32 %v553_v20, %v3050_v10  ;;  %v3094_v20 = vrot.slane %v3042_v29, %v2615_v43  ;;  %1813 = vperm.xlu0 %2341, %v2965_v3   ;;  %v3109_v43 = vrot.slane %v2890_v11, %v2640_v62  ;;  %v622_v62 = vmul.f32 %v3086_v46, %v616_v1 }
 0x1c6   :  { %782 = vperm.xlu1 %2319, %v2976_v17   ;;  %vm517_vm1 = vcmp.gt.f32.partialorder %v513_v63, 0.0  ;;  %v1117_v48 = vmul.f32 0.2, %v1109_v45  ;;  %vm1113_vm2 = vcmp.gt.f32.partialorder %v1109_v45, 0.0  ;;  %vm1071_vm3 = vcmp.gt.f32.partialorder %v1067_v52, 0.0 }
 0x1c7   :  { %vm562_vm15 = vcmp.gt.f32.partialorder %v558_v56, 0.0  ;;  %v566_v16 = vmul.f32 0.2, %v558_v56  ;;  %v771_v13 = vpop.permute.xlu0 %770  ;;  %4012 = vst [vmem:[#allocation36_spill] sm:$0xff] %v3109_v43 }
 0x1c9   :  { %v570_v30 = vsel %vm562_vm15, %v558_v56, %v566_v16  ;;  %v3127_v21 = vpop.permute.xlu1 %1063  ;;  %1825 = vperm.xlu0 %2341, %v2976_v17   ;;  %v521_v56 = vmul.f32 0.2, %v513_v63  ;;  %v3139_v16 = vrot.slane %v3042_v29, %v2645_v5  ;;  %v3158_v5 = vstv %s3081_s30 }
 0x1ca   :  { %4014 = vst [vmem:[#allocation38_spill] sm:$0xff] %v3127_v21  ;;  %v576_v34 = vmul.f32 %v3055_v28, %v570_v30  ;;  %2320 = vset.pattern.permute.xlu1 %v4015_v40  ;;  %v3155_v40 = vrot.slane %v2890_v11, %v2653_v8  ;;  %v1068_v8 = vadd.f32 %v2930_v18, %v3059_v33 }
 0x1cb   :  { %1335 = vperm.xlu1 %2320, %v2976_v17   ;;  %v567_v17 = vsel %vm559_vm0, %v555_v36, %v563_v15  ;;  %v525_v4 = vsel %vm517_vm1, %v513_v63, %v521_v56  ;;  %v1201_v15 = vadd.f32 %v2958_v53, %v3094_v20  ;;  %v4018_v36 = vmov 15   ;;  %v4020_v56 = vld [vmem:[#allocation12_spill] sm:$0xff] }
 0x1cc   :  { %v580_v1 = vadd.f32 %v576_v34, %v2921_v22  ;;  %v3148_v30 = vpop.permute.xlu0 %1327  ;;  %4016 = vst [vmem:[#allocation39_spill] sm:$0xff] %v3155_v40  ;;  %v647_v22 = vadd.f32 %v2951_v50, %v3090_v41  ;;  %v3925_v34 = vmov 31   ;;  %v1075_v50 = vmul.f32 0.2, %v1067_v52 }
 0x1cd   :  { %2344 = vset.pattern.permute.xlu0 %v3925_v34  ;;  %v693_v34 = vadd.f32 %v2986_v12, %v3109_v43  ;;  %v3188_v18 = vrot.slane %v2890_v11, %v4020_v56  ;;  %v739_v53 = vadd.f32 %v3014_v23, %v3125_v25  ;;  %v573_v12 = vmul.f32 %v3055_v28, %v567_v17 }
 0x1ce   :  { %v3167_v21 = vpop.permute.xlu1 %1101  ;;  %v3169_v31 = vadd.f32 %v622_v62, %v580_v1  ;;  %1863 = vperm.xlu0 %2344, %v3000_v6   ;;  %v3182_v62 = vstv %s3114_s2  ;;  %v3194_v1 = vrot.slane %v3042_v29, %v4020_v56  ;;  %v531_v43 = vmul.f32 %v2900_v47, %v525_v4 }
 0x1cf   :  { %2321 = vset.pattern.permute.xlu1 %v4018_v36  ;;  %4019 = vst [vmem:[#allocation41_spill] sm:$0xff] %v3182_v62  ;;  %4021 = vst [vmem:[#allocation42_spill] sm:$0xff] %v3188_v18  ;;  %v1121_v41 = vsel %vm1113_vm2, %v1109_v45, %v1117_v48  ;;  %v655_v33 = vmul.f32 0.2, %v647_v22  ;;  %vm1072_vm4 = vcmp.gt.f32.partialorder %v1068_v8, 0.0  ;;  %vm651_vm8 = vcmp.gt.f32.partialorder %v647_v22, 0.0 }
 0x1d0   :  { %4017 = vst [vmem:[#allocation40_spill] sm:$0xff] %v3169_v31  ;;  %820 = vperm.xlu1 %2321, %v3000_v6   ;;  %v3184_v63 = vpop.permute.xlu0 %1331  ;;  %4022 = vst [vmem:[#allocation43_spill] sm:$0xff] %v3194_v1  ;;  %v3197_v31 = vstv %s3129_s8  ;;  %v1209_v11 = vmul.f32 0.2, %v1201_v15  ;;  %v785_v10 = vadd.f32 %v771_v13, %v3155_v40  ;;  %v1079_v23 = vsel %vm1071_vm3, %v1067_v52, %v1075_v50 }
 0x1d1   :  { %4023 = vst [vmem:[#allocation44_spill] sm:$0xff] %v3197_v31  ;;  %vm1205_vm11 = vcmp.gt.f32.partialorder %v1201_v15, 0.0  ;;  %v701_v25 = vmul.f32 0.2, %v693_v34  ;;  %v4024_v56 = vmov 23   ;;  %v1127_v17 = vmul.f32 %v3069_v58, %v1121_v41 }
 0x1d2   :  { %v1076_v61 = vmul.f32 0.2, %v1068_v8  ;;  %vm697_vm12 = vcmp.gt.f32.partialorder %v693_v34, 0.0  ;;  %v747_v47 = vmul.f32 0.2, %v739_v53  ;;  %v659_v4 = vsel %vm651_vm8, %v647_v22, %v655_v33 }
 0x1d3   :  { %v587_v9 = vpop.permute.xlu1 %586  ;;  %vm743_vm13 = vcmp.gt.f32.partialorder %v739_v53, 0.0  ;;  %v577_v48 = vadd.f32 %v573_v12, %v531_v43  ;;  %v1085_v52 = vmul.f32 %v3061_v7, %v1079_v23  ;;  %v1213_v50 = vsel %vm1205_vm11, %v1201_v15, %v1209_v11 }
 0x1d4   :  { %v601_v29 = vadd.f32 %v587_v9, %v3018_v59  ;;  %2322 = vset.pattern.permute.xlu1 %v4024_v56  ;;  %v793_v9 = vmul.f32 0.2, %v785_v10  ;;  %v705_v28 = vsel %vm697_vm12, %v693_v34, %v701_v25  ;;  %v1247_v41 = vadd.f32 %v2993_v35, %v3118_v44 }
 0x1d5   :  { %1369 = vperm.xlu1 %2322, %v2965_v3   ;;  %v1374_v45 = vpop.permute.xlu0 %1373  ;;  %vm789_vm15 = vcmp.gt.f32.partialorder %v785_v10, 0.0  ;;  %v1080_v26 = vsel %vm1072_vm4, %v1068_v8, %v1076_v61  ;;  %v665_v33 = vmul.f32 %v3102_v54, %v659_v4  ;;  %v751_v22 = vsel %vm743_vm13, %v739_v53, %v747_v47 }
 0x1d6   :  { %vm605_vm14 = vcmp.gt.f32.partialorder %v601_v29, 0.0  ;;  %v609_v13 = vmul.f32 0.2, %v601_v29  ;;  %v4025_v12 = vmov 24   ;;  %v1131_v23 = vadd.f32 %v1127_v17, %v1085_v52 }
 0x1d7   :  { %v3209_v40 = vpop.permute.xlu1 %590  ;;  %v1219_v15 = vmul.f32 %v3105_v27, %v1213_v50  ;;  %v1202_v25 = vadd.f32 %v2969_v0, %v3094_v20  ;;  %v1293_v35 = vadd.f32 %v3027_v60, %v3139_v16  ;;  %v711_v8 = vmul.f32 %v3112_v24, %v705_v28 }
 0x1d8   :  { %v613_v59 = vsel %vm605_vm14, %v601_v29, %v609_v13  ;;  %v797_v61 = vsel %vm789_vm15, %v785_v10, %v793_v9  ;;  %vm1251_vm0 = vcmp.gt.f32.partialorder %v1247_v41, 0.0  ;;  %v1255_v11 = vmul.f32 0.2, %v1247_v41 }
 0x1d9   :  { %v619_v43 = vmul.f32 %v3086_v46, %v613_v59  ;;  %2325 = vset.pattern.permute.xlu1 %v4025_v12  ;;  %v757_v29 = vmul.f32 %v3145_v42, %v751_v22  ;;  %v1339_v17 = vadd.f32 %v3148_v30, %v3162_v32  ;;  %v1110_v60 = vadd.f32 %v3167_v21, %v3065_v55 }
 0x1da   :  { %1541 = vperm.xlu1 %2325, %v2965_v3   ;;  %v817_v34 = vpop.permute.xlu0 %816  ;;  %vm1206_vm2 = vcmp.gt.f32.partialorder %v1202_v25, 0.0  ;;  %v1301_v10 = vmul.f32 0.2, %v1293_v35  ;;  %v803_v4 = vmul.f32 %v3158_v5, %v797_v61  ;;  %v1210_v50 = vmul.f32 0.2, %v1202_v25 }
 0x1db   :  { %v623_v53 = vadd.f32 %v619_v43, %v577_v48  ;;  %v831_v59 = vadd.f32 %v817_v34, %v3188_v18  ;;  %v1385_v48 = vadd.f32 %v1374_v45, %v3194_v1  ;;  %v1259_v9 = vsel %vm1251_vm0, %v1247_v41, %v1255_v11 }
 0x1dc   :  { %v1144_v0 = vpop.permute.xlu1 %1143  ;;  %vm1297_vm4 = vcmp.gt.f32.partialorder %v1293_v35, 0.0  ;;  %v1347_v22 = vmul.f32 0.2, %v1339_v17  ;;  %vm1114_vm8 = vcmp.gt.f32.partialorder %v1110_v60, 0.0  ;;  %vm1343_vm11 = vcmp.gt.f32.partialorder %v1339_v17, 0.0 }
 0x1dd   :  { %v669_v47 = vadd.f32 %v665_v33, %v623_v53  ;;  %v1155_v28 = vadd.f32 %v1144_v0, %v3073_v14  ;;  %vm835_vm1 = vcmp.gt.f32.partialorder %v831_v59, 0.0  ;;  %v839_v13 = vmul.f32 0.2, %v831_v59 }
 0x1de   :  { %1545 = vperm.xlu1 %2325, %v3000_v6   ;;  %v1118_v33 = vmul.f32 0.2, %v1110_v60  ;;  %v4026_v0 = vmov 25   ;;  %v1248_v41 = vadd.f32 %v3006_v57, %v3118_v44  ;;  %vm1389_vm12 = vcmp.gt.f32.partialorder %v1385_v48, 0.0 }
 0x1df   :  { %vm1159_vm3 = vcmp.gt.f32.partialorder %v1155_v28, 0.0  ;;  %v1163_v30 = vmul.f32 0.2, %v1155_v28  ;;  %v715_v52 = vadd.f32 %v711_v8, %v669_v47  ;;  %v843_v21 = vsel %vm835_vm1, %v831_v59, %v839_v13 }
 0x1e0   :  { %v849_v45 = vmul.f32 %v3197_v31, %v843_v21  ;;  %v1305_v8 = vsel %vm1297_vm4, %v1293_v35, %v1301_v10  ;;  %v1393_v59 = vmul.f32 0.2, %v1385_v48  ;;  %v1265_v47 = vmul.f32 %v3121_v38, %v1259_v9 }
 0x1e1   :  { %v1167_v43 = vsel %vm1159_vm3, %v1155_v28, %v1163_v30  ;;  %v3237_v34 = vpop.permute.xlu1 %594  ;;  %v761_v61 = vadd.f32 %v757_v29, %v715_v52  ;;  %v3247_v28 = vstv %s3228_s0  ;;  %v1086_v13 = vmul.f32 %v3061_v7, %v1080_v26 }
 0x1e2   :  { %v1173_v53 = vmul.f32 %v3075_v37, %v1167_v43  ;;  %2326 = vset.pattern.permute.xlu1 %v4026_v0  ;;  %4027 = vst [vmem:[#allocation45_spill] sm:$0xff] %v3247_v28  ;;  %v1214_v30 = vsel %vm1206_vm2, %v1202_v25, %v1210_v50  ;;  %v1122_v52 = vsel %vm1114_vm8, %v1110_v60, %v1118_v33  ;;  %vm1252_vm13 = vcmp.gt.f32.partialorder %v1248_v41, 0.0 }
 0x1e3   :  { %1587 = vperm.xlu1 %2326, %v3000_v6   ;;  %v807_v11 = vadd.f32 %v803_v4, %v761_v61  ;;  %v1351_v21 = vsel %vm1343_vm11, %v1339_v17, %v1347_v22  ;;  %v1311_v57 = vmul.f32 %v3151_v19, %v1305_v8  ;;  %v1294_v35 = vadd.f32 %v3053_v39, %v3139_v16 }
 0x1e4   :  { %v1177_v29 = vadd.f32 %v1173_v53, %v1131_v23  ;;  %v1256_v43 = vmul.f32 0.2, %v1248_v41  ;;  %v1397_v61 = vsel %vm1389_vm12, %v1385_v48, %v1393_v59  ;;  %v1128_v26 = vmul.f32 %v3069_v58, %v1122_v52 }
 0x1e5   :  { %v853_v9 = vadd.f32 %v849_v45, %v807_v11  ;;  %v1357_v25 = vmul.f32 %v3182_v62, %v1351_v21  ;;  %v1340_v17 = vadd.f32 %v3184_v63, %v3162_v32  ;;  %v1302_v60 = vmul.f32 0.2, %v1294_v35 }
 0x1e6   :  { %v1223_v10 = vadd.f32 %v1219_v15, %v1177_v29  ;;  %v1148_v4 = vpop.permute.xlu1 %1147  ;;  %v1403_v50 = vmul.f32 %v3247_v28, %v1397_v61  ;;  %v1220_v22 = vmul.f32 %v3105_v27, %v1214_v30  ;;  %v1260_v53 = vsel %vm1252_vm13, %v1248_v41, %v1256_v43  ;;  %v4030_v61 = vld [vmem:[#allocation15_spill] sm:$0xff] }
 0x1e7   :  { %v1156_v23 = vadd.f32 %v1148_v4, %v3073_v14  ;;  %2327 = vset.pattern.permute.xlu1 %v4018_v36  ;;  %v3266_v33 = vsel %vm2757_vm7, %v853_v9, -1e+30  ;;  %vm1298_vm15 = vcmp.gt.f32.partialorder %v1294_v35, 0.0  ;;  %v1132_v45 = vadd.f32 %v1128_v26, %v1086_v13 }
 0x1e8   :  { %824 = vperm.xlu1 %2327, %v2983_v51   ;;  %v1269_v39 = vadd.f32 %v1265_v47, %v1223_v10  ;;  %4028 = vst [vmem:[#allocation46_spill] sm:$0xff] %v3266_v33  ;;  %v1348_v8 = vmul.f32 0.2, %v1340_v17  ;;  %vm1344_vm0 = vcmp.gt.f32.partialorder %v1340_v17, 0.0  ;;  %v861_v47 = vsel %vm442_vm9, %v3266_v33, -inf }
 0x1e9   :  { %vm1160_vm14 = vcmp.gt.f32.partialorder %v1156_v23, 0.0  ;;  %v1164_v15 = vmul.f32 0.2, %v1156_v23  ;;  %v1306_v29 = vsel %vm1298_vm15, %v1294_v35, %v1302_v60  ;;  %v1266_v41 = vmul.f32 %v3121_v38, %v1260_v53 }
 0x1ea   :  { %v1152_v48 = vpop.permute.xlu1 %1151  ;;  %v1315_v36 = vadd.f32 %v1311_v57, %v1269_v39  ;;  %v1352_v57 = vsel %vm1344_vm0, %v1340_v17, %v1348_v8  ;;  %v1312_v10 = vmul.f32 %v3151_v19, %v1306_v29  ;;  %v456_v35 = vsub.f32 %v4030_v61, %v2908_v49  ;;  %v4032_v39 = vld [vmem:[#allocation28_spill] sm:$0xff] }
 0x1eb   :  { %v1168_v63 = vsel %vm1160_vm14, %v1156_v23, %v1164_v15  ;;  %v1358_v4 = vmul.f32 %v3182_v62, %v1352_v57  ;;  %v4033_v15 = vld [vmem:[#allocation18_spill] sm:$0xff] }
 0x1ec   :  { %v1174_v59 = vmul.f32 %v3075_v37, %v1168_v63  ;;  %2328 = vset.pattern.permute.xlu1 %v4024_v56  ;;  %v1361_v11 = vadd.f32 %v1357_v25, %v1315_v36  ;;  %v461_v25 = vmul.f32 1.442695, %v456_v35  ;;  %v458_v17 = vsub.f32 %v4033_v15, %v4032_v39  ;;  %v4041_v39 = vld [vmem:[#allocation26_spill] sm:$0xff] }
 0x1ed   :  { %862 = vmax.xlane.f32.xlu0 %v861_v47 }
 0x1ee   :  { %v1178_v52 = vadd.f32 %v1174_v59, %v1132_v45  ;;  %v3274_v21 = vadd.f32 %v1403_v50, %v1361_v11  ;;  %2357 = vpow2.f32 %v461_v25  ;;  %v465_v50 = vmul.f32 1.442695, %v458_v17 }
 0x1ef   :  { %v637_v30 = vpop.permute.xlu1 %636  ;;  %v1157_v25 = vadd.f32 %v1152_v48, %v3073_v14 }
 0x1f0   :  { %4029 = vst [vmem:[#allocation47_spill] sm:$0xff] %v3274_v21  ;;  %v1224_v13 = vadd.f32 %v1220_v22, %v1178_v52  ;;  %2359 = vpow2.f32 %v465_v50  ;;  %v4036_v52 = vld [vmem:[#allocation32_spill] sm:$0xff]  ;;  %v4045_v21 = vld [vmem:[#allocation31_spill] sm:$0xff] }
 0x1f1   :  { %vm1161_vm4 = vcmp.gt.f32.partialorder %v1157_v25, 0.0 }
 0x1f2   :  { %v1270_v56 = vadd.f32 %v1266_v41, %v1224_v13  ;;  %v4037_v41 = vld [vmem:[#allocation25_spill] sm:$0xff]  ;;  %v4038_v13 = vld [vmem:[#allocation23_spill] sm:$0xff] }
 0x1f3   :  { %v556_v57 = vadd.f32 %v4037_v41, %v4036_v52 }
 0x1f4   :  { %v3279_v9 = vpop.permute.xlu1 %1185  ;;  %v1316_v43 = vadd.f32 %v1312_v10, %v1270_v56  ;;  %v1111_v10 = vadd.f32 %v4038_v13, %v3065_v55  ;;  %v4040_v56 = vld [vmem:[#allocation38_spill] sm:$0xff]  ;;  %v1165_v13 = vmul.f32 0.2, %v1157_v25 }
 0x1f5   :  { %v564_v61 = vmul.f32 0.2, %v556_v57  ;;  %vm560_vm1 = vcmp.gt.f32.partialorder %v556_v57, 0.0 }
 0x1f6   :  { %v3283_v23 = vadd.f32 %v1358_v4, %v1316_v43  ;;  %v4039_v4 = vld [vmem:[#allocation34_spill] sm:$0xff]  ;;  %v1119_v15 = vmul.f32 0.2, %v1111_v10  ;;  %vm1115_vm2 = vcmp.gt.f32.partialorder %v1111_v10, 0.0 }
 0x1f7   :  { %v1069_v43 = vadd.f32 %v4040_v56, %v4039_v4 }
 0x1f8   :  { %4031 = vst [vmem:[#allocation15_spill] sm:$0xff] %v3283_v23  ;;  %v3291_v53 = vpop.eup %2357  ;;  %v1123_v48 = vsel %vm1115_vm2, %v1111_v10, %v1119_v15  ;;  %v4043_v23 = vld [vmem:[#allocation35_spill] sm:$0xff] }
 0x1f9   :  { %v3285_v26 = vpop.permute.xlu1 %640  ;;  %4034 = vst [vmem:[#allocation28_spill] sm:$0xff] %v3291_v53  ;;  %v470_v49 = vsel %vm442_vm9, %v3291_v53, 0.0  ;;  %v1077_v17 = vmul.f32 0.2, %v1069_v43  ;;  %vm1073_vm3 = vcmp.gt.f32.partialorder %v1069_v43, 0.0  ;;  %v4044_v53 = vld [vmem:[#allocation33_spill] sm:$0xff]  ;;  %v1129_v28 = vmul.f32 %v3069_v58, %v1123_v48 }
 0x1fa   :  { %v3295_v63 = vpop.eup %2359 }
 0x1fb   :  { %4035 = vst [vmem:[#allocation18_spill] sm:$0xff] %v3295_v63  ;;  %v476_v8 = vsel %vm442_vm9, %v3295_v63, 0.0  ;;  %v648_v63 = vadd.f32 %v637_v30, %v4043_v23 }
 0x1fd   :  { %v3289_v60 = vpop.permute.xlu1 %644  ;;  %v656_v1 = vmul.f32 0.2, %v648_v63  ;;  %vm652_vm13 = vcmp.gt.f32.partialorder %v648_v63, 0.0 }
 0x1ff   :  { %v660_v62 = vsel %vm652_vm13, %v648_v63, %v656_v1 }
 0x200   :  { %v666_v63 = vmul.f32 %v3102_v54, %v660_v62 }
 0x202   :  { %v1198_v36 = vpop.permute.xlu1 %1197 }
 0x203   :  { %v1203_v50 = vadd.f32 %v1198_v36, %v3094_v20 }
 0x205   :  { %vm1207_vm8 = vcmp.gt.f32.partialorder %v1203_v50, 0.0 }
 0x207   :  { %v683_v22 = vpop.permute.xlu1 %682 }
 0x20c   :  { %v3297_v45 = vpop.permute.xlu1 %1231  ;;  %471 = vadd.xlane.f32.xlu1 %v470_v49  ;;  %v568_v49 = vsel %vm560_vm1, %v556_v57, %v564_v61  ;;  %v1081_v57 = vsel %vm1073_vm3, %v1069_v43, %v1077_v17  ;;  %v1211_v61 = vmul.f32 0.2, %v1203_v50  ;;  %v4047_v43 = vld [vmem:[#allocation37_spill] sm:$0xff] }
 0x20d   :  { %v574_v36 = vmul.f32 %v4044_v53, %v568_v49  ;;  %v1087_v30 = vmul.f32 %v3061_v7, %v1081_v57 }
 0x20e   :  { %v1215_v49 = vsel %vm1207_vm8, %v1203_v50, %v1211_v61  ;;  %v4049_v61 = vmov 26  }
 0x210   :  { %477 = vadd.xlane.f32.xlu1 %v476_v8  ;;  %v4042_v8 = vld [vmem:[#allocation29_spill] sm:$0xff] }
 0x211   :  { %v3301_v59 = vpop.permute.xlu1 %686  ;;  %v602_v41 = vadd.f32 %v3209_v40, %v4042_v8  ;;  %v557_v40 = vadd.f32 %v4045_v21, %v4036_v52  ;;  %v4048_v21 = vld [vmem:[#allocation19_spill] sm:$0xff]  ;;  %v603_v57 = vadd.f32 %v3237_v34, %v4042_v8 }
 0x212   :  { %v578_v52 = vadd.f32 %v574_v36, %v4048_v21 }
 0x213   :  { %v610_v2 = vmul.f32 0.2, %v602_v41  ;;  %vm606_vm11 = vcmp.gt.f32.partialorder %v602_v41, 0.0  ;;  %vm561_vm14 = vcmp.gt.f32.partialorder %v557_v40, 0.0  ;;  %v611_v1 = vmul.f32 0.2, %v603_v57 }
 0x214   :  { %vm607_vm2 = vcmp.gt.f32.partialorder %v603_v57, 0.0 }
 0x215   :  { %v3303_v11 = vpop.permute.xlu1 %690  ;;  %v614_v48 = vsel %vm606_vm11, %v602_v41, %v610_v2  ;;  %v649_v2 = vadd.f32 %v3285_v26, %v4043_v23 }
 0x216   :  { %v620_v50 = vmul.f32 %v3086_v46, %v614_v48 }
 0x217   :  { %v657_v48 = vmul.f32 0.2, %v649_v2  ;;  %vm653_vm3 = vcmp.gt.f32.partialorder %v649_v2, 0.0 }
 0x21a   :  { %v1244_v47 = vpop.permute.xlu1 %1243 }
 0x21b   :  { %v1249_v56 = vadd.f32 %v1244_v47, %v3118_v44  ;;  %v4046_v47 = vld [vmem:[#allocation36_spill] sm:$0xff] }
 0x21c   :  { %v694_v31 = vadd.f32 %v683_v22, %v4046_v47  ;;  %v565_v22 = vmul.f32 0.2, %v557_v40  ;;  %v695_v26 = vadd.f32 %v3301_v59, %v4046_v47 }
 0x21d   :  { %v1257_v10 = vmul.f32 0.2, %v1249_v56  ;;  %vm1253_vm12 = vcmp.gt.f32.partialorder %v1249_v56, 0.0 }
 0x21e   :  { %vm698_vm15 = vcmp.gt.f32.partialorder %v694_v31, 0.0  ;;  %vm699_vm8 = vcmp.gt.f32.partialorder %v695_v26, 0.0 }
 0x21f   :  { %v729_v29 = vpop.permute.xlu1 %728  ;;  %v1261_v18 = vsel %vm1253_vm12, %v1249_v56, %v1257_v10 }
 0x220   :  { %v740_v17 = vadd.f32 %v729_v29, %v4047_v43  ;;  %v1133_v29 = vadd.f32 %v1129_v28, %v1087_v30  ;;  %v1267_v28 = vmul.f32 %v3121_v38, %v1261_v18 }
 0x221   :  { %1377 = vperm.xlu1 %2328, %v2983_v51  }
 0x222   :  { %v748_v36 = vmul.f32 0.2, %v740_v17  ;;  %vm744_vm0 = vcmp.gt.f32.partialorder %v740_v17, 0.0 }
 0x224   :  { %v3312_v35 = vpop.permute.xlu1 %1277  ;;  %v752_v30 = vsel %vm744_vm0, %v740_v17, %v748_v36  ;;  %v703_v17 = vmul.f32 0.2, %v695_v26 }
 0x225   :  { %1381 = vperm.xlu1 %2328, %v4041_v39   ;;  %v758_v59 = vmul.f32 %v3145_v42, %v752_v30 }
 0x229   :  { %v3320_v33 = vpop.permute.xlu1 %732  ;;  %2331 = vset.pattern.permute.xlu1 %v4025_v12  ;;  %v1169_v12 = vsel %vm1161_vm4, %v1157_v25, %v1165_v13  ;;  %v702_v13 = vmul.f32 0.2, %v694_v31 }
 0x22a   :  { %1553 = vperm.xlu1 %2331, %v4041_v39   ;;  %v1175_v25 = vmul.f32 %v3075_v37, %v1169_v12  ;;  %v569_v12 = vsel %vm561_vm14, %v557_v40, %v565_v22 }
 0x22b   :  { %v706_v8 = vsel %vm698_vm15, %v694_v31, %v702_v13  ;;  %v4050_v13 = vld [vmem:[#allocation39_spill] sm:$0xff] }
 0x22c   :  { %v1179_v34 = vadd.f32 %v1175_v25, %v1133_v29  ;;  %v712_v40 = vmul.f32 %v3112_v24, %v706_v8  ;;  %v741_v25 = vadd.f32 %v3320_v33, %v4047_v43  ;;  %v575_v33 = vmul.f32 %v4044_v53, %v569_v12 }
 0x22d   :  { %v3330_v15 = vpop.permute.xlu1 %736  ;;  %v707_v12 = vsel %vm699_vm8, %v695_v26, %v703_v17 }
 0x22e   :  { %2332 = vset.pattern.permute.xlu1 %v4026_v0  ;;  %v1221_v0 = vmul.f32 %v3105_v27, %v1215_v49  ;;  %v624_v49 = vadd.f32 %v620_v50, %v578_v52  ;;  %v4051_v50 = vld [vmem:[#allocation30_spill] sm:$0xff]  ;;  %vm745_vm11 = vcmp.gt.f32.partialorder %v741_v25, 0.0 }
 0x22f   :  { %1591 = vperm.xlu1 %2332, %v2983_v51  }
 0x230   :  { %v1225_v10 = vadd.f32 %v1221_v0, %v1179_v34  ;;  %v615_v0 = vsel %vm607_vm2, %v603_v57, %v611_v1  ;;  %v4052_v34 = vld [vmem:[#allocation27_spill] sm:$0xff]  ;;  %v661_v57 = vsel %vm653_vm3, %v649_v2, %v657_v48 }
 0x231   :  { %v1066_v8 = vadd.f32 %v4052_v34, %v4039_v4  ;;  %v667_v4 = vmul.f32 %v3102_v54, %v661_v57  ;;  %v650_v34 = vadd.f32 %v3289_v60, %v4043_v23 }
 0x232   :  { %v1290_v21 = vpop.permute.xlu1 %1289  ;;  %v1271_v18 = vadd.f32 %v1267_v28, %v1225_v10  ;;  %v749_v28 = vmul.f32 0.2, %v741_v25 }
 0x233   :  { %v1295_v41 = vadd.f32 %v1290_v21, %v3139_v16  ;;  %2333 = vset.pattern.permute.xlu1 %v4049_v61  ;;  %v670_v21 = vadd.f32 %v666_v63, %v624_v49  ;;  %vm1070_vm13 = vcmp.gt.f32.partialorder %v1066_v8, 0.0 }
 0x234   :  { %1629 = vperm.xlu1 %2333, %v2965_v3   ;;  %v753_v48 = vsel %vm745_vm11, %v741_v25, %v749_v28  ;;  %v1200_v25 = vadd.f32 %v3279_v9, %v3094_v20  ;;  %v1246_v28 = vadd.f32 %v3297_v45, %v3118_v44  ;;  %v658_v45 = vmul.f32 0.2, %v650_v34 }
 0x235   :  { %vm1299_vm1 = vcmp.gt.f32.partialorder %v1295_v41, 0.0  ;;  %v1303_v56 = vmul.f32 0.2, %v1295_v41  ;;  %v716_v61 = vadd.f32 %v712_v40, %v670_v21  ;;  %v4054_v40 = vld [vmem:[#allocation20_spill] sm:$0xff] }
 0x236   :  { %vm1204_vm0 = vcmp.gt.f32.partialorder %v1200_v25, 0.0  ;;  %vm1250_vm2 = vcmp.gt.f32.partialorder %v1246_v28, 0.0 }
 0x237   :  { %v1307_v31 = vsel %vm1299_vm1, %v1295_v41, %v1303_v56  ;;  %v775_v22 = vpop.permute.xlu1 %774  ;;  %v1108_v41 = vadd.f32 %v4051_v50, %v3065_v55  ;;  %v621_v56 = vmul.f32 %v3086_v46, %v615_v0  ;;  %v762_v30 = vadd.f32 %v758_v59, %v716_v61  ;;  %v4053_v55 = vld [vmem:[#allocation24_spill] sm:$0xff] }
 0x238   :  { %v1313_v62 = vmul.f32 %v3151_v19, %v1307_v31  ;;  %v786_v29 = vadd.f32 %v775_v22, %v4050_v13  ;;  %1633 = vperm.xlu1 %2333, %v3000_v6   ;;  %v1154_v53 = vadd.f32 %v4053_v55, %v3073_v14  ;;  %v579_v31 = vadd.f32 %v575_v33, %v4054_v40 }
 0x239   :  { %v1116_v49 = vmul.f32 0.2, %v1108_v41  ;;  %vm1112_vm12 = vcmp.gt.f32.partialorder %v1108_v41, 0.0  ;;  %v4055_v22 = vmov 27   ;;  %v1074_v46 = vmul.f32 0.2, %v1066_v8 }
 0x23a   :  { %v3358_v52 = vadd.f32 %v1313_v62, %v1271_v18  ;;  %vm790_vm4 = vcmp.gt.f32.partialorder %v786_v29, 0.0  ;;  %v794_v36 = vmul.f32 0.2, %v786_v29  ;;  %v625_v18 = vadd.f32 %v621_v56, %v579_v31 }
 0x23b   :  { %v713_v62 = vmul.f32 %v3112_v24, %v707_v12  ;;  %v1162_v26 = vmul.f32 0.2, %v1154_v53  ;;  %v1120_v0 = vsel %vm1112_vm12, %v1108_v41, %v1116_v49  ;;  %v759_v59 = vmul.f32 %v3145_v42, %v753_v48 }
 0x23c   :  { %v798_v1 = vsel %vm790_vm4, %v786_v29, %v794_v36  ;;  %v1324_v63 = vpop.permute.xlu1 %1323  ;;  %1641 = vperm.xlu1 %2333, %v4041_v39   ;;  %v671_v21 = vadd.f32 %v667_v4, %v625_v18  ;;  %vm1158_vm14 = vcmp.gt.f32.partialorder %v1154_v53, 0.0  ;;  %v1078_v36 = vsel %vm1070_vm13, %v1066_v8, %v1074_v46  ;;  %v4057_v4 = vld [vmem:[#allocation41_spill] sm:$0xff] }
 0x23d   :  { %v804_v10 = vmul.f32 %v3158_v5, %v798_v1  ;;  %v1126_v61 = vmul.f32 %v3069_v58, %v1120_v0  ;;  %v1166_v57 = vsel %vm1158_vm14, %v1154_v53, %v1162_v26  ;;  %v1084_v9 = vmul.f32 %v3061_v7, %v1078_v36 }
 0x23e   :  { %v717_v50 = vadd.f32 %v713_v62, %v671_v21  ;;  %v1208_v8 = vmul.f32 0.2, %v1200_v25  ;;  %v696_v56 = vadd.f32 %v3303_v11, %v4046_v47  ;;  %v1292_v58 = vadd.f32 %v3312_v35, %v3139_v16 }
 0x23f   :  { %v3372_v2 = vadd.f32 %v804_v10, %v762_v30  ;;  %v1172_v60 = vmul.f32 %v3075_v37, %v1166_v57  ;;  %v1130_v44 = vadd.f32 %v1126_v61, %v1084_v9  ;;  %vm654_vm1 = vcmp.gt.f32.partialorder %v650_v34, 0.0  ;;  %v3428_v9 = vld [vmem:[%s3885_s3 + $0x18] sm:$0xff]  ;;  %s2145_s3 = sld [smem:[#allocation2 + $0x180]] }
 0x240   :  { %2335 = vset.pattern.permute.xlu1 %v4055_v22  ;;  %v763_v20 = vadd.f32 %v759_v59, %v717_v50  ;;  %v1254_v30 = vmul.f32 0.2, %v1246_v28  ;;  %v742_v7 = vadd.f32 %v3330_v15, %v4047_v43  ;;  %v1338_v11 = vadd.f32 %v1324_v63, %v3162_v32  ;;  %v4058_v22 = vld [vmem:[#allocation42_spill] sm:$0xff] }
 0x241   :  { %v779_v29 = vpop.permute.xlu1 %778  ;;  %1675 = vperm.xlu1 %2335, %v2965_v3   ;;  %v1212_v55 = vsel %vm1204_vm0, %v1200_v25, %v1208_v8  ;;  %v704_v16 = vmul.f32 0.2, %v696_v56  ;;  %v1300_v35 = vmul.f32 0.2, %v1292_v58  ;;  %v4056_v53 = vmov 28  }
 0x242   :  { %v787_v14 = vadd.f32 %v779_v29, %v4050_v13  ;;  %v1176_v12 = vadd.f32 %v1172_v60, %v1130_v44  ;;  %v662_v49 = vsel %vm654_vm1, %v650_v34, %v658_v45  ;;  %vm700_vm4 = vcmp.gt.f32.partialorder %v696_v56, 0.0 }
 0x243   :  { %vm1296_vm8 = vcmp.gt.f32.partialorder %v1292_v58, 0.0  ;;  %v1258_v15 = vsel %vm1250_vm2, %v1246_v28, %v1254_v30  ;;  %v750_v43 = vmul.f32 0.2, %v742_v7  ;;  %v1218_v31 = vmul.f32 %v3105_v27, %v1212_v55 }
 0x244   :  { %vm791_vm15 = vcmp.gt.f32.partialorder %v787_v14, 0.0  ;;  %v795_v17 = vmul.f32 0.2, %v787_v14  ;;  %vm746_vm11 = vcmp.gt.f32.partialorder %v742_v7, 0.0  ;;  %vm1342_vm12 = vcmp.gt.f32.partialorder %v1338_v11, 0.0 }
 0x245   :  { %v783_v33 = vpop.permute.xlu1 %782  ;;  %1683 = vperm.xlu1 %2335, %v2983_v51   ;;  %v708_v18 = vsel %vm700_vm4, %v696_v56, %v704_v16  ;;  %v1304_v62 = vsel %vm1296_vm8, %v1292_v58, %v1300_v35  ;;  %v754_v27 = vsel %vm746_vm11, %v742_v7, %v750_v43  ;;  %v1222_v21 = vadd.f32 %v1218_v31, %v1176_v12  ;;  %v4062_v58 = vld [vmem:[#allocation45_spill] sm:$0xff] }
 0x246   :  { %v799_v41 = vsel %vm791_vm15, %v787_v14, %v795_v17  ;;  %v1264_v14 = vmul.f32 %v3121_v38, %v1258_v15  ;;  %v714_v59 = vmul.f32 %v3112_v24, %v708_v18  ;;  %v1310_v25 = vmul.f32 %v3151_v19, %v1304_v62  ;;  %v4060_v38 = vld [vmem:[#allocation40_spill] sm:$0xff] }
 0x247   :  { %v805_v1 = vmul.f32 %v3158_v5, %v799_v41  ;;  %v760_v41 = vmul.f32 %v3145_v42, %v754_v27  ;;  %v4061_v57 = vmov 29   ;;  %v4070_v31 = vmov 30  }
 0x248   :  { %v1268_v34 = vadd.f32 %v1264_v14, %v1222_v21 }
 0x249   :  { %1687 = vperm.xlu1 %2335, %v4041_v39   ;;  %v3394_v23 = vadd.f32 %v805_v1, %v763_v20  ;;  %v788_v39 = vadd.f32 %v783_v33, %v4050_v13  ;;  %v829_v13 = vpop.permute.xlu0 %828 }
 0x24a   :  { %v1336_v10 = vpop.permute.xlu1 %1335  ;;  %v834_v46 = vadd.f32 %v829_v13, %v4058_v22  ;;  %v1314_v1 = vadd.f32 %v1310_v25, %v1268_v34 }
 0x24b   :  { %v1341_v47 = vadd.f32 %v1336_v10, %v3162_v32  ;;  %v1346_v32 = vmul.f32 0.2, %v1338_v11  ;;  %v796_v29 = vmul.f32 0.2, %v788_v39  ;;  %vm792_vm13 = vcmp.gt.f32.partialorder %v788_v39, 0.0  ;;  %v4064_v10 = vld [vmem:[#allocation5_spill] sm:$0xff] }
 0x24c   :  { %vm838_vm14 = vcmp.gt.f32.partialorder %v834_v46, 0.0  ;;  %v842_v36 = vmul.f32 0.2, %v834_v46 }
 0x24d   :  { %vm1345_vm3 = vcmp.gt.f32.partialorder %v1341_v47, 0.0  ;;  %v1349_v37 = vmul.f32 0.2, %v1341_v47  ;;  %2338 = vset.pattern.permute.xlu1 %v4056_v53  ;;  %v1350_v0 = vsel %vm1342_vm12, %v1338_v11, %v1346_v32  ;;  %v800_v50 = vsel %vm792_vm13, %v788_v39, %v796_v29  ;;  %v4067_v39 = vld [vmem:[#allocation47_spill] sm:$0xff] }
 0x24e   :  { %1725 = vperm.xlu1 %2338, %v3000_v6   ;;  %v668_v6 = vmul.f32 %v3102_v54, %v662_v49  ;;  %v4059_v54 = vld [vmem:[#allocation43_spill] sm:$0xff]  ;;  %v806_v19 = vmul.f32 %v3158_v5, %v800_v50  ;;  %v846_v20 = vsel %vm838_vm14, %v834_v46, %v842_v36  ;;  %v3437_v5 = vrot.slane %v3428_v9, %v4064_v10  ;;  %v4069_v49 = vld [vmem:[#allocation6_spill] sm:$0xff]  ;;  %v3495_v36 = vld [vmem:[%s3883_s1] sm:$0xff] }
 0x24f   :  { %v1353_v63 = vsel %vm1345_vm3, %v1341_v47, %v1349_v37  ;;  %v3405_v40 = vpop.permute.xlu1 %820  ;;  %v3455_v53 = vsel %vm2800_vm5, %v4067_v39, -1e+30  ;;  %v3459_v15 = vrot.slane %v3428_v9, %v4069_v49  ;;  %v3475_v29 = vstv %s2145_s3  ;;  %4075 = vst [vmem:[#allocation34_spill] sm:$0xff] %v3495_v36  ;;  %v4077_v39 = vld [vmem:[#allocation21_spill] sm:$0xff]  ;;  %v4079_v49 = vld [vmem:[#allocation28_spill] sm:$0xff] }
 0x250   :  { %v1359_v48 = vmul.f32 %v4057_v4, %v1353_v63  ;;  %v672_v61 = vadd.f32 %v668_v6, %v4060_v38  ;;  %v1417_v13 = vsel %vm442_vm9, %v3455_v53, -inf  ;;  %v3477_v6 = vstv %s2146_s11  ;;  %s2472_s11 = smov 96  }
 0x251   :  { %v832_v50 = vadd.f32 %v3405_v40, %v4058_v22 }
 0x252   :  { %1729 = vperm.xlu1 %2338, %v2983_v51   ;;  %v3414_v26 = vadd.f32 %v1359_v48, %v3358_v52  ;;  %v1356_v52 = vmul.f32 %v4057_v4, %v1350_v0  ;;  %v718_v24 = vadd.f32 %v714_v59, %v672_v61  ;;  %v3468_v4 = vld [vmem:[%s3883_s1 + $0x8] sm:$0xff]  ;;  %v3486_v59 = vld [vmem:[%s3883_s1 + $0x10] sm:$0xff] }
 0x253   :  { %4071 = vst [vmem:[#allocation25_spill] sm:$0xff] %v3468_v4  ;;  %4073 = vst [vmem:[#allocation23_spill] sm:$0xff] %v3486_v59  ;;  %v840_v38 = vmul.f32 0.2, %v832_v50  ;;  %vm836_vm2 = vcmp.gt.f32.partialorder %v832_v50, 0.0 }
 0x254   :  { %v1370_v17 = vpop.permute.xlu1 %1369  ;;  %v764_v56 = vadd.f32 %v760_v41, %v718_v24  ;;  %v1360_v44 = vadd.f32 %v1356_v52, %v1314_v1 }
 0x255   :  { %v1384_v33 = vadd.f32 %v1370_v17, %v4059_v54  ;;  %v4074_v17 = vmov 31   ;;  %v844_v34 = vsel %vm836_vm2, %v832_v50, %v840_v38  ;;  %v4085_v38 = vld [vmem:[#allocation15_spill] sm:$0xff] }
 0x256   :  { %2339 = vset.pattern.permute.xlu1 %v4061_v57  ;;  %v810_v7 = vadd.f32 %v806_v19, %v764_v56  ;;  %v469_v57 = vpop.xlane.xlu0 %468 }
 0x257   :  { %vm1388_vm15 = vcmp.gt.f32.partialorder %v1384_v33, 0.0  ;;  %v1392_v28 = vmul.f32 0.2, %v1384_v33  ;;  %1767 = vperm.xlu1 %2339, %v2965_v3   ;;  %v4063_v3 = vld [vmem:[#allocation44_spill] sm:$0xff]  ;;  %2361 = vrcp.f32 %v469_v57 }
 0x258   :  { %v852_v45 = vmul.f32 %v4063_v3, %v846_v20  ;;  %v850_v52 = vmul.f32 %v4063_v3, %v844_v34 }
 0x259   :  { %v1396_v8 = vsel %vm1388_vm15, %v1384_v33, %v1392_v28  ;;  %v3430_v42 = vpop.permute.xlu1 %1541 }
 0x25a   :  { %v1402_v60 = vmul.f32 %v4062_v58, %v1396_v8  ;;  %v856_v12 = vadd.f32 %v852_v45, %v810_v7  ;;  %v854_v19 = vadd.f32 %v850_v52, %v3372_v2  ;;  %v475_v1 = vpop.xlane.xlu0 %474 }
 0x25b   :  { %1775 = vperm.xlu1 %2339, %v2983_v51   ;;  %v3447_v51 = vld [vmem:[%s3883_s1 + $0x18] sm:$0xff]  ;;  %s2147_s1 = sld [smem:[#allocation2 + $0x182]] }
 0x25c   :  { %v1406_v30 = vadd.f32 %v1402_v60, %v1360_v44  ;;  %4066 = vst [vmem:[#allocation32_spill] sm:$0xff] %v3447_v51  ;;  %v3473_v46 = vsel %vm2843_vm10, %v856_v12, -1e+30  ;;  %v3508_v40 = vsel %vm2800_vm5, %v854_v19, -1e+30 }
 0x25d   :  { %v1546_v11 = vpop.permute.xlu1 %1545  ;;  %v870_v27 = vsel %vm442_vm9, %v3473_v46, -inf  ;;  %v864_v8 = vsel %vm442_vm9, %v3508_v40, -inf }
 0x25e   :  { %v1557_v47 = vadd.f32 %v1546_v11, %v3437_v5  ;;  %v3442_v16 = vsel %vm2757_vm7, %v1406_v30, -1e+30 }
 0x25f   :  { %1779 = vperm.xlu1 %2339, %v3447_v51   ;;  %v1414_v35 = vsel %vm442_vm9, %v3442_v16, -inf }
 0x260   :  { %1415 = vmax.xlane.f32.xlu0 %v1414_v35  ;;  %v1565_v43 = vmul.f32 0.2, %v1557_v47  ;;  %vm1561_vm0 = vcmp.gt.f32.partialorder %v1557_v47, 0.0 }
 0x261   :  { %v2362_v10 = vpop.eup %2361 }
 0x262   :  { %v1588_v32 = vpop.permute.xlu1 %1587  ;;  %v1569_v18 = vsel %vm1561_vm0, %v1557_v47, %v1565_v43  ;;  %v3521_v12 = vmul.f32 %v2362_v10, %v4077_v39  ;;  %v4088_v10 = vld [vmem:[#allocation7_spill] sm:$0xff] }
 0x263   :  { %v1599_v63 = vadd.f32 %v1588_v32, %v3459_v15  ;;  %2342 = vset.pattern.permute.xlu1 %v4070_v31  ;;  %v1575_v0 = vmul.f32 %v3475_v29, %v1569_v18 }
 0x264   :  { %1817 = vperm.xlu1 %2342, %v3468_v4   ;;  %1418 = vmax.xlane.f32.xlu0 %v1417_v13  ;;  %4078 = vst [vmem:[#allocation38_spill] sm:$0xff] %v3521_v12 }
 0x265   :  { %vm1603_vm1 = vcmp.gt.f32.partialorder %v1599_v63, 0.0  ;;  %v1607_v62 = vmul.f32 0.2, %v1599_v63 }
 0x267   :  { %v1611_v14 = vsel %vm1603_vm1, %v1599_v63, %v1607_v62  ;;  %v825_v33 = vpop.permute.xlu1 %824 }
 0x268   :  { %v1617_v21 = vmul.f32 %v3477_v6, %v1611_v14  ;;  %1821 = vperm.xlu1 %2342, %v3486_v59   ;;  %871 = vmax.xlane.f32.xlu0 %v870_v27  ;;  %v833_v61 = vadd.f32 %v825_v33, %v4058_v22  ;;  %v1550_v22 = vpop.permute.xlu0 %1549 }
 0x26a   :  { %v3489_v25 = vadd.f32 %v1617_v21, %v1575_v0  ;;  %v841_v41 = vmul.f32 0.2, %v833_v61  ;;  %vm837_vm3 = vcmp.gt.f32.partialorder %v833_v61, 0.0  ;;  %v4081_v0 = vld [vmem:[#allocation22_spill] sm:$0xff] }
 0x26c   :  { %2343 = vset.pattern.permute.xlu1 %v4074_v17  ;;  %v845_v28 = vsel %vm837_vm3, %v833_v61, %v841_v41  ;;  %v1584_v2 = vpop.permute.xlu0 %1583  ;;  %v4083_v17 = vld [vmem:[#allocation18_spill] sm:$0xff] }
 0x26d   :  { %1859 = vperm.xlu1 %2343, %v3495_v36   ;;  %v851_v24 = vmul.f32 %v4063_v3, %v845_v28 }
 0x26f   :  { %v855_v20 = vadd.f32 %v851_v24, %v3394_v23 }
 0x270   :  { %v1596_v30 = vpop.permute.xlu0 %1595 }
 0x271   :  { %1867 = vperm.xlu1 %2343, %v3486_v59   ;;  %v3515_v44 = vsel %vm2811_vm6, %v855_v20, -1e+30  ;;  %v1601_v39 = vadd.f32 %v1596_v30, %v3459_v15 }
 0x272   :  { %v867_v3 = vsel %vm442_vm9, %v3515_v44, -inf }
 0x273   :  { %vm1605_vm13 = vcmp.gt.f32.partialorder %v1601_v39, 0.0 }
 0x274   :  { %v1638_v14 = vpop.permute.xlu0 %1637 }
 0x275   :  { %1871 = vperm.xlu1 %2343, %v3447_v51  }
 0x278   :  { %v1680_v24 = vpop.permute.xlu0 %1679 }
 0x299   :  { %865 = vmax.xlane.f32.xlu1 %v864_v8  ;;  %v472_v56 = vpop.xlane.xlu1 %471  ;;  %v1722_v8 = vpop.permute.xlu0 %1721 }
 0x29a   :  { %2363 = vrcp.f32 %v472_v56 }
 0x29b   :  { %2365 = vrcp.f32 %v475_v1 }
 0x29d   :  { %868 = vmax.xlane.f32.xlu1 %v867_v3  ;;  %v478_v45 = vpop.xlane.xlu1 %477  ;;  %v1734_v3 = vpop.permute.xlu0 %1733 }
 0x29e   :  { %2367 = vrcp.f32 %v478_v45 }
 0x2a1   :  { %v1378_v23 = vpop.permute.xlu1 %1377 }
 0x2a2   :  { %v1386_v7 = vadd.f32 %v1378_v23, %v4059_v54  ;;  %v1772_v23 = vpop.permute.xlu0 %1771 }
 0x2a4   :  { %v2364_v11 = vpop.eup %2363  ;;  %vm1390_vm4 = vcmp.gt.f32.partialorder %v1386_v7, 0.0  ;;  %v1394_v47 = vmul.f32 0.2, %v1386_v7 }
 0x2a5   :  { %v1382_v35 = vpop.permute.xlu1 %1381  ;;  %v3524_v43 = vmul.f32 %v2364_v11, %v4079_v49  ;;  %v2366_v32 = vpop.eup %2365  ;;  %v1558_v11 = vadd.f32 %v1550_v22, %v3437_v5 }
 0x2a6   :  { %v1398_v63 = vsel %vm1390_vm4, %v1386_v7, %v1394_v47  ;;  %v1387_v31 = vadd.f32 %v1382_v35, %v4059_v54  ;;  %v3531_v21 = vmul.f32 %v2366_v32, %v4081_v0  ;;  %v3565_v7 = vrot.slane %v3428_v9, %v4088_v10  ;;  %v4089_v32 = vld [vmem:[#allocation8_spill] sm:$0xff] }
 0x2a7   :  { %4080 = vst [vmem:[#allocation26_spill] sm:$0xff] %v3524_v43  ;;  %v1404_v13 = vmul.f32 %v4062_v58, %v1398_v63  ;;  %v1598_v47 = vadd.f32 %v1584_v2, %v3459_v15  ;;  %v3575_v63 = vrot.slane %v3428_v9, %v4089_v32  ;;  %vm1562_vm11 = vcmp.gt.f32.partialorder %v1558_v11, 0.0 }
 0x2a8   :  { %v2368_v62 = vpop.eup %2367  ;;  %vm1391_vm8 = vcmp.gt.f32.partialorder %v1387_v31, 0.0  ;;  %v1395_v27 = vmul.f32 0.2, %v1387_v31  ;;  %4082 = vst [vmem:[#allocation29_spill] sm:$0xff] %v3531_v21  ;;  %v1646_v49 = vadd.f32 %v1638_v14, %v3565_v7  ;;  %v1566_v22 = vmul.f32 0.2, %v1558_v11 }
 0x2a9   :  { %v3534_v50 = vmul.f32 %v2368_v62, %v4083_v17  ;;  %v3536_v33 = vpop.permute.xlu1 %1553  ;;  %v1408_v61 = vadd.f32 %v1404_v13, %v4085_v38  ;;  %v1814_v62 = vpop.permute.xlu0 %1813  ;;  %v1606_v2 = vmul.f32 0.2, %v1598_v47  ;;  %vm1602_vm12 = vcmp.gt.f32.partialorder %v1598_v47, 0.0 }
 0x2aa   :  { %v1399_v54 = vsel %vm1391_vm8, %v1387_v31, %v1395_v27  ;;  %v4090_v31 = vld [vmem:[#allocation9_spill] sm:$0xff]  ;;  %v4091_v27 = vld [vmem:[#allocation10_spill] sm:$0xff]  ;;  %v1609_v0 = vmul.f32 0.2, %v1601_v39  ;;  %v1654_v17 = vmul.f32 0.2, %v1646_v49  ;;  %v1691_v38 = vadd.f32 %v1680_v24, %v3575_v63 }
 0x2ab   :  { %4084 = vst [vmem:[#allocation35_spill] sm:$0xff] %v3534_v50  ;;  %v1405_v34 = vmul.f32 %v4062_v58, %v1399_v54  ;;  %v3542_v41 = vsel %vm2811_vm6, %v1408_v61, -1e+30  ;;  %v3579_v13 = vrot.slane %v3428_v9, %v4090_v31  ;;  %v3587_v30 = vrot.slane %v3428_v9, %v4091_v27  ;;  %v4092_v54 = vld [vmem:[#allocation11_spill] sm:$0xff] }
 0x2ac   :  { %4086 = vst [vmem:[#allocation33_spill] sm:$0xff] %v3542_v41  ;;  %v1420_v57 = vsel %vm442_vm9, %v3542_v41, -inf  ;;  %vm1650_vm14 = vcmp.gt.f32.partialorder %v1646_v49, 0.0  ;;  %v1610_v10 = vsel %vm1602_vm12, %v1598_v47, %v1606_v2  ;;  %v3601_v32 = vstv %s2149_s21  ;;  %v4093_v47 = vld [vmem:[#allocation12_spill] sm:$0xff] }
 0x2ad   :  { %1421 = vmax.xlane.f32.xlu1 %v1420_v57  ;;  %v1409_v28 = vadd.f32 %v1405_v34, %v3414_v26  ;;  %v1736_v61 = vadd.f32 %v1722_v8, %v3579_v13  ;;  %v3595_v34 = vrot.slane %v3428_v9, %v4092_v54  ;;  %v3597_v57 = vstv %s2147_s1  ;;  %v1826_v24 = vpop.permute.xlu0 %1825 }
 0x2ae   :  { %v3549_v19 = vpop.permute.xlu1 %1591  ;;  %v3603_v31 = vstv %s2150_s22  ;;  %v1613_v27 = vsel %vm1605_vm13, %v1601_v39, %v1609_v0  ;;  %v1658_v52 = vsel %vm1650_vm14, %v1646_v49, %v1654_v17  ;;  %v1699_v8 = vmul.f32 0.2, %v1691_v38 }
 0x2af   :  { %v3553_v1 = vsel %vm2843_vm10, %v1409_v28, -1e+30  ;;  %v3599_v28 = vstv %s2148_s20  ;;  %v1739_v18 = vadd.f32 %v1734_v3, %v3579_v13  ;;  %vm1695_vm15 = vcmp.gt.f32.partialorder %v1691_v38, 0.0 }
 0x2b0   :  { %4087 = vst [vmem:[#allocation31_spill] sm:$0xff] %v3553_v1  ;;  %v1423_v58 = vsel %vm442_vm9, %v3553_v1, -inf  ;;  %v1744_v21 = vmul.f32 0.2, %v1736_v61  ;;  %v1783_v50 = vadd.f32 %v1772_v23, %v3587_v30  ;;  %v1828_v12 = vadd.f32 %v1814_v62, %v3595_v34 }
 0x2b1   :  { %1424 = vmax.xlane.f32.xlu0 %v1423_v58  ;;  %v1570_v58 = vsel %vm1562_vm11, %v1558_v11, %v1566_v22  ;;  %vm1740_vm0 = vcmp.gt.f32.partialorder %v1736_v61, 0.0  ;;  %v3609_v11 = vstv %s3581_s23  ;;  %v3613_v22 = vrot.slane %v3428_v9, %v4093_v47  ;;  %v1864_v51 = vpop.permute.xlu0 %1863 }
 0x2b2   :  { %v3616_v2 = vstv %s3583_s24  ;;  %v3619_v39 = vmul.f32 %v3475_v29, %v1570_v58  ;;  %v3622_v3 = vmul.f32 %v3477_v6, %v1610_v10  ;;  %v3625_v49 = vmul.f32 %v3477_v6, %v1613_v27 }
 0x2b3   :  { %v3557_v20 = vpop.permute.xlu1 %1629  ;;  %v1556_v62 = vadd.f32 %v3430_v42, %v3437_v5  ;;  %v3631_v0 = vmul.f32 %v3597_v57, %v1658_v52  ;;  %v1703_v9 = vsel %vm1695_vm15, %v1691_v38, %v1699_v8  ;;  %v1747_v17 = vmul.f32 0.2, %v1739_v18 }
 0x2b4   :  { %v1748_v58 = vsel %vm1740_vm0, %v1736_v61, %v1744_v21  ;;  %vm1743_vm1 = vcmp.gt.f32.partialorder %v1739_v18, 0.0  ;;  %v1791_v43 = vmul.f32 0.2, %v1783_v50  ;;  %v1836_v10 = vmul.f32 0.2, %v1828_v12 }
 0x2b5   :  { %vm1787_vm2 = vcmp.gt.f32.partialorder %v1783_v50, 0.0  ;;  %vm1832_vm3 = vcmp.gt.f32.partialorder %v1828_v12, 0.0  ;;  %v1875_v27 = vadd.f32 %v1864_v51, %v3613_v22  ;;  %v3639_v42 = vmul.f32 %v3599_v28, %v1703_v9 }
 0x2b6   :  { %v1600_v52 = vadd.f32 %v3549_v19, %v3459_v15  ;;  %v1644_v21 = vadd.f32 %v3557_v20, %v3565_v7  ;;  %v1564_v61 = vmul.f32 0.2, %v1556_v62  ;;  %v3646_v8 = vmul.f32 %v3601_v32, %v1748_v58 }
 0x2b7   :  { %v1634_v56 = vpop.permute.xlu1 %1633  ;;  %v1751_v59 = vsel %vm1743_vm1, %v1739_v18, %v1747_v17  ;;  %vm1560_vm8 = vcmp.gt.f32.partialorder %v1556_v62, 0.0  ;;  %v1795_v51 = vsel %vm1787_vm2, %v1783_v50, %v1791_v43  ;;  %v1840_v4 = vsel %vm1832_vm3, %v1828_v12, %v1836_v10 }
 0x2b8   :  { %v1645_v23 = vadd.f32 %v1634_v56, %v3565_v7  ;;  %v1559_v56 = vadd.f32 %v3536_v33, %v3437_v5  ;;  %v3650_v9 = vadd.f32 %v1826_v24, %v3595_v34  ;;  %vm1879_vm11 = vcmp.gt.f32.partialorder %v1875_v27, 0.0 }
 0x2b9   :  { %v1883_v15 = vmul.f32 0.2, %v1875_v27  ;;  %v1608_v20 = vmul.f32 0.2, %v1600_v52  ;;  %v1652_v36 = vmul.f32 0.2, %v1644_v21  ;;  %v1568_v58 = vsel %vm1560_vm8, %v1556_v62, %v1564_v61 }
 0x2ba   :  { %v1653_v38 = vmul.f32 0.2, %v1645_v23  ;;  %vm1649_vm4 = vcmp.gt.f32.partialorder %v1645_v23, 0.0  ;;  %v1567_v19 = vmul.f32 0.2, %v1559_v56  ;;  %vm1563_vm12 = vcmp.gt.f32.partialorder %v1559_v56, 0.0 }
 0x2bb   :  { %v3559_v45 = vpop.permute.xlu1 %1641  ;;  %vm1604_vm13 = vcmp.gt.f32.partialorder %v1600_v52, 0.0  ;;  %vm1648_vm14 = vcmp.gt.f32.partialorder %v1644_v21, 0.0  ;;  %v3655_v12 = vmul.f32 %v3601_v32, %v1751_v59  ;;  %v3658_v18 = vmul.f32 %v3603_v31, %v1795_v51 }
 0x2bc   :  { %v1657_v1 = vsel %vm1649_vm4, %v1645_v23, %v1653_v38  ;;  %v3661_v50 = vmul.f32 %v3609_v11, %v1840_v4  ;;  %v1887_v17 = vsel %vm1879_vm11, %v1875_v27, %v1883_v15  ;;  %v1571_v23 = vsel %vm1563_vm12, %v1559_v56, %v1567_v19  ;;  %v863_v4 = vpop.xlane.xlu0 %862  ;;  %v4094_v19 = vld [vmem:[#allocation46_spill] sm:$0xff] }
 0x2bd   :  { %v1663_v62 = vmul.f32 %v3597_v57, %v1657_v1  ;;  %v1574_v10 = vmul.f32 %v3475_v29, %v1568_v58  ;;  %v1656_v38 = vsel %vm1648_vm14, %v1644_v21, %v1652_v36  ;;  %v1647_v59 = vadd.f32 %v3559_v45, %v3565_v7 }
 0x2be   :  { %v3669_v61 = vmul.f32 0.2, %v3650_v9  ;;  %v3676_v1 = vmul.f32 %v3616_v2, %v1887_v17  ;;  %v1577_v56 = vmul.f32 %v3475_v29, %v1571_v23  ;;  %v1662_v7 = vmul.f32 %v3597_v57, %v1656_v38 }
 0x2bf   :  { %v1667_v21 = vadd.f32 %v1663_v62, %v3489_v25  ;;  %vm1651_vm1 = vcmp.gt.f32.partialorder %v1647_v59, 0.0  ;;  %vm1835_vm8 = vcmp.gt.f32.partialorder %v3650_v9, 0.0 }
 0x2c0   :  { %v3561_v26 = vpop.permute.xlu1 %1675 }
 0x2c1   :  { %v1690_v43 = vadd.f32 %v3561_v26, %v3575_v63  ;;  %v1612_v26 = vsel %vm1604_vm13, %v1600_v52, %v1608_v20 }
 0x2c2   :  { %v1618_v45 = vmul.f32 %v3477_v6, %v1612_v26 }
 0x2c3   :  { %v1698_v51 = vmul.f32 0.2, %v1690_v43  ;;  %vm1694_vm0 = vcmp.gt.f32.partialorder %v1690_v43, 0.0 }
 0x2c4   :  { %v3569_v35 = vpop.permute.xlu1 %1683  ;;  %v1622_v25 = vadd.f32 %v1618_v45, %v3619_v39 }
 0x2c5   :  { %v1692_v41 = vadd.f32 %v3569_v35, %v3575_v63  ;;  %v1620_v35 = vadd.f32 %v3622_v3, %v1574_v10  ;;  %v1702_v20 = vsel %vm1694_vm0, %v1690_v43, %v1698_v51  ;;  %v1713_v3 = vadd.f32 %v3639_v42, %v1667_v21 }
 0x2c6   :  { %v1708_v43 = vmul.f32 %v3599_v28, %v1702_v20 }
 0x2c7   :  { %v1700_v58 = vmul.f32 0.2, %v1692_v41  ;;  %vm1696_vm2 = vcmp.gt.f32.partialorder %v1692_v41, 0.0 }
 0x2c8   :  { %v3589_v14 = vpop.permute.xlu1 %1687 }
 0x2c9   :  { %v1693_v27 = vadd.f32 %v3589_v14, %v3575_v63  ;;  %v873_v63 = vsub.f32 %v4094_v19, %v863_v4  ;;  %v1655_v14 = vmul.f32 0.2, %v1647_v59 }
 0x2cb   :  { %v1701_v29 = vmul.f32 0.2, %v1693_v27  ;;  %vm1697_vm3 = vcmp.gt.f32.partialorder %v1693_v27, 0.0  ;;  %v1659_v62 = vsel %vm1651_vm1, %v1647_v59, %v1655_v14  ;;  %v1668_v59 = vadd.f32 %v3631_v0, %v1622_v25 }
 0x2cc   :  { %v1665_v4 = vmul.f32 %v3597_v57, %v1659_v62 }
 0x2cd   :  { %v1726_v54 = vpop.permute.xlu1 %1725  ;;  %v1705_v26 = vsel %vm1697_vm3, %v1693_v27, %v1701_v29 }
 0x2ce   :  { %v1737_v5 = vadd.f32 %v1726_v54, %v3579_v13 }
 0x2d0   :  { %v1745_v24 = vmul.f32 0.2, %v1737_v5  ;;  %vm1741_vm15 = vcmp.gt.f32.partialorder %v1737_v5, 0.0 }
 0x2d1   :  { %v3633_v47 = vpop.permute.xlu1 %1729 }
 0x2d2   :  { %v1749_v36 = vsel %vm1741_vm15, %v1737_v5, %v1745_v24  ;;  %v1623_v24 = vadd.f32 %v3625_v49, %v1577_v56  ;;  %v1738_v6 = vadd.f32 %v3633_v47, %v3579_v13  ;;  %v1704_v49 = vsel %vm1696_vm2, %v1692_v41, %v1700_v58 }
 0x2d3   :  { %v1755_v5 = vmul.f32 %v3601_v32, %v1749_v36  ;;  %v1710_v45 = vmul.f32 %v3599_v28, %v1704_v49 }
 0x2d4   :  { %v1746_v47 = vmul.f32 0.2, %v1738_v6  ;;  %vm1742_vm12 = vcmp.gt.f32.partialorder %v1738_v6, 0.0  ;;  %v1669_v14 = vadd.f32 %v1665_v4, %v1623_v24 }
 0x2d5   :  { %v1759_v38 = vadd.f32 %v1755_v5, %v1713_v3  ;;  %v1714_v20 = vadd.f32 %v1710_v45, %v1668_v59 }
 0x2d6   :  { %v1768_v33 = vpop.permute.xlu1 %1767  ;;  %v1750_v21 = vsel %vm1742_vm12, %v1738_v6, %v1746_v47 }
 0x2d7   :  { %v1782_v15 = vadd.f32 %v1768_v33, %v3587_v30  ;;  %v1666_v33 = vadd.f32 %v1662_v7, %v1620_v35  ;;  %v1756_v58 = vmul.f32 %v3601_v32, %v1750_v21  ;;  %v1843_v32 = vsel %vm1835_vm8, %v3650_v9, %v3669_v61 }
 0x2d9   :  { %v1790_v17 = vmul.f32 0.2, %v1782_v15  ;;  %vm1786_vm4 = vcmp.gt.f32.partialorder %v1782_v15, 0.0  ;;  %v1712_v36 = vadd.f32 %v1708_v43, %v1666_v33 }
 0x2da   :  { %v1776_v54 = vpop.permute.xlu1 %1775 }
 0x2db   :  { %v1784_v13 = vadd.f32 %v1776_v54, %v3587_v30  ;;  %v1794_v51 = vsel %vm1786_vm4, %v1782_v15, %v1790_v17  ;;  %v1711_v54 = vmul.f32 %v3599_v28, %v1705_v26  ;;  %v877_v15 = vmul.f32 1.442695, %v873_v63 }
 0x2dc   :  { %v1800_v57 = vmul.f32 %v3603_v31, %v1794_v51 }
 0x2dd   :  { %v1792_v7 = vmul.f32 0.2, %v1784_v13  ;;  %vm1788_vm13 = vcmp.gt.f32.partialorder %v1784_v13, 0.0  ;;  %v1715_v25 = vadd.f32 %v1711_v54, %v1669_v14  ;;  %2369 = vpow2.f32 %v877_v15 }
 0x2de   :  { %v1780_v52 = vpop.permute.xlu1 %1779 }
 0x2df   :  { %v1785_v39 = vadd.f32 %v1780_v52, %v3587_v30  ;;  %v1805_v52 = vadd.f32 %v3658_v18, %v1759_v38  ;;  %v1796_v29 = vsel %vm1788_vm13, %v1784_v13, %v1792_v7  ;;  %v1761_v61 = vadd.f32 %v3655_v12, %v1715_v25 }
 0x2e1   :  { %v1793_v0 = vmul.f32 0.2, %v1785_v39  ;;  %vm1789_vm14 = vcmp.gt.f32.partialorder %v1785_v39, 0.0 }
 0x2e3   :  { %v1818_v23 = vpop.permute.xlu1 %1817  ;;  %v1797_v63 = vsel %vm1789_vm14, %v1785_v39, %v1793_v0 }
 0x2e4   :  { %v1829_v10 = vadd.f32 %v1818_v23, %v3595_v34  ;;  %v1803_v43 = vmul.f32 %v3603_v31, %v1797_v63  ;;  %v4095_v63 = vld [vmem:[#allocation33_spill] sm:$0xff] }
 0x2e6   :  { %vm1833_vm11 = vcmp.gt.f32.partialorder %v1829_v10, 0.0  ;;  %v1837_v42 = vmul.f32 0.2, %v1829_v10  ;;  %v1807_v4 = vadd.f32 %v1803_v43, %v1761_v61  ;;  %v2350_v61 = vld [vmem:[%s3886_s4 + $0x28] sm:$0xff]  }
 0x2e7   :  { %v1822_v56 = vpop.permute.xlu1 %1821 }
 0x2e8   :  { %v1841_v41 = vsel %vm1833_vm11, %v1829_v10, %v1837_v42  ;;  %v1830_v27 = vadd.f32 %v1822_v56, %v3595_v34  ;;  %v1758_v34 = vadd.f32 %v3646_v8, %v1712_v36 }
 0x2e9   :  { %v1847_v30 = vmul.f32 %v3609_v11, %v1841_v41 }
 0x2ea   :  { %v1838_v35 = vmul.f32 0.2, %v1830_v27  ;;  %vm1834_vm15 = vcmp.gt.f32.partialorder %v1830_v27, 0.0  ;;  %v1804_v33 = vadd.f32 %v1800_v57, %v1758_v34 }
 0x2eb   :  { %v1851_v19 = vadd.f32 %v1847_v30, %v1805_v52 }
 0x2ec   :  { %v1860_v28 = vpop.permute.xlu1 %1859  ;;  %v1842_v17 = vsel %vm1834_vm15, %v1830_v27, %v1838_v35  ;;  %v1850_v9 = vadd.f32 %v3661_v50, %v1804_v33  ;;  %v3735_v27 = vpop.eup %2369 }
 0x2ed   :  { %v1874_v18 = vadd.f32 %v1860_v28, %v3613_v22  ;;  %v1416_v5 = vpop.xlane.xlu0 %1415  ;;  %v1897_v6 = vadd.f32 %v3676_v1, %v1851_v19  ;;  %v1802_v1 = vmul.f32 %v3603_v31, %v1796_v29  ;;  %v1848_v49 = vmul.f32 %v3609_v11, %v1842_v17 }
 0x2ee   :  { %v1426_v3 = vsub.f32 %v3442_v16, %v1416_v5  ;;  %v1760_v16 = vadd.f32 %v1756_v58, %v1714_v20  ;;  %v1849_v31 = vmul.f32 %v3609_v11, %v1843_v32 }
 0x2ef   :  { %vm1878_vm0 = vcmp.gt.f32.partialorder %v1874_v18, 0.0  ;;  %v1882_v24 = vmul.f32 0.2, %v1874_v18  ;;  %v3711_v8 = vsel %vm2800_vm5, %v1897_v6, -1e+30 }
 0x2f0   :  { %v1868_v23 = vpop.permute.xlu1 %1867  ;;  %v1907_v62 = vsel %vm442_vm9, %v3711_v8, -inf  ;;  %v1430_v38 = vmul.f32 1.442695, %v1426_v3  ;;  %v1806_v47 = vadd.f32 %v1802_v1, %v1760_v16  ;;  %v1853_v55 = vadd.f32 %v1849_v31, %v1807_v4  ;;  %v4096_v1 = vld [vmem:[#allocation31_spill] sm:$0xff] }
 0x2f1   :  { %v1886_v10 = vsel %vm1878_vm0, %v1874_v18, %v1882_v24  ;;  %v1876_v37 = vadd.f32 %v1868_v23, %v3613_v22  ;;  %1908 = vmax.xlane.f32.xlu0 %v1907_v62  ;;  %v1419_v0 = vpop.xlane.xlu0 %1418 }
 0x2f2   :  { %v1892_v26 = vmul.f32 %v3616_v2, %v1886_v10  ;;  %2371 = vpow2.f32 %v1430_v38  ;;  %v1852_v50 = vadd.f32 %v1848_v49, %v1806_v47  ;;  %v1427_v15 = vsub.f32 %v3455_v53, %v1419_v0  ;;  %v3795_v38 = vld [vmem:[%s3886_s4] sm:$0xff]  }
 0x2f3   :  { %vm1880_vm5 = vcmp.gt.f32.partialorder %v1876_v37, 0.0  ;;  %v1884_v13 = vmul.f32 0.2, %v1876_v37 }
 0x2f4   :  { %v1872_v39 = vpop.permute.xlu1 %1871  ;;  %v1896_v42 = vadd.f32 %v1892_v26, %v1850_v9  ;;  %v1432_v14 = vmul.f32 1.442695, %v1427_v15  ;;  %v2346_v26 = vld [vmem:[%s3886_s4 + $0x18] sm:$0xff]   ;;  %v2349_v9 = vld [vmem:[%s3886_s4 + $0x20] sm:$0xff]  }
 0x2f5   :  { %v1888_v59 = vsel %vm1880_vm5, %v1876_v37, %v1884_v13  ;;  %v1877_v51 = vadd.f32 %v1872_v39, %v3613_v22  ;;  %v872_v48 = vpop.xlane.xlu0 %871  ;;  %v2345_v37 = vld [vmem:[%s3886_s4 + $0x10] sm:$0xff]   ;;  %2203 = vmatprep.subr.bf16.mxu0 %v2349_v9 }
 0x2f6   :  { %v1894_v56 = vmul.f32 %v3616_v2, %v1888_v59  ;;  %v3731_v36 = vsel %vm2757_vm7, %v1896_v42, -1e+30  ;;  %v876_v20 = vsub.f32 %v3473_v46, %v872_v48  ;;  %2187 = vmatprep.subr.bf16.mxu1 %v2345_v37  ;;  %2204 = vmatpush3.bf16.msra.mxu0 %v2349_v9  ;;  %v4100_v48 = vld [vmem:[#allocation32_spill] sm:$0xff] }
 0x2f7   :  { %vm1881_vm1 = vcmp.gt.f32.partialorder %v1877_v51, 0.0  ;;  %v1885_v12 = vmul.f32 0.2, %v1877_v51  ;;  %v1904_v45 = vsel %vm442_vm9, %v3731_v36, -inf  ;;  %2188 = vmatpush3.bf16.msra.mxu1 %v2345_v37  ;;  %2205 = vmatprep.subr.bf16.mxu0 %v2350_v61 }
 0x2f8   :  { %1905 = vmax.xlane.f32.xlu1 %v1904_v45  ;;  %v1898_v41 = vadd.f32 %v1894_v56, %v1852_v50  ;;  %v883_v29 = vmul.f32 1.442695, %v876_v20  ;;  %2189 = vmatprep.subr.bf16.mxu1 %v2346_v26 }
 0x2f9   :  { %v1889_v11 = vsel %vm1881_vm1, %v1877_v51, %v1885_v12 }
 0x2fa   :  { %v1895_v22 = vmul.f32 %v3616_v2, %v1889_v11  ;;  %v3740_v54 = vsel %vm2811_vm6, %v1898_v41, -1e+30  ;;  %v885_v2 = vsel %vm442_vm9, %v3735_v27, 0.0  ;;  %2206 = vmatpush3.bf16.msra.mxu0 %v2350_v61  ;;  %v2352_v61 = vld [vmem:[%s3886_s4 + $0x38] sm:$0xff]   ;;  %vm2092_vm6 = vcmask 257024  }
 0x2fb   :  { %v1910_v7 = vsel %vm442_vm9, %v3740_v54, -inf  ;;  %2190 = vmatpush3.bf16.msra.mxu1 %v2346_v26 }
 0x2fc   :  { %1911 = vmax.xlane.f32.xlu1 %v1910_v7  ;;  %v1899_v30 = vadd.f32 %v1895_v22, %v1853_v55  ;;  %v3752_v57 = vpop.eup %2371  ;;  %2195 = vmatprep.subr.bf16.mxu1 %v3795_v38 }
 0x2fd   :  { %v1438_v60 = vsel %vm442_vm9, %v3752_v57, 0.0 }
 0x2fe   :  { %v3746_v52 = vsel %vm2843_vm10, %v1899_v30, -1e+30  ;;  %v2351_v30 = vld [vmem:[%s3886_s4 + $0x30] sm:$0xff]  }
 0x2ff   :  { %v1913_v21 = vsel %vm442_vm9, %v3746_v52, -inf  ;;  %2211 = vmatprep.subr.bf16.mxu0 %v2351_v30 }
 0x300   :  { %1914 = vmax.xlane.f32.xlu0 %v1913_v21  ;;  %886 = vadd.xlane.f32.xlu1 %v885_v2  ;;  %v4098_v21 = vld [vmem:[#allocation25_spill] sm:$0xff] }
 0x304   :  { %1439 = vadd.xlane.f32.xlu1 %v1438_v60  ;;  %v4099_v60 = vld [vmem:[#allocation23_spill] sm:$0xff] }
 0x326   :  { %v866_v35 = vpop.xlane.xlu1 %865 }
 0x327   :  { %v874_v19 = vsub.f32 %v3508_v40, %v866_v35 }
 0x329   :  { %v879_v34 = vmul.f32 1.442695, %v874_v19 }
 0x32a   :  { %v869_v28 = vpop.xlane.xlu1 %868 }
 0x32b   :  { %2373 = vpow2.f32 %v879_v34  ;;  %v875_v58 = vsub.f32 %v3515_v44, %v869_v28 }
 0x32c   :  { %2375 = vpow2.f32 %v1432_v14 }
 0x32d   :  { %v881_v18 = vmul.f32 1.442695, %v875_v58 }
 0x32f   :  { %2377 = vpow2.f32 %v881_v18 }
 0x330   :  { %2379 = vpow2.f32 %v883_v29 }
 0x335   :  { %v3760_v5 = vpop.eup %2373 }
 0x336   :  { %v888_v53 = vsel %vm442_vm9, %v3760_v5, 0.0  ;;  %v3764_v6 = vpop.eup %2375 }
 0x337   :  { %889 = vadd.xlane.f32.xlu0 %v888_v53  ;;  %v1441_v44 = vsel %vm442_vm9, %v3764_v6, 0.0 }
 0x339   :  { %v3766_v40 = vpop.eup %2377 }
 0x33a   :  { %v1422_v46 = vpop.xlane.xlu1 %1421  ;;  %v891_v25 = vsel %vm442_vm9, %v3766_v40, 0.0  ;;  %v3772_v33 = vpop.eup %2379 }
 0x33b   :  { %v1428_v3 = vsub.f32 %v4095_v63, %v1422_v46  ;;  %892 = vadd.xlane.f32.xlu1 %v891_v25  ;;  %1442 = vadd.xlane.f32.xlu0 %v1441_v44  ;;  %v894_v32 = vsel %vm442_vm9, %v3772_v33, 0.0 }
 0x33d   :  { %v1434_v17 = vmul.f32 1.442695, %v1428_v3 }
 0x33e   :  { %v1425_v24 = vpop.xlane.xlu0 %1424 }
 0x33f   :  { %2381 = vpow2.f32 %v1434_v17  ;;  %v1429_v23 = vsub.f32 %v4096_v1, %v1425_v24  ;;  %895 = vadd.xlane.f32.xlu0 %v894_v32  ;;  %v4102_v1 = vld [vmem:[#allocation38_spill] sm:$0xff] }
 0x341   :  { %v1436_v62 = vmul.f32 1.442695, %v1429_v23 }
 0x343   :  { %2383 = vpow2.f32 %v1436_v62  ;;  %v4104_v62 = vld [vmem:[#allocation35_spill] sm:$0xff] }
 0x349   :  { %v3778_v16 = vpop.eup %2381 }
 0x34a   :  { %v1444_v43 = vsel %vm442_vm9, %v3778_v16, 0.0 }
 0x34b   :  { %1445 = vadd.xlane.f32.xlu1 %v1444_v43  ;;  %v4105_v43 = vld [vmem:[#allocation29_spill] sm:$0xff] }
 0x34c   :  { %v4106_v37 = vpack.c.bf16 %v4104_v62, %v4105_v43 }
 0x34d   :  { %v3782_v10 = vpop.eup %2383 }
 0x34e   :  { %v1447_v49 = vsel %vm442_vm9, %v3782_v10, 0.0 }
 0x34f   :  { %1448 = vadd.xlane.f32.xlu0 %v1447_v49 }
 0x37e   :  { %v1909_v13 = vpop.xlane.xlu0 %1908 }
 0x37f   :  { %v1917_v47 = vsub.f32 %v3711_v8, %v1909_v13 }
 0x381   :  { %v1922_v39 = vmul.f32 1.442695, %v1917_v47 }
 0x383   :  { %2385 = vpow2.f32 %v1922_v39 }
 0x385   :  { %v1906_v42 = vpop.xlane.xlu1 %1905 }
 0x386   :  { %v1916_v31 = vsub.f32 %v3731_v36, %v1906_v42 }
 0x388   :  { %v1920_v4 = vmul.f32 1.442695, %v1916_v31 }
 0x389   :  { %v1912_v59 = vpop.xlane.xlu1 %1911 }
 0x38a   :  { %2387 = vpow2.f32 %v1920_v4  ;;  %v1918_v51 = vsub.f32 %v3740_v54, %v1912_v59 }
 0x38c   :  { %v1924_v56 = vmul.f32 1.442695, %v1918_v51 }
 0x38d   :  { %v3807_v50 = vpop.eup %2385  ;;  %v1915_v12 = vpop.xlane.xlu0 %1914 }
 0x38e   :  { %2389 = vpow2.f32 %v1924_v56  ;;  %v1919_v45 = vsub.f32 %v3746_v52, %v1915_v12  ;;  %v1931_v8 = vsel %vm442_vm9, %v3807_v50, 0.0  ;;  %v4097_v52 = vld [vmem:[#allocation34_spill] sm:$0xff]  ;;  %v887_v2 = vpop.xlane.xlu1 %886 }
 0x38f   :  { %1932 = vadd.xlane.f32.xlu0 %v1931_v8 }
 0x390   :  { %v1926_v41 = vmul.f32 1.442695, %v1919_v45 }
 0x392   :  { %2391 = vpow2.f32 %v1926_v41  ;;  %v1440_v0 = vpop.xlane.xlu1 %1439 }
 0x393   :  { %2393 = vrcp.f32 %v887_v2 }
 0x394   :  { %v3812_v11 = vpop.eup %2387 }
 0x395   :  { %v1928_v36 = vsel %vm442_vm9, %v3812_v11, 0.0 }
 0x396   :  { %1929 = vadd.xlane.f32.xlu1 %v1928_v36 }
 0x398   :  { %v3816_v22 = vpop.eup %2389 }
 0x399   :  { %v1934_v54 = vsel %vm442_vm9, %v3816_v22, 0.0 }
 0x39a   :  { %1935 = vadd.xlane.f32.xlu1 %v1934_v54 }
 0x39c   :  { %v3820_v55 = vpop.eup %2391 }
 0x39d   :  { %v1937_v7 = vsel %vm442_vm9, %v3820_v55, 0.0  ;;  %v2394_v20 = vpop.eup %2393 }
 0x39e   :  { %1938 = vadd.xlane.f32.xlu0 %v1937_v7  ;;  %v901_v28 = vmul.f32 %v2394_v20, %v3735_v27 }
 0x3ab   :  { %2026 = vrot.lane.b32.xlu1 %v4097_v52, %s2472_s11 }
 0x3af   :  { %2030 = vrot.lane.b32.xlu1 %v4099_v60, %s2472_s11 }
 0x3b3   :  { %2032 = vrot.lane.b32.xlu1 %v4100_v48, %s2472_s11 }
 0x3b4   :  { %2028 = vrot.lane.b32.xlu0 %v4098_v21, %s2472_s11  ;;  %v2161_v21 = vld [vmem:[%s3887_s5] ss:$0 sm:$0xff] }
 0x3c4   :  { %v890_v15 = vpop.xlane.xlu0 %889 }
 0x3c5   :  { %2395 = vrcp.f32 %v890_v15 }
 0x3c6   :  { %2397 = vrcp.f32 %v1440_v0 }
 0x3c8   :  { %v893_v35 = vpop.xlane.xlu1 %892  ;;  %v1443_v19 = vpop.xlane.xlu0 %1442 }
 0x3c9   :  { %2399 = vrcp.f32 %v1443_v19 }
 0x3ca   :  { %2401 = vrcp.f32 %v893_v35  ;;  %v2162_v35 = vld [vmem:[%s3888_s6] ss:$0 sm:$0xff] }
 0x3cc   :  { %v896_v14 = vpop.xlane.xlu0 %895 }
 0x3cd   :  { %2403 = vrcp.f32 %v896_v14 }
 0x3cf   :  { %v2396_v34 = vpop.eup %2395 }
 0x3d0   :  { %v902_v58 = vmul.f32 %v2396_v34, %v3760_v5  ;;  %v2398_v29 = vpop.eup %2397  ;;  %v2348_v5 = vld [vmem:[%s3886_s4 + $0x8] sm:$0xff]  }
 0x3d1   :  { %v1454_v25 = vmul.f32 %v2398_v29, %v3752_v57 }
 0x3d2   :  { %v905_v18 = vpack.c.bf16 %v902_v58, %v901_v28 }
 0x3d3   :  { %v2400_v53 = vpop.eup %2399 }
 0x3d4   :  { %2191 = vmatprep.mubr.msk.bf16.mxu1 %vm442_vm9, %v905_v18  ;;  %v2402_v46 = vpop.eup %2401  ;;  %v1455_v44 = vmul.f32 %v2400_v53, %v3764_v6  ;;  %v4101_v6 = vld [vmem:[#allocation26_spill] sm:$0xff] }
 0x3d5   :  { %v903_v24 = vmul.f32 %v2402_v46, %v3766_v40  ;;  %v4103_v23 = vpack.c.bf16 %v4101_v6, %v4102_v1 }
 0x3d6   :  { %v1458_v3 = vpack.c.bf16 %v1455_v44, %v1454_v25 }
 0x3d7   :  { %v2404_v63 = vpop.eup %2403 }
 0x3d8   :  { %v1446_v17 = vpop.xlane.xlu1 %1445  ;;  %v904_v32 = vmul.f32 %v2404_v63, %v3772_v33  ;;  %2207 = vmatprep.mubr.msk.bf16.mxu0 %vm442_vm9, %v1458_v3 }
 0x3d9   :  { %2405 = vrcp.f32 %v1446_v17 }
 0x3da   :  { %v906_v27 = vpack.c.bf16 %v904_v32, %v903_v24 }
 0x3dc   :  { %2192 = vmatmul.mubr.msk.bf16.vlgmr.msra.gmra.mrb[0].mxu1 %vm442_vm9, %v906_v27  ;;  %v1449_v57 = vpop.xlane.xlu0 %1448 }
 0x3dd   :  { %2407 = vrcp.f32 %v1449_v57  ;;  %2199 = vmatprep.mubr.msk.bf16.mxu1 %vm442_vm9, %v4103_v23  ;;  %2196 = vmatpush3.bf16.msra.mxu1 %v3795_v38 }
 0x3de   :  { %2197 = vmatprep.subr.bf16.mxu1 %v2348_v5 }
 0x3e1   :  { %2198 = vmatpush3.bf16.msra.mxu1 %v2348_v5 }
 0x3e3   :  { %v2406_v40 = vpop.eup %2405 }
 0x3e4   :  { %v1456_v49 = vmul.f32 %v2406_v40, %v3778_v16 }
 0x3e7   :  { %v2408_v33 = vpop.eup %2407 }
 0x3e8   :  { %2200 = vmatmul.mubr.msk.bf16.vlgmr.msra.gmra.mrb[0].mxu1 %vm442_vm9, %v4106_v37  ;;  %v1457_v26 = vmul.f32 %v2408_v33, %v3782_v10 }
 0x3ea   :  { %v1459_v9 = vpack.c.bf16 %v1457_v26, %v1456_v49 }
 0x3ec   :  { %2208 = vmatmul.mubr.msk.bf16.vlgmr.msra.gmra.mrb[0].mxu0 %vm442_vm9, %v1459_v9 }
 0x3ed   :  { %2212 = vmatpush3.bf16.msra.mxu0 %v2351_v30 }
 0x3ee   :  { %2213 = vmatprep.subr.bf16.mxu0 %v2352_v61 }
 0x3f1   :  { %2214 = vmatpush3.bf16.msra.mxu0 %v2352_v61 }
 0x41c   :  { %v1933_v38 = vpop.xlane.xlu0 %1932 }
 0x41d   :  { %2409 = vrcp.f32 %v1933_v38 }
 0x423   :  { %v1930_v13 = vpop.xlane.xlu1 %1929 }
 0x424   :  { %2411 = vrcp.f32 %v1930_v13 }
 0x427   :  { %v1936_v47 = vpop.xlane.xlu1 %1935  ;;  %v2410_v16 = vpop.eup %2409 }
 0x428   :  { %2413 = vrcp.f32 %v1936_v47  ;;  %v1945_v31 = vmul.f32 %v2410_v16, %v3807_v50 }
 0x42b   :  { %v1939_v39 = vpop.xlane.xlu0 %1938  ;;  %v2027_v7 = vpop.permute.xlu1 %2026 }
 0x42c   :  { %2415 = vrcp.f32 %v1939_v39 }
 0x42e   :  { %v2412_v10 = vpop.eup %2411 }
 0x42f   :  { %v1944_v42 = vmul.f32 %v2412_v10, %v3812_v11  ;;  %v2031_v11 = vpop.permute.xlu1 %2030  ;;  %v2029_v48 = vpop.permute.xlu0 %2028 }
 0x431   :  { %v1948_v4 = vpack.c.bf16 %v1945_v31, %v1944_v42 }
 0x432   :  { %v2414_v59 = vpop.eup %2413 }
 0x433   :  { %2215 = vmatprep.mubr.msk.bf16.mxu0 %vm442_vm9, %v1948_v4  ;;  %v1946_v56 = vmul.f32 %v2414_v59, %v3816_v22  ;;  %v2033_v60 = vpop.permute.xlu1 %2032 }
 0x436   :  { %v2416_v51 = vpop.eup %2415 }
 0x437   :  { %v1947_v12 = vmul.f32 %v2416_v51, %v3820_v55 }
 0x439   :  { %v1949_v45 = vpack.c.bf16 %v1947_v12, %v1946_v56 }
 0x43b   :  { %2216 = vmatmul.mubr.msk.bf16.vlgmr.msra.gmra.mrb[0].mxu0 %vm442_vm9, %v1949_v45 }
 0x4bb   :  { %v2201_v8 = vpop.f32.mrb[0].mxu1 }
 0x4bc   :  { %v1031_v41 = vpop.f32.mrb[1].mxu1 }
 0x4bd   :  { %v2202_v36 = vpop.f32.mrb[2].mxu1 }
 0x4be   :  { %v1034_v54 = vpop.f32.mrb[3].mxu1 }
 0x50e   :  { %v2217_v30 = vpop.f32.mrb[0].mxu0 }
 0x50f   :  { %v2219_v50 = vadd.f32 %v2217_v30, %v2201_v8  ;;  %v2007_v52 = vpop.f32.mrb[1].mxu0 }
 0x510   :  { %v2220_v2 = vadd.f32 %v2007_v52, %v1031_v41  ;;  %v2218_v22 = vpop.f32.mrb[2].mxu0 }
 0x511   :  { %v2040_v55 = vadd.f32 %v2219_v50, %v2031_v11  ;;  %v2221_v0 = vadd.f32 %v2218_v22, %v2202_v36  ;;  %v2010_v15 = vpop.f32.mrb[3].mxu0 }
 0x512   :  { %v2038_v19 = vadd.f32 %v2220_v2, %v2027_v7  ;;  %v2222_v14 = vadd.f32 %v2010_v15, %v1034_v54 }
 0x513   :  { %v2051_v20 = vmul.f32 %v2161_v21, %v2040_v55  ;;  %v2041_v34 = vadd.f32 %v2221_v0, %v2033_v60 }
 0x514   :  { %v2049_v28 = vmul.f32 %v2161_v21, %v2038_v19  ;;  %v2039_v58 = vadd.f32 %v2222_v14, %v2029_v48 }
 0x515   :  { %v2062_v29 = vadd.f32 %v2162_v35, %v2051_v20  ;;  %v2052_v18 = vmul.f32 %v2161_v21, %v2041_v34 }
 0x516   :  { %v2060_v53 = vadd.f32 %v2162_v35, %v2049_v28  ;;  %v2050_v46 = vmul.f32 %v2161_v21, %v2039_v58 }
 0x517   :  { %vm2066_vm7 = vcmp.gt.f32.partialorder %v2062_v29, 0.0  ;;  %v2070_v25 = vmul.f32 0.2, %v2062_v29  ;;  %v2063_v44 = vadd.f32 %v2162_v35, %v2052_v18 }
 0x518   :  { %vm2064_vm9 = vcmp.gt.f32.partialorder %v2060_v53, 0.0  ;;  %v2068_v63 = vmul.f32 0.2, %v2060_v53  ;;  %v2061_v3 = vadd.f32 %v2162_v35, %v2050_v46 }
 0x519   :  { %v2074_v17 = vsel %vm2066_vm7, %v2062_v29, %v2070_v25  ;;  %vm2067_vm10 = vcmp.gt.f32.partialorder %v2063_v44, 0.0  ;;  %v2071_v24 = vmul.f32 0.2, %v2063_v44 }
 0x51a   :  { %v2169_v32 = vpack.c.bf16 %v2074_v17, %v2074_v17  ;;  %v2072_v27 = vsel %vm2064_vm9, %v2060_v53, %v2068_v63  ;;  %vm2065_vm2 = vcmp.gt.f32.partialorder %v2061_v3, 0.0  ;;  %v2069_v5 = vmul.f32 0.2, %v2061_v3 }
 0x51b   :  { %v2167_v57 = vpack.c.bf16 %v2072_v27, %v2072_v27  ;;  %v2075_v6 = vsel %vm2067_vm10, %v2063_v44, %v2071_v24 }
 0x51c   :  { %2095 = vst.msk [vmem:[%s3889_s7 + $0x8] sm:$0xf] %vm2092_vm6, %v2169_v32  ;;  %v2170_v1 = vpack.c.bf16 %v2075_v6, %v2075_v6  ;;  %v2073_v23 = vsel %vm2065_vm2, %v2061_v3, %v2069_v5 }
 0x51d   :  { %2093 = vst.msk [vmem:[%s3889_s7] sm:$0xf] %vm2092_vm6, %v2167_v57  ;;  %v2168_v40 = vpack.c.bf16 %v2073_v23, %v2073_v23 }
 0x51e   :  { %2096 = vst.msk [vmem:[%s3889_s7 + $0xc] sm:$0xf] %vm2092_vm6, %v2170_v1 }
 0x51f   :  { %2094 = vst.msk [vmem:[%s3889_s7 + $0x4] sm:$0xf] %vm2092_vm6, %v2168_v40 }
 0x520   :  { %2101 = vsyncpa [#allocation3], 1 }

// kernel: simple_gat_encoder.11
= control target key start
LH: loop header
LB: loop body
LE: loop exit
PB: predicated region body
PF: predicated region fallthrough
CT: control target
= control target key end

     0   :  { %14 = vsyncpa [#allocation3], 0  ;;  %s4067_s0 = inlined_call_operand.vmem [shape: f32[4,8], index: 0, kind: input, shape index: {}]   ;;  %s4068_s1 = inlined_call_operand.vmem [shape: f32[32,64], index: 1, kind: input, shape index: {}]   ;;  %s4069_s2 = inlined_call_operand.vmem [shape: s8[32,32], index: 2, kind: input, shape index: {}]   ;;  %s4070_s3 = inlined_call_operand.vmem [shape: f32[32,32], index: 3, kind: input, shape index: {}]   ;;  %s4071_s4 = inlined_call_operand.vmem [shape: bf16[4,32,32], index: 4, kind: input, shape index: {}]   ;;  %s4072_s5 = inlined_call_operand.vmem [shape: f32[1,32], index: 5, kind: input, shape index: {}]   ;;  %s4073_s6 = inlined_call_operand.vmem [shape: f32[1,32], index: 6, kind: input, shape index: {}]   ;;  %s4074_s7 = inlined_call_operand.vmem [shape: bf16[32,16], index: 7, kind: input, shape index: {}]   ;;  %s4075_s8 = inlined_call_operand.vmem [shape: f32[1,16], index: 8, kind: input, shape index: {}]   ;;  %s4076_s9 = inlined_call_operand.vmem [shape: f32[32,16], index: 9, kind: output, shape index: {}]  }
   0x1   :  { %s21_s11 = sshll.u32 %s4067_s0, 4  ;;  %s22_s11 = int_to_ptr.vmem [resolvable:$true] %s21_s11 }
   0x2   :  { %s2510_s12 = scalar_lea.vmem %s22_s11, 64  ;;  %p2515_p1 = scmp.lt.s32.totalorder %s22_s11, %s22_s11 }
   0x3   :  { %p2511_p0 = scmp.ne.s32.totalorder %s22_s11, %s2510_s12  ;;  %p2516_p2 = scmp.lt.s32.totalorder %s2510_s12, %s2510_s12 }
   0x5   :  { %p2517_p3 = por %p2516_p2, %p2515_p1 }
   0x7   :  { %p2518_p4 = pnand %p2517_p3, %p2511_p0 }
   0x9   :  { %2521 = shalt.err (!%p2518_p4)
}
   0xa   :  { %s2524_s13 = smov [#allocation2]  }
   0xb   :  { %24 = dma.vmem_to_smem %s22_s11, 64, %s2524_s13, [#allocation3]  }
   0xc   :  { %2522 = dma.done.wait [#allocation3], 64  }
   0xd   :  { %2523 = vsyncadd [#allocation3], 4294967232 }
   0xe   :  { %44 = sfence }
   0xf   :  { %v2614_v0 = vld [vmem:[%s4068_s1] sm:$0xff]  ;;  %v2525_v1 = vmov 1   ;;  %v4097_v2 = vmov 0   ;;  %v2622_v3 = vld [vmem:[%s4068_s1 + $0x8] sm:$0xff]  ;;  %v2629_v4 = vld [vmem:[%s4068_s1 + $0x10] sm:$0xff]  ;;  %v2527_v6 = vmov 2   ;;  %v64_v21 = vlaneseq }
  0x10   :  { %2345 = vset.pattern.permute.xlu1 %v2525_v1  ;;  %2344 = vset.pattern.permute.xlu0 %v4097_v2  ;;  %v2634_v5 = vld [vmem:[%s4068_s1 + $0x18] sm:$0xff]  ;;  %v2528_v7 = vmov 3   ;;  %v2529_v8 = vmov 4   ;;  %v2530_v9 = vmov 5   ;;  %v2531_v10 = vmov 6   ;;  %v2708_v27 = vld [vmem:[%s4070_s3] sm:$0xff] }
  0x11   :  { %115 = vperm.xlu1 %2345, %v2614_v0   ;;  %70 = vperm.xlu0 %2344, %v2614_v0   ;;  %v2532_v11 = vmov 7   ;;  %v2533_v12 = vmov 16   ;;  %v2534_v13 = vmov 18   ;;  %v2535_v14 = vmov 19   ;;  %s2172_s23 = sld [smem:[#allocation2 + $0x1]]  ;;  %s104_s24 = sld [smem:[#allocation2]] }
  0x12   :  { %v2536_v15 = vmov 20   ;;  %v2537_v16 = vmov 17   ;;  %v2538_v17 = vmov 21   ;;  %v2539_v18 = vmov 22   ;;  %s2173_s25 = sld [smem:[#allocation2 + $0x2]]  ;;  %s2175_s26 = sld [smem:[#allocation2 + $0x4]] }
  0x13   :  { %v4099_v19 = vmov 23   ;;  %v4101_v20 = vmov 8   ;;  %v4100_v22 = vmov 9   ;;  %v2693_v23 = vshrl.u32 %v64_v21, 7  ;;  %s2174_s27 = sld [smem:[#allocation2 + $0x3]]  ;;  %s2177_s28 = sld [smem:[#allocation2 + $0x6]] }
  0x14   :  { %v4093_v24 = vmov 24   ;;  %v4096_v36 = vmov 25   ;;  %v4089_v47 = vmov 26   ;;  %v4091_v53 = vmov 10   ;;  %s2176_s29 = sld [smem:[#allocation2 + $0x5]]  ;;  %s2178_s30 = sld [smem:[#allocation2 + $0x7]] }
  0x15   :  { %119 = vperm.xlu1 %2345, %v2622_v3   ;;  %75 = vperm.xlu0 %2344, %v2622_v3   ;;  %v2699_v25 = vsub.s32 1, %v2693_v23  ;;  %v2702_v26 = vsub.s32 0, %v2693_v23  ;;  %v2742_v48 = vsub.s32 2, %v2693_v23  ;;  %v4087_v59 = vmov 11   ;;  %s2892_s14 = sld [smem:[#allocation2 + $0x102]]  ;;  %s2907_s15 = sld [smem:[#allocation2 + $0x100]] }
  0x16   :  { %s2924_s0 = sld [smem:[#allocation2 + $0x101]]  ;;  %s2939_s16 = sld [smem:[#allocation2 + $0x104]] }
  0x17   :  { %4145 = vst [vmem:[#allocation5_spill] sm:$0xff] %v2699_v25  ;;  %4146 = vst [vmem:[#allocation6_spill] sm:$0xff] %v2702_v26  ;;  %v2717_v30 = vrot.slane %v2708_v27, %v2699_v25  ;;  %v2721_v31 = vrot.slane %v2708_v27, %v2702_v26  ;;  %v2731_v40 = vstv %s2172_s23  ;;  %v2733_v41 = vstv %s104_s24  ;;  %s2964_s17 = sld [smem:[#allocation2 + $0x106]]  ;;  %s2204_s10 = sld [smem:[#allocation2 + $0x105]] }
  0x18   :  { %4147 = vst [vmem:[#allocation7_spill] sm:$0xff] %v2742_v48  ;;  %v2752_v52 = vrot.slane %v2708_v27, %v2742_v48  ;;  %v2761_v57 = vstv %s2173_s25  ;;  %v2799_v21 = vstv %s2175_s26  ;;  %s2202_s26 = sld [smem:[#allocation2 + $0x103]]  ;;  %s2206_s11 = sld [smem:[#allocation2 + $0x107]] }
  0x19   :  { %2346 = vset.pattern.permute.xlu1 %v4097_v2  ;;  %80 = vperm.xlu0 %2344, %v2629_v4   ;;  %s3382_s18 = sld [smem:[#allocation2 + $0x181]]  ;;  %s3387_s19 = sld [smem:[#allocation2 + $0x182]] }
  0x1a   :  { %85 = vperm.xlu1 %2346, %v2634_v5   ;;  %s3392_s20 = sld [smem:[#allocation2 + $0x83]]  ;;  %s3406_s24 = sld [smem:[#allocation2 + $0x84]] }
  0x1b   :  { %s3394_s21 = sld [smem:[#allocation2 + $0x183]]  ;;  %s3409_s25 = sld [smem:[#allocation2 + $0x184]] }
  0x1d   :  { %2347 = vset.pattern.permute.xlu0 %v2525_v1 }
  0x1e   :  { %2348 = vset.pattern.permute.xlu1 %v2525_v1  ;;  %123 = vperm.xlu0 %2347, %v2629_v4   ;;  %v2772_v1 = vsub.s32 4, %v2693_v23 }
  0x1f   :  { %127 = vperm.xlu1 %2348, %v2634_v5  }
  0x20   :  { %4148 = vst [vmem:[#allocation8_spill] sm:$0xff] %v2772_v1 }
  0x22   :  { %2350 = vset.pattern.permute.xlu0 %v2527_v6 }
  0x23   :  { %2349 = vset.pattern.permute.xlu1 %v2527_v6  ;;  %165 = vperm.xlu0 %2350, %v2622_v3  }
  0x24   :  { %161 = vperm.xlu1 %2349, %v2614_v0  }
  0x27   :  { %2351 = vset.pattern.permute.xlu0 %v2528_v7 }
  0x28   :  { %169 = vperm.xlu1 %2349, %v2629_v4   ;;  %207 = vperm.xlu0 %2351, %v2614_v0  }
  0x2c   :  { %173 = vperm.xlu1 %2349, %v2634_v5   ;;  %219 = vperm.xlu0 %2351, %v2634_v5  }
  0x30   :  { %2352 = vset.pattern.permute.xlu1 %v2528_v7  ;;  %2354 = vset.pattern.permute.xlu0 %v2529_v8  ;;  %v4085_v7 = vmov 27  }
  0x31   :  { %211 = vperm.xlu1 %2352, %v2622_v3   ;;  %257 = vperm.xlu0 %2354, %v2622_v3  }
  0x35   :  { %215 = vperm.xlu1 %2352, %v2629_v4   ;;  %2355 = vset.pattern.permute.xlu0 %v2530_v9 }
  0x36   :  { %299 = vperm.xlu0 %2355, %v2614_v0  }
  0x39   :  { %2353 = vset.pattern.permute.xlu1 %v2529_v8  ;;  %v2777_v8 = vsub.s32 3, %v2693_v23 }
  0x3a   :  { %253 = vperm.xlu1 %2353, %v2614_v0   ;;  %311 = vperm.xlu0 %2355, %v2634_v5  }
  0x3b   :  { %4149 = vst [vmem:[#allocation9_spill] sm:$0xff] %v2777_v8 }
  0x3e   :  { %261 = vperm.xlu1 %2353, %v2629_v4   ;;  %2358 = vset.pattern.permute.xlu0 %v2531_v10 }
  0x3f   :  { %349 = vperm.xlu0 %2358, %v2622_v3  }
  0x42   :  { %265 = vperm.xlu1 %2353, %v2634_v5  }
  0x43   :  { %2359 = vset.pattern.permute.xlu0 %v2532_v11 }
  0x44   :  { %391 = vperm.xlu0 %2359, %v2614_v0  }
  0x46   :  { %2356 = vset.pattern.permute.xlu1 %v2530_v9 }
  0x47   :  { %303 = vperm.xlu1 %2356, %v2622_v3  }
  0x48   :  { %399 = vperm.xlu0 %2359, %v2629_v4  }
  0x4b   :  { %307 = vperm.xlu1 %2356, %v2629_v4  }
  0x4c   :  { %2363 = vset.pattern.permute.xlu0 %v2533_v12 }
  0x4d   :  { %1061 = vperm.xlu0 %2363, %v2622_v3  }
  0x4f   :  { %2357 = vset.pattern.permute.xlu1 %v2531_v10 }
  0x50   :  { %345 = vperm.xlu1 %2357, %v2614_v0  }
  0x51   :  { %1069 = vperm.xlu0 %2363, %v2634_v5  }
  0x54   :  { %353 = vperm.xlu1 %2357, %v2629_v4  }
  0x55   :  { %2367 = vset.pattern.permute.xlu0 %v2534_v13 }
  0x56   :  { %1145 = vperm.xlu0 %2367, %v2614_v0  }
  0x58   :  { %357 = vperm.xlu1 %2357, %v2634_v5  }
  0x5a   :  { %1157 = vperm.xlu0 %2367, %v2634_v5  }
  0x5c   :  { %2360 = vset.pattern.permute.xlu1 %v2532_v11 }
  0x5d   :  { %395 = vperm.xlu1 %2360, %v2622_v3  }
  0x5e   :  { %2370 = vset.pattern.permute.xlu0 %v2535_v14 }
  0x5f   :  { %1195 = vperm.xlu0 %2370, %v2622_v3  }
  0x61   :  { %2361 = vset.pattern.permute.xlu1 %v2533_v12 }
  0x62   :  { %1057 = vperm.xlu1 %2361, %v2614_v0  }
  0x63   :  { %2371 = vset.pattern.permute.xlu0 %v2536_v15 }
  0x64   :  { %1237 = vperm.xlu0 %2371, %v2614_v0  }
  0x66   :  { %2362 = vset.pattern.permute.xlu1 %v2537_v16 }
  0x67   :  { %1099 = vperm.xlu1 %2362, %v2614_v0  }
  0x68   :  { %1249 = vperm.xlu0 %2371, %v2634_v5  }
  0x6b   :  { %1103 = vperm.xlu1 %2362, %v2622_v3  }
  0x6c   :  { %2374 = vset.pattern.permute.xlu0 %v2538_v17 }
  0x6d   :  { %1287 = vperm.xlu0 %2374, %v2622_v3  }
  0x6f   :  { %2364 = vset.pattern.permute.xlu1 %v2532_v11  ;;  %v2786_v11 = vrot.slane %v2708_v27, %v2772_v1 }
  0x70   :  { %403 = vperm.xlu1 %2364, %v2634_v5  }
  0x71   :  { %2375 = vset.pattern.permute.xlu0 %v2539_v18 }
  0x72   :  { %1329 = vperm.xlu0 %2375, %v2614_v0  }
  0x74   :  { %2365 = vset.pattern.permute.xlu1 %v2533_v12  ;;  %v2791_v12 = vrot.slane %v2708_v27, %v2777_v8 }
  0x75   :  { %1065 = vperm.xlu1 %2365, %v2629_v4  }
  0x76   :  { %1341 = vperm.xlu0 %2375, %v2634_v5  }
  0x79   :  { %2366 = vset.pattern.permute.xlu1 %v2537_v16 }
  0x7a   :  { %1107 = vperm.xlu1 %2366, %v2629_v4   ;;  %2379 = vset.pattern.permute.xlu0 %v4099_v19 }
  0x7b   :  { %1375 = vperm.xlu0 %2379, %v2614_v0  }
  0x7e   :  { %1111 = vperm.xlu1 %2366, %v2634_v5  }
  0x7f   :  { %2380 = vset.pattern.permute.xlu0 %v4101_v20 }
  0x80   :  { %508 = vperm.xlu0 %2380, %v2622_v3  }
  0x82   :  { %2368 = vset.pattern.permute.xlu1 %v2534_v13 }
  0x83   :  { %1149 = vperm.xlu1 %2368, %v2622_v3  }
  0x84   :  { %512 = vperm.xlu0 %2380, %v2629_v4  }
  0x87   :  { %1153 = vperm.xlu1 %2368, %v2629_v4  }
  0x88   :  { %2386 = vset.pattern.permute.xlu0 %v4100_v22 }
  0x89   :  { %558 = vperm.xlu0 %2386, %v2634_v5  }
  0x8b   :  { %2369 = vset.pattern.permute.xlu1 %v2535_v14 }
  0x8c   :  { %1191 = vperm.xlu1 %2369, %v2614_v0  }
  0x8d   :  { %2387 = vset.pattern.permute.xlu0 %v4093_v24 }
  0x8e   :  { %1551 = vperm.xlu0 %2387, %v2622_v3  }
  0x90   :  { %1199 = vperm.xlu1 %2369, %v2629_v4   ;;  %v2710_v28 = vpop.permute.xlu1 %115  ;;  %v2712_v29 = vpop.permute.xlu0 %70 }
  0x92   :  { %1555 = vperm.xlu0 %2387, %v2629_v4  }
  0x94   :  { %1203 = vperm.xlu1 %2369, %v2634_v5   ;;  %v120_v32 = vpop.permute.xlu1 %119  ;;  %v76_v33 = vpop.permute.xlu0 %75 }
  0x95   :  { %v131_v34 = vadd.f32 %v120_v32, %v2717_v30  ;;  %v89_v35 = vadd.f32 %v76_v33, %v2721_v31 }
  0x96   :  { %2391 = vset.pattern.permute.xlu0 %v4096_v36 }
  0x97   :  { %vm135_vm0 = vcmp.gt.f32.partialorder %v131_v34, 0.0  ;;  %v139_v37 = vmul.f32 0.2, %v131_v34  ;;  %vm93_vm1 = vcmp.gt.f32.partialorder %v89_v35, 0.0  ;;  %v97_v38 = vmul.f32 0.2, %v89_v35  ;;  %1601 = vperm.xlu0 %2391, %v2634_v5  }
  0x98   :  { %2372 = vset.pattern.permute.xlu1 %v2536_v15  ;;  %v2729_v39 = vpop.permute.xlu0 %80 }
  0x99   :  { %v143_v42 = vsel %vm135_vm0, %v131_v34, %v139_v37  ;;  %v101_v43 = vsel %vm93_vm1, %v89_v35, %v97_v38  ;;  %1241 = vperm.xlu1 %2372, %v2622_v3   ;;  %v2736_v44 = vpop.permute.xlu1 %85  ;;  %v2804_v34 = vstv %s2174_s27  ;;  %s3683_s27 = sld [smem:[#allocation2 + $0x85]] }
  0x9a   :  { %v149_v45 = vmul.f32 %v2731_v40, %v143_v42  ;;  %v107_v46 = vmul.f32 %v2733_v41, %v101_v43 }
  0x9b   :  { %2393 = vset.pattern.permute.xlu0 %v4089_v47 }
  0x9c   :  { %v153_v49 = vadd.f32 %v149_v45, %v107_v46  ;;  %1635 = vperm.xlu0 %2393, %v2614_v0   ;;  %v2812_v45 = vsub.s32 6, %v2693_v23 }
  0x9d   :  { %1245 = vperm.xlu1 %2372, %v2629_v4   ;;  %v2746_v50 = vpop.permute.xlu0 %123 }
  0x9e   :  { %v2748_v51 = vpop.permute.xlu1 %127  ;;  %4150 = vst [vmem:[#allocation10_spill] sm:$0xff] %v2812_v45 }
  0xa0   :  { %2396 = vset.pattern.permute.xlu0 %v4091_v53 }
  0xa1   :  { %2373 = vset.pattern.permute.xlu1 %v2538_v17  ;;  %604 = vperm.xlu0 %2396, %v2634_v5  }
  0xa2   :  { %1283 = vperm.xlu1 %2373, %v2614_v0   ;;  %v166_v54 = vpop.permute.xlu0 %165 }
  0xa3   :  { %v177_v55 = vadd.f32 %v166_v54, %v2752_v52  ;;  %v2759_v56 = vpop.permute.xlu1 %161 }
  0xa5   :  { %vm181_vm2 = vcmp.gt.f32.partialorder %v177_v55, 0.0  ;;  %v185_v58 = vmul.f32 0.2, %v177_v55  ;;  %2398 = vset.pattern.permute.xlu0 %v4087_v59  ;;  %v88_v59 = vadd.f32 %v2712_v29, %v2721_v31  ;;  %v4094_v29 = vmov 14  }
  0xa6   :  { %1291 = vperm.xlu1 %2373, %v2629_v4   ;;  %638 = vperm.xlu0 %2398, %v2614_v0  }
  0xa7   :  { %v189_v60 = vsel %vm181_vm2, %v177_v55, %v185_v58  ;;  %v2766_v61 = vpop.permute.xlu1 %169  ;;  %v2768_v62 = vpop.permute.xlu0 %207  ;;  %vm92_vm9 = vcmp.gt.f32.partialorder %v88_v59, 0.0 }
  0xa8   :  { %v195_v63 = vmul.f32 %v2761_v57, %v189_v60  ;;  %v2823_v60 = vrot.slane %v2708_v27, %v2812_v45 }
  0xaa   :  { %v199_v6 = vadd.f32 %v195_v63, %v153_v49  ;;  %1295 = vperm.xlu1 %2373, %v2634_v5   ;;  %2401 = vset.pattern.permute.xlu0 %v4085_v7  ;;  %v4079_v49 = vmov 28   ;;  %v130_v7 = vadd.f32 %v2710_v28, %v2717_v30 }
  0xab   :  { %v2779_v9 = vpop.permute.xlu1 %173  ;;  %1685 = vperm.xlu0 %2401, %v2622_v3   ;;  %v2782_v10 = vpop.permute.xlu0 %219 }
  0xac   :  { %vm134_vm8 = vcmp.gt.f32.partialorder %v130_v7, 0.0 }
  0xae   :  { %2376 = vset.pattern.permute.xlu1 %v2539_v18  ;;  %v4081_v18 = vmov 12  }
  0xaf   :  { %1333 = vperm.xlu1 %2376, %v2622_v3   ;;  %1689 = vperm.xlu0 %2401, %v2629_v4  }
  0xb0   :  { %v212_v13 = vpop.permute.xlu1 %211  ;;  %v258_v14 = vpop.permute.xlu0 %257 }
  0xb1   :  { %v223_v15 = vadd.f32 %v212_v13, %v2791_v12  ;;  %v269_v16 = vadd.f32 %v258_v14, %v2786_v11  ;;  %v2832_v14 = vsub.s32 5, %v2693_v23 }
  0xb3   :  { %vm227_vm3 = vcmp.gt.f32.partialorder %v223_v15, 0.0  ;;  %v231_v17 = vmul.f32 0.2, %v223_v15  ;;  %vm273_vm4 = vcmp.gt.f32.partialorder %v269_v16, 0.0  ;;  %1337 = vperm.xlu1 %2376, %v2629_v4   ;;  %2404 = vset.pattern.permute.xlu0 %v4081_v18  ;;  %v277_v32 = vmul.f32 0.2, %v269_v16 }
  0xb4   :  { %v2801_v33 = vpop.permute.xlu1 %215  ;;  %684 = vperm.xlu0 %2404, %v2614_v0   ;;  %4151 = vst [vmem:[#allocation11_spill] sm:$0xff] %v2832_v14  ;;  %v2862_v18 = vsub.s32 7, %v2693_v23  ;;  %v90_v23 = vadd.f32 %v2729_v39, %v2721_v31 }
  0xb5   :  { %v235_v35 = vsel %vm227_vm3, %v223_v15, %v231_v17  ;;  %v2806_v37 = vpop.permute.xlu0 %299  ;;  %v281_v42 = vsel %vm273_vm4, %v269_v16, %v277_v32  ;;  %v4077_v16 = vmov 13   ;;  %v2838_v17 = vstv %s2177_s28  ;;  %s2185_s28 = sld [smem:[#allocation2 + $0x86]] }
  0xb6   :  { %v241_v38 = vmul.f32 %v2804_v34, %v235_v35  ;;  %v287_v43 = vmul.f32 %v2799_v21, %v281_v42  ;;  %4152 = vst [vmem:[#allocation12_spill] sm:$0xff] %v2862_v18  ;;  %vm94_vm10 = vcmp.gt.f32.partialorder %v90_v23, 0.0 }
  0xb7   :  { %2377 = vset.pattern.permute.xlu1 %v4101_v20 }
  0xb8   :  { %v245_v46 = vadd.f32 %v241_v38, %v199_v6  ;;  %504 = vperm.xlu1 %2377, %v2614_v0   ;;  %2407 = vset.pattern.permute.xlu0 %v4079_v49 }
  0xb9   :  { %v2816_v54 = vpop.permute.xlu1 %253  ;;  %1731 = vperm.xlu0 %2407, %v2622_v3   ;;  %v2819_v55 = vpop.permute.xlu0 %311 }
  0xba   :  { %v291_v58 = vadd.f32 %v287_v43, %v245_v46  ;;  %v2846_v43 = vrot.slane %v2708_v27, %v2832_v14 }
  0xbc   :  { %2378 = vset.pattern.permute.xlu1 %v4100_v22 }
  0xbd   :  { %546 = vperm.xlu1 %2378, %v2614_v0   ;;  %v2827_v63 = vpop.permute.xlu1 %261  ;;  %1735 = vperm.xlu0 %2407, %v2629_v4  }
  0xbe   :  { %v350_v6 = vpop.permute.xlu0 %349 }
  0xbf   :  { %v361_v13 = vadd.f32 %v350_v6, %v2823_v60  ;;  %v4083_v6 = vmov 29  }
  0xc1   :  { %550 = vperm.xlu1 %2378, %v2622_v3   ;;  %v2835_v15 = vpop.permute.xlu1 %265  ;;  %2410 = vset.pattern.permute.xlu0 %v4077_v16  ;;  %vm365_vm5 = vcmp.gt.f32.partialorder %v361_v13, 0.0  ;;  %v369_v32 = vmul.f32 0.2, %v361_v13 }
  0xc2   :  { %730 = vperm.xlu0 %2410, %v2614_v0  }
  0xc3   :  { %v373_v35 = vsel %vm365_vm5, %v361_v13, %v369_v32  ;;  %v2841_v38 = vpop.permute.xlu0 %391 }
  0xc4   :  { %v379_v42 = vmul.f32 %v2838_v17, %v373_v35  ;;  %v52_v35 = vld [vmem:[%s4069_s2] sm:$0x3] }
  0xc5   :  { %2381 = vset.pattern.permute.xlu1 %v4099_v19  ;;  %vm56_vm7 = vnez %v52_v35  ;;  %v2890_v35 = vld [vmem:[%s4070_s3 + $0x10] sm:$0xff]  ;;  %v176_v19 = vadd.f32 %v2759_v56, %v2752_v52  ;;  %v4104_v56 = vmov 30  }
  0xc6   :  { %1379 = vperm.xlu1 %2381, %v2622_v3   ;;  %v304_v46 = vpop.permute.xlu1 %303  ;;  %2413 = vset.pattern.permute.xlu0 %v4083_v6  ;;  %v2864_v6 = vstv %s2176_s29  ;;  %v2897_v39 = vsel %vm56_vm7, 16843009, %v4097_v2  ;;  %v2915_v22 = vrot.slane %v2890_v35, %v2742_v48  ;;  %s2186_s29 = sld [smem:[#allocation2 + $0x87]] }
  0xc7   :  { %v315_v16 = vadd.f32 %v304_v46, %v2846_v43  ;;  %1777 = vperm.xlu0 %2413, %v2622_v3   ;;  %v2853_v13 = vpop.permute.xlu0 %399  ;;  %vm180_vm14 = vcmp.gt.f32.partialorder %v176_v19, 0.0 }
  0xc9   :  { %vm319_vm6 = vcmp.gt.f32.partialorder %v315_v16, 0.0  ;;  %v323_v32 = vmul.f32 0.2, %v315_v16 }
  0xca   :  { %2382 = vset.pattern.permute.xlu1 %v4093_v24  ;;  %v2859_v49 = vpop.permute.xlu1 %307  ;;  %v132_v24 = vadd.f32 %v2746_v50, %v2717_v30  ;;  %v96_v50 = vmul.f32 0.2, %v88_v59 }
  0xcb   :  { %v327_v46 = vsel %vm319_vm6, %v315_v16, %v323_v32  ;;  %1547 = vperm.xlu1 %2382, %v2614_v0   ;;  %1781 = vperm.xlu0 %2413, %v2629_v4   ;;  %v2879_v16 = vrot.slane %v2708_v27, %v2862_v18  ;;  %v2894_v27 = vstv %s2178_s30  ;;  %s2222_s30 = sld [smem:[#allocation2 + $0x187]] }
  0xcc   :  { %v333_v47 = vmul.f32 %v2864_v6, %v327_v46  ;;  %v2873_v53 = vpop.permute.xlu0 %1061  ;;  %v91_v46 = vadd.f32 %v2736_v44, %v2721_v31  ;;  %vm136_vm11 = vcmp.gt.f32.partialorder %v132_v24, 0.0 }
  0xcd   :  { %4153 = vst [vmem:[#allocation13_spill] sm:$0xff] %v2873_v53  ;;  %v222_v53 = vadd.f32 %v2768_v62, %v2791_v12 }
  0xce   :  { %v337_v32 = vadd.f32 %v333_v47, %v291_v58  ;;  %v138_v47 = vmul.f32 0.2, %v130_v7  ;;  %vm95_vm12 = vcmp.gt.f32.partialorder %v91_v46, 0.0 }
  0xcf   :  { %2383 = vset.pattern.permute.xlu1 %v4096_v36  ;;  %v2884_v28 = vpop.permute.xlu1 %345  ;;  %2416 = vset.pattern.permute.xlu0 %v4094_v29  ;;  %v98_v29 = vmul.f32 0.2, %v90_v23  ;;  %v133_v36 = vadd.f32 %v2748_v51, %v2717_v30  ;;  %v2922_v30 = vrot.slane %v2890_v35, %v2702_v26  ;;  %v100_v51 = vsel %vm92_vm9, %v88_v59, %v96_v50 }
  0xd0   :  { %1589 = vperm.xlu1 %2383, %v2614_v0   ;;  %776 = vperm.xlu0 %2416, %v2614_v0   ;;  %v2901_v58 = vpop.permute.xlu0 %1069  ;;  %v2909_v2 = vadd.f32 %v379_v42, %v337_v32  ;;  %v142_v44 = vsel %vm134_vm8, %v130_v7, %v138_v47  ;;  %v2932_v42 = vrot.slane %v2890_v35, %v2699_v25  ;;  %v99_v32 = vmul.f32 0.2, %v91_v46 }
  0xd1   :  { %4154 = vst [vmem:[#allocation14_spill] sm:$0xff] %v2901_v58  ;;  %v140_v58 = vmul.f32 0.2, %v132_v24  ;;  %v102_v20 = vsel %vm94_vm10, %v90_v23, %v98_v29  ;;  %v141_v26 = vmul.f32 0.2, %v133_v36  ;;  %vm137_vm13 = vcmp.gt.f32.partialorder %v133_v36, 0.0 }
  0xd2   :  { %v184_v59 = vmul.f32 0.2, %v176_v19  ;;  %v178_v47 = vadd.f32 %v2766_v61, %v2752_v52  ;;  %v2946_v29 = vstv %s2892_s14  ;;  %v106_v25 = vmul.f32 %v2733_v41, %v100_v51 }
  0xd3   :  { %v2918_v31 = vpop.permute.xlu1 %353  ;;  %v144_v48 = vsel %vm136_vm11, %v132_v24, %v140_v58  ;;  %v4155_v61 = vmov 8   ;;  %v103_v14 = vsel %vm95_vm12, %v91_v46, %v99_v32  ;;  %v145_v24 = vsel %vm137_vm13, %v133_v36, %v141_v26 }
  0xd4   :  { %1593 = vperm.xlu1 %2383, %v2622_v3   ;;  %2419 = vset.pattern.permute.xlu0 %v4104_v56  ;;  %v148_v56 = vmul.f32 %v2731_v40, %v142_v44  ;;  %v108_v44 = vmul.f32 %v2733_v41, %v102_v20  ;;  %v2958_v58 = vstv %s2907_s15  ;;  %v150_v62 = vmul.f32 %v2731_v40, %v144_v48  ;;  %s3342_s15 = sld [smem:[#allocation2 + $0x81]] }
  0xd5   :  { %1823 = vperm.xlu0 %2419, %v2622_v3   ;;  %v1146_v7 = vpop.permute.xlu0 %1145  ;;  %v186_v18 = vmul.f32 0.2, %v178_v47  ;;  %vm182_vm0 = vcmp.gt.f32.partialorder %v178_v47, 0.0  ;;  %v179_v20 = vadd.f32 %v2779_v9, %v2752_v52  ;;  %v2969_v26 = vstv %s2924_s0  ;;  %s3344_s0 = sld [smem:[#allocation2 + $0x82]] }
  0xd6   :  { %v1160_v50 = vadd.f32 %v1146_v7, %v2915_v22  ;;  %v152_v46 = vadd.f32 %v148_v56, %v106_v25  ;;  %v151_v32 = vmul.f32 %v2731_v40, %v145_v24  ;;  %v230_v48 = vmul.f32 0.2, %v222_v53 }
  0xd7   :  { %v2943_v23 = vpop.permute.xlu1 %357  ;;  %vm226_vm1 = vcmp.gt.f32.partialorder %v222_v53, 0.0  ;;  %v4157_v9 = vmov 9   ;;  %v154_v25 = vadd.f32 %v150_v62, %v108_v44  ;;  %v190_v40 = vsel %vm182_vm0, %v178_v47, %v186_v18 }
  0xd8   :  { %2384 = vset.pattern.permute.xlu1 %v4155_v61  ;;  %vm1164_vm15 = vcmp.gt.f32.partialorder %v1160_v50, 0.0  ;;  %v1168_v7 = vmul.f32 0.2, %v1160_v50  ;;  %v188_v61 = vsel %vm180_vm14, %v176_v19, %v184_v59  ;;  %v2977_v19 = vrot.slane %v2890_v35, %v2772_v1 }
  0xd9   :  { %516 = vperm.xlu1 %2384, %v2634_v5   ;;  %1827 = vperm.xlu0 %2419, %v2629_v4   ;;  %v2960_v51 = vpop.permute.xlu0 %1157  ;;  %v109_v59 = vmul.f32 %v2733_v41, %v103_v14  ;;  %v2988_v56 = vstv %s2939_s16  ;;  %v2992_v41 = vrot.slane %v2890_v35, %v2812_v45  ;;  %v187_v14 = vmul.f32 0.2, %v179_v20  ;;  %s3355_s16 = sld [smem:[#allocation2 + $0x80]] }
  0xda   :  { %4156 = vst [vmem:[#allocation15_spill] sm:$0xff] %v2960_v51  ;;  %v1172_v8 = vsel %vm1164_vm15, %v1160_v50, %v1168_v7  ;;  %v194_v50 = vmul.f32 %v2761_v57, %v188_v61  ;;  %v225_v7 = vadd.f32 %v2782_v10, %v2791_v12  ;;  %v234_v47 = vsel %vm226_vm1, %v222_v53, %v230_v48 }
  0xdb   :  { %v2972_v36 = vmul.f32 %v2946_v29, %v1172_v8  ;;  %v4116_v8 = vmov 15   ;;  %v2998_v18 = vadd.f32 %v151_v32, %v109_v59  ;;  %vm183_vm3 = vcmp.gt.f32.partialorder %v179_v20, 0.0 }
  0xdc   :  { %v396_v51 = vpop.permute.xlu1 %395  ;;  %v198_v62 = vadd.f32 %v194_v50, %v152_v46  ;;  %v196_v61 = vmul.f32 %v2761_v57, %v190_v40  ;;  %v314_v45 = vadd.f32 %v2806_v37, %v2846_v43  ;;  %v4159_v59 = vmov 23  }
  0xdd   :  { %v407_v52 = vadd.f32 %v396_v51, %v2879_v16  ;;  %2385 = vset.pattern.permute.xlu1 %v4157_v9  ;;  %2422 = vset.pattern.permute.xlu0 %v4116_v8  ;;  %v268_v51 = vadd.f32 %v2816_v54, %v2786_v11  ;;  %v224_v9 = vadd.f32 %v2801_v33, %v2791_v12  ;;  %v4120_v53 = vmov 31  }
  0xde   :  { %554 = vperm.xlu1 %2385, %v2629_v4   ;;  %822 = vperm.xlu0 %2422, %v2614_v0   ;;  %v2996_v44 = vpop.permute.xlu0 %1195  ;;  %v3012_v48 = vstv %s2964_s17  ;;  %v240_v46 = vmul.f32 %v2804_v34, %v234_v47  ;;  %v191_v50 = vsel %vm183_vm3, %v179_v20, %v187_v14  ;;  %vm229_vm4 = vcmp.gt.f32.partialorder %v225_v7, 0.0  ;;  %s3376_s17 = sld [smem:[#allocation2 + $0x180]] }
  0xdf   :  { %vm411_vm2 = vcmp.gt.f32.partialorder %v407_v52, 0.0  ;;  %v415_v24 = vmul.f32 0.2, %v407_v52  ;;  %4158 = vst [vmem:[#allocation16_spill] sm:$0xff] %v2996_v44  ;;  %v233_v12 = vmul.f32 0.2, %v225_v7 }
  0xe0   :  { %v276_v37 = vmul.f32 0.2, %v268_v51  ;;  %vm228_vm6 = vcmp.gt.f32.partialorder %v224_v9, 0.0  ;;  %v232_v40 = vmul.f32 0.2, %v224_v9  ;;  %vm272_vm7 = vcmp.gt.f32.partialorder %v268_v51, 0.0 }
  0xe1   :  { %v419_v10 = vsel %vm411_vm2, %v407_v52, %v415_v24  ;;  %v1058_v8 = vpop.permute.xlu1 %1057  ;;  %v322_v47 = vmul.f32 0.2, %v314_v45  ;;  %vm318_vm9 = vcmp.gt.f32.partialorder %v314_v45, 0.0  ;;  %v237_v1 = vsel %vm229_vm4, %v225_v7, %v233_v12 }
  0xe2   :  { %v1072_v32 = vadd.f32 %v1058_v8, %v2922_v30  ;;  %2388 = vset.pattern.permute.xlu1 %v4159_v59  ;;  %2425 = vset.pattern.permute.xlu0 %v4120_v53  ;;  %v425_v54 = vmul.f32 %v2894_v27, %v419_v10  ;;  %v236_v44 = vsel %vm228_vm6, %v224_v9, %v232_v40 }
  0xe3   :  { %1383 = vperm.xlu1 %2388, %v2629_v4   ;;  %1869 = vperm.xlu0 %2425, %v2622_v3   ;;  %v1238_v33 = vpop.permute.xlu0 %1237  ;;  %v270_v3 = vadd.f32 %v2827_v63, %v2786_v11  ;;  %v316_v7 = vadd.f32 %v2859_v49, %v2846_v43  ;;  %v362_v49 = vadd.f32 %v2918_v31, %v2823_v60 }
  0xe4   :  { %vm1076_vm5 = vcmp.gt.f32.partialorder %v1072_v32, 0.0  ;;  %v1080_v52 = vmul.f32 0.2, %v1072_v32  ;;  %v1252_v8 = vadd.f32 %v1238_v33, %v2977_v19  ;;  %v3020_v24 = vadd.f32 %v425_v54, %v2909_v2 }
  0xe5   :  { %v200_v2 = vadd.f32 %v196_v61, %v154_v25  ;;  %v280_v54 = vsel %vm272_vm7, %v268_v51, %v276_v37  ;;  %v326_v25 = vsel %vm318_vm9, %v314_v45, %v322_v47  ;;  %v278_v51 = vmul.f32 0.2, %v270_v3 }
  0xe6   :  { %4160 = vst [vmem:[#allocation17_spill] sm:$0xff] %v3020_v24  ;;  %v1084_v20 = vsel %vm1076_vm5, %v1072_v32, %v1080_v52  ;;  %v1100_v14 = vpop.permute.xlu1 %1099  ;;  %vm1256_vm8 = vcmp.gt.f32.partialorder %v1252_v8, 0.0  ;;  %v1260_v10 = vmul.f32 0.2, %v1252_v8  ;;  %v197_v32 = vmul.f32 %v2761_v57, %v191_v50 }
  0xe7   :  { %v1090_v59 = vmul.f32 %v2958_v58, %v1084_v20  ;;  %v1114_v53 = vadd.f32 %v1100_v14, %v2932_v42  ;;  %1387 = vperm.xlu1 %2388, %v2634_v5   ;;  %1873 = vperm.xlu0 %2425, %v2629_v4   ;;  %v3028_v33 = vpop.permute.xlu0 %1249  ;;  %v360_v24 = vadd.f32 %v2884_v28, %v2823_v60  ;;  %v4161_v37 = vmov 24  }
  0xe8   :  { %v1264_v52 = vsel %vm1256_vm8, %v1252_v8, %v1260_v10  ;;  %v244_v14 = vadd.f32 %v240_v46, %v198_v62  ;;  %v286_v57 = vmul.f32 %v2799_v21, %v280_v54  ;;  %v317_v28 = vadd.f32 %v2819_v55, %v2846_v43 }
  0xe9   :  { %vm1118_vm10 = vcmp.gt.f32.partialorder %v1114_v53, 0.0  ;;  %v1122_v63 = vmul.f32 0.2, %v1114_v53  ;;  %v3035_v20 = vmul.f32 %v2988_v56, %v1264_v52  ;;  %vm274_vm11 = vcmp.gt.f32.partialorder %v270_v3, 0.0 }
  0xea   :  { %v3040_v61 = vpop.permute.xlu1 %1103  ;;  %v271_v62 = vadd.f32 %v2835_v15, %v2786_v11  ;;  %v3055_v46 = vadd.f32 %v197_v32, %v2998_v18  ;;  %v3058_v55 = vmul.f32 %v2804_v34, %v237_v1  ;;  %v368_v12 = vmul.f32 0.2, %v360_v24  ;;  %v3064_v11 = vld [vmem:[%s4069_s2 + $0x4] sm:$0x3] }
  0xeb   :  { %v1126_v50 = vsel %vm1118_vm10, %v1114_v53, %v1122_v63  ;;  %2389 = vset.pattern.permute.xlu1 %v4161_v37  ;;  %v242_v53 = vmul.f32 %v2804_v34, %v236_v44  ;;  %vm364_vm12 = vcmp.gt.f32.partialorder %v360_v24, 0.0  ;;  %v332_v43 = vmul.f32 %v2864_v6, %v326_v25 }
  0xec   :  { %v1132_v45 = vmul.f32 %v2969_v26, %v1126_v50  ;;  %1559 = vperm.xlu1 %2389, %v2634_v5   ;;  %v3052_v9 = vpop.permute.xlu0 %1287  ;;  %v406_v5 = vadd.f32 %v2841_v38, %v2879_v16  ;;  %v282_v1 = vsel %vm274_vm11, %v270_v3, %v278_v51  ;;  %vm321_vm13 = vcmp.gt.f32.partialorder %v317_v28, 0.0 }
  0xed   :  { %v325_v34 = vmul.f32 0.2, %v317_v28  ;;  %v290_v18 = vadd.f32 %v286_v57, %v244_v14  ;;  %v279_v8 = vmul.f32 0.2, %v271_v62  ;;  %v324_v40 = vmul.f32 0.2, %v316_v7 }
  0xee   :  { %v1136_v15 = vadd.f32 %v1132_v45, %v1090_v59  ;;  %v4162_v10 = vmov 25   ;;  %vm58_vm14 = vnez %v3064_v11  ;;  %v246_v38 = vadd.f32 %v242_v53, %v200_v2 }
  0xef   :  { %v404_v44 = vpop.permute.xlu1 %403  ;;  %vm275_vm15 = vcmp.gt.f32.partialorder %v271_v62, 0.0  ;;  %vm320_vm0 = vcmp.gt.f32.partialorder %v316_v7, 0.0  ;;  %v372_v31 = vsel %vm364_vm12, %v360_v24, %v368_v12  ;;  %v288_v3 = vmul.f32 %v2799_v21, %v282_v1 }
  0xf0   :  { %v3073_v47 = vadd.f32 %v2972_v36, %v1136_v15  ;;  %2390 = vset.pattern.permute.xlu1 %v4162_v10  ;;  %v414_v59 = vmul.f32 0.2, %v406_v5  ;;  %v370_v32 = vmul.f32 0.2, %v362_v49  ;;  %v408_v54 = vadd.f32 %v2853_v13, %v2879_v16 }
  0xf1   :  { %1597 = vperm.xlu1 %2390, %v2629_v4   ;;  %v1330_v36 = vpop.permute.xlu0 %1329  ;;  %v329_v52 = vsel %vm321_vm13, %v317_v28, %v325_v34  ;;  %vm410_vm1 = vcmp.gt.f32.partialorder %v406_v5, 0.0  ;;  %vm366_vm2 = vcmp.gt.f32.partialorder %v362_v49, 0.0  ;;  %v283_v63 = vsel %vm275_vm15, %v271_v62, %v279_v8 }
  0xf2   :  { %v1344_v2 = vadd.f32 %v1330_v36, %v2992_v41  ;;  %v328_v14 = vsel %vm320_vm0, %v316_v7, %v324_v40  ;;  %v378_v24 = vmul.f32 %v2838_v17, %v372_v31  ;;  %v336_v4 = vadd.f32 %v332_v43, %v290_v18  ;;  %v55_v18 = vld [vmem:[%s4069_s2 + $0x6] sm:$0x3] }
  0xf3   :  { %v363_v57 = vadd.f32 %v2943_v23, %v2823_v60  ;;  %v4163_v50 = vmov 10   ;;  %v292_v28 = vadd.f32 %v288_v3, %v246_v38  ;;  %v418_v37 = vsel %vm410_vm1, %v406_v5, %v414_v59 }
  0xf4   :  { %v1066_v25 = vpop.permute.xlu1 %1065  ;;  %vm1348_vm3 = vcmp.gt.f32.partialorder %v1344_v2, 0.0  ;;  %v1352_v13 = vmul.f32 0.2, %v1344_v2  ;;  %v374_v45 = vsel %vm366_vm2, %v362_v49, %v370_v32  ;;  %v416_v53 = vmul.f32 0.2, %v408_v54 }
  0xf5   :  { %v1074_v51 = vadd.f32 %v1066_v25, %v2922_v30  ;;  %2392 = vset.pattern.permute.xlu1 %v4163_v50  ;;  %v409_v62 = vadd.f32 %v404_v44, %v2879_v16  ;;  %v289_v15 = vmul.f32 %v2799_v21, %v283_v63  ;;  %v334_v60 = vmul.f32 %v2864_v6, %v328_v14  ;;  %v3103_v21 = vld [vmem:[%s4068_s1 + $0x8] sm:$0xff] }
  0xf6   :  { %592 = vperm.xlu1 %2392, %v2614_v0   ;;  %v1356_v12 = vsel %vm1348_vm3, %v1344_v2, %v1352_v13  ;;  %vm412_vm5 = vcmp.gt.f32.partialorder %v408_v54, 0.0  ;;  %v371_v43 = vmul.f32 0.2, %v363_v57  ;;  %v382_v49 = vadd.f32 %v378_v24, %v336_v4 }
  0xf7   :  { %vm1078_vm4 = vcmp.gt.f32.partialorder %v1074_v51, 0.0  ;;  %v1082_v7 = vmul.f32 0.2, %v1074_v51  ;;  %v3094_v23 = vmul.f32 %v3012_v48, %v1356_v12  ;;  %v424_v34 = vmul.f32 %v2894_v27, %v418_v37 }
  0xf8   :  { %v380_v0 = vmul.f32 %v2838_v17, %v374_v45  ;;  %vm367_vm6 = vcmp.gt.f32.partialorder %v363_v57, 0.0  ;;  %v247_v8 = vadd.f32 %v3058_v55, %v3055_v46  ;;  %v420_v40 = vsel %vm412_vm5, %v408_v54, %v416_v53 }
  0xf9   :  { %v1086_v1 = vsel %vm1078_vm4, %v1074_v51, %v1082_v7  ;;  %v1108_v5 = vpop.permute.xlu1 %1107  ;;  %v417_v10 = vmul.f32 0.2, %v409_v62  ;;  %v4164_v38 = vmov 0   ;;  %vm413_vm7 = vcmp.gt.f32.partialorder %v409_v62, 0.0  ;;  %v3145_v7 = vld [vmem:[%s4068_s1 + $0x10] sm:$0xff] }
  0xfa   :  { %v1092_v16 = vmul.f32 %v2958_v58, %v1086_v1  ;;  %v1116_v44 = vadd.f32 %v1108_v5, %v2932_v42  ;;  %596 = vperm.xlu1 %2392, %v3103_v21   ;;  %v434_v31 = vsel %vm58_vm14, 16843009, %v4164_v38  ;;  %v338_v59 = vadd.f32 %v334_v60, %v292_v28  ;;  %v3159_v5 = vpop.permute.xlu0 %1341 }
  0xfb   :  { %v293_v32 = vadd.f32 %v289_v15, %v247_v8  ;;  %v335_v36 = vmul.f32 %v2864_v6, %v329_v52  ;;  %v375_v2 = vsel %vm367_vm6, %v363_v57, %v371_v43  ;;  %vm59_vm9 = vnez %v55_v18 }
  0xfc   :  { %vm1120_vm8 = vcmp.gt.f32.partialorder %v1116_v44, 0.0  ;;  %v1124_v3 = vmul.f32 0.2, %v1116_v44  ;;  %v4165_v46 = vmov 26   ;;  %v428_v55 = vadd.f32 %v424_v34, %v382_v49 }
  0xfd   :  { %v3116_v63 = vpop.permute.xlu1 %1111  ;;  %v384_v54 = vadd.f32 %v380_v0, %v338_v59  ;;  %v426_v11 = vmul.f32 %v2894_v27, %v420_v40  ;;  %v421_v24 = vsel %vm413_vm7, %v409_v62, %v417_v10  ;;  %v4166_v4 = vunpack.c.0.s8 %v2897_v39  ;;  %v4178_v0 = vld [vmem:[#allocation9_spill] sm:$0xff] }
  0xfe   :  { %v1128_v14 = vsel %vm1120_vm8, %v1116_v44, %v1124_v3  ;;  %2394 = vset.pattern.permute.xlu1 %v4165_v46  ;;  %v4167_v6 = vmov 0  ;;  %v438_v52 = vunpack.c.0.s8 %v434_v31  ;;  %v381_v57 = vmul.f32 %v2838_v17, %v375_v2  ;;  %v3178_v31 = vld [vmem:[%s4068_s1 + $0x18] sm:$0xff]  ;;  %v1376_v59 = vpop.permute.xlu0 %1375 }
  0xff   :  { %v1134_v25 = vmul.f32 %v2969_v26, %v1128_v14  ;;  %1639 = vperm.xlu1 %2394, %v3103_v21   ;;  %vm3124_vm10 = vcmp.ne.s32.totalorder %v4166_v4, 0  ;;  %v435_v51 = vsel %vm59_vm9, 16843009, %v4164_v38  ;;  %vm448_vm11 = vcmask 261120  }
 0x100   :  { %v4168_v6 = vsel %vm3124_vm10, 4294967295, %v4167_v6  ;;  %v3134_v37 = vsel %vm3124_vm10, %v428_v55, -1e+30  ;;  %v430_v45 = vadd.f32 %v426_v11, %v384_v54  ;;  %v339_v53 = vadd.f32 %v335_v36, %v293_v32 }
 0x101   :  { %4169 = vst [vmem:[#allocation18_spill] sm:$0xff] %v4168_v6  ;;  %v1138_v13 = vadd.f32 %v1134_v25, %v1092_v16  ;;  %4170 = vst [vmem:[#allocation19_spill] sm:$0xff] %v3134_v37  ;;  %v427_v39 = vmul.f32 %v2894_v27, %v421_v24  ;;  %vm3138_vm12 = vcmp.ne.s32.totalorder %v438_v52, 0  ;;  %v4171_v62 = vmov 0 }
 0x102   :  { %v3130_v28 = vpop.permute.xlu1 %1149  ;;  %v4172_v62 = vsel %vm3138_vm12, 4294967295, %v4171_v62  ;;  %v439_v17 = vunpack.c.0.s8 %v435_v51  ;;  %v385_v12 = vadd.f32 %v381_v57, %v339_v53  ;;  %v449_v15 = vsel %vm448_vm11, %v3134_v37, -inf  ;;  %v3188_v24 = vpop.permute.xlu0 %508 }
 0x103   :  { %2395 = vset.pattern.permute.xlu1 %v4163_v50  ;;  %4173 = vst [vmem:[#allocation20_spill] sm:$0xff] %v4172_v62  ;;  %v3152_v27 = vsel %vm3138_vm12, %v430_v45, -1e+30  ;;  %v4175_v1 = vmov 0  ;;  %v3167_v16 = vrot.slane %v2890_v35, %v4178_v0  ;;  %v3183_v14 = vstv %s2202_s26  ;;  %s3514_s26 = sld [smem:[#allocation2 + $0x186]] }
 0x104   :  { %600 = vperm.xlu1 %2395, %v3145_v7   ;;  %4174 = vst [vmem:[#allocation21_spill] sm:$0xff] %v3152_v27  ;;  %v431_v50 = vadd.f32 %v427_v39, %v385_v12  ;;  %vm3155_vm13 = vcmp.ne.s32.totalorder %v439_v17, 0  ;;  %v455_v34 = vsel %vm448_vm11, %v3152_v27, -inf  ;;  %v4180_v11 = vmov 11   ;;  %v3200_v39 = vld [vmem:[%s4068_s1] sm:$0xff]  ;;  %v4182_v12 = vld [vmem:[#allocation12_spill] sm:$0xff] }
 0x105   :  { %v4176_v1 = vsel %vm3155_vm13, 4294967295, %v4175_v1  ;;  %v4181_v45 = vmov 27  }
 0x106   :  { %v1154_v60 = vpop.permute.xlu1 %1153  ;;  %450 = vmax.xlane.f32.xlu0 %v449_v15  ;;  %4177 = vst [vmem:[#allocation22_spill] sm:$0xff] %v4176_v1  ;;  %v3171_v44 = vsel %vm3155_vm13, %v431_v50, -1e+30  ;;  %v3203_v17 = vpop.permute.xlu0 %512  ;;  %v3209_v15 = vrot.slane %v2890_v35, %v4182_v12  ;;  %v4218_v1 = vmov 31  }
 0x107   :  { %v1162_v43 = vadd.f32 %v1154_v60, %v2915_v22  ;;  %4179 = vst [vmem:[#allocation9_spill] sm:$0xff] %v3171_v44  ;;  %v458_v3 = vsel %vm448_vm11, %v3171_v44, -inf }
 0x108   :  { %2397 = vset.pattern.permute.xlu1 %v4165_v46  ;;  %4183 = vst [vmem:[#allocation23_spill] sm:$0xff] %v3209_v15 }
 0x109   :  { %vm1166_vm14 = vcmp.gt.f32.partialorder %v1162_v43, 0.0  ;;  %v1170_v49 = vmul.f32 0.2, %v1162_v43  ;;  %1643 = vperm.xlu1 %2397, %v3145_v7  }
 0x10a   :  { %456 = vmax.xlane.f32.xlu0 %v455_v34  ;;  %v3214_v50 = vpop.permute.xlu0 %558  ;;  %v4184_v34 = vld [vmem:[#allocation11_spill] sm:$0xff] }
 0x10b   :  { %v1174_v18 = vsel %vm1166_vm14, %v1162_v43, %v1170_v49  ;;  %v1192_v8 = vpop.permute.xlu1 %1191  ;;  %v1390_v43 = vadd.f32 %v1376_v59, %v3209_v15 }
 0x10c   :  { %v1180_v40 = vmul.f32 %v2946_v29, %v1174_v18  ;;  %v1206_v10 = vadd.f32 %v1192_v8, %v3167_v16  ;;  %v3219_v18 = vrot.slane %v2890_v35, %v4184_v34 }
 0x10d   :  { %1647 = vperm.xlu1 %2397, %v3178_v31   ;;  %vm1394_vm2 = vcmp.gt.f32.partialorder %v1390_v43, 0.0 }
 0x10e   :  { %v1184_v32 = vadd.f32 %v1180_v40, %v1138_v13  ;;  %vm1210_vm15 = vcmp.gt.f32.partialorder %v1206_v10, 0.0  ;;  %v1214_v36 = vmul.f32 0.2, %v1206_v10  ;;  %459 = vmax.xlane.f32.xlu0 %v458_v3 }
 0x10f   :  { %v1200_v2 = vpop.permute.xlu1 %1199 }
 0x110   :  { %v1218_v46 = vsel %vm1210_vm15, %v1206_v10, %v1214_v36  ;;  %v1208_v55 = vadd.f32 %v1200_v2, %v3167_v16  ;;  %v3224_v36 = vpop.permute.xlu0 %1551 }
 0x111   :  { %v1224_v54 = vmul.f32 %v3183_v14, %v1218_v46  ;;  %2399 = vset.pattern.permute.xlu1 %v4180_v11  ;;  %v3227_v46 = vstv %s2204_s10 }
 0x112   :  { %vm1212_vm0 = vcmp.gt.f32.partialorder %v1208_v55, 0.0  ;;  %v1216_v25 = vmul.f32 0.2, %v1208_v55  ;;  %642 = vperm.xlu1 %2399, %v3103_v21  }
 0x113   :  { %v1228_v4 = vadd.f32 %v1224_v54, %v3073_v47  ;;  %v3192_v52 = vpop.permute.xlu1 %1203 }
 0x114   :  { %v1220_v57 = vsel %vm1212_vm0, %v1208_v55, %v1216_v25 }
 0x115   :  { %v1274_v51 = vadd.f32 %v3035_v20, %v1228_v4  ;;  %v1226_v13 = vmul.f32 %v3183_v14, %v1220_v57 }
 0x116   :  { %2400 = vset.pattern.permute.xlu1 %v4181_v45 }
 0x117   :  { %v1230_v53 = vadd.f32 %v1226_v13, %v1184_v32  ;;  %1681 = vperm.xlu1 %2400, %v3200_v39   ;;  %v1398_v32 = vmul.f32 0.2, %v1390_v43 }
 0x118   :  { %v3205_v47 = vpop.permute.xlu1 %1241 }
 0x119   :  { %v1402_v25 = vsel %vm1394_vm2, %v1390_v43, %v1398_v32 }
 0x11b   :  { %2402 = vset.pattern.permute.xlu1 %v4180_v11  ;;  %v3231_v11 = vstv %s2206_s11 }
 0x11c   :  { %646 = vperm.xlu1 %2402, %v3145_v7   ;;  %v1246_v20 = vpop.permute.xlu1 %1245  ;;  %4185 = vst [vmem:[#allocation11_spill] sm:$0xff] %v3231_v11  ;;  %v1408_v13 = vmul.f32 %v3231_v11, %v1402_v25 }
 0x11d   :  { %v1254_v60 = vadd.f32 %v1246_v20, %v2977_v19  ;;  %v3238_v20 = vpop.permute.xlu0 %1555 }
 0x11f   :  { %vm1258_vm1 = vcmp.gt.f32.partialorder %v1254_v60, 0.0  ;;  %v1262_v49 = vmul.f32 0.2, %v1254_v60 }
 0x120   :  { %650 = vperm.xlu1 %2402, %v3178_v31  }
 0x121   :  { %v1266_v8 = vsel %vm1258_vm1, %v1254_v60, %v1262_v49  ;;  %v1284_v40 = vpop.permute.xlu1 %1283 }
 0x122   :  { %v1272_v10 = vmul.f32 %v2988_v56, %v1266_v8  ;;  %v1298_v3 = vadd.f32 %v1284_v40, %v3219_v18 }
 0x124   :  { %v1276_v2 = vadd.f32 %v1272_v10, %v1230_v53  ;;  %vm1302_vm3 = vcmp.gt.f32.partialorder %v1298_v3, 0.0  ;;  %v1306_v59 = vmul.f32 0.2, %v1298_v3  ;;  %2403 = vset.pattern.permute.xlu1 %v4181_v45  ;;  %v4186_v53 = vmov 12  }
 0x125   :  { %1693 = vperm.xlu1 %2403, %v3178_v31   ;;  %v1292_v35 = vpop.permute.xlu1 %1291 }
 0x126   :  { %v1310_v55 = vsel %vm1302_vm3, %v1298_v3, %v1306_v59  ;;  %v1300_v54 = vadd.f32 %v1292_v35, %v3219_v18  ;;  %v4188_v3 = vld [vmem:[#allocation13_spill] sm:$0xff]  ;;  %v1115_v59 = vadd.f32 %v3040_v61, %v2932_v42  ;;  %v4189_v35 = vmov 28  }
 0x127   :  { %v1316_v4 = vmul.f32 %v3227_v46, %v1310_v55  ;;  %v1073_v32 = vadd.f32 %v4188_v3, %v2922_v30 }
 0x128   :  { %vm1304_vm4 = vcmp.gt.f32.partialorder %v1300_v54, 0.0  ;;  %v1308_v57 = vmul.f32 0.2, %v1300_v54  ;;  %v1123_v25 = vmul.f32 0.2, %v1115_v59  ;;  %vm1119_vm6 = vcmp.gt.f32.partialorder %v1115_v59, 0.0 }
 0x129   :  { %2405 = vset.pattern.permute.xlu1 %v4186_v53  ;;  %v3236_v45 = vpop.permute.xlu1 %1295  ;;  %v1320_v60 = vadd.f32 %v1316_v4, %v1274_v51  ;;  %v3251_v51 = vpop.permute.xlu0 %1601  ;;  %vm1077_vm5 = vcmp.gt.f32.partialorder %v1073_v32, 0.0 }
 0x12a   :  { %v1312_v49 = vsel %vm1304_vm4, %v1300_v54, %v1308_v57  ;;  %688 = vperm.xlu1 %2405, %v3103_v21   ;;  %v1161_v54 = vadd.f32 %v3130_v28, %v2915_v22  ;;  %v4190_v57 = vld [vmem:[#allocation16_spill] sm:$0xff] }
 0x12b   :  { %v1318_v8 = vmul.f32 %v3227_v46, %v1312_v49  ;;  %v1366_v43 = vadd.f32 %v3094_v23, %v1320_v60  ;;  %v1081_v23 = vmul.f32 0.2, %v1073_v32 }
 0x12c   :  { %v1169_v61 = vmul.f32 0.2, %v1161_v54  ;;  %vm1165_vm7 = vcmp.gt.f32.partialorder %v1161_v54, 0.0 }
 0x12d   :  { %v3243_v40 = vadd.f32 %v1408_v13, %v1366_v43  ;;  %v1322_v10 = vadd.f32 %v1318_v8, %v1276_v2  ;;  %v1207_v13 = vadd.f32 %v4190_v57, %v3167_v16  ;;  %v3260_v49 = vpop.permute.xlu0 %1635  ;;  %v1085_v28 = vsel %vm1077_vm5, %v1073_v32, %v1081_v23 }
 0x12e   :  { %2406 = vset.pattern.permute.xlu1 %v4189_v35  ;;  %v1334_v55 = vpop.permute.xlu1 %1333  ;;  %v1127_v8 = vsel %vm1119_vm6, %v1115_v59, %v1123_v25  ;;  %v1253_v43 = vadd.f32 %v3205_v47, %v2977_v19  ;;  %v1091_v57 = vmul.f32 %v2958_v58, %v1085_v28  ;;  %v1299_v32 = vadd.f32 %v3052_v9, %v3219_v18 }
 0x12f   :  { %4187 = vst [vmem:[#allocation24_spill] sm:$0xff] %v3243_v40  ;;  %1727 = vperm.xlu1 %2406, %v3200_v39   ;;  %v1215_v44 = vmul.f32 0.2, %v1207_v13  ;;  %v1133_v37 = vmul.f32 %v2969_v26, %v1127_v8  ;;  %vm1211_vm9 = vcmp.gt.f32.partialorder %v1207_v13, 0.0  ;;  %v1345_v25 = vadd.f32 %v1334_v55, %v2992_v41 }
 0x130   :  { %v1261_v62 = vmul.f32 0.2, %v1253_v43  ;;  %vm1257_vm14 = vcmp.gt.f32.partialorder %v1253_v43, 0.0  ;;  %v1307_v28 = vmul.f32 0.2, %v1299_v32  ;;  %vm1303_vm15 = vcmp.gt.f32.partialorder %v1299_v32, 0.0 }
 0x131   :  { %v1219_v23 = vsel %vm1211_vm9, %v1207_v13, %v1215_v44  ;;  %vm1349_vm0 = vcmp.gt.f32.partialorder %v1345_v25, 0.0  ;;  %v4192_v55 = vmov 13  }
 0x132   :  { %v1338_v4 = vpop.permute.xlu1 %1337 }
 0x133   :  { %v1346_v2 = vadd.f32 %v1338_v4, %v2992_v41  ;;  %2408 = vset.pattern.permute.xlu1 %v4186_v53  ;;  %v1173_v53 = vsel %vm1165_vm7, %v1161_v54, %v1169_v61  ;;  %v3275_v54 = vpop.permute.xlu0 %604  ;;  %v1137_v61 = vadd.f32 %v1133_v37, %v1091_v57  ;;  %v53_v37 = vld [vmem:[%s4069_s2 + $0x2] sm:$0x3] }
 0x134   :  { %692 = vperm.xlu1 %2408, %v3145_v7   ;;  %v1179_v47 = vmul.f32 %v2946_v29, %v1173_v53  ;;  %vm57_vm1 = vnez %v53_v37 }
 0x135   :  { %vm1350_vm8 = vcmp.gt.f32.partialorder %v1346_v2, 0.0  ;;  %v1354_v60 = vmul.f32 0.2, %v1346_v2 }
 0x136   :  { %v1183_v9 = vadd.f32 %v1179_v47, %v1137_v61 }
 0x137   :  { %v1358_v3 = vsel %vm1350_vm8, %v1346_v2, %v1354_v60  ;;  %v3264_v4 = vpop.permute.xlu1 %504  ;;  %v1265_v60 = vsel %vm1257_vm14, %v1253_v43, %v1261_v62  ;;  %v1311_v62 = vsel %vm1303_vm15, %v1299_v32, %v1307_v28 }
 0x138   :  { %v1364_v27 = vmul.f32 %v3012_v48, %v1358_v3  ;;  %696 = vperm.xlu1 %2408, %v3178_v31   ;;  %v1271_v44 = vmul.f32 %v2988_v56, %v1265_v60  ;;  %v1317_v53 = vmul.f32 %v3227_v46, %v1311_v62  ;;  %v433_v60 = vsel %vm57_vm1, 16843009, %v4164_v38  ;;  %v4194_v62 = vld [vmem:[#allocation14_spill] sm:$0xff] }
 0x139   :  { %v1117_v38 = vadd.f32 %v3116_v63, %v2932_v42  ;;  %v4200_v42 = vld [vmem:[#allocation7_spill] sm:$0xff] }
 0x13a   :  { %v3272_v59 = vadd.f32 %v1364_v27, %v1322_v10  ;;  %v1225_v27 = vmul.f32 %v3183_v14, %v1219_v23  ;;  %v1353_v10 = vmul.f32 0.2, %v1345_v25  ;;  %v4193_v23 = vmov 29  }
 0x13b   :  { %vm1121_vm5 = vcmp.gt.f32.partialorder %v1117_v38, 0.0 }
 0x13c   :  { %4191 = vst [vmem:[#allocation13_spill] sm:$0xff] %v3272_v59  ;;  %2409 = vset.pattern.permute.xlu1 %v4189_v35  ;;  %v3279_v2 = vpop.permute.xlu1 %546  ;;  %v3287_v35 = vpop.permute.xlu0 %638  ;;  %v1229_v13 = vadd.f32 %v1225_v27, %v1183_v9  ;;  %v1357_v43 = vsel %vm1349_vm0, %v1345_v25, %v1353_v10  ;;  %v437_v10 = vunpack.c.0.s8 %v433_v60  ;;  %v4203_v59 = vld [vmem:[#allocation6_spill] sm:$0xff] }
 0x13d   :  { %1739 = vperm.xlu1 %2409, %v3178_v31   ;;  %v1363_v61 = vmul.f32 %v3012_v48, %v1357_v43 }
 0x13e   :  { %v1275_v3 = vadd.f32 %v1271_v44, %v1229_v13  ;;  %v1075_v13 = vadd.f32 %v4194_v62, %v2922_v30  ;;  %vm3317_vm3 = vcmp.ne.s32.totalorder %v437_v10, 0 }
 0x140   :  { %v3283_v8 = vpop.permute.xlu1 %550  ;;  %v3299_v32 = vpop.permute.xlu0 %1685  ;;  %v1321_v25 = vadd.f32 %v1317_v53, %v1275_v3  ;;  %v3315_v3 = vld [vmem:[%s4070_s3 + $0x8] sm:$0xff]  ;;  %v4198_v53 = vld [vmem:[#allocation15_spill] sm:$0xff]  ;;  %vm1079_vm4 = vcmp.gt.f32.partialorder %v1075_v13, 0.0 }
 0x141   :  { %2411 = vset.pattern.permute.xlu1 %v4192_v55  ;;  %v3329_v63 = vrot.slane %v3315_v3, %v4200_v42  ;;  %v3362_v6 = vrot.slane %v3315_v3, %v4203_v59 }
 0x142   :  { %734 = vperm.xlu1 %2411, %v3103_v21   ;;  %v1367_v44 = vadd.f32 %v1363_v61, %v1321_v25  ;;  %v4199_v61 = vld [vmem:[#allocation5_spill] sm:$0xff] }
 0x143   :  { %v3325_v30 = vrot.slane %v3315_v3, %v4199_v61  ;;  %v610_v62 = vadd.f32 %v3275_v54, %v3329_v63 }
 0x145   :  { %v1380_v57 = vpop.permute.xlu1 %1379  ;;  %v564_v10 = vadd.f32 %v3214_v50, %v3325_v30  ;;  %vm614_vm9 = vcmp.gt.f32.partialorder %v610_v62, 0.0 }
 0x146   :  { %v1391_v47 = vadd.f32 %v1380_v57, %v3209_v15  ;;  %2412 = vset.pattern.permute.xlu1 %v4193_v23  ;;  %v3310_v57 = vpop.permute.xlu0 %1689 }
 0x147   :  { %1773 = vperm.xlu1 %2412, %v3200_v39   ;;  %vm568_vm7 = vcmp.gt.f32.partialorder %v564_v10, 0.0 }
 0x148   :  { %vm1395_vm2 = vcmp.gt.f32.partialorder %v1391_v47, 0.0  ;;  %v1399_v28 = vmul.f32 0.2, %v1391_v47 }
 0x14a   :  { %v1403_v9 = vsel %vm1395_vm2, %v1391_v47, %v1399_v28  ;;  %v3301_v27 = vpop.permute.xlu1 %1547  ;;  %v1163_v47 = vadd.f32 %v4198_v53, %v2915_v22  ;;  %v1083_v22 = vmul.f32 0.2, %v1075_v13  ;;  %v3352_v53 = vpop.permute.xlu0 %684 }
 0x14b   :  { %2414 = vset.pattern.permute.xlu1 %v4192_v55  ;;  %v1409_v37 = vmul.f32 %v3231_v11, %v1403_v9  ;;  %v4195_v55 = vmov 0  ;;  %v1125_v9 = vmul.f32 0.2, %v1117_v38 }
 0x14c   :  { %738 = vperm.xlu1 %2414, %v3145_v7   ;;  %v4196_v55 = vsel %vm3317_vm3, 4294967295, %v4195_v55  ;;  %vm1167_vm6 = vcmp.gt.f32.partialorder %v1163_v47, 0.0  ;;  %v1087_v50 = vsel %vm1079_vm4, %v1075_v13, %v1083_v22 }
 0x14d   :  { %v1413_v43 = vadd.f32 %v1409_v37, %v1367_v44  ;;  %4197 = vst [vmem:[#allocation16_spill] sm:$0xff] %v4196_v55  ;;  %v1171_v44 = vmul.f32 0.2, %v1163_v47  ;;  %v1209_v37 = vadd.f32 %v3192_v52, %v3167_v16  ;;  %v1255_v16 = vadd.f32 %v3028_v33, %v2977_v19 }
 0x14e   :  { %v1093_v13 = vmul.f32 %v2958_v58, %v1087_v50  ;;  %v1301_v19 = vadd.f32 %v3236_v45, %v3219_v18  ;;  %v3374_v58 = vstv %s3342_s15 }
 0x14f   :  { %v3331_v60 = vpop.permute.xlu1 %1589  ;;  %v3335_v28 = vsel %vm3317_vm3, %v1413_v43, -1e+30  ;;  %v1175_v52 = vsel %vm1167_vm6, %v1163_v47, %v1171_v44  ;;  %v1217_v54 = vmul.f32 0.2, %v1209_v37  ;;  %vm1213_vm8 = vcmp.gt.f32.partialorder %v1209_v37, 0.0  ;;  %v3370_v44 = vpop.permute.xlu0 %1731 }
 0x150   :  { %4201 = vst [vmem:[#allocation14_spill] sm:$0xff] %v3331_v60  ;;  %4202 = vst [vmem:[#allocation15_spill] sm:$0xff] %v3335_v28  ;;  %742 = vperm.xlu1 %2414, %v3178_v31   ;;  %v1423_v25 = vsel %vm448_vm11, %v3335_v28, -inf  ;;  %v572_v28 = vmul.f32 0.2, %v564_v10  ;;  %v1181_v40 = vmul.f32 %v2946_v29, %v1175_v52  ;;  %vm1259_vm15 = vcmp.gt.f32.partialorder %v1255_v16, 0.0 }
 0x151   :  { %1424 = vmax.xlane.f32.xlu0 %v1423_v25  ;;  %v1129_v25 = vsel %vm1121_vm5, %v1117_v38, %v1125_v9  ;;  %v4204_v9 = vmov 14   ;;  %v1263_v55 = vmul.f32 0.2, %v1255_v16  ;;  %v1221_v18 = vsel %vm1213_vm8, %v1209_v37, %v1217_v54 }
 0x152   :  { %v1135_v38 = vmul.f32 %v2969_v26, %v1129_v25  ;;  %v576_v33 = vsel %vm568_vm7, %v564_v10, %v572_v28  ;;  %v3379_v26 = vstv %s3344_s0  ;;  %v1347_v29 = vadd.f32 %v3159_v5, %v2992_v41  ;;  %v3402_v41 = vld [vmem:[%s4070_s3 + $0x18] sm:$0xff]  ;;  %s3425_s3 = sld [smem:[#allocation2 + $0x185]] }
 0x153   :  { %v3350_v43 = vpop.permute.xlu1 %1593  ;;  %v582_v50 = vmul.f32 %v3374_v58, %v576_v33  ;;  %v1309_v25 = vmul.f32 0.2, %v1301_v19  ;;  %v3390_v52 = vstv %s3355_s16  ;;  %v1227_v54 = vmul.f32 %v3183_v14, %v1221_v18  ;;  %4205 = vst [vmem:[#allocation5_spill] sm:$0xff] %v3402_v41  ;;  %v3413_v14 = vpop.permute.xlu0 %1735 }
 0x154   :  { %2415 = vset.pattern.permute.xlu1 %v4193_v23  ;;  %v618_v23 = vmul.f32 0.2, %v610_v62  ;;  %v1139_v10 = vadd.f32 %v1135_v38, %v1093_v13  ;;  %vm1305_vm0 = vcmp.gt.f32.partialorder %v1301_v19, 0.0  ;;  %v4206_v13 = vmov 30  }
 0x155   :  { %1785 = vperm.xlu1 %2415, %v3178_v31   ;;  %v1267_v38 = vsel %vm1259_vm15, %v1255_v16, %v1263_v55  ;;  %v1355_v33 = vmul.f32 0.2, %v1347_v29  ;;  %vm1351_vm1 = vcmp.gt.f32.partialorder %v1347_v29, 0.0  ;;  %v1313_v18 = vsel %vm1305_vm0, %v1301_v19, %v1309_v25 }
 0x156   :  { %v622_v45 = vsel %vm614_vm9, %v610_v62, %v618_v23  ;;  %v3421_v55 = vstv %s3376_s17  ;;  %v520_v19 = vadd.f32 %v3188_v24, %v3362_v6  ;;  %v1319_v25 = vmul.f32 %v3227_v46, %v1313_v18 }
 0x157   :  { %v628_v5 = vmul.f32 %v3379_v26, %v622_v45  ;;  %v3417_v45 = vrot.slane %v3402_v41, %v4203_v59  ;;  %v3433_v59 = vrot.slane %v3402_v41, %v4199_v61  ;;  %v3449_v24 = vrot.slane %v3315_v3, %v4178_v0  ;;  %v3466_v46 = vpop.permute.xlu0 %730 }
 0x158   :  { %v517_v22 = vpop.permute.xlu1 %516  ;;  %v3453_v61 = vstv %s3392_s20  ;;  %v528_v18 = vmul.f32 0.2, %v520_v19  ;;  %vm524_vm2 = vcmp.gt.f32.partialorder %v520_v19, 0.0  ;;  %s2557_s20 = smov 96  }
 0x159   :  { %v522_v47 = vadd.f32 %v517_v22, %v3362_v6  ;;  %2417 = vset.pattern.permute.xlu1 %v4204_v9  ;;  %v1185_v22 = vadd.f32 %v1181_v40, %v1139_v10  ;;  %v3436_v10 = vstv %s3382_s18  ;;  %4209 = vst [vmem:[#allocation25_spill] sm:$0xff] %v3453_v61 }
 0x15a   :  { %780 = vperm.xlu1 %2417, %v3103_v21  }
 0x15b   :  { %vm526_vm14 = vcmp.gt.f32.partialorder %v522_v47, 0.0  ;;  %v530_v28 = vmul.f32 0.2, %v522_v47 }
 0x15d   :  { %v534_v37 = vsel %vm526_vm14, %v522_v47, %v530_v28  ;;  %v3396_v62 = vpop.permute.xlu1 %554  ;;  %v1231_v28 = vadd.f32 %v1227_v54, %v1185_v22  ;;  %v3445_v54 = vstv %s3387_s19 }
 0x15e   :  { %v540_v23 = vmul.f32 %v3390_v52, %v534_v37  ;;  %2418 = vset.pattern.permute.xlu1 %v4206_v13  ;;  %v1273_v37 = vmul.f32 %v2988_v56, %v1267_v38  ;;  %v3440_v56 = vrot.slane %v3402_v41, %v4200_v42  ;;  %v3460_v42 = vstv %s3394_s21 }
 0x15f   :  { %1819 = vperm.xlu1 %2418, %v3200_v39   ;;  %v3469_v38 = vstv %s3406_s24 }
 0x160   :  { %v586_v47 = vadd.f32 %v582_v50, %v540_v23  ;;  %v1359_v50 = vsel %vm1351_vm1, %v1347_v29, %v1355_v33  ;;  %v1277_v23 = vadd.f32 %v1273_v37, %v1231_v28  ;;  %4212 = vst [vmem:[#allocation26_spill] sm:$0xff] %v3469_v38  ;;  %v3476_v33 = vstv %s3409_s25 }
 0x161   :  { %v1563_v28 = vadd.f32 %v3224_v36, %v3417_v45  ;;  %v1564_v37 = vadd.f32 %v3238_v20, %v3417_v45  ;;  %v3498_v36 = vstv %s3425_s3 }
 0x162   :  { %v3423_v16 = vpop.permute.xlu1 %1383  ;;  %v3427_v40 = vadd.f32 %v628_v5, %v586_v47  ;;  %v3457_v5 = vrot.slane %v3402_v41, %v4178_v0  ;;  %v1365_v47 = vmul.f32 %v3012_v48, %v1359_v50  ;;  %v3489_v48 = vrot.slane %v3315_v3, %v4184_v34  ;;  %4214 = vst [vmem:[#allocation28_spill] sm:$0xff] %v3498_v36 }
 0x163   :  { %4207 = vst [vmem:[#allocation7_spill] sm:$0xff] %v3423_v16  ;;  %2420 = vset.pattern.permute.xlu1 %v4204_v9  ;;  %v4210_v9 = vld [vmem:[#allocation8_spill] sm:$0xff]  ;;  %v1607_v50 = vadd.f32 %v3251_v51, %v3433_v59  ;;  %v1572_v51 = vmul.f32 0.2, %v1564_v37  ;;  %vm1567_vm6 = vcmp.gt.f32.partialorder %v1563_v28, 0.0  ;;  %vm1568_vm7 = vcmp.gt.f32.partialorder %v1564_v37, 0.0 }
 0x164   :  { %4208 = vst [vmem:[#allocation6_spill] sm:$0xff] %v3427_v40  ;;  %784 = vperm.xlu1 %2420, %v3145_v7   ;;  %v3464_v29 = vrot.slane %v3315_v3, %v4210_v9  ;;  %4211 = vst [vmem:[#allocation8_spill] sm:$0xff] %v3466_v46  ;;  %v3473_v22 = vrot.slane %v3402_v41, %v4210_v9  ;;  %v521_v40 = vadd.f32 %v3203_v17, %v3362_v6 }
 0x165   :  { %v1323_v9 = vadd.f32 %v1319_v25, %v1277_v23  ;;  %4213 = vst [vmem:[#allocation27_spill] sm:$0xff] %v3489_v48  ;;  %v3493_v17 = vrot.slane %v3402_v41, %v4184_v34  ;;  %v532_v23 = vsel %vm524_vm2, %v520_v19, %v528_v18  ;;  %v3510_v34 = vpop.permute.xlu0 %1777  ;;  %v1571_v48 = vmul.f32 0.2, %v1563_v28 }
 0x166   :  { %v1388_v0 = vpop.permute.xlu1 %1387  ;;  %vm525_vm5 = vcmp.gt.f32.partialorder %v521_v40, 0.0  ;;  %v1650_v19 = vadd.f32 %v3260_v49, %v3440_v56  ;;  %v1615_v18 = vmul.f32 0.2, %v1607_v50  ;;  %vm1611_vm8 = vcmp.gt.f32.partialorder %v1607_v50, 0.0 }
 0x167   :  { %v1393_v16 = vadd.f32 %v1388_v0, %v3209_v15  ;;  %v4215_v0 = vld [vmem:[#allocation10_spill] sm:$0xff]  ;;  %v529_v15 = vmul.f32 0.2, %v521_v40  ;;  %v1369_v60 = vadd.f32 %v1365_v47, %v1323_v9  ;;  %v3526_v47 = vmul.f32 %v3390_v52, %v532_v23 }
 0x168   :  { %788 = vperm.xlu1 %2420, %v3178_v31   ;;  %v3502_v20 = vrot.slane %v3315_v3, %v4215_v0  ;;  %v3506_v25 = vrot.slane %v3402_v41, %v4215_v0  ;;  %v3531_v49 = vrot.slane %v3315_v3, %v4182_v12  ;;  %v1576_v0 = vsel %vm1568_vm7, %v1564_v37, %v1572_v51 }
 0x169   :  { %vm1397_vm4 = vcmp.gt.f32.partialorder %v1393_v16, 0.0  ;;  %v1401_v38 = vmul.f32 0.2, %v1393_v16  ;;  %v533_v9 = vsel %vm525_vm5, %v521_v40, %v529_v15  ;;  %vm1654_vm9 = vcmp.gt.f32.partialorder %v1650_v19, 0.0  ;;  %v3541_v15 = vpop.permute.xlu0 %1781 }
 0x16a   :  { %v4217_v40 = vmov 15   ;;  %v1619_v37 = vsel %vm1611_vm8, %v1607_v50, %v1615_v18  ;;  %v1743_v23 = vadd.f32 %v3370_v44, %v3473_v22  ;;  %v3552_v51 = vmul.f32 %v3390_v52, %v533_v9 }
 0x16b   :  { %v1405_v61 = vsel %vm1397_vm4, %v1393_v16, %v1401_v38  ;;  %v3508_v46 = vpop.permute.xlu1 %1559  ;;  %v1697_v16 = vadd.f32 %v3299_v32, %v3457_v5  ;;  %v562_v38 = vadd.f32 %v3283_v8, %v3325_v30  ;;  %v1575_v32 = vsel %vm1567_vm6, %v1563_v28, %v1571_v48 }
 0x16c   :  { %2421 = vset.pattern.permute.xlu1 %v4206_v13  ;;  %v1411_v36 = vmul.f32 %v3231_v11, %v1405_v61  ;;  %v1698_v13 = vadd.f32 %v3310_v57, %v3457_v5  ;;  %v653_v8 = vadd.f32 %v3287_v35, %v3449_v24  ;;  %v3558_v18 = vstv %s3514_s26 }
 0x16d   :  { %1831 = vperm.xlu1 %2421, %v3178_v31   ;;  %vm1701_vm14 = vcmp.gt.f32.partialorder %v1697_v16, 0.0  ;;  %v570_v28 = vmul.f32 0.2, %v562_v38  ;;  %v1705_v35 = vmul.f32 0.2, %v1697_v16  ;;  %vm566_vm15 = vcmp.gt.f32.partialorder %v562_v38, 0.0  ;;  %v3581_v11 = vpop.permute.xlu0 %776 }
 0x16e   :  { %v1415_v61 = vadd.f32 %v1411_v36, %v1369_v60  ;;  %v1658_v60 = vmul.f32 0.2, %v1650_v19  ;;  %v1706_v48 = vmul.f32 0.2, %v1698_v13  ;;  %v519_v36 = vadd.f32 %v3264_v4, %v3362_v6 }
 0x16f   :  { %vm1702_vm0 = vcmp.gt.f32.partialorder %v1698_v13, 0.0  ;;  %v661_v50 = vmul.f32 0.2, %v653_v8  ;;  %vm657_vm1 = vcmp.gt.f32.partialorder %v653_v8, 0.0  ;;  %v1605_v6 = vadd.f32 %v3350_v43, %v3433_v59 }
 0x170   :  { %v3535_v41 = vpop.permute.xlu1 %1597  ;;  %v3539_v57 = vsel %vm3155_vm13, %v1415_v61, -1e+30  ;;  %v3555_v61 = vmul.f32 %v3421_v55, %v1575_v32  ;;  %v574_v44 = vsel %vm566_vm15, %v562_v38, %v570_v28  ;;  %v3571_v9 = vsel %vm1654_vm9, %v1650_v19, %v1658_v60 }
 0x171   :  { %4216 = vst [vmem:[#allocation10_spill] sm:$0xff] %v3539_v57  ;;  %2423 = vset.pattern.permute.xlu1 %v4217_v40  ;;  %v1429_v3 = vsel %vm448_vm11, %v3539_v57, -inf  ;;  %v1709_v32 = vsel %vm1701_vm14, %v1697_v16, %v1705_v35  ;;  %v1710_v57 = vsel %vm1702_vm0, %v1698_v13, %v1706_v48  ;;  %v3579_v12 = vadd.f32 %v3352_v53, %v3464_v29 }
 0x172   :  { %826 = vperm.xlu1 %2423, %v3103_v21   ;;  %1430 = vmax.xlane.f32.xlu0 %v1429_v3  ;;  %v3561_v21 = vmul.f32 %v3421_v55, %v1576_v0  ;;  %v3564_v3 = vmul.f32 %v3436_v10, %v1619_v37  ;;  %v527_v0 = vmul.f32 0.2, %v519_v36  ;;  %v561_v37 = vadd.f32 %v3279_v2, %v3325_v30 }
 0x173   :  { %v1751_v43 = vmul.f32 0.2, %v1743_v23  ;;  %vm523_vm2 = vcmp.gt.f32.partialorder %v519_v36, 0.0  ;;  %v3584_v19 = vsel %vm657_vm1, %v653_v8, %v661_v50  ;;  %vm1747_vm4 = vcmp.gt.f32.partialorder %v1743_v23, 0.0 }
 0x174   :  { %v1744_v16 = vadd.f32 %v3413_v14, %v3473_v22  ;;  %v580_v38 = vmul.f32 %v3374_v58, %v574_v44  ;;  %v1613_v13 = vmul.f32 0.2, %v1605_v6  ;;  %v3590_v2 = vmul.f32 %v3460_v42, %v1709_v32 }
 0x175   :  { %v3568_v4 = vpop.permute.xlu1 %592  ;;  %v1789_v53 = vadd.f32 %v3510_v34, %v3493_v17  ;;  %vm1609_vm5 = vcmp.gt.f32.partialorder %v1605_v6, 0.0  ;;  %v563_v8 = vadd.f32 %v3396_v62, %v3325_v30  ;;  %v531_v14 = vsel %vm523_vm2, %v519_v36, %v527_v0  ;;  %v1824_v62 = vpop.permute.xlu0 %1823 }
 0x176   :  { %2424 = vset.pattern.permute.xlu1 %v4218_v1  ;;  %vm565_vm6 = vcmp.gt.f32.partialorder %v561_v37, 0.0  ;;  %v3601_v35 = vmul.f32 0.2, %v3579_v12  ;;  %v1755_v48 = vsel %vm1747_vm4, %v1743_v23, %v1751_v43  ;;  %v569_v50 = vmul.f32 0.2, %v561_v37 }
 0x177   :  { %1865 = vperm.xlu1 %2424, %v3200_v39   ;;  %v3595_v39 = vmul.f32 %v3460_v42, %v1710_v57  ;;  %vm1748_vm7 = vcmp.gt.f32.partialorder %v1744_v16, 0.0  ;;  %v584_v57 = vadd.f32 %v580_v38, %v3526_v47  ;;  %v1617_v44 = vsel %vm1609_vm5, %v1605_v6, %v1613_v13 }
 0x178   :  { %v1752_v30 = vmul.f32 0.2, %v1744_v16  ;;  %vm1793_vm9 = vcmp.gt.f32.partialorder %v1789_v53, 0.0  ;;  %v571_v36 = vmul.f32 0.2, %v563_v8  ;;  %v1835_v0 = vadd.f32 %v1824_v62, %v3506_v25 }
 0x179   :  { %v597_v60 = vpop.permute.xlu1 %596  ;;  %v1797_v32 = vmul.f32 0.2, %v1789_v53  ;;  %vm567_vm14 = vcmp.gt.f32.partialorder %v563_v8, 0.0  ;;  %v3612_v47 = vmul.f32 %v3390_v52, %v531_v14  ;;  %v3615_v6 = vsel %vm565_vm6, %v561_v37, %v569_v50 }
 0x17a   :  { %v608_v28 = vadd.f32 %v597_v60, %v3329_v63  ;;  %v1623_v38 = vmul.f32 %v3436_v10, %v1617_v44  ;;  %v1761_v13 = vmul.f32 %v3476_v33, %v1755_v48  ;;  %v575_v62 = vsel %vm567_vm14, %v563_v8, %v571_v36 }
 0x17b   :  { %2426 = vset.pattern.permute.xlu1 %v4217_v40  ;;  %v1606_v40 = vadd.f32 %v3535_v41, %v3433_v59  ;;  %v3627_v52 = vsel %vm1748_vm7, %v1744_v16, %v1752_v30  ;;  %v1565_v37 = vadd.f32 %v3508_v46, %v3417_v45  ;;  %v1801_v14 = vsel %vm1793_vm9, %v1789_v53, %v1797_v32  ;;  %v4219_v53 = vld [vmem:[#allocation28_spill] sm:$0xff] }
 0x17c   :  { %vm612_vm8 = vcmp.gt.f32.partialorder %v608_v28, 0.0  ;;  %v616_v34 = vmul.f32 0.2, %v608_v28  ;;  %830 = vperm.xlu1 %2426, %v3145_v7   ;;  %vm1839_vm0 = vcmp.gt.f32.partialorder %v1835_v0, 0.0  ;;  %v1843_v50 = vmul.f32 0.2, %v1835_v0 }
 0x17d   :  { %v1614_v48 = vmul.f32 0.2, %v1606_v40  ;;  %vm1610_vm1 = vcmp.gt.f32.partialorder %v1606_v40, 0.0  ;;  %v3638_v16 = vadd.f32 %v3301_v27, %v3417_v45  ;;  %v581_v46 = vmul.f32 %v3374_v58, %v575_v62  ;;  %v1828_v45 = vpop.permute.xlu0 %1827 }
 0x17e   :  { %v620_v60 = vsel %vm612_vm8, %v608_v28, %v616_v34  ;;  %v1640_v23 = vpop.permute.xlu1 %1639  ;;  %v3622_v28 = vadd.f32 %v3541_v15, %v3493_v17  ;;  %v1627_v15 = vadd.f32 %v1623_v38, %v3555_v61  ;;  %v1807_v30 = vmul.f32 %v4219_v53, %v1801_v14 }
 0x17f   :  { %v626_v43 = vmul.f32 %v3379_v26, %v620_v60  ;;  %v1651_v7 = vadd.f32 %v1640_v23, %v3440_v56  ;;  %v1573_v61 = vmul.f32 0.2, %v1565_v37  ;;  %v4220_v23 = vld [vmem:[#allocation14_spill] sm:$0xff]  ;;  %vm1569_vm5 = vcmp.gt.f32.partialorder %v1565_v37, 0.0 }
 0x180   :  { %834 = vperm.xlu1 %2426, %v3178_v31   ;;  %vm1794_vm2 = vcmp.gt.f32.partialorder %v3622_v28, 0.0  ;;  %v1847_v27 = vsel %vm1839_vm0, %v1835_v0, %v1843_v50  ;;  %v1836_v38 = vadd.f32 %v1828_v45, %v3506_v25  ;;  %v585_v14 = vadd.f32 %v581_v46, %v3552_v51 }
 0x181   :  { %v3624_v41 = vadd.f32 %v626_v43, %v584_v57  ;;  %vm1655_vm15 = vcmp.gt.f32.partialorder %v1651_v7, 0.0  ;;  %v1659_v34 = vmul.f32 0.2, %v1651_v7  ;;  %v1604_v43 = vadd.f32 %v4220_v23, %v3433_v59 }
 0x182   :  { %v1853_v50 = vmul.f32 %v3558_v18, %v1847_v27  ;;  %vm703_vm7 = vcmp.gt.f32.partialorder %v3579_v12, 0.0  ;;  %vm1840_vm9 = vcmp.gt.f32.partialorder %v1836_v38, 0.0  ;;  %v579_v23 = vmul.f32 %v3374_v58, %v3615_v6 }
 0x183   :  { %v1663_v44 = vsel %vm1655_vm15, %v1651_v7, %v1659_v34  ;;  %v601_v60 = vpop.permute.xlu1 %600  ;;  %v1798_v7 = vmul.f32 0.2, %v3622_v28  ;;  %vm1608_vm6 = vcmp.gt.f32.partialorder %v1604_v43, 0.0  ;;  %vm1566_vm0 = vcmp.gt.f32.partialorder %v3638_v16, 0.0 }
 0x184   :  { %v1669_v57 = vmul.f32 %v3445_v54, %v1663_v44  ;;  %v609_v8 = vadd.f32 %v601_v60, %v3329_v63  ;;  %2427 = vset.pattern.permute.xlu1 %v4218_v1  ;;  %v1618_v1 = vsel %vm1610_vm1, %v1606_v40, %v1614_v48  ;;  %v607_v44 = vadd.f32 %v3568_v4, %v3329_v63 }
 0x185   :  { %1877 = vperm.xlu1 %2427, %v3178_v31   ;;  %v1577_v48 = vsel %vm1569_vm5, %v1565_v37, %v1573_v61  ;;  %v1624_v0 = vmul.f32 %v3436_v10, %v1618_v1  ;;  %v1844_v63 = vmul.f32 0.2, %v1836_v38  ;;  %v1570_v1 = vmul.f32 0.2, %v3638_v16 }
 0x186   :  { %v1673_v36 = vadd.f32 %v1669_v57, %v1627_v15  ;;  %vm613_vm4 = vcmp.gt.f32.partialorder %v609_v8, 0.0  ;;  %v617_v32 = vmul.f32 0.2, %v609_v8  ;;  %v1612_v15 = vmul.f32 0.2, %v1604_v43 }
 0x187   :  { %v615_v37 = vmul.f32 0.2, %v607_v44  ;;  %vm611_vm14 = vcmp.gt.f32.partialorder %v607_v44, 0.0  ;;  %v1762_v45 = vmul.f32 %v3476_v33, %v3627_v52  ;;  %v4221_v52 = vld [vmem:[#allocation27_spill] sm:$0xff] }
 0x188   :  { %v1719_v34 = vadd.f32 %v3590_v2, %v1673_v36  ;;  %v621_v62 = vsel %vm613_vm4, %v609_v8, %v617_v32  ;;  %v1644_v31 = vpop.permute.xlu1 %1643  ;;  %v1583_v8 = vmul.f32 %v3421_v55, %v1577_v48  ;;  %v1616_v27 = vsel %vm1608_vm6, %v1604_v43, %v1612_v15 }
 0x189   :  { %v627_v59 = vmul.f32 %v3379_v26, %v621_v62  ;;  %v1652_v40 = vadd.f32 %v1644_v31, %v3440_v56  ;;  %v1848_v62 = vsel %vm1840_vm9, %v1836_v38, %v1844_v63 }
 0x18a   :  { %v1765_v60 = vadd.f32 %v1761_v13, %v1719_v34  ;;  %v1628_v13 = vadd.f32 %v1624_v0, %v3561_v21  ;;  %v619_v34 = vsel %vm611_vm14, %v607_v44, %v615_v37  ;;  %v1629_v31 = vadd.f32 %v3564_v3, %v1583_v8 }
 0x18b   :  { %v3658_v2 = vadd.f32 %v627_v59, %v585_v14  ;;  %vm1656_vm8 = vcmp.gt.f32.partialorder %v1652_v40, 0.0  ;;  %v1660_v51 = vmul.f32 0.2, %v1652_v40  ;;  %v625_v48 = vmul.f32 %v3379_v26, %v619_v34 }
 0x18c   :  { %v1648_v4 = vpop.permute.xlu1 %1647  ;;  %v1811_v57 = vadd.f32 %v1807_v30, %v1765_v60  ;;  %v1668_v0 = vmul.f32 %v3445_v54, %v3571_v9  ;;  %v711_v26 = vsel %vm703_vm7, %v3579_v12, %v3601_v35 }
 0x18d   :  { %v1664_v46 = vsel %vm1656_vm8, %v1652_v40, %v1660_v51  ;;  %v1653_v61 = vadd.f32 %v1648_v4, %v3440_v56  ;;  %v1802_v56 = vsel %vm1794_vm2, %v3622_v28, %v1798_v7  ;;  %v1574_v40 = vsel %vm1566_vm0, %v3638_v16, %v1570_v1  ;;  %v4222_v7 = vld [vmem:[#allocation8_spill] sm:$0xff]  ;;  %v4223_v16 = vld [vmem:[#allocation25_spill] sm:$0xff] }
 0x18e   :  { %v1670_v36 = vmul.f32 %v3445_v54, %v1664_v46  ;;  %v3664_v32 = vadd.f32 %v1853_v50, %v1811_v57  ;;  %v1622_v28 = vmul.f32 %v3436_v10, %v1616_v27  ;;  %v745_v44 = vadd.f32 %v4222_v7, %v4221_v52  ;;  %v4224_v46 = vld [vmem:[#allocation23_spill] sm:$0xff] }
 0x18f   :  { %vm1657_vm15 = vcmp.gt.f32.partialorder %v1653_v61, 0.0  ;;  %v1661_v30 = vmul.f32 0.2, %v1653_v61  ;;  %v1808_v38 = vmul.f32 %v4219_v53, %v1802_v56  ;;  %v671_v50 = vmul.f32 %v4223_v16, %v3584_v19 }
 0x190   :  { %v1674_v21 = vadd.f32 %v1670_v36, %v1628_v13  ;;  %v1854_v10 = vmul.f32 %v3558_v18, %v1848_v62  ;;  %v583_v51 = vadd.f32 %v579_v23, %v3612_v47  ;;  %v1580_v15 = vmul.f32 %v3421_v55, %v1574_v40  ;;  %v823_v36 = vpop.permute.xlu0 %822  ;;  %v4226_v23 = vld [vmem:[#allocation26_spill] sm:$0xff] }
 0x191   :  { %v1665_v58 = vsel %vm1657_vm15, %v1653_v61, %v1661_v30  ;;  %v643_v6 = vpop.permute.xlu1 %642  ;;  %vm749_vm2 = vcmp.gt.f32.partialorder %v745_v44, 0.0  ;;  %v753_v8 = vmul.f32 0.2, %v745_v44  ;;  %v791_v55 = vadd.f32 %v3581_v11, %v3502_v20  ;;  %v4225_v61 = vld [vmem:[#allocation7_spill] sm:$0xff] }
 0x192   :  { %v1720_v14 = vadd.f32 %v3595_v39, %v1674_v21  ;;  %v1671_v59 = vmul.f32 %v3445_v54, %v1665_v58  ;;  %v654_v43 = vadd.f32 %v643_v6, %v3449_v24  ;;  %v1626_v57 = vadd.f32 %v1622_v28, %v1580_v15 }
 0x193   :  { %v629_v47 = vadd.f32 %v625_v48, %v583_v51  ;;  %v1392_v13 = vadd.f32 %v4225_v61, %v4224_v46  ;;  %v717_v1 = vmul.f32 %v4226_v23, %v711_v26  ;;  %v3715_v30 = vstv %s3683_s27  ;;  %v4227_v26 = vld [vmem:[#allocation17_spill] sm:$0xff]  ;;  %v4231_v61 = vld [vmem:[#allocation24_spill] sm:$0xff] }
 0x194   :  { %v3689_v3 = vadd.f32 %v1671_v59, %v1629_v31  ;;  %vm658_vm1 = vcmp.gt.f32.partialorder %v654_v43, 0.0  ;;  %v662_v39 = vmul.f32 0.2, %v654_v43  ;;  %v1766_v60 = vadd.f32 %v1762_v45, %v1720_v14 }
 0x195   :  { %v757_v11 = vsel %vm749_vm2, %v745_v44, %v753_v8  ;;  %v1672_v21 = vadd.f32 %v1668_v0, %v1626_v57  ;;  %vm795_vm5 = vcmp.gt.f32.partialorder %v791_v55, 0.0  ;;  %v799_v34 = vmul.f32 0.2, %v791_v55 }
 0x196   :  { %v666_v63 = vsel %vm658_vm1, %v654_v43, %v662_v39  ;;  %v1682_v4 = vpop.permute.xlu1 %1681  ;;  %v1812_v19 = vadd.f32 %v1808_v38, %v1766_v60  ;;  %v675_v62 = vadd.f32 %v671_v50, %v629_v47  ;;  %v837_v58 = vadd.f32 %v823_v36, %v3531_v49 }
 0x197   :  { %v672_v54 = vmul.f32 %v4223_v16, %v666_v63  ;;  %v1696_v9 = vadd.f32 %v1682_v4, %v3457_v5  ;;  %v1400_v6 = vmul.f32 0.2, %v1392_v13  ;;  %vm1396_vm7 = vcmp.gt.f32.partialorder %v1392_v13, 0.0 }
 0x198   :  { %v3709_v35 = vadd.f32 %v1854_v10, %v1812_v19  ;;  %v3723_v43 = vstv %s2185_s28  ;;  %v763_v7 = vmul.f32 %v3715_v30, %v757_v11  ;;  %v803_v44 = vsel %vm795_vm5, %v791_v55, %v799_v34  ;;  %v4230_v55 = vld [vmem:[#allocation6_spill] sm:$0xff] }
 0x199   :  { %v3707_v37 = vadd.f32 %v672_v54, %v3624_v41  ;;  %vm1700_vm4 = vcmp.gt.f32.partialorder %v1696_v9, 0.0  ;;  %v1704_v12 = vmul.f32 0.2, %v1696_v9  ;;  %v721_v48 = vadd.f32 %v717_v1, %v675_v62 }
 0x19a   :  { %v1404_v39 = vsel %vm1396_vm7, %v1392_v13, %v1400_v6  ;;  %v845_v0 = vmul.f32 0.2, %v837_v58  ;;  %vm841_vm9 = vcmp.gt.f32.partialorder %v837_v58, 0.0  ;;  %v809_v60 = vmul.f32 %v3723_v43, %v803_v44 }
 0x19b   :  { %v1708_v27 = vsel %vm1700_vm4, %v1696_v9, %v1704_v12  ;;  %v647_v56 = vpop.permute.xlu1 %646  ;;  %v3735_v63 = vsel %vm3317_vm3, %v4227_v26, -1e+30  ;;  %v4229_v9 = vld [vmem:[#allocation11_spill] sm:$0xff]  ;;  %v767_v57 = vadd.f32 %v763_v7, %v721_v48  ;;  %v3740_v8 = vstv %s2186_s29 }
 0x19c   :  { %v1714_v41 = vmul.f32 %v3460_v42, %v1708_v27  ;;  %v655_v45 = vadd.f32 %v647_v56, %v3449_v24  ;;  %v1410_v19 = vmul.f32 %v4229_v9, %v1404_v39  ;;  %v452_v46 = vsel %vm448_vm11, %v3735_v63, -inf  ;;  %v4233_v27 = vld [vmem:[#allocation13_spill] sm:$0xff]  ;;  %v4235_v39 = vld [vmem:[#allocation12_spill] sm:$0xff] }
 0x19d   :  { %v813_v11 = vadd.f32 %v809_v60, %v767_v57  ;;  %v1870_v60 = vpop.permute.xlu0 %1869 }
 0x19e   :  { %v3721_v31 = vadd.f32 %v1714_v41, %v1672_v21  ;;  %vm659_vm6 = vcmp.gt.f32.partialorder %v655_v45, 0.0  ;;  %v663_v14 = vmul.f32 0.2, %v655_v45  ;;  %v1414_v56 = vadd.f32 %v1410_v19, %v4233_v27 }
 0x19f   :  { %v651_v59 = vpop.permute.xlu1 %650  ;;  %v3783_v19 = vstv %s2222_s30 }
 0x1a0   :  { %v667_v40 = vsel %vm659_vm6, %v655_v45, %v663_v14  ;;  %v656_v28 = vadd.f32 %v651_v59, %v3449_v24  ;;  %v3762_v62 = vsel %vm3138_vm12, %v1414_v56, -1e+30 }
 0x1a1   :  { %v673_v38 = vmul.f32 %v4223_v16, %v667_v40  ;;  %v1426_v14 = vsel %vm448_vm11, %v3762_v62, -inf }
 0x1a2   :  { %vm660_vm8 = vcmp.gt.f32.partialorder %v656_v28, 0.0  ;;  %v664_v50 = vmul.f32 0.2, %v656_v28 }
 0x1a3   :  { %v3729_v10 = vadd.f32 %v673_v38, %v3658_v2  ;;  %v849_v2 = vsel %vm841_vm9, %v837_v58, %v845_v0  ;;  %v4236_v0 = vld [vmem:[#allocation5_spill] sm:$0xff] }
 0x1a4   :  { %v668_v51 = vsel %vm660_vm8, %v656_v28, %v664_v50  ;;  %v1694_v15 = vpop.permute.xlu1 %1693  ;;  %v3778_v50 = vrot.slane %v4236_v0, %v4235_v39 }
 0x1a5   :  { %v674_v4 = vmul.f32 %v4223_v16, %v668_v51  ;;  %v1699_v54 = vadd.f32 %v1694_v15, %v3457_v5  ;;  %v3750_v16 = vsel %vm3124_vm10, %v4231_v61, -1e+30  ;;  %v855_v5 = vmul.f32 %v3740_v8, %v849_v2 }
 0x1a6   :  { %v1420_v45 = vsel %vm448_vm11, %v3750_v16, -inf  ;;  %v1881_v15 = vadd.f32 %v1870_v60, %v3778_v50 }
 0x1a7   :  { %v3743_v47 = vadd.f32 %v674_v4, %v4230_v55  ;;  %vm1703_vm14 = vcmp.gt.f32.partialorder %v1699_v54, 0.0  ;;  %v1707_v12 = vmul.f32 0.2, %v1699_v54  ;;  %v859_v58 = vadd.f32 %v855_v5, %v813_v11 }
 0x1a8   :  { %v1889_v4 = vmul.f32 0.2, %v1881_v15  ;;  %vm1885_vm15 = vcmp.gt.f32.partialorder %v1881_v15, 0.0 }
 0x1a9   :  { %v1711_v36 = vsel %vm1703_vm14, %v1699_v54, %v1707_v12  ;;  %v689_v1 = vpop.permute.xlu1 %688  ;;  %453 = vmax.xlane.f32.xlu1 %v452_v46  ;;  %v1874_v54 = vpop.permute.xlu0 %1873 }
 0x1aa   :  { %v1717_v21 = vmul.f32 %v3460_v42, %v1711_v36  ;;  %v3768_v42 = vsel %vm3124_vm10, %v859_v58, -1e+30  ;;  %v1893_v57 = vsel %vm1885_vm15, %v1881_v15, %v1889_v4  ;;  %v700_v2 = vadd.f32 %v689_v1, %v3464_v29 }
 0x1ab   :  { %v867_v59 = vsel %vm448_vm11, %v3768_v42, -inf  ;;  %v1899_v46 = vmul.f32 %v3783_v19, %v1893_v57  ;;  %v1882_v61 = vadd.f32 %v1874_v54, %v3778_v50  ;;  %v4238_v57 = vld [vmem:[#allocation21_spill] sm:$0xff] }
 0x1ac   :  { %v3756_v41 = vadd.f32 %v1717_v21, %v3689_v3  ;;  %v708_v5 = vmul.f32 0.2, %v700_v2  ;;  %vm704_vm0 = vcmp.gt.f32.partialorder %v700_v2, 0.0  ;;  %v4237_v21 = vld [vmem:[#allocation19_spill] sm:$0xff] }
 0x1ad   :  { %1421 = vmax.xlane.f32.xlu1 %v1420_v45  ;;  %v451_v12 = vpop.xlane.xlu0 %450  ;;  %v1890_v11 = vmul.f32 0.2, %v1882_v61  ;;  %v1903_v58 = vadd.f32 %v1899_v46, %v3664_v32  ;;  %vm1886_vm2 = vcmp.gt.f32.partialorder %v1882_v61, 0.0 }
 0x1ae   :  { %v1728_v6 = vpop.permute.xlu1 %1727  ;;  %v461_v45 = vsub.f32 %v4237_v21, %v451_v12 }
 0x1af   :  { %v1742_v55 = vadd.f32 %v1728_v6, %v3473_v22  ;;  %v712_v6 = vsel %vm704_vm0, %v700_v2, %v708_v5  ;;  %v1894_v4 = vsel %vm1886_vm2, %v1882_v61, %v1890_v11  ;;  %v3799_v32 = vsel %vm3317_vm3, %v1903_v58, -1e+30 }
 0x1b0   :  { %v465_v54 = vmul.f32 1.442695, %v461_v45  ;;  %v3810_v11 = vsel %vm448_vm11, %v3799_v32, -inf }
 0x1b1   :  { %1427 = vmax.xlane.f32.xlu1 %v1426_v14  ;;  %v1750_v27 = vmul.f32 0.2, %v1742_v55  ;;  %vm1746_vm1 = vcmp.gt.f32.partialorder %v1742_v55, 0.0  ;;  %v457_v1 = vpop.xlane.xlu0 %456 }
 0x1b2   :  { %v463_v12 = vsub.f32 %v4238_v57, %v457_v1  ;;  %2438 = vpow2.f32 %v465_v54 }
 0x1b3   :  { %v693_v3 = vpop.permute.xlu1 %692  ;;  %v1754_v39 = vsel %vm1746_vm1, %v1742_v55, %v1750_v27  ;;  %v3806_v27 = vmul.f32 %v3783_v19, %v1894_v4 }
 0x1b4   :  { %v701_v14 = vadd.f32 %v693_v3, %v3464_v29  ;;  %v718_v3 = vmul.f32 %v4226_v23, %v712_v6  ;;  %v1760_v2 = vmul.f32 %v3476_v33, %v1754_v39  ;;  %v3812_v21 = vmul.f32 1.442695, %v463_v12 }
 0x1b5   :  { %868 = vmax.xlane.f32.xlu1 %v867_v59 }
 0x1b6   :  { %vm705_vm5 = vcmp.gt.f32.partialorder %v701_v14, 0.0  ;;  %v1764_v45 = vadd.f32 %v1760_v2, %v3721_v31  ;;  %2440 = vpow2.f32 %v3812_v21 }
 0x1b7   :  { %v697_v40 = vpop.permute.xlu1 %696 }
 0x1b8   :  { %v702_v0 = vadd.f32 %v697_v40, %v3464_v29  ;;  %v709_v29 = vmul.f32 0.2, %v701_v14 }
 0x1ba   :  { %vm706_vm6 = vcmp.gt.f32.partialorder %v702_v0, 0.0  ;;  %v710_v40 = vmul.f32 0.2, %v702_v0 }
 0x1bc   :  { %v3772_v28 = vpop.permute.xlu1 %1739  ;;  %v714_v58 = vsel %vm706_vm6, %v702_v0, %v710_v40 }
 0x1c1   :  { %v735_v7 = vpop.permute.xlu1 %734 }
 0x1c2   :  { %v746_v56 = vadd.f32 %v735_v7, %v4221_v52 }
 0x1c4   :  { %v754_v60 = vmul.f32 0.2, %v746_v56  ;;  %vm750_vm4 = vcmp.gt.f32.partialorder %v746_v56, 0.0 }
 0x1c6   :  { %v1774_v44 = vpop.permute.xlu1 %1773 }
 0x1c7   :  { %v1788_v7 = vadd.f32 %v1774_v44, %v3493_v17 }
 0x1c9   :  { %v1796_v44 = vmul.f32 0.2, %v1788_v7  ;;  %vm1792_vm8 = vcmp.gt.f32.partialorder %v1788_v7, 0.0 }
 0x1cb   :  { %v739_v38 = vpop.permute.xlu1 %738  ;;  %v1800_v39 = vsel %vm1792_vm8, %v1788_v7, %v1796_v44  ;;  %v3834_v44 = vpop.eup %2438 }
 0x1cc   :  { %v747_v61 = vadd.f32 %v739_v38, %v4221_v52  ;;  %v1745_v38 = vadd.f32 %v3772_v28, %v3473_v22  ;;  %v720_v28 = vmul.f32 %v4226_v23, %v714_v58 }
 0x1ce   :  { %vm751_vm9 = vcmp.gt.f32.partialorder %v747_v61, 0.0  ;;  %vm1749_vm15 = vcmp.gt.f32.partialorder %v1745_v38, 0.0 }
 0x1cf   :  { %v3774_v48 = vpop.permute.xlu1 %742 }
 0x1d0   :  { %v748_v4 = vadd.f32 %v3774_v48, %v4221_v52 }
 0x1d2   :  { %vm752_vm1 = vcmp.gt.f32.partialorder %v748_v4, 0.0  ;;  %v756_v7 = vmul.f32 0.2, %v748_v4 }
 0x1d4   :  { %v3780_v51 = vpop.permute.xlu1 %1785 }
 0x1d9   :  { %v781_v26 = vpop.permute.xlu1 %780 }
 0x1da   :  { %v792_v15 = vadd.f32 %v781_v26, %v3502_v20  ;;  %v758_v26 = vsel %vm750_vm4, %v746_v56, %v754_v60  ;;  %v722_v56 = vadd.f32 %v718_v3, %v3707_v37  ;;  %v755_v60 = vmul.f32 0.2, %v747_v61 }
 0x1db   :  { %v764_v1 = vmul.f32 %v3715_v30, %v758_v26 }
 0x1dc   :  { %v800_v55 = vmul.f32 0.2, %v792_v15  ;;  %vm796_vm7 = vcmp.gt.f32.partialorder %v792_v15, 0.0  ;;  %v759_v48 = vsel %vm751_vm9, %v747_v61, %v755_v60  ;;  %v1753_v61 = vmul.f32 0.2, %v1745_v38 }
 0x1dd   :  { %v768_v0 = vadd.f32 %v764_v1, %v722_v56 }
 0x1de   :  { %v1820_v9 = vpop.permute.xlu1 %1819  ;;  %v804_v6 = vsel %vm796_vm7, %v792_v15, %v800_v55  ;;  %v1806_v15 = vmul.f32 %v4219_v53, %v1800_v39 }
 0x1df   :  { %v1834_v5 = vadd.f32 %v1820_v9, %v3506_v25  ;;  %v713_v9 = vsel %vm705_vm5, %v701_v14, %v709_v29  ;;  %v810_v14 = vmul.f32 %v3723_v43, %v804_v6 }
 0x1e0   :  { %v719_v31 = vmul.f32 %v4226_v23, %v713_v9  ;;  %v1810_v56 = vadd.f32 %v1806_v15, %v1764_v45 }
 0x1e1   :  { %v1842_v54 = vmul.f32 0.2, %v1834_v5  ;;  %vm1838_vm14 = vcmp.gt.f32.partialorder %v1834_v5, 0.0  ;;  %v814_v55 = vadd.f32 %v810_v14, %v768_v0  ;;  %v724_v14 = vadd.f32 %v720_v28, %v3743_v47 }
 0x1e3   :  { %v785_v36 = vpop.permute.xlu1 %784  ;;  %v1846_v12 = vsel %vm1838_vm14, %v1834_v5, %v1842_v54  ;;  %v765_v5 = vmul.f32 %v3715_v30, %v759_v48 }
 0x1e4   :  { %v793_v37 = vadd.f32 %v785_v36, %v3502_v20  ;;  %v1791_v36 = vadd.f32 %v3780_v51, %v3493_v17  ;;  %v1852_v9 = vmul.f32 %v3558_v18, %v1846_v12  ;;  %v760_v17 = vsel %vm752_vm1, %v748_v4, %v756_v7 }
 0x1e5   :  { %v766_v48 = vmul.f32 %v3715_v30, %v760_v17 }
 0x1e6   :  { %v801_v3 = vmul.f32 0.2, %v793_v37  ;;  %vm797_vm2 = vcmp.gt.f32.partialorder %v793_v37, 0.0  ;;  %vm1795_vm5 = vcmp.gt.f32.partialorder %v1791_v36, 0.0 }
 0x1e7   :  { %v789_v59 = vpop.permute.xlu1 %788 }
 0x1e8   :  { %v794_v2 = vadd.f32 %v789_v59, %v3502_v20  ;;  %v1799_v59 = vmul.f32 0.2, %v1791_v36  ;;  %v805_v58 = vsel %vm797_vm2, %v793_v37, %v801_v3  ;;  %v723_v37 = vadd.f32 %v719_v31, %v3729_v10 }
 0x1ea   :  { %v802_v1 = vmul.f32 0.2, %v794_v2  ;;  %vm798_vm6 = vcmp.gt.f32.partialorder %v794_v2, 0.0  ;;  %v1803_v7 = vsel %vm1795_vm5, %v1791_v36, %v1799_v59 }
 0x1ec   :  { %v1832_v46 = vpop.permute.xlu1 %1831  ;;  %v806_v24 = vsel %vm798_vm6, %v794_v2, %v802_v1  ;;  %v473_v1 = vsel %vm448_vm11, %v3834_v44, 0.0 }
 0x1ed   :  { %v1837_v6 = vadd.f32 %v1832_v46, %v3506_v25  ;;  %v1757_v25 = vsel %vm1749_vm15, %v1745_v38, %v1753_v61  ;;  %v811_v46 = vmul.f32 %v3723_v43, %v805_v58  ;;  %v812_v31 = vmul.f32 %v3723_v43, %v806_v24  ;;  %v3892_v58 = vpop.eup %2440 }
 0x1ee   :  { %v1763_v2 = vmul.f32 %v3476_v33, %v1757_v25  ;;  %v1809_v43 = vmul.f32 %v4219_v53, %v1803_v7  ;;  %v4241_v25 = vld [vmem:[#allocation15_spill] sm:$0xff]  ;;  %v4242_v7 = vld [vmem:[#allocation10_spill] sm:$0xff]  ;;  %vm2162_vm15 = vcmask 130048  }
 0x1ef   :  { %v1845_v12 = vmul.f32 0.2, %v1837_v6  ;;  %vm1841_vm7 = vcmp.gt.f32.partialorder %v1837_v6, 0.0 }
 0x1f1   :  { %v827_v57 = vpop.permute.xlu1 %826 }
 0x1f2   :  { %v838_v22 = vadd.f32 %v827_v57, %v3531_v49 }
 0x1f4   :  { %vm842_vm0 = vcmp.gt.f32.partialorder %v838_v22, 0.0  ;;  %v846_v52 = vmul.f32 0.2, %v838_v22 }
 0x1f6   :  { %v850_v29 = vsel %vm842_vm0, %v838_v22, %v846_v52  ;;  %v1866_v23 = vpop.permute.xlu1 %1865  ;;  %v1856_v22 = vadd.f32 %v1852_v9, %v1810_v56  ;;  %v769_v52 = vadd.f32 %v765_v5, %v723_v37  ;;  %v1767_v5 = vadd.f32 %v1763_v2, %v3756_v41 }
 0x1f7   :  { %v856_v40 = vmul.f32 %v3740_v8, %v850_v29  ;;  %v1880_v26 = vadd.f32 %v1866_v23, %v3778_v50  ;;  %v1849_v23 = vsel %vm1841_vm7, %v1837_v6, %v1845_v12 }
 0x1f8   :  { %v815_v36 = vadd.f32 %v811_v46, %v769_v52  ;;  %v1855_v9 = vmul.f32 %v3558_v18, %v1849_v23 }
 0x1f9   :  { %vm1884_vm4 = vcmp.gt.f32.partialorder %v1880_v26, 0.0  ;;  %v1888_v20 = vmul.f32 0.2, %v1880_v26  ;;  %v860_v51 = vadd.f32 %v856_v40, %v814_v55  ;;  %v1904_v40 = vadd.f32 %v3806_v27, %v3709_v35 }
 0x1fb   :  { %v1892_v39 = vsel %vm1884_vm4, %v1880_v26, %v1888_v20  ;;  %v831_v60 = vpop.permute.xlu1 %830  ;;  %v3842_v45 = vsel %vm3317_vm3, %v860_v51, -1e+30 }
 0x1fc   :  { %v1898_v54 = vmul.f32 %v3783_v19, %v1892_v39  ;;  %v839_v4 = vadd.f32 %v831_v60, %v3531_v49  ;;  %v870_v57 = vsel %vm448_vm11, %v3842_v45, -inf  ;;  %v479_v39 = vsel %vm448_vm11, %v3892_v58, 0.0  ;;  %v460_v60 = vpop.xlane.xlu0 %459 }
 0x1fd   :  { %871 = vmax.xlane.f32.xlu0 %v870_v57 }
 0x1fe   :  { %vm843_vm3 = vcmp.gt.f32.partialorder %v839_v4, 0.0  ;;  %v847_v0 = vmul.f32 0.2, %v839_v4  ;;  %v1902_v15 = vadd.f32 %v1898_v54, %v1856_v22  ;;  %v4240_v54 = vld [vmem:[#allocation9_spill] sm:$0xff] }
 0x1ff   :  { %v835_v3 = vpop.permute.xlu1 %834 }
 0x200   :  { %v851_v10 = vsel %vm843_vm3, %v839_v4, %v847_v0  ;;  %v840_v47 = vadd.f32 %v835_v3, %v3531_v49  ;;  %v3857_v38 = vsel %vm3124_vm10, %v1902_v15, -1e+30  ;;  %v770_v49 = vadd.f32 %v766_v48, %v724_v14  ;;  %v1425_v57 = vpop.xlane.xlu0 %1424 }
 0x201   :  { %v857_v28 = vmul.f32 %v3740_v8, %v851_v10  ;;  %1914 = vmax.xlane.f32.xlu0 %v3810_v11  ;;  %v1910_v30 = vsel %vm448_vm11, %v3857_v38, -inf  ;;  %v464_v4 = vsub.f32 %v4240_v54, %v460_v60  ;;  %v1433_v46 = vsub.f32 %v4241_v25, %v1425_v57 }
 0x202   :  { %vm844_vm8 = vcmp.gt.f32.partialorder %v840_v47, 0.0  ;;  %v848_v29 = vmul.f32 0.2, %v840_v47  ;;  %1911 = vmax.xlane.f32.xlu1 %v1910_v30  ;;  %v816_v56 = vadd.f32 %v812_v31, %v770_v49 }
 0x203   :  { %v861_v13 = vadd.f32 %v857_v28, %v815_v36  ;;  %v471_v14 = vmul.f32 1.442695, %v464_v4  ;;  %v1438_v48 = vmul.f32 1.442695, %v1433_v46 }
 0x204   :  { %v852_v11 = vsel %vm844_vm8, %v840_v47, %v848_v29  ;;  %v1878_v26 = vpop.permute.xlu1 %1877  ;;  %v1431_v0 = vpop.xlane.xlu0 %1430 }
 0x205   :  { %v858_v55 = vmul.f32 %v3740_v8, %v852_v11  ;;  %v1883_v61 = vadd.f32 %v1878_v26, %v3778_v50  ;;  %v3873_v33 = vsel %vm3138_vm12, %v861_v13, -1e+30  ;;  %v3881_v8 = vsel %vm3138_vm12, %v1904_v40, -1e+30 }
 0x206   :  { %v873_v35 = vsel %vm448_vm11, %v3873_v33, -inf  ;;  %v1813_v50 = vadd.f32 %v1809_v43, %v1767_v5  ;;  %v1916_v51 = vsel %vm448_vm11, %v3881_v8, -inf  ;;  %v1435_v12 = vsub.f32 %v4242_v7, %v1431_v0  ;;  %v2429_v5 = vld [vmem:[%s4071_s4 + $0x8] sm:$0xff]   ;;  %v2432_v7 = vld [vmem:[%s4071_s4 + $0x10] sm:$0xff]  }
 0x207   :  { %vm1887_vm10 = vcmp.gt.f32.partialorder %v1883_v61, 0.0  ;;  %v1891_v53 = vmul.f32 0.2, %v1883_v61  ;;  %874 = vmax.xlane.f32.xlu1 %v873_v35  ;;  %v862_v27 = vadd.f32 %v858_v55, %v816_v56  ;;  %v2428_v56 = vld [vmem:[%s4071_s4] sm:$0xff]   ;;  %2258 = vmatprep.subr.bf16.mxu1 %v2432_v7 }
 0x208   :  { %v1859_v59 = vadd.f32 %v1855_v9, %v1813_v50  ;;  %2266 = vmatprep.subr.bf16.mxu0 %v2428_v56  ;;  %v3948_v9 = vld [vmem:[%s4071_s4 + $0x20] sm:$0xff]   ;;  %2259 = vmatpush3.bf16.msra.mxu1 %v2432_v7 }
 0x209   :  { %v1895_v21 = vsel %vm1887_vm10, %v1883_v61, %v1891_v53  ;;  %v3885_v20 = vsel %vm3155_vm13, %v862_v27, -1e+30  ;;  %2267 = vmatpush3.bf16.msra.mxu0 %v2428_v56 }
 0x20a   :  { %v1901_v41 = vmul.f32 %v3783_v19, %v1895_v21  ;;  %v876_v18 = vsel %vm448_vm11, %v3885_v20, -inf  ;;  %2268 = vmatprep.subr.bf16.mxu0 %v2429_v5 }
 0x20b   :  { %877 = vmax.xlane.f32.xlu0 %v876_v18  ;;  %1917 = vmax.xlane.f32.xlu1 %v1916_v51 }
 0x20c   :  { %v1905_v34 = vadd.f32 %v1901_v41, %v1859_v59 }
 0x20d   :  { %2269 = vmatpush3.bf16.msra.mxu0 %v2429_v5 }
 0x20e   :  { %v3898_v6 = vsel %vm3155_vm13, %v1905_v34, -1e+30  ;;  %2274 = vmatprep.subr.bf16.mxu0 %v3948_v9 }
 0x20f   :  { %474 = vadd.xlane.f32.xlu1 %v473_v1  ;;  %v1919_v19 = vsel %vm448_vm11, %v3898_v6, -inf }
 0x210   :  { %1920 = vmax.xlane.f32.xlu0 %v1919_v19 }
 0x213   :  { %480 = vadd.xlane.f32.xlu1 %v479_v39 }
 0x236   :  { %v454_v22 = vpop.xlane.xlu1 %453 }
 0x237   :  { %v462_v37 = vsub.f32 %v3735_v63, %v454_v22  ;;  %v1442_v63 = vmul.f32 1.442695, %v1435_v12  ;;  %v2434_v12 = vld [vmem:[%s4071_s4 + $0x18] sm:$0xff]  }
 0x238   :  { %2260 = vmatprep.subr.bf16.mxu1 %v2434_v12 }
 0x239   :  { %v467_v24 = vmul.f32 1.442695, %v462_v37  ;;  %2261 = vmatpush3.bf16.msra.mxu1 %v2434_v12 }
 0x23a   :  { %v1422_v15 = vpop.xlane.xlu1 %1421 }
 0x23b   :  { %2442 = vpow2.f32 %v467_v24  ;;  %v1432_v52 = vsub.f32 %v3750_v16, %v1422_v15 }
 0x23c   :  { %2444 = vpow2.f32 %v471_v14 }
 0x23d   :  { %v1436_v3 = vmul.f32 1.442695, %v1432_v52 }
 0x23e   :  { %v1428_v10 = vpop.xlane.xlu1 %1427 }
 0x23f   :  { %2446 = vpow2.f32 %v1436_v3  ;;  %v1434_v47 = vsub.f32 %v3762_v62, %v1428_v10  ;;  %v2506_v3 = vld [vmem:[%s4068_s1] sm:$0xff]  ;;  %v2507_v10 = vld [vmem:[%s4068_s1 + $0x8] sm:$0xff] }
 0x240   :  { %2448 = vpow2.f32 %v1438_v48 }
 0x241   :  { %v1440_v31 = vmul.f32 1.442695, %v1434_v47 }
 0x242   :  { %v869_v28 = vpop.xlane.xlu1 %868 }
 0x243   :  { %2450 = vpow2.f32 %v1440_v31  ;;  %v879_v30 = vsub.f32 %v3768_v42, %v869_v28  ;;  %v2509_v28 = vld [vmem:[%s4068_s1 + $0x18] sm:$0xff] }
 0x244   :  { %2452 = vpow2.f32 %v1442_v63  ;;  %v2508_v63 = vld [vmem:[%s4068_s1 + $0x10] sm:$0xff] }
 0x245   :  { %v3911_v36 = vpop.eup %2442  ;;  %v883_v16 = vmul.f32 1.442695, %v879_v30 }
 0x246   :  { %v476_v2 = vsel %vm448_vm11, %v3911_v36, 0.0  ;;  %v3915_v29 = vpop.eup %2444 }
 0x247   :  { %2454 = vpow2.f32 %v883_v16  ;;  %477 = vadd.xlane.f32.xlu0 %v476_v2  ;;  %v482_v23 = vsel %vm448_vm11, %v3915_v29, 0.0 }
 0x249   :  { %v3917_v49 = vpop.eup %2446 }
 0x24a   :  { %v1444_v62 = vsel %vm448_vm11, %v3917_v49, 0.0  ;;  %v3923_v42 = vpop.eup %2448 }
 0x24b   :  { %1445 = vadd.xlane.f32.xlu1 %v1444_v62  ;;  %483 = vadd.xlane.f32.xlu0 %v482_v23  ;;  %v1447_v43 = vsel %vm448_vm11, %v3923_v42, 0.0 }
 0x24d   :  { %v3925_v13 = vpop.eup %2450 }
 0x24e   :  { %v1450_v40 = vsel %vm448_vm11, %v3925_v13, 0.0  ;;  %v3931_v11 = vpop.eup %2452 }
 0x24f   :  { %1451 = vadd.xlane.f32.xlu1 %v1450_v40  ;;  %1448 = vadd.xlane.f32.xlu0 %v1447_v43  ;;  %v1453_v61 = vsel %vm448_vm11, %v3931_v11, 0.0 }
 0x251   :  { %v3933_v26 = vpop.eup %2454 }
 0x252   :  { %v891_v55 = vsel %vm448_vm11, %v3933_v26, 0.0 }
 0x253   :  { %892 = vadd.xlane.f32.xlu1 %v891_v55  ;;  %1454 = vadd.xlane.f32.xlu0 %v1453_v61 }
 0x28a   :  { %v872_v35 = vpop.xlane.xlu0 %871 }
 0x28b   :  { %v880_v53 = vsub.f32 %v3842_v45, %v872_v35 }
 0x28d   :  { %v885_v27 = vmul.f32 1.442695, %v880_v53 }
 0x28e   :  { %v1915_v50 = vpop.xlane.xlu0 %1914 }
 0x28f   :  { %2456 = vpow2.f32 %v885_v27  ;;  %v1923_v21 = vsub.f32 %v3799_v32, %v1915_v50  ;;  %v1912_v17 = vpop.xlane.xlu1 %1911 }
 0x290   :  { %v1922_v41 = vsub.f32 %v3857_v38, %v1912_v17 }
 0x291   :  { %v1928_v18 = vmul.f32 1.442695, %v1923_v21 }
 0x292   :  { %v1926_v51 = vmul.f32 1.442695, %v1922_v41 }
 0x293   :  { %2458 = vpow2.f32 %v1928_v18 }
 0x294   :  { %2460 = vpow2.f32 %v1926_v51  ;;  %v875_v59 = vpop.xlane.xlu1 %874 }
 0x295   :  { %v881_v34 = vsub.f32 %v3873_v33, %v875_v59 }
 0x297   :  { %v887_v1 = vmul.f32 1.442695, %v881_v34 }
 0x298   :  { %v1918_v19 = vpop.xlane.xlu1 %1917  ;;  %v878_v39 = vpop.xlane.xlu0 %877 }
 0x299   :  { %v3955_v60 = vpop.eup %2456  ;;  %2462 = vpow2.f32 %v887_v1  ;;  %v1924_v45 = vsub.f32 %v3881_v8, %v1918_v19  ;;  %v882_v32 = vsub.f32 %v3885_v20, %v878_v39 }
 0x29a   :  { %v894_v38 = vsel %vm448_vm11, %v3955_v60, 0.0 }
 0x29b   :  { %v1930_v54 = vmul.f32 1.442695, %v1924_v45  ;;  %v889_v4 = vmul.f32 1.442695, %v882_v32  ;;  %895 = vadd.xlane.f32.xlu0 %v894_v38 }
 0x29c   :  { %v475_v47 = vpop.xlane.xlu1 %474 }
 0x29d   :  { %v3961_v57 = vpop.eup %2458  ;;  %2464 = vpow2.f32 %v1930_v54  ;;  %v1921_v33 = vpop.xlane.xlu0 %1920 }
 0x29e   :  { %v3963_v22 = vpop.eup %2460  ;;  %2466 = vpow2.f32 %v889_v4  ;;  %v1925_v37 = vsub.f32 %v3898_v6, %v1921_v33  ;;  %v1937_v8 = vsel %vm448_vm11, %v3961_v57, 0.0 }
 0x29f   :  { %1938 = vadd.xlane.f32.xlu0 %v1937_v8  ;;  %v1934_v20 = vsel %vm448_vm11, %v3963_v22, 0.0 }
 0x2a0   :  { %v1932_v14 = vmul.f32 1.442695, %v1925_v37  ;;  %1935 = vadd.xlane.f32.xlu1 %v1934_v20  ;;  %v481_v30 = vpop.xlane.xlu1 %480 }
 0x2a2   :  { %2468 = vpow2.f32 %v1932_v14 }
 0x2a3   :  { %v3970_v25 = vpop.eup %2462  ;;  %2470 = vrcp.f32 %v475_v47 }
 0x2a4   :  { %v897_v46 = vsel %vm448_vm11, %v3970_v25, 0.0 }
 0x2a5   :  { %898 = vadd.xlane.f32.xlu1 %v897_v46 }
 0x2a7   :  { %v3974_v24 = vpop.eup %2464 }
 0x2a8   :  { %v3976_v0 = vpop.eup %2466  ;;  %v1940_v6 = vsel %vm448_vm11, %v3974_v24, 0.0 }
 0x2a9   :  { %1941 = vadd.xlane.f32.xlu1 %v1940_v6  ;;  %v900_v15 = vsel %vm448_vm11, %v3976_v0, 0.0 }
 0x2aa   :  { %901 = vadd.xlane.f32.xlu0 %v900_v15 }
 0x2ac   :  { %v3982_v52 = vpop.eup %2468 }
 0x2ad   :  { %v1943_v48 = vsel %vm448_vm11, %v3982_v52, 0.0  ;;  %v2471_v23 = vpop.eup %2470 }
 0x2ae   :  { %1944 = vadd.xlane.f32.xlu0 %v1943_v48  ;;  %v489_v55 = vmul.f32 %v2471_v23, %v3834_v44  ;;  %v2431_v44 = vld [vmem:[%s4071_s4 + $0x28] sm:$0xff]   ;;  %v2231_v23 = vld [vmem:[%s4072_s5] ss:$0 sm:$0xff] }
 0x2ba   :  { %2032 = vrot.lane.b32.xlu1 %v2506_v3, %s2557_s20 }
 0x2be   :  { %2036 = vrot.lane.b32.xlu1 %v2508_v63, %s2557_s20  ;;  %v2436_v63 = vld [vmem:[%s4074_s7] sm:$0xff]  }
 0x2bf   :  { %2290 = vmatprep.subr.bf16.mxu1 %v2436_v63 }
 0x2c2   :  { %2038 = vrot.lane.b32.xlu1 %v2509_v28, %s2557_s20 }
 0x2c4   :  { %2034 = vrot.lane.b32.xlu0 %v2507_v10, %s2557_s20 }
 0x2d4   :  { %v478_v31 = vpop.xlane.xlu0 %477 }
 0x2d5   :  { %2472 = vrcp.f32 %v478_v31 }
 0x2d6   :  { %2474 = vrcp.f32 %v481_v30 }
 0x2d8   :  { %v484_v16 = vpop.xlane.xlu0 %483  ;;  %v1446_v2 = vpop.xlane.xlu1 %1445 }
 0x2d9   :  { %2476 = vrcp.f32 %v484_v16 }
 0x2da   :  { %2478 = vrcp.f32 %v1446_v2 }
 0x2dc   :  { %v1449_v62 = vpop.xlane.xlu0 %1448  ;;  %v1452_v56 = vpop.xlane.xlu1 %1451 }
 0x2dd   :  { %2480 = vrcp.f32 %v1449_v62 }
 0x2df   :  { %v2473_v40 = vpop.eup %2472 }
 0x2e0   :  { %v1455_v43 = vpop.xlane.xlu0 %1454  ;;  %v490_v61 = vmul.f32 %v2473_v40, %v3911_v36  ;;  %v2475_v5 = vpop.eup %2474 }
 0x2e1   :  { %2482 = vrcp.f32 %v1455_v43  ;;  %v491_v27 = vmul.f32 %v2475_v5, %v3892_v58  ;;  %v2433_v58 = vld [vmem:[%s4071_s4 + $0x30] sm:$0xff]  }
 0x2e2   :  { %v493_v35 = vpack.c.bf16 %v490_v61, %v489_v55  ;;  %2484 = vrcp.f32 %v1452_v56 }
 0x2e3   :  { %v2477_v53 = vpop.eup %2476 }
 0x2e4   :  { %2270 = vmatprep.mubr.msk.bf16.mxu0 %vm448_vm11, %v493_v35  ;;  %v492_v50 = vmul.f32 %v2477_v53, %v3915_v29  ;;  %v2479_v21 = vpop.eup %2478  ;;  %v2232_v53 = vld [vmem:[%s4073_s6] ss:$0 sm:$0xff] }
 0x2e5   :  { %v1460_v36 = vmul.f32 %v2479_v21, %v3917_v49 }
 0x2e6   :  { %v494_v17 = vpack.c.bf16 %v492_v50, %v491_v27 }
 0x2e7   :  { %v2481_v41 = vpop.eup %2480 }
 0x2e8   :  { %2271 = vmatmul.mubr.msk.bf16.vlgmr.msra.gmra.mrb[0].mxu0 %vm448_vm11, %v494_v17  ;;  %v1461_v18 = vmul.f32 %v2481_v41, %v3923_v42  ;;  %v2435_v42 = vld [vmem:[%s4071_s4 + $0x38] sm:$0xff]  }
 0x2e9   :  { %2275 = vmatpush3.bf16.msra.mxu0 %v3948_v9  ;;  %v893_v9 = vpop.xlane.xlu1 %892 }
 0x2ea   :  { %v1464_v51 = vpack.c.bf16 %v1461_v18, %v1460_v36  ;;  %2276 = vmatprep.subr.bf16.mxu0 %v2431_v44  ;;  %2486 = vrcp.f32 %v893_v9 }
 0x2eb   :  { %v2483_v29 = vpop.eup %2482 }
 0x2ec   :  { %2278 = vmatprep.mubr.msk.bf16.mxu0 %vm448_vm11, %v1464_v51  ;;  %v2485_v59 = vpop.eup %2484  ;;  %v1463_v34 = vmul.f32 %v2483_v29, %v3931_v11 }
 0x2ed   :  { %2277 = vmatpush3.bf16.msra.mxu0 %v2431_v44  ;;  %v1462_v49 = vmul.f32 %v2485_v59, %v3925_v13 }
 0x2ee   :  { %2282 = vmatprep.subr.bf16.mxu0 %v2433_v58 }
 0x2ef   :  { %v1465_v1 = vpack.c.bf16 %v1463_v34, %v1462_v49 }
 0x2f4   :  { %2279 = vmatmul.mubr.msk.bf16.vlgmr.msra.gmra.mrb[0].mxu0 %vm448_vm11, %v1465_v1  ;;  %v2487_v45 = vpop.eup %2486 }
 0x2f5   :  { %2283 = vmatpush3.bf16.msra.mxu0 %v2433_v58  ;;  %v907_v38 = vmul.f32 %v2487_v45, %v3933_v26 }
 0x2f6   :  { %2284 = vmatprep.subr.bf16.mxu0 %v2435_v42 }
 0x2f9   :  { %2285 = vmatpush3.bf16.msra.mxu0 %v2435_v42 }
 0x328   :  { %v896_v19 = vpop.xlane.xlu0 %895 }
 0x329   :  { %2488 = vrcp.f32 %v896_v19 }
 0x32c   :  { %v1939_v39 = vpop.xlane.xlu0 %1938 }
 0x32d   :  { %2490 = vrcp.f32 %v1939_v39  ;;  %v1936_v11 = vpop.xlane.xlu1 %1935 }
 0x32e   :  { %2492 = vrcp.f32 %v1936_v11 }
 0x332   :  { %v899_v13 = vpop.xlane.xlu1 %898 }
 0x333   :  { %v2489_v32 = vpop.eup %2488  ;;  %2494 = vrcp.f32 %v899_v13 }
 0x334   :  { %v908_v54 = vmul.f32 %v2489_v32, %v3955_v60  ;;  %v2233_v32 = vld [vmem:[%s4075_s8] ss:$0 sm:$0xff] }
 0x336   :  { %v911_v4 = vpack.c.bf16 %v908_v54, %v907_v38  ;;  %v1942_v37 = vpop.xlane.xlu1 %1941 }
 0x337   :  { %v2491_v33 = vpop.eup %2490  ;;  %v902_v8 = vpop.xlane.xlu0 %901 }
 0x338   :  { %v2493_v20 = vpop.eup %2492  ;;  %2496 = vrcp.f32 %v902_v8  ;;  %2262 = vmatprep.mubr.msk.bf16.mxu1 %vm448_vm11, %v911_v4  ;;  %v1951_v14 = vmul.f32 %v2491_v33, %v3961_v57 }
 0x339   :  { %v1950_v46 = vmul.f32 %v2493_v20, %v3963_v22  ;;  %2498 = vrcp.f32 %v1942_v37 }
 0x33b   :  { %v1945_v6 = vpop.xlane.xlu0 %1944  ;;  %v1954_v15 = vpack.c.bf16 %v1951_v14, %v1950_v46 }
 0x33c   :  { %2500 = vrcp.f32 %v1945_v6 }
 0x33d   :  { %2286 = vmatprep.mubr.msk.bf16.mxu0 %vm448_vm11, %v1954_v15  ;;  %v2495_v26 = vpop.eup %2494 }
 0x33e   :  { %v909_v48 = vmul.f32 %v2495_v26, %v3970_v25  ;;  %v2437_v25 = vld [vmem:[%s4074_s7 + $0x8] sm:$0xff]  }
 0x33f   :  { %v2035_v35 = vpop.permute.xlu0 %2034 }
 0x342   :  { %v2497_v60 = vpop.eup %2496 }
 0x343   :  { %v910_v7 = vmul.f32 %v2497_v60, %v3976_v0  ;;  %v2499_v12 = vpop.eup %2498 }
 0x344   :  { %v1952_v47 = vmul.f32 %v2499_v12, %v3974_v24  ;;  %v2033_v24 = vpop.permute.xlu1 %2032 }
 0x345   :  { %v912_v3 = vpack.c.bf16 %v910_v7, %v909_v48 }
 0x346   :  { %v2501_v10 = vpop.eup %2500 }
 0x347   :  { %v1953_v57 = vmul.f32 %v2501_v10, %v3982_v52  ;;  %2263 = vmatmul.mubr.msk.bf16.vlgmr.msra.gmra.mrb[0].mxu1 %vm448_vm11, %v912_v3 }
 0x348   :  { %2291 = vmatpush3.bf16.msra.mxu1 %v2436_v63  ;;  %v2037_v52 = vpop.permute.xlu1 %2036 }
 0x349   :  { %v1955_v22 = vpack.c.bf16 %v1953_v57, %v1952_v47  ;;  %2292 = vmatprep.subr.bf16.mxu1 %v2437_v25 }
 0x34b   :  { %2287 = vmatmul.mubr.msk.bf16.vlgmr.msra.gmra.mrb[0].mxu0 %vm448_vm11, %v1955_v22 }
 0x34c   :  { %2293 = vmatpush3.bf16.msra.mxu1 %v2437_v25  ;;  %v2039_v55 = vpop.permute.xlu1 %2038 }
 0x41a   :  { %v2264_v0 = vpop.f32.mrb[0].mxu1 }
 0x41b   :  { %v970_v31 = vpop.f32.mrb[1].mxu1 }
 0x41c   :  { %v2265_v28 = vpop.f32.mrb[2].mxu1 }
 0x41d   :  { %v973_v30 = vpop.f32.mrb[3].mxu1 }
 0x41e   :  { %v2288_v16 = vpop.f32.mrb[0].mxu0 }
 0x41f   :  { %v2298_v2 = vadd.f32 %v2288_v16, %v2264_v0  ;;  %v2013_v62 = vpop.f32.mrb[1].mxu0 }
 0x420   :  { %v2299_v40 = vadd.f32 %v2013_v62, %v970_v31  ;;  %v2289_v43 = vpop.f32.mrb[2].mxu0 }
 0x421   :  { %v2046_v61 = vadd.f32 %v2298_v2, %v2037_v52  ;;  %v2300_v56 = vadd.f32 %v2289_v43, %v2265_v28  ;;  %v2016_v5 = vpop.f32.mrb[3].mxu0 }
 0x422   :  { %v2044_v27 = vadd.f32 %v2299_v40, %v2033_v24  ;;  %v2301_v50 = vadd.f32 %v2016_v5, %v973_v30 }
 0x423   :  { %v2057_v21 = vmul.f32 %v2231_v23, %v2046_v61  ;;  %v2047_v17 = vadd.f32 %v2300_v56, %v2039_v55 }
 0x424   :  { %v2055_v44 = vmul.f32 %v2231_v23, %v2044_v27  ;;  %v2045_v41 = vadd.f32 %v2301_v50, %v2035_v35 }
 0x425   :  { %v2068_v36 = vadd.f32 %v2232_v53, %v2057_v21  ;;  %v2058_v18 = vmul.f32 %v2231_v23, %v2047_v17 }
 0x426   :  { %v2066_v51 = vadd.f32 %v2232_v53, %v2055_v44  ;;  %v2056_v58 = vmul.f32 %v2231_v23, %v2045_v41 }
 0x427   :  { %v2076_v29 = vmul.f32 0.2, %v2068_v36  ;;  %v2069_v59 = vadd.f32 %v2232_v53, %v2058_v18  ;;  %vm2072_vm12 = vcmp.gt.f32.partialorder %v2068_v36, 0.0 }
 0x428   :  { %v2074_v34 = vmul.f32 0.2, %v2066_v51  ;;  %v2067_v49 = vadd.f32 %v2232_v53, %v2056_v58  ;;  %vm2070_vm9 = vcmp.gt.f32.partialorder %v2066_v51, 0.0 }
 0x429   :  { %vm2073_vm13 = vcmp.gt.f32.partialorder %v2069_v59, 0.0  ;;  %v2077_v1 = vmul.f32 0.2, %v2069_v59  ;;  %v2080_v9 = vsel %vm2072_vm12, %v2068_v36, %v2076_v29 }
 0x42a   :  { %vm2071_vm14 = vcmp.gt.f32.partialorder %v2067_v49, 0.0  ;;  %v2075_v42 = vmul.f32 0.2, %v2067_v49  ;;  %v2078_v11 = vsel %vm2070_vm9, %v2066_v51, %v2074_v34 }
 0x42b   :  { %v2081_v19 = vsel %vm2073_vm13, %v2069_v59, %v2077_v1 }
 0x42c   :  { %v2083_v39 = vpack.c.bf16 %v2081_v19, %v2080_v9  ;;  %v2079_v45 = vsel %vm2071_vm14, %v2067_v49, %v2075_v42 }
 0x42d   :  { %v2082_v13 = vpack.c.bf16 %v2079_v45, %v2078_v11 }
 0x42f   :  { %2294 = vmatprep.mubr.msk.bf16.mxu1 %vm448_vm11, %v2082_v13 }
 0x430   :  { %2295 = vmatmul.mubr.msk.bf16.vlgmr.msra.gmra.mrb[4].mxu1 %vm448_vm11, %v2083_v39 }
 0x503   :  { %v2296_v38 = vpop.f32.mrb[4].mxu1 }
 0x504   :  { %v2156_v54 = vadd.f32 %v2296_v38, %v2233_v32  ;;  %v2147_v4 = vpop.f32.mrb[5].mxu1 }
 0x505   :  { %v2148_v33 = vadd.f32 %v2233_v32, %v2147_v4  ;;  %v2297_v37 = vpop.f32.mrb[6].mxu1 }
 0x506   :  { %2165 = vst.msk [vmem:[%s4076_s9 + $0x10] sm:$0xff] %vm2162_vm15, %v2156_v54  ;;  %v2159_v8 = vadd.f32 %v2297_v37, %v2233_v32  ;;  %v2150_v20 = vpop.f32.mrb[7].mxu1 }
 0x507   :  { %2163 = vst.msk [vmem:[%s4076_s9] sm:$0xff] %vm2162_vm15, %v2148_v33  ;;  %v2151_v14 = vadd.f32 %v2233_v32, %v2150_v20 }
 0x508   :  { %2166 = vst.msk [vmem:[%s4076_s9 + $0x18] sm:$0xff] %vm2162_vm15, %v2159_v8 }
 0x509   :  { %2164 = vst.msk [vmem:[%s4076_s9 + $0x8] sm:$0xff] %vm2162_vm15, %v2151_v14 }
 0x50a   :  { %2171 = vsyncpa [#allocation3], 1 }

</bundles_post_ra>
